<compile_context>
chip_gen: v6e
topology: v6e:2x2x1
jax: 0.10.0
libtpu: 0.0.40
codegen_flags: <defaults>
</compile_context>

<pallas_src>
import math

import jax
import jax.numpy as jnp
from jax import lax
from jax.experimental import pallas as pl
from jax.experimental.pallas import tpu as pltpu

K = 3  # conv kernel size (3x3)


# ----------------------------- in-kernel conv helper -----------------------------

def _conv3x3_from_padded(pad_ref, H, W, Cin, w_ref, b_ref, relu):
    """3x3 'same' conv as 9 accumulated MXU dots (one per kernel tap).

    pad_ref : VMEM (H+2, W+2, >=Cin) f32; zero border, input at [1:H+1, 1:W+1, :Cin]
    w_ref   : (9*Cin, Cout) bf16, rows ordered (kh, kw, ci)
    b_ref   : (1, Cout) f32
    returns : (H*W, Cout) f32 (bias included, optional ReLU)
    """
    M = H * W
    Cout = w_ref.shape[-1]
    # Bias folded into the accumulator initialization.
    acc = jnp.broadcast_to(b_ref[...], (M, Cout))
    for kh in range(K):
        for kw in range(K):
            tap = pad_ref[pl.ds(kh, H), pl.ds(kw, W), pl.ds(0, Cin)]      # (H, W, Cin) f32
            wk = w_ref[pl.ds((kh * K + kw) * Cin, Cin), :]                # (Cin, Cout) bf16
            acc = acc + jnp.dot(tap.reshape(M, Cin).astype(jnp.bfloat16), wk,
                                preferred_element_type=jnp.float32)
    if relu:
        acc = jnp.maximum(acc, 0.0)
    return acc


# ----------------------------- fused Stack kernel --------------------------------

def _make_stack_kernel(H, W, Cin, C):
    H2, W2 = H // 2, W // 2
    cmax = max(Cin, C)

    def zero_border(pad_ref, h, w, c):
        # Only the border must be zero; the interior is overwritten before every read.
        z_row = jnp.zeros((1, w + 2, c), jnp.float32)
        z_col = jnp.zeros((h + 2, 1, c), jnp.float32)
        pad_ref[pl.ds(0, 1), :, :] = z_row
        pad_ref[pl.ds(h + 1, 1), :, :] = z_row
        pad_ref[:, pl.ds(0, 1), :] = z_col
        pad_ref[:, pl.ds(w + 1, 1), :] = z_col

    def kernel(x_ref, w11, b11, w12, b12, w21, b21, w22, b22, wc, bc,
               o_ref, pad_big, pad_small):
        # Re-done every grid step so the batch axis can safely be "parallel"
        # (each TensorCore owns its own scratch).
        zero_border(pad_big, H, W, cmax)
        zero_border(pad_small, H2, W2, C)

        # ---------------- ResNet block 1 ----------------
        pad_big[pl.ds(1, H), pl.ds(1, W), pl.ds(0, Cin)] = x_ref[...]
        h1 = _conv3x3_from_padded(pad_big, H, W, Cin, w11, b11, relu=True)
        pad_big[pl.ds(1, H), pl.ds(1, W), pl.ds(0, C)] = h1.reshape(H, W, C)
        h2 = _conv3x3_from_padded(pad_big, H, W, C, w12, b12, relu=True) + h1

        # ---------------- ResNet block 2 ----------------
        pad_big[pl.ds(1, H), pl.ds(1, W), pl.ds(0, C)] = h2.reshape(H, W, C)
        h3 = _conv3x3_from_padded(pad_big, H, W, C, w21, b21, relu=True)
        pad_big[pl.ds(1, H), pl.ds(1, W), pl.ds(0, C)] = h3.reshape(H, W, C)
        h4 = _conv3x3_from_padded(pad_big, H, W, C, w22, b22, relu=True) + h3

        # ---------------- MaxPool 2x2 (fused epilogue) ----------------
        # h4 rows are ordered (h, w); all reshapes keep the last (lane) dim = C.
        r = h4.reshape(H2, 2, W, C)                      # (i, a, w, c)
        mh = jnp.maximum(r[:, 0], r[:, 1])               # (H2, W, C)   pool over h pair
        mw = mh.reshape(H2, W2, 2, C)                    # (i, j, b, c)
        pooled = jnp.maximum(mw[:, :, 0], mw[:, :, 1])   # (H2, W2, C)  pool over w pair

        # ---------------- Final conv ----------------
        pad_small[pl.ds(1, H2), pl.ds(1, W2), pl.ds(0, C)] = pooled
        h5 = _conv3x3_from_padded(pad_small, H2, W2, C, wc, bc, relu=False)
        o_ref[...] = h5.astype(o_ref.dtype)              # (H2*W2, C)

    return kernel


# ----------------------------- wrapper --------------------------------------------

def stack_forward(x_nchw, params):
    """Forward of Stack.  x_nchw: (N, Cin, H, W) f32 -> (N, Cout, H//2, W//2) f32."""
    N, Cin, H, W = x_nchw.shape
    C = params["conv_b"].shape[0]
    H2, W2 = H // 2, W // 2

    x = jnp.transpose(x_nchw, (0, 2, 3, 1)).astype(jnp.float32)   # NCHW -> NHWC

    def wmat(w):   # (3,3,ci,co) HWIO -> (9*ci, co) bf16, rows ordered (kh, kw, ci)
        kh, kw, ci, co = w.shape
        return w.reshape(kh * kw * ci, co).astype(jnp.bfloat16)

    def bvec(b):
        return b.reshape(1, -1).astype(jnp.float32)

    p1, p2 = params["block1"], params["block2"]
    consts = [wmat(p1["w1"]), bvec(p1["b1"]), wmat(p1["w2"]), bvec(p1["b2"]),
              wmat(p2["w1"]), bvec(p2["b1"]), wmat(p2["w2"]), bvec(p2["b2"]),
              wmat(params["conv_w"]), bvec(params["conv_b"])]

    def const_spec(a):  # full-array block, broadcast across the batch grid
        nd = a.ndim
        return pl.BlockSpec(a.shape, lambda n, _nd=nd: (0,) * _nd)

    in_specs = [pl.BlockSpec((None, H, W, Cin), lambda n: (n, 0, 0, 0))]
    in_specs += [const_spec(a) for a in consts]

    cmax = max(Cin, C)
    out = pl.pallas_call(
        _make_stack_kernel(H, W, Cin, C),
        out_shape=jax.ShapeDtypeStruct((N, H2 * W2, C), jnp.float32),
        grid=(N,),
        in_specs=in_specs,
        out_specs=pl.BlockSpec((None, H2 * W2, C), lambda n: (n, 0, 0)),
        scratch_shapes=[
            pltpu.VMEM((H + 2, W + 2, cmax), jnp.float32),     # padded HxW stage
            pltpu.VMEM((H2 + 2, W2 + 2, C), jnp.float32),      # padded H/2xW/2 stage
        ],
        compiler_params=pltpu.CompilerParams(
            dimension_semantics=("parallel",)),   # v7x: shard batch across 2 TCs
    )(x, *consts)

    out = out.reshape(N, H2, W2, C)
    return jnp.transpose(out, (0, 3, 1, 2))       # NHWC -> NCHW


# ----------------------------- pure-JAX reference ----------------------------------

def _conv_ref(x, w, b, relu=False):
    # Same quantization as the kernel: bf16 operands, f32 accumulation.
    y = lax.conv_general_dilated(
        x.astype(jnp.bfloat16), w.astype(jnp.bfloat16),
        window_strides=(1, 1), padding=((1, 1), (1, 1)),
        dimension_numbers=("NHWC", "HWIO", "NHWC"),
        preferred_element_type=jnp.float32) + b
    if relu:
        y = jnp.maximum(y, 0.0)
    return y


def stack_ref(x_nchw, params):
    x = jnp.transpose(x_nchw, (0, 2, 3, 1))
    for blk in ("block1", "block2"):
        p = params[blk]
        h = _conv_ref(x, p["w1"], p["b1"], relu=True)
        x = _conv_ref(h, p["w2"], p["b2"], relu=True) + h
    N, H, W, C = x.shape
    x = x.reshape(N, H // 2, 2, W // 2, 2, C).max(axis=(2, 4))
    x = _conv_ref(x, params["conv_w"], params["conv_b"])
    return jnp.transpose(x, (0, 3, 1, 2))


# ----------------------------- main -------------------------------------------------

if __name__ == "__main__":
    key = jax.random.PRNGKey(0)
    N, CIN, COUT, H, W = 2, 4, 8, 16, 16
    ks = jax.random.split(key, 11)

    def init_conv(kw, kb, cin, cout, k=3):
        # PyTorch Conv2d default-style uniform(-1/sqrt(fan_in), 1/sqrt(fan_in))
        bound = 1.0 / math.sqrt(cin * k * k)
        w = jax.random.uniform(kw, (k, k, cin, cout), jnp.float32, -bound, bound)
        b = jax.random.uniform(kb, (cout,), jnp.float32, -bound, bound)
        return w, b

    w11, b11 = init_conv(ks[0], ks[1], CIN, COUT)
    w12, b12 = init_conv(ks[2], ks[3], COUT, COUT)
    w21, b21 = init_conv(ks[4], ks[5], COUT, COUT)
    w22, b22 = init_conv(ks[6], ks[7], COUT, COUT)
    wc, bc = init_conv(ks[8], ks[9], COUT, COUT)

    params = {
        "block1": {"w1": w11, "b1": b11, "w2": w12, "b2": b12},
        "block2": {"w1": w21, "b1": b21, "w2": w22, "b2": b22},
        "conv_w": wc, "conv_b": bc,
    }

    x = jax.random.normal(ks[10], (N, CIN, H, W), jnp.float32)   # NCHW like PyTorch

    out = jax.block_until_ready(jax.jit(stack_forward)(x, params))
    ref = jax.block_until_ready(jax.jit(stack_ref)(x, params))

    assert out.shape == (N, COUT, H // 2, W // 2), out.shape
    max_err = float(jnp.max(jnp.abs(out - ref)))
    # Kernel and reference both use bf16 MXU operands with f32 accumulation; the
    # residual difference is accumulation-order / bf16-rounding noise only.
    assert jnp.allclose(out, ref, rtol=2e-2, atol=2e-2), f"max abs err {max_err}"
    print("KERNEL_OK")
</pallas_src>

<mosaic_0001>
module attributes {stable_mosaic.version = 11 : i64} {
  func.func @kernel(%arg0: i32, %arg1: memref<1x16x16x4xf32, #tpu.memory_space<vmem>>, %arg2: memref<36x8xbf16, #tpu.memory_space<vmem>>, %arg3: memref<1x8xf32, #tpu.memory_space<vmem>>, %arg4: memref<72x8xbf16, #tpu.memory_space<vmem>>, %arg5: memref<1x8xf32, #tpu.memory_space<vmem>>, %arg6: memref<72x8xbf16, #tpu.memory_space<vmem>>, %arg7: memref<1x8xf32, #tpu.memory_space<vmem>>, %arg8: memref<72x8xbf16, #tpu.memory_space<vmem>>, %arg9: memref<1x8xf32, #tpu.memory_space<vmem>>, %arg10: memref<72x8xbf16, #tpu.memory_space<vmem>>, %arg11: memref<1x8xf32, #tpu.memory_space<vmem>>, %arg12: memref<1x64x8xf32, #tpu.memory_space<vmem>>, %arg13: memref<18x18x8xf32, #tpu.memory_space<vmem>>, %arg14: memref<10x10x8xf32, #tpu.memory_space<vmem>>) attributes {dimension_semantics = [#tpu.dimension_semantics<parallel>], iteration_bounds = array<i64: 2>, scalar_prefetch = 0 : i64, scratch_operands = 2 : i64, tpu.core_type = #tpu.core_type<tc>, window_params = [{transform_indices = @transform_0, window_bounds = array<i64: 1, 16, 16, 4>}, {pipeline_mode = #tpu.pipeline_mode<synchronous>, transform_indices = @transform_1, window_bounds = array<i64: 36, 8>}, {pipeline_mode = #tpu.pipeline_mode<synchronous>, transform_indices = @transform_2, window_bounds = array<i64: 1, 8>}, {pipeline_mode = #tpu.pipeline_mode<synchronous>, transform_indices = @transform_3, window_bounds = array<i64: 72, 8>}, {pipeline_mode = #tpu.pipeline_mode<synchronous>, transform_indices = @transform_4, window_bounds = array<i64: 1, 8>}, {pipeline_mode = #tpu.pipeline_mode<synchronous>, transform_indices = @transform_5, window_bounds = array<i64: 72, 8>}, {pipeline_mode = #tpu.pipeline_mode<synchronous>, transform_indices = @transform_6, window_bounds = array<i64: 1, 8>}, {pipeline_mode = #tpu.pipeline_mode<synchronous>, transform_indices = @transform_7, window_bounds = array<i64: 72, 8>}, {pipeline_mode = #tpu.pipeline_mode<synchronous>, transform_indices = @transform_8, window_bounds = array<i64: 1, 8>}, {pipeline_mode = #tpu.pipeline_mode<synchronous>, transform_indices = @transform_9, window_bounds = array<i64: 72, 8>}, {pipeline_mode = #tpu.pipeline_mode<synchronous>, transform_indices = @transform_10, window_bounds = array<i64: 1, 8>}, {transform_indices = @transform_11, window_bounds = array<i64: 1, 64, 8>}]} {
    %cst = arith.constant 0.000000e+00 : f32
    %0 = vector.broadcast %cst : f32 to vector<1x18x8xf32>
    %cst_0 = arith.constant 0.000000e+00 : f32
    %1 = vector.broadcast %cst_0 : f32 to vector<18x1x8xf32>
    %c0 = arith.constant 0 : index
    %c0_1 = arith.constant 0 : index
    %c0_2 = arith.constant 0 : index
    %2 = vector.load %arg13[%c0, %c0_1, %c0_2] : memref<18x18x8xf32, #tpu.memory_space<vmem>>, vector<1x18x8xf32>
    tpu.vector_store %arg13[%c0, %c0_1, %c0_2], %0 {strides = array<i32>} : memref<18x18x8xf32, #tpu.memory_space<vmem>>, vector<1x18x8xf32>,
    %c17 = arith.constant 17 : index
    %c0_3 = arith.constant 0 : index
    %c0_4 = arith.constant 0 : index
    %3 = vector.load %arg13[%c17, %c0_3, %c0_4] : memref<18x18x8xf32, #tpu.memory_space<vmem>>, vector<1x18x8xf32>
    tpu.vector_store %arg13[%c17, %c0_3, %c0_4], %0 {strides = array<i32>} : memref<18x18x8xf32, #tpu.memory_space<vmem>>, vector<1x18x8xf32>,
    %c0_5 = arith.constant 0 : index
    %c0_6 = arith.constant 0 : index
    %c0_7 = arith.constant 0 : index
    %4 = vector.load %arg13[%c0_5, %c0_6, %c0_7] : memref<18x18x8xf32, #tpu.memory_space<vmem>>, vector<18x1x8xf32>
    tpu.vector_store %arg13[%c0_5, %c0_6, %c0_7], %1 {strides = array<i32>} : memref<18x18x8xf32, #tpu.memory_space<vmem>>, vector<18x1x8xf32>,
    %c0_8 = arith.constant 0 : index
    %c17_9 = arith.constant 17 : index
    %c0_10 = arith.constant 0 : index
    %5 = vector.load %arg13[%c0_8, %c17_9, %c0_10] : memref<18x18x8xf32, #tpu.memory_space<vmem>>, vector<18x1x8xf32>
    tpu.vector_store %arg13[%c0_8, %c17_9, %c0_10], %1 {strides = array<i32>} : memref<18x18x8xf32, #tpu.memory_space<vmem>>, vector<18x1x8xf32>,
    %cst_11 = arith.constant 0.000000e+00 : f32
    %6 = vector.broadcast %cst_11 : f32 to vector<1x10x8xf32>
    %cst_12 = arith.constant 0.000000e+00 : f32
    %7 = vector.broadcast %cst_12 : f32 to vector<10x1x8xf32>
    %c0_13 = arith.constant 0 : index
    %c0_14 = arith.constant 0 : index
    %c0_15 = arith.constant 0 : index
    %8 = vector.load %arg14[%c0_13, %c0_14, %c0_15] : memref<10x10x8xf32, #tpu.memory_space<vmem>>, vector<1x10x8xf32>
    tpu.vector_store %arg14[%c0_13, %c0_14, %c0_15], %6 {strides = array<i32>} : memref<10x10x8xf32, #tpu.memory_space<vmem>>, vector<1x10x8xf32>,
    %c9 = arith.constant 9 : index
    %c0_16 = arith.constant 0 : index
    %c0_17 = arith.constant 0 : index
    %9 = vector.load %arg14[%c9, %c0_16, %c0_17] : memref<10x10x8xf32, #tpu.memory_space<vmem>>, vector<1x10x8xf32>
    tpu.vector_store %arg14[%c9, %c0_16, %c0_17], %6 {strides = array<i32>} : memref<10x10x8xf32, #tpu.memory_space<vmem>>, vector<1x10x8xf32>,
    %c0_18 = arith.constant 0 : index
    %c0_19 = arith.constant 0 : index
    %c0_20 = arith.constant 0 : index
    %10 = vector.load %arg14[%c0_18, %c0_19, %c0_20] : memref<10x10x8xf32, #tpu.memory_space<vmem>>, vector<10x1x8xf32>
    tpu.vector_store %arg14[%c0_18, %c0_19, %c0_20], %7 {strides = array<i32>} : memref<10x10x8xf32, #tpu.memory_space<vmem>>, vector<10x1x8xf32>,
    %c0_21 = arith.constant 0 : index
    %c9_22 = arith.constant 9 : index
    %c0_23 = arith.constant 0 : index
    %11 = vector.load %arg14[%c0_21, %c9_22, %c0_23] : memref<10x10x8xf32, #tpu.memory_space<vmem>>, vector<10x1x8xf32>
    tpu.vector_store %arg14[%c0_21, %c9_22, %c0_23], %7 {strides = array<i32>} : memref<10x10x8xf32, #tpu.memory_space<vmem>>, vector<10x1x8xf32>,
    %c0_24 = arith.constant 0 : index
    %c0_25 = arith.constant 0 : index
    %c0_26 = arith.constant 0 : index
    %c0_27 = arith.constant 0 : index
    %12 = vector.load %arg1[%c0_24, %c0_25, %c0_26, %c0_27] : memref<1x16x16x4xf32, #tpu.memory_space<vmem>>, vector<1x16x16x4xf32>
    %13 = vector.shape_cast %12 : vector<1x16x16x4xf32> to vector<16x16x4xf32>
    %c1 = arith.constant 1 : index
    %c1_28 = arith.constant 1 : index
    %c0_29 = arith.constant 0 : index
    %14 = vector.load %arg13[%c1, %c1_28, %c0_29] : memref<18x18x8xf32, #tpu.memory_space<vmem>>, vector<16x16x4xf32>
    tpu.vector_store %arg13[%c1, %c1_28, %c0_29], %13 {strides = array<i32>} : memref<18x18x8xf32, #tpu.memory_space<vmem>>, vector<16x16x4xf32>,
    %c0_30 = arith.constant 0 : index
    %c0_31 = arith.constant 0 : index
    %15 = vector.load %arg3[%c0_30, %c0_31] : memref<1x8xf32, #tpu.memory_space<vmem>>, vector<1x8xf32>
    %16 = vector.shape_cast %15 : vector<1x8xf32> to vector<1x8xf32>
    %17 = vector.broadcast %16 : vector<1x8xf32> to vector<256x8xf32>
    %c0_32 = arith.constant 0 : index
    %c0_33 = arith.constant 0 : index
    %c0_34 = arith.constant 0 : index
    %18 = vector.load %arg13[%c0_32, %c0_33, %c0_34] : memref<18x18x8xf32, #tpu.memory_space<vmem>>, vector<16x16x4xf32>
    %c0_35 = arith.constant 0 : index
    %c0_36 = arith.constant 0 : index
    %19 = vector.load %arg2[%c0_35, %c0_36] : memref<36x8xbf16, #tpu.memory_space<vmem>>, vector<4x8xbf16>
    %20 = vector.shape_cast %18 : vector<16x16x4xf32> to vector<256x4xf32>
    %21 = arith.truncf %20 : vector<256x4xf32> to vector<256x4xbf16>
    %cst_37 = arith.constant dense<0.000000e+00> : vector<256x8xf32>
    %22 = tpu.matmul %21, %19, %cst_37 {dimension_numbers = #tpu.dot_dimension_numbers<[1], [0], [0], [1], [0, 0, 1, 1], [], []>} : vector<256x4xbf16>, vector<4x8xbf16>, vector<256x8xf32> -> vector<256x8xf32>
    %23 = arith.addf %17, %22 : vector<256x8xf32>
    %c0_38 = arith.constant 0 : index
    %c1_39 = arith.constant 1 : index
    %c0_40 = arith.constant 0 : index
    %24 = vector.load %arg13[%c0_38, %c1_39, %c0_40] : memref<18x18x8xf32, #tpu.memory_space<vmem>>, vector<16x16x4xf32>
    %c4 = arith.constant 4 : index
    %c0_41 = arith.constant 0 : index
    %25 = vector.load %arg2[%c4, %c0_41] : memref<36x8xbf16, #tpu.memory_space<vmem>>, vector<4x8xbf16>
    %26 = vector.shape_cast %24 : vector<16x16x4xf32> to vector<256x4xf32>
    %27 = arith.truncf %26 : vector<256x4xf32> to vector<256x4xbf16>
    %cst_42 = arith.constant dense<0.000000e+00> : vector<256x8xf32>
    %28 = tpu.matmul %27, %25, %cst_42 {dimension_numbers = #tpu.dot_dimension_numbers<[1], [0], [0], [1], [0, 0, 1, 1], [], []>} : vector<256x4xbf16>, vector<4x8xbf16>, vector<256x8xf32> -> vector<256x8xf32>
    %29 = arith.addf %23, %28 : vector<256x8xf32>
    %c0_43 = arith.constant 0 : index
    %c2 = arith.constant 2 : index
    %c0_44 = arith.constant 0 : index
    %30 = vector.load %arg13[%c0_43, %c2, %c0_44] : memref<18x18x8xf32, #tpu.memory_space<vmem>>, vector<16x16x4xf32>
    %c8 = arith.constant 8 : index
    %c0_45 = arith.constant 0 : index
    %31 = vector.load %arg2[%c8, %c0_45] : memref<36x8xbf16, #tpu.memory_space<vmem>>, vector<4x8xbf16>
    %32 = vector.shape_cast %30 : vector<16x16x4xf32> to vector<256x4xf32>
    %33 = arith.truncf %32 : vector<256x4xf32> to vector<256x4xbf16>
    %cst_46 = arith.constant dense<0.000000e+00> : vector<256x8xf32>
    %34 = tpu.matmul %33, %31, %cst_46 {dimension_numbers = #tpu.dot_dimension_numbers<[1], [0], [0], [1], [0, 0, 1, 1], [], []>} : vector<256x4xbf16>, vector<4x8xbf16>, vector<256x8xf32> -> vector<256x8xf32>
    %35 = arith.addf %29, %34 : vector<256x8xf32>
    %c1_47 = arith.constant 1 : index
    %c0_48 = arith.constant 0 : index
    %c0_49 = arith.constant 0 : index
    %36 = vector.load %arg13[%c1_47, %c0_48, %c0_49] : memref<18x18x8xf32, #tpu.memory_space<vmem>>, vector<16x16x4xf32>
    %c12 = arith.constant 12 : index
    %c0_50 = arith.constant 0 : index
    %37 = vector.load %arg2[%c12, %c0_50] : memref<36x8xbf16, #tpu.memory_space<vmem>>, vector<4x8xbf16>
    %38 = vector.shape_cast %36 : vector<16x16x4xf32> to vector<256x4xf32>
    %39 = arith.truncf %38 : vector<256x4xf32> to vector<256x4xbf16>
    %cst_51 = arith.constant dense<0.000000e+00> : vector<256x8xf32>
    %40 = tpu.matmul %39, %37, %cst_51 {dimension_numbers = #tpu.dot_dimension_numbers<[1], [0], [0], [1], [0, 0, 1, 1], [], []>} : vector<256x4xbf16>, vector<4x8xbf16>, vector<256x8xf32> -> vector<256x8xf32>
    %41 = arith.addf %35, %40 : vector<256x8xf32>
    %c1_52 = arith.constant 1 : index
    %c1_53 = arith.constant 1 : index
    %c0_54 = arith.constant 0 : index
    %42 = vector.load %arg13[%c1_52, %c1_53, %c0_54] : memref<18x18x8xf32, #tpu.memory_space<vmem>>, vector<16x16x4xf32>
    %c16 = arith.constant 16 : index
    %c0_55 = arith.constant 0 : index
    %43 = vector.load %arg2[%c16, %c0_55] : memref<36x8xbf16, #tpu.memory_space<vmem>>, vector<4x8xbf16>
    %44 = vector.shape_cast %42 : vector<16x16x4xf32> to vector<256x4xf32>
    %45 = arith.truncf %44 : vector<256x4xf32> to vector<256x4xbf16>
    %cst_56 = arith.constant dense<0.000000e+00> : vector<256x8xf32>
    %46 = tpu.matmul %45, %43, %cst_56 {dimension_numbers = #tpu.dot_dimension_numbers<[1], [0], [0], [1], [0, 0, 1, 1], [], []>} : vector<256x4xbf16>, vector<4x8xbf16>, vector<256x8xf32> -> vector<256x8xf32>
    %47 = arith.addf %41, %46 : vector<256x8xf32>
    %c1_57 = arith.constant 1 : index
    %c2_58 = arith.constant 2 : index
    %c0_59 = arith.constant 0 : index
    %48 = vector.load %arg13[%c1_57, %c2_58, %c0_59] : memref<18x18x8xf32, #tpu.memory_space<vmem>>, vector<16x16x4xf32>
    %c20 = arith.constant 20 : index
    %c0_60 = arith.constant 0 : index
    %49 = vector.load %arg2[%c20, %c0_60] : memref<36x8xbf16, #tpu.memory_space<vmem>>, vector<4x8xbf16>
    %50 = vector.shape_cast %48 : vector<16x16x4xf32> to vector<256x4xf32>
    %51 = arith.truncf %50 : vector<256x4xf32> to vector<256x4xbf16>
    %cst_61 = arith.constant dense<0.000000e+00> : vector<256x8xf32>
    %52 = tpu.matmul %51, %49, %cst_61 {dimension_numbers = #tpu.dot_dimension_numbers<[1], [0], [0], [1], [0, 0, 1, 1], [], []>} : vector<256x4xbf16>, vector<4x8xbf16>, vector<256x8xf32> -> vector<256x8xf32>
    %53 = arith.addf %47, %52 : vector<256x8xf32>
    %c2_62 = arith.constant 2 : index
    %c0_63 = arith.constant 0 : index
    %c0_64 = arith.constant 0 : index
    %54 = vector.load %arg13[%c2_62, %c0_63, %c0_64] : memref<18x18x8xf32, #tpu.memory_space<vmem>>, vector<16x16x4xf32>
    %c24 = arith.constant 24 : index
    %c0_65 = arith.constant 0 : index
    %55 = vector.load %arg2[%c24, %c0_65] : memref<36x8xbf16, #tpu.memory_space<vmem>>, vector<4x8xbf16>
    %56 = vector.shape_cast %54 : vector<16x16x4xf32> to vector<256x4xf32>
    %57 = arith.truncf %56 : vector<256x4xf32> to vector<256x4xbf16>
    %cst_66 = arith.constant dense<0.000000e+00> : vector<256x8xf32>
    %58 = tpu.matmul %57, %55, %cst_66 {dimension_numbers = #tpu.dot_dimension_numbers<[1], [0], [0], [1], [0, 0, 1, 1], [], []>} : vector<256x4xbf16>, vector<4x8xbf16>, vector<256x8xf32> -> vector<256x8xf32>
    %59 = arith.addf %53, %58 : vector<256x8xf32>
    %c2_67 = arith.constant 2 : index
    %c1_68 = arith.constant 1 : index
    %c0_69 = arith.constant 0 : index
    %60 = vector.load %arg13[%c2_67, %c1_68, %c0_69] : memref<18x18x8xf32, #tpu.memory_space<vmem>>, vector<16x16x4xf32>
    %c28 = arith.constant 28 : index
    %c0_70 = arith.constant 0 : index
    %61 = vector.load %arg2[%c28, %c0_70] : memref<36x8xbf16, #tpu.memory_space<vmem>>, vector<4x8xbf16>
    %62 = vector.shape_cast %60 : vector<16x16x4xf32> to vector<256x4xf32>
    %63 = arith.truncf %62 : vector<256x4xf32> to vector<256x4xbf16>
    %cst_71 = arith.constant dense<0.000000e+00> : vector<256x8xf32>
    %64 = tpu.matmul %63, %61, %cst_71 {dimension_numbers = #tpu.dot_dimension_numbers<[1], [0], [0], [1], [0, 0, 1, 1], [], []>} : vector<256x4xbf16>, vector<4x8xbf16>, vector<256x8xf32> -> vector<256x8xf32>
    %65 = arith.addf %59, %64 : vector<256x8xf32>
    %c2_72 = arith.constant 2 : index
    %c2_73 = arith.constant 2 : index
    %c0_74 = arith.constant 0 : index
    %66 = vector.load %arg13[%c2_72, %c2_73, %c0_74] : memref<18x18x8xf32, #tpu.memory_space<vmem>>, vector<16x16x4xf32>
    %c32 = arith.constant 32 : index
    %c0_75 = arith.constant 0 : index
    %67 = vector.load %arg2[%c32, %c0_75] : memref<36x8xbf16, #tpu.memory_space<vmem>>, vector<4x8xbf16>
    %68 = vector.shape_cast %66 : vector<16x16x4xf32> to vector<256x4xf32>
    %69 = arith.truncf %68 : vector<256x4xf32> to vector<256x4xbf16>
    %cst_76 = arith.constant dense<0.000000e+00> : vector<256x8xf32>
    %70 = tpu.matmul %69, %67, %cst_76 {dimension_numbers = #tpu.dot_dimension_numbers<[1], [0], [0], [1], [0, 0, 1, 1], [], []>} : vector<256x4xbf16>, vector<4x8xbf16>, vector<256x8xf32> -> vector<256x8xf32>
    %71 = arith.addf %65, %70 : vector<256x8xf32>
    %cst_77 = arith.constant 0.000000e+00 : f32
    %72 = vector.broadcast %cst_77 : f32 to vector<256x8xf32>
    %73 = arith.maximumf %71, %72 : vector<256x8xf32>
    %74 = vector.shape_cast %73 : vector<256x8xf32> to vector<16x16x8xf32>
    %c1_78 = arith.constant 1 : index
    %c1_79 = arith.constant 1 : index
    %c0_80 = arith.constant 0 : index
    %75 = vector.load %arg13[%c1_78, %c1_79, %c0_80] : memref<18x18x8xf32, #tpu.memory_space<vmem>>, vector<16x16x8xf32>
    tpu.vector_store %arg13[%c1_78, %c1_79, %c0_80], %74 {strides = array<i32>} : memref<18x18x8xf32, #tpu.memory_space<vmem>>, vector<16x16x8xf32>,
    %c0_81 = arith.constant 0 : index
    %c0_82 = arith.constant 0 : index
    %76 = vector.load %arg5[%c0_81, %c0_82] : memref<1x8xf32, #tpu.memory_space<vmem>>, vector<1x8xf32>
    %77 = vector.shape_cast %76 : vector<1x8xf32> to vector<1x8xf32>
    %78 = vector.broadcast %77 : vector<1x8xf32> to vector<256x8xf32>
    %c0_83 = arith.constant 0 : index
    %c0_84 = arith.constant 0 : index
    %c0_85 = arith.constant 0 : index
    %79 = vector.load %arg13[%c0_83, %c0_84, %c0_85] : memref<18x18x8xf32, #tpu.memory_space<vmem>>, vector<16x16x8xf32>
    %c0_86 = arith.constant 0 : index
    %c0_87 = arith.constant 0 : index
    %80 = vector.load %arg4[%c0_86, %c0_87] : memref<72x8xbf16, #tpu.memory_space<vmem>>, vector<8x8xbf16>
    %81 = vector.shape_cast %79 : vector<16x16x8xf32> to vector<256x8xf32>
    %82 = arith.truncf %81 : vector<256x8xf32> to vector<256x8xbf16>
    %cst_88 = arith.constant dense<0.000000e+00> : vector<256x8xf32>
    %83 = tpu.matmul %82, %80, %cst_88 {dimension_numbers = #tpu.dot_dimension_numbers<[1], [0], [0], [1], [0, 0, 1, 1], [], []>} : vector<256x8xbf16>, vector<8x8xbf16>, vector<256x8xf32> -> vector<256x8xf32>
    %84 = arith.addf %78, %83 : vector<256x8xf32>
    %c0_89 = arith.constant 0 : index
    %c1_90 = arith.constant 1 : index
    %c0_91 = arith.constant 0 : index
    %85 = vector.load %arg13[%c0_89, %c1_90, %c0_91] : memref<18x18x8xf32, #tpu.memory_space<vmem>>, vector<16x16x8xf32>
    %c8_92 = arith.constant 8 : index
    %c0_93 = arith.constant 0 : index
    %86 = vector.load %arg4[%c8_92, %c0_93] : memref<72x8xbf16, #tpu.memory_space<vmem>>, vector<8x8xbf16>
    %87 = vector.shape_cast %85 : vector<16x16x8xf32> to vector<256x8xf32>
    %88 = arith.truncf %87 : vector<256x8xf32> to vector<256x8xbf16>
    %cst_94 = arith.constant dense<0.000000e+00> : vector<256x8xf32>
    %89 = tpu.matmul %88, %86, %cst_94 {dimension_numbers = #tpu.dot_dimension_numbers<[1], [0], [0], [1], [0, 0, 1, 1], [], []>} : vector<256x8xbf16>, vector<8x8xbf16>, vector<256x8xf32> -> vector<256x8xf32>
    %90 = arith.addf %84, %89 : vector<256x8xf32>
    %c0_95 = arith.constant 0 : index
    %c2_96 = arith.constant 2 : index
    %c0_97 = arith.constant 0 : index
    %91 = vector.load %arg13[%c0_95, %c2_96, %c0_97] : memref<18x18x8xf32, #tpu.memory_space<vmem>>, vector<16x16x8xf32>
    %c16_98 = arith.constant 16 : index
    %c0_99 = arith.constant 0 : index
    %92 = vector.load %arg4[%c16_98, %c0_99] : memref<72x8xbf16, #tpu.memory_space<vmem>>, vector<8x8xbf16>
    %93 = vector.shape_cast %91 : vector<16x16x8xf32> to vector<256x8xf32>
    %94 = arith.truncf %93 : vector<256x8xf32> to vector<256x8xbf16>
    %cst_100 = arith.constant dense<0.000000e+00> : vector<256x8xf32>
    %95 = tpu.matmul %94, %92, %cst_100 {dimension_numbers = #tpu.dot_dimension_numbers<[1], [0], [0], [1], [0, 0, 1, 1], [], []>} : vector<256x8xbf16>, vector<8x8xbf16>, vector<256x8xf32> -> vector<256x8xf32>
    %96 = arith.addf %90, %95 : vector<256x8xf32>
    %c1_101 = arith.constant 1 : index
    %c0_102 = arith.constant 0 : index
    %c0_103 = arith.constant 0 : index
    %97 = vector.load %arg13[%c1_101, %c0_102, %c0_103] : memref<18x18x8xf32, #tpu.memory_space<vmem>>, vector<16x16x8xf32>
    %c24_104 = arith.constant 24 : index
    %c0_105 = arith.constant 0 : index
    %98 = vector.load %arg4[%c24_104, %c0_105] : memref<72x8xbf16, #tpu.memory_space<vmem>>, vector<8x8xbf16>
    %99 = vector.shape_cast %97 : vector<16x16x8xf32> to vector<256x8xf32>
    %100 = arith.truncf %99 : vector<256x8xf32> to vector<256x8xbf16>
    %cst_106 = arith.constant dense<0.000000e+00> : vector<256x8xf32>
    %101 = tpu.matmul %100, %98, %cst_106 {dimension_numbers = #tpu.dot_dimension_numbers<[1], [0], [0], [1], [0, 0, 1, 1], [], []>} : vector<256x8xbf16>, vector<8x8xbf16>, vector<256x8xf32> -> vector<256x8xf32>
    %102 = arith.addf %96, %101 : vector<256x8xf32>
    %c1_107 = arith.constant 1 : index
    %c1_108 = arith.constant 1 : index
    %c0_109 = arith.constant 0 : index
    %103 = vector.load %arg13[%c1_107, %c1_108, %c0_109] : memref<18x18x8xf32, #tpu.memory_space<vmem>>, vector<16x16x8xf32>
    %c32_110 = arith.constant 32 : index
    %c0_111 = arith.constant 0 : index
    %104 = vector.load %arg4[%c32_110, %c0_111] : memref<72x8xbf16, #tpu.memory_space<vmem>>, vector<8x8xbf16>
    %105 = vector.shape_cast %103 : vector<16x16x8xf32> to vector<256x8xf32>
    %106 = arith.truncf %105 : vector<256x8xf32> to vector<256x8xbf16>
    %cst_112 = arith.constant dense<0.000000e+00> : vector<256x8xf32>
    %107 = tpu.matmul %106, %104, %cst_112 {dimension_numbers = #tpu.dot_dimension_numbers<[1], [0], [0], [1], [0, 0, 1, 1], [], []>} : vector<256x8xbf16>, vector<8x8xbf16>, vector<256x8xf32> -> vector<256x8xf32>
    %108 = arith.addf %102, %107 : vector<256x8xf32>
    %c1_113 = arith.constant 1 : index
    %c2_114 = arith.constant 2 : index
    %c0_115 = arith.constant 0 : index
    %109 = vector.load %arg13[%c1_113, %c2_114, %c0_115] : memref<18x18x8xf32, #tpu.memory_space<vmem>>, vector<16x16x8xf32>
    %c40 = arith.constant 40 : index
    %c0_116 = arith.constant 0 : index
    %110 = vector.load %arg4[%c40, %c0_116] : memref<72x8xbf16, #tpu.memory_space<vmem>>, vector<8x8xbf16>
    %111 = vector.shape_cast %109 : vector<16x16x8xf32> to vector<256x8xf32>
    %112 = arith.truncf %111 : vector<256x8xf32> to vector<256x8xbf16>
    %cst_117 = arith.constant dense<0.000000e+00> : vector<256x8xf32>
    %113 = tpu.matmul %112, %110, %cst_117 {dimension_numbers = #tpu.dot_dimension_numbers<[1], [0], [0], [1], [0, 0, 1, 1], [], []>} : vector<256x8xbf16>, vector<8x8xbf16>, vector<256x8xf32> -> vector<256x8xf32>
    %114 = arith.addf %108, %113 : vector<256x8xf32>
    %c2_118 = arith.constant 2 : index
    %c0_119 = arith.constant 0 : index
    %c0_120 = arith.constant 0 : index
    %115 = vector.load %arg13[%c2_118, %c0_119, %c0_120] : memref<18x18x8xf32, #tpu.memory_space<vmem>>, vector<16x16x8xf32>
    %c48 = arith.constant 48 : index
    %c0_121 = arith.constant 0 : index
    %116 = vector.load %arg4[%c48, %c0_121] : memref<72x8xbf16, #tpu.memory_space<vmem>>, vector<8x8xbf16>
    %117 = vector.shape_cast %115 : vector<16x16x8xf32> to vector<256x8xf32>
    %118 = arith.truncf %117 : vector<256x8xf32> to vector<256x8xbf16>
    %cst_122 = arith.constant dense<0.000000e+00> : vector<256x8xf32>
    %119 = tpu.matmul %118, %116, %cst_122 {dimension_numbers = #tpu.dot_dimension_numbers<[1], [0], [0], [1], [0, 0, 1, 1], [], []>} : vector<256x8xbf16>, vector<8x8xbf16>, vector<256x8xf32> -> vector<256x8xf32>
    %120 = arith.addf %114, %119 : vector<256x8xf32>
    %c2_123 = arith.constant 2 : index
    %c1_124 = arith.constant 1 : index
    %c0_125 = arith.constant 0 : index
    %121 = vector.load %arg13[%c2_123, %c1_124, %c0_125] : memref<18x18x8xf32, #tpu.memory_space<vmem>>, vector<16x16x8xf32>
    %c56 = arith.constant 56 : index
    %c0_126 = arith.constant 0 : index
    %122 = vector.load %arg4[%c56, %c0_126] : memref<72x8xbf16, #tpu.memory_space<vmem>>, vector<8x8xbf16>
    %123 = vector.shape_cast %121 : vector<16x16x8xf32> to vector<256x8xf32>
    %124 = arith.truncf %123 : vector<256x8xf32> to vector<256x8xbf16>
    %cst_127 = arith.constant dense<0.000000e+00> : vector<256x8xf32>
    %125 = tpu.matmul %124, %122, %cst_127 {dimension_numbers = #tpu.dot_dimension_numbers<[1], [0], [0], [1], [0, 0, 1, 1], [], []>} : vector<256x8xbf16>, vector<8x8xbf16>, vector<256x8xf32> -> vector<256x8xf32>
    %126 = arith.addf %120, %125 : vector<256x8xf32>
    %c2_128 = arith.constant 2 : index
    %c2_129 = arith.constant 2 : index
    %c0_130 = arith.constant 0 : index
    %127 = vector.load %arg13[%c2_128, %c2_129, %c0_130] : memref<18x18x8xf32, #tpu.memory_space<vmem>>, vector<16x16x8xf32>
    %c64 = arith.constant 64 : index
    %c0_131 = arith.constant 0 : index
    %128 = vector.load %arg4[%c64, %c0_131] : memref<72x8xbf16, #tpu.memory_space<vmem>>, vector<8x8xbf16>
    %129 = vector.shape_cast %127 : vector<16x16x8xf32> to vector<256x8xf32>
    %130 = arith.truncf %129 : vector<256x8xf32> to vector<256x8xbf16>
    %cst_132 = arith.constant dense<0.000000e+00> : vector<256x8xf32>
    %131 = tpu.matmul %130, %128, %cst_132 {dimension_numbers = #tpu.dot_dimension_numbers<[1], [0], [0], [1], [0, 0, 1, 1], [], []>} : vector<256x8xbf16>, vector<8x8xbf16>, vector<256x8xf32> -> vector<256x8xf32>
    %132 = arith.addf %126, %131 : vector<256x8xf32>
    %cst_133 = arith.constant 0.000000e+00 : f32
    %133 = vector.broadcast %cst_133 : f32 to vector<256x8xf32>
    %134 = arith.maximumf %132, %133 : vector<256x8xf32>
    %135 = arith.addf %134, %73 : vector<256x8xf32>
    %136 = vector.shape_cast %135 : vector<256x8xf32> to vector<16x16x8xf32>
    %c1_134 = arith.constant 1 : index
    %c1_135 = arith.constant 1 : index
    %c0_136 = arith.constant 0 : index
    %137 = vector.load %arg13[%c1_134, %c1_135, %c0_136] : memref<18x18x8xf32, #tpu.memory_space<vmem>>, vector<16x16x8xf32>
    tpu.vector_store %arg13[%c1_134, %c1_135, %c0_136], %136 {strides = array<i32>} : memref<18x18x8xf32, #tpu.memory_space<vmem>>, vector<16x16x8xf32>,
    %c0_137 = arith.constant 0 : index
    %c0_138 = arith.constant 0 : index
    %138 = vector.load %arg7[%c0_137, %c0_138] : memref<1x8xf32, #tpu.memory_space<vmem>>, vector<1x8xf32>
    %139 = vector.shape_cast %138 : vector<1x8xf32> to vector<1x8xf32>
    %140 = vector.broadcast %139 : vector<1x8xf32> to vector<256x8xf32>
    %c0_139 = arith.constant 0 : index
    %c0_140 = arith.constant 0 : index
    %c0_141 = arith.constant 0 : index
    %141 = vector.load %arg13[%c0_139, %c0_140, %c0_141] : memref<18x18x8xf32, #tpu.memory_space<vmem>>, vector<16x16x8xf32>
    %c0_142 = arith.constant 0 : index
    %c0_143 = arith.constant 0 : index
    %142 = vector.load %arg6[%c0_142, %c0_143] : memref<72x8xbf16, #tpu.memory_space<vmem>>, vector<8x8xbf16>
    %143 = vector.shape_cast %141 : vector<16x16x8xf32> to vector<256x8xf32>
    %144 = arith.truncf %143 : vector<256x8xf32> to vector<256x8xbf16>
    %cst_144 = arith.constant dense<0.000000e+00> : vector<256x8xf32>
    %145 = tpu.matmul %144, %142, %cst_144 {dimension_numbers = #tpu.dot_dimension_numbers<[1], [0], [0], [1], [0, 0, 1, 1], [], []>} : vector<256x8xbf16>, vector<8x8xbf16>, vector<256x8xf32> -> vector<256x8xf32>
    %146 = arith.addf %140, %145 : vector<256x8xf32>
    %c0_145 = arith.constant 0 : index
    %c1_146 = arith.constant 1 : index
    %c0_147 = arith.constant 0 : index
    %147 = vector.load %arg13[%c0_145, %c1_146, %c0_147] : memref<18x18x8xf32, #tpu.memory_space<vmem>>, vector<16x16x8xf32>
    %c8_148 = arith.constant 8 : index
    %c0_149 = arith.constant 0 : index
    %148 = vector.load %arg6[%c8_148, %c0_149] : memref<72x8xbf16, #tpu.memory_space<vmem>>, vector<8x8xbf16>
    %149 = vector.shape_cast %147 : vector<16x16x8xf32> to vector<256x8xf32>
    %150 = arith.truncf %149 : vector<256x8xf32> to vector<256x8xbf16>
    %cst_150 = arith.constant dense<0.000000e+00> : vector<256x8xf32>
    %151 = tpu.matmul %150, %148, %cst_150 {dimension_numbers = #tpu.dot_dimension_numbers<[1], [0], [0], [1], [0, 0, 1, 1], [], []>} : vector<256x8xbf16>, vector<8x8xbf16>, vector<256x8xf32> -> vector<256x8xf32>
    %152 = arith.addf %146, %151 : vector<256x8xf32>
    %c0_151 = arith.constant 0 : index
    %c2_152 = arith.constant 2 : index
    %c0_153 = arith.constant 0 : index
    %153 = vector.load %arg13[%c0_151, %c2_152, %c0_153] : memref<18x18x8xf32, #tpu.memory_space<vmem>>, vector<16x16x8xf32>
    %c16_154 = arith.constant 16 : index
    %c0_155 = arith.constant 0 : index
    %154 = vector.load %arg6[%c16_154, %c0_155] : memref<72x8xbf16, #tpu.memory_space<vmem>>, vector<8x8xbf16>
    %155 = vector.shape_cast %153 : vector<16x16x8xf32> to vector<256x8xf32>
    %156 = arith.truncf %155 : vector<256x8xf32> to vector<256x8xbf16>
    %cst_156 = arith.constant dense<0.000000e+00> : vector<256x8xf32>
    %157 = tpu.matmul %156, %154, %cst_156 {dimension_numbers = #tpu.dot_dimension_numbers<[1], [0], [0], [1], [0, 0, 1, 1], [], []>} : vector<256x8xbf16>, vector<8x8xbf16>, vector<256x8xf32> -> vector<256x8xf32>
    %158 = arith.addf %152, %157 : vector<256x8xf32>
    %c1_157 = arith.constant 1 : index
    %c0_158 = arith.constant 0 : index
    %c0_159 = arith.constant 0 : index
    %159 = vector.load %arg13[%c1_157, %c0_158, %c0_159] : memref<18x18x8xf32, #tpu.memory_space<vmem>>, vector<16x16x8xf32>
    %c24_160 = arith.constant 24 : index
    %c0_161 = arith.constant 0 : index
    %160 = vector.load %arg6[%c24_160, %c0_161] : memref<72x8xbf16, #tpu.memory_space<vmem>>, vector<8x8xbf16>
    %161 = vector.shape_cast %159 : vector<16x16x8xf32> to vector<256x8xf32>
    %162 = arith.truncf %161 : vector<256x8xf32> to vector<256x8xbf16>
    %cst_162 = arith.constant dense<0.000000e+00> : vector<256x8xf32>
    %163 = tpu.matmul %162, %160, %cst_162 {dimension_numbers = #tpu.dot_dimension_numbers<[1], [0], [0], [1], [0, 0, 1, 1], [], []>} : vector<256x8xbf16>, vector<8x8xbf16>, vector<256x8xf32> -> vector<256x8xf32>
    %164 = arith.addf %158, %163 : vector<256x8xf32>
    %c1_163 = arith.constant 1 : index
    %c1_164 = arith.constant 1 : index
    %c0_165 = arith.constant 0 : index
    %165 = vector.load %arg13[%c1_163, %c1_164, %c0_165] : memref<18x18x8xf32, #tpu.memory_space<vmem>>, vector<16x16x8xf32>
    %c32_166 = arith.constant 32 : index
    %c0_167 = arith.constant 0 : index
    %166 = vector.load %arg6[%c32_166, %c0_167] : memref<72x8xbf16, #tpu.memory_space<vmem>>, vector<8x8xbf16>
    %167 = vector.shape_cast %165 : vector<16x16x8xf32> to vector<256x8xf32>
    %168 = arith.truncf %167 : vector<256x8xf32> to vector<256x8xbf16>
    %cst_168 = arith.constant dense<0.000000e+00> : vector<256x8xf32>
    %169 = tpu.matmul %168, %166, %cst_168 {dimension_numbers = #tpu.dot_dimension_numbers<[1], [0], [0], [1], [0, 0, 1, 1], [], []>} : vector<256x8xbf16>, vector<8x8xbf16>, vector<256x8xf32> -> vector<256x8xf32>
    %170 = arith.addf %164, %169 : vector<256x8xf32>
    %c1_169 = arith.constant 1 : index
    %c2_170 = arith.constant 2 : index
    %c0_171 = arith.constant 0 : index
    %171 = vector.load %arg13[%c1_169, %c2_170, %c0_171] : memref<18x18x8xf32, #tpu.memory_space<vmem>>, vector<16x16x8xf32>
    %c40_172 = arith.constant 40 : index
    %c0_173 = arith.constant 0 : index
    %172 = vector.load %arg6[%c40_172, %c0_173] : memref<72x8xbf16, #tpu.memory_space<vmem>>, vector<8x8xbf16>
    %173 = vector.shape_cast %171 : vector<16x16x8xf32> to vector<256x8xf32>
    %174 = arith.truncf %173 : vector<256x8xf32> to vector<256x8xbf16>
    %cst_174 = arith.constant dense<0.000000e+00> : vector<256x8xf32>
    %175 = tpu.matmul %174, %172, %cst_174 {dimension_numbers = #tpu.dot_dimension_numbers<[1], [0], [0], [1], [0, 0, 1, 1], [], []>} : vector<256x8xbf16>, vector<8x8xbf16>, vector<256x8xf32> -> vector<256x8xf32>
    %176 = arith.addf %170, %175 : vector<256x8xf32>
    %c2_175 = arith.constant 2 : index
    %c0_176 = arith.constant 0 : index
    %c0_177 = arith.constant 0 : index
    %177 = vector.load %arg13[%c2_175, %c0_176, %c0_177] : memref<18x18x8xf32, #tpu.memory_space<vmem>>, vector<16x16x8xf32>
    %c48_178 = arith.constant 48 : index
    %c0_179 = arith.constant 0 : index
    %178 = vector.load %arg6[%c48_178, %c0_179] : memref<72x8xbf16, #tpu.memory_space<vmem>>, vector<8x8xbf16>
    %179 = vector.shape_cast %177 : vector<16x16x8xf32> to vector<256x8xf32>
    %180 = arith.truncf %179 : vector<256x8xf32> to vector<256x8xbf16>
    %cst_180 = arith.constant dense<0.000000e+00> : vector<256x8xf32>
    %181 = tpu.matmul %180, %178, %cst_180 {dimension_numbers = #tpu.dot_dimension_numbers<[1], [0], [0], [1], [0, 0, 1, 1], [], []>} : vector<256x8xbf16>, vector<8x8xbf16>, vector<256x8xf32> -> vector<256x8xf32>
    %182 = arith.addf %176, %181 : vector<256x8xf32>
    %c2_181 = arith.constant 2 : index
    %c1_182 = arith.constant 1 : index
    %c0_183 = arith.constant 0 : index
    %183 = vector.load %arg13[%c2_181, %c1_182, %c0_183] : memref<18x18x8xf32, #tpu.memory_space<vmem>>, vector<16x16x8xf32>
    %c56_184 = arith.constant 56 : index
    %c0_185 = arith.constant 0 : index
    %184 = vector.load %arg6[%c56_184, %c0_185] : memref<72x8xbf16, #tpu.memory_space<vmem>>, vector<8x8xbf16>
    %185 = vector.shape_cast %183 : vector<16x16x8xf32> to vector<256x8xf32>
    %186 = arith.truncf %185 : vector<256x8xf32> to vector<256x8xbf16>
    %cst_186 = arith.constant dense<0.000000e+00> : vector<256x8xf32>
    %187 = tpu.matmul %186, %184, %cst_186 {dimension_numbers = #tpu.dot_dimension_numbers<[1], [0], [0], [1], [0, 0, 1, 1], [], []>} : vector<256x8xbf16>, vector<8x8xbf16>, vector<256x8xf32> -> vector<256x8xf32>
    %188 = arith.addf %182, %187 : vector<256x8xf32>
    %c2_187 = arith.constant 2 : index
    %c2_188 = arith.constant 2 : index
    %c0_189 = arith.constant 0 : index
    %189 = vector.load %arg13[%c2_187, %c2_188, %c0_189] : memref<18x18x8xf32, #tpu.memory_space<vmem>>, vector<16x16x8xf32>
    %c64_190 = arith.constant 64 : index
    %c0_191 = arith.constant 0 : index
    %190 = vector.load %arg6[%c64_190, %c0_191] : memref<72x8xbf16, #tpu.memory_space<vmem>>, vector<8x8xbf16>
    %191 = vector.shape_cast %189 : vector<16x16x8xf32> to vector<256x8xf32>
    %192 = arith.truncf %191 : vector<256x8xf32> to vector<256x8xbf16>
    %cst_192 = arith.constant dense<0.000000e+00> : vector<256x8xf32>
    %193 = tpu.matmul %192, %190, %cst_192 {dimension_numbers = #tpu.dot_dimension_numbers<[1], [0], [0], [1], [0, 0, 1, 1], [], []>} : vector<256x8xbf16>, vector<8x8xbf16>, vector<256x8xf32> -> vector<256x8xf32>
    %194 = arith.addf %188, %193 : vector<256x8xf32>
    %cst_193 = arith.constant 0.000000e+00 : f32
    %195 = vector.broadcast %cst_193 : f32 to vector<256x8xf32>
    %196 = arith.maximumf %194, %195 : vector<256x8xf32>
    %197 = vector.shape_cast %196 : vector<256x8xf32> to vector<16x16x8xf32>
    %c1_194 = arith.constant 1 : index
    %c1_195 = arith.constant 1 : index
    %c0_196 = arith.constant 0 : index
    %198 = vector.load %arg13[%c1_194, %c1_195, %c0_196] : memref<18x18x8xf32, #tpu.memory_space<vmem>>, vector<16x16x8xf32>
    tpu.vector_store %arg13[%c1_194, %c1_195, %c0_196], %197 {strides = array<i32>} : memref<18x18x8xf32, #tpu.memory_space<vmem>>, vector<16x16x8xf32>,
    %c0_197 = arith.constant 0 : index
    %c0_198 = arith.constant 0 : index
    %199 = vector.load %arg9[%c0_197, %c0_198] : memref<1x8xf32, #tpu.memory_space<vmem>>, vector<1x8xf32>
    %200 = vector.shape_cast %199 : vector<1x8xf32> to vector<1x8xf32>
    %201 = vector.broadcast %200 : vector<1x8xf32> to vector<256x8xf32>
    %c0_199 = arith.constant 0 : index
    %c0_200 = arith.constant 0 : index
    %c0_201 = arith.constant 0 : index
    %202 = vector.load %arg13[%c0_199, %c0_200, %c0_201] : memref<18x18x8xf32, #tpu.memory_space<vmem>>, vector<16x16x8xf32>
    %c0_202 = arith.constant 0 : index
    %c0_203 = arith.constant 0 : index
    %203 = vector.load %arg8[%c0_202, %c0_203] : memref<72x8xbf16, #tpu.memory_space<vmem>>, vector<8x8xbf16>
    %204 = vector.shape_cast %202 : vector<16x16x8xf32> to vector<256x8xf32>
    %205 = arith.truncf %204 : vector<256x8xf32> to vector<256x8xbf16>
    %cst_204 = arith.constant dense<0.000000e+00> : vector<256x8xf32>
    %206 = tpu.matmul %205, %203, %cst_204 {dimension_numbers = #tpu.dot_dimension_numbers<[1], [0], [0], [1], [0, 0, 1, 1], [], []>} : vector<256x8xbf16>, vector<8x8xbf16>, vector<256x8xf32> -> vector<256x8xf32>
    %207 = arith.addf %201, %206 : vector<256x8xf32>
    %c0_205 = arith.constant 0 : index
    %c1_206 = arith.constant 1 : index
    %c0_207 = arith.constant 0 : index
    %208 = vector.load %arg13[%c0_205, %c1_206, %c0_207] : memref<18x18x8xf32, #tpu.memory_space<vmem>>, vector<16x16x8xf32>
    %c8_208 = arith.constant 8 : index
    %c0_209 = arith.constant 0 : index
    %209 = vector.load %arg8[%c8_208, %c0_209] : memref<72x8xbf16, #tpu.memory_space<vmem>>, vector<8x8xbf16>
    %210 = vector.shape_cast %208 : vector<16x16x8xf32> to vector<256x8xf32>
    %211 = arith.truncf %210 : vector<256x8xf32> to vector<256x8xbf16>
    %cst_210 = arith.constant dense<0.000000e+00> : vector<256x8xf32>
    %212 = tpu.matmul %211, %209, %cst_210 {dimension_numbers = #tpu.dot_dimension_numbers<[1], [0], [0], [1], [0, 0, 1, 1], [], []>} : vector<256x8xbf16>, vector<8x8xbf16>, vector<256x8xf32> -> vector<256x8xf32>
    %213 = arith.addf %207, %212 : vector<256x8xf32>
    %c0_211 = arith.constant 0 : index
    %c2_212 = arith.constant 2 : index
    %c0_213 = arith.constant 0 : index
    %214 = vector.load %arg13[%c0_211, %c2_212, %c0_213] : memref<18x18x8xf32, #tpu.memory_space<vmem>>, vector<16x16x8xf32>
    %c16_214 = arith.constant 16 : index
    %c0_215 = arith.constant 0 : index
    %215 = vector.load %arg8[%c16_214, %c0_215] : memref<72x8xbf16, #tpu.memory_space<vmem>>, vector<8x8xbf16>
    %216 = vector.shape_cast %214 : vector<16x16x8xf32> to vector<256x8xf32>
    %217 = arith.truncf %216 : vector<256x8xf32> to vector<256x8xbf16>
    %cst_216 = arith.constant dense<0.000000e+00> : vector<256x8xf32>
    %218 = tpu.matmul %217, %215, %cst_216 {dimension_numbers = #tpu.dot_dimension_numbers<[1], [0], [0], [1], [0, 0, 1, 1], [], []>} : vector<256x8xbf16>, vector<8x8xbf16>, vector<256x8xf32> -> vector<256x8xf32>
    %219 = arith.addf %213, %218 : vector<256x8xf32>
    %c1_217 = arith.constant 1 : index
    %c0_218 = arith.constant 0 : index
    %c0_219 = arith.constant 0 : index
    %220 = vector.load %arg13[%c1_217, %c0_218, %c0_219] : memref<18x18x8xf32, #tpu.memory_space<vmem>>, vector<16x16x8xf32>
    %c24_220 = arith.constant 24 : index
    %c0_221 = arith.constant 0 : index
    %221 = vector.load %arg8[%c24_220, %c0_221] : memref<72x8xbf16, #tpu.memory_space<vmem>>, vector<8x8xbf16>
    %222 = vector.shape_cast %220 : vector<16x16x8xf32> to vector<256x8xf32>
    %223 = arith.truncf %222 : vector<256x8xf32> to vector<256x8xbf16>
    %cst_222 = arith.constant dense<0.000000e+00> : vector<256x8xf32>
    %224 = tpu.matmul %223, %221, %cst_222 {dimension_numbers = #tpu.dot_dimension_numbers<[1], [0], [0], [1], [0, 0, 1, 1], [], []>} : vector<256x8xbf16>, vector<8x8xbf16>, vector<256x8xf32> -> vector<256x8xf32>
    %225 = arith.addf %219, %224 : vector<256x8xf32>
    %c1_223 = arith.constant 1 : index
    %c1_224 = arith.constant 1 : index
    %c0_225 = arith.constant 0 : index
    %226 = vector.load %arg13[%c1_223, %c1_224, %c0_225] : memref<18x18x8xf32, #tpu.memory_space<vmem>>, vector<16x16x8xf32>
    %c32_226 = arith.constant 32 : index
    %c0_227 = arith.constant 0 : index
    %227 = vector.load %arg8[%c32_226, %c0_227] : memref<72x8xbf16, #tpu.memory_space<vmem>>, vector<8x8xbf16>
    %228 = vector.shape_cast %226 : vector<16x16x8xf32> to vector<256x8xf32>
    %229 = arith.truncf %228 : vector<256x8xf32> to vector<256x8xbf16>
    %cst_228 = arith.constant dense<0.000000e+00> : vector<256x8xf32>
    %230 = tpu.matmul %229, %227, %cst_228 {dimension_numbers = #tpu.dot_dimension_numbers<[1], [0], [0], [1], [0, 0, 1, 1], [], []>} : vector<256x8xbf16>, vector<8x8xbf16>, vector<256x8xf32> -> vector<256x8xf32>
    %231 = arith.addf %225, %230 : vector<256x8xf32>
    %c1_229 = arith.constant 1 : index
    %c2_230 = arith.constant 2 : index
    %c0_231 = arith.constant 0 : index
    %232 = vector.load %arg13[%c1_229, %c2_230, %c0_231] : memref<18x18x8xf32, #tpu.memory_space<vmem>>, vector<16x16x8xf32>
    %c40_232 = arith.constant 40 : index
    %c0_233 = arith.constant 0 : index
    %233 = vector.load %arg8[%c40_232, %c0_233] : memref<72x8xbf16, #tpu.memory_space<vmem>>, vector<8x8xbf16>
    %234 = vector.shape_cast %232 : vector<16x16x8xf32> to vector<256x8xf32>
    %235 = arith.truncf %234 : vector<256x8xf32> to vector<256x8xbf16>
    %cst_234 = arith.constant dense<0.000000e+00> : vector<256x8xf32>
    %236 = tpu.matmul %235, %233, %cst_234 {dimension_numbers = #tpu.dot_dimension_numbers<[1], [0], [0], [1], [0, 0, 1, 1], [], []>} : vector<256x8xbf16>, vector<8x8xbf16>, vector<256x8xf32> -> vector<256x8xf32>
    %237 = arith.addf %231, %236 : vector<256x8xf32>
    %c2_235 = arith.constant 2 : index
    %c0_236 = arith.constant 0 : index
    %c0_237 = arith.constant 0 : index
    %238 = vector.load %arg13[%c2_235, %c0_236, %c0_237] : memref<18x18x8xf32, #tpu.memory_space<vmem>>, vector<16x16x8xf32>
    %c48_238 = arith.constant 48 : index
    %c0_239 = arith.constant 0 : index
    %239 = vector.load %arg8[%c48_238, %c0_239] : memref<72x8xbf16, #tpu.memory_space<vmem>>, vector<8x8xbf16>
    %240 = vector.shape_cast %238 : vector<16x16x8xf32> to vector<256x8xf32>
    %241 = arith.truncf %240 : vector<256x8xf32> to vector<256x8xbf16>
    %cst_240 = arith.constant dense<0.000000e+00> : vector<256x8xf32>
    %242 = tpu.matmul %241, %239, %cst_240 {dimension_numbers = #tpu.dot_dimension_numbers<[1], [0], [0], [1], [0, 0, 1, 1], [], []>} : vector<256x8xbf16>, vector<8x8xbf16>, vector<256x8xf32> -> vector<256x8xf32>
    %243 = arith.addf %237, %242 : vector<256x8xf32>
    %c2_241 = arith.constant 2 : index
    %c1_242 = arith.constant 1 : index
    %c0_243 = arith.constant 0 : index
    %244 = vector.load %arg13[%c2_241, %c1_242, %c0_243] : memref<18x18x8xf32, #tpu.memory_space<vmem>>, vector<16x16x8xf32>
    %c56_244 = arith.constant 56 : index
    %c0_245 = arith.constant 0 : index
    %245 = vector.load %arg8[%c56_244, %c0_245] : memref<72x8xbf16, #tpu.memory_space<vmem>>, vector<8x8xbf16>
    %246 = vector.shape_cast %244 : vector<16x16x8xf32> to vector<256x8xf32>
    %247 = arith.truncf %246 : vector<256x8xf32> to vector<256x8xbf16>
    %cst_246 = arith.constant dense<0.000000e+00> : vector<256x8xf32>
    %248 = tpu.matmul %247, %245, %cst_246 {dimension_numbers = #tpu.dot_dimension_numbers<[1], [0], [0], [1], [0, 0, 1, 1], [], []>} : vector<256x8xbf16>, vector<8x8xbf16>, vector<256x8xf32> -> vector<256x8xf32>
    %249 = arith.addf %243, %248 : vector<256x8xf32>
    %c2_247 = arith.constant 2 : index
    %c2_248 = arith.constant 2 : index
    %c0_249 = arith.constant 0 : index
    %250 = vector.load %arg13[%c2_247, %c2_248, %c0_249] : memref<18x18x8xf32, #tpu.memory_space<vmem>>, vector<16x16x8xf32>
    %c64_250 = arith.constant 64 : index
    %c0_251 = arith.constant 0 : index
    %251 = vector.load %arg8[%c64_250, %c0_251] : memref<72x8xbf16, #tpu.memory_space<vmem>>, vector<8x8xbf16>
    %252 = vector.shape_cast %250 : vector<16x16x8xf32> to vector<256x8xf32>
    %253 = arith.truncf %252 : vector<256x8xf32> to vector<256x8xbf16>
    %cst_252 = arith.constant dense<0.000000e+00> : vector<256x8xf32>
    %254 = tpu.matmul %253, %251, %cst_252 {dimension_numbers = #tpu.dot_dimension_numbers<[1], [0], [0], [1], [0, 0, 1, 1], [], []>} : vector<256x8xbf16>, vector<8x8xbf16>, vector<256x8xf32> -> vector<256x8xf32>
    %255 = arith.addf %249, %254 : vector<256x8xf32>
    %cst_253 = arith.constant 0.000000e+00 : f32
    %256 = vector.broadcast %cst_253 : f32 to vector<256x8xf32>
    %257 = arith.maximumf %255, %256 : vector<256x8xf32>
    %258 = arith.addf %257, %196 : vector<256x8xf32>
    %259 = vector.shape_cast %258 : vector<256x8xf32> to vector<8x2x16x8xf32>
    %260 = vector.extract_strided_slice %259 {offsets = [0, 0, 0, 0], sizes = [8, 1, 16, 8], strides = [1, 1, 1, 1]} : vector<8x2x16x8xf32> to vector<8x1x16x8xf32>
    %261 = vector.shape_cast %260 : vector<8x1x16x8xf32> to vector<8x16x8xf32>
    %262 = vector.extract_strided_slice %259 {offsets = [0, 1, 0, 0], sizes = [8, 1, 16, 8], strides = [1, 1, 1, 1]} : vector<8x2x16x8xf32> to vector<8x1x16x8xf32>
    %263 = vector.shape_cast %262 : vector<8x1x16x8xf32> to vector<8x16x8xf32>
    %264 = arith.maximumf %261, %263 : vector<8x16x8xf32>
    %265 = vector.shape_cast %264 : vector<8x16x8xf32> to vector<8x8x2x8xf32>
    %266 = vector.extract_strided_slice %265 {offsets = [0, 0, 0, 0], sizes = [8, 8, 1, 8], strides = [1, 1, 1, 1]} : vector<8x8x2x8xf32> to vector<8x8x1x8xf32>
    %267 = vector.shape_cast %266 : vector<8x8x1x8xf32> to vector<8x8x8xf32>
    %268 = vector.extract_strided_slice %265 {offsets = [0, 0, 1, 0], sizes = [8, 8, 1, 8], strides = [1, 1, 1, 1]} : vector<8x8x2x8xf32> to vector<8x8x1x8xf32>
    %269 = vector.shape_cast %268 : vector<8x8x1x8xf32> to vector<8x8x8xf32>
    %270 = arith.maximumf %267, %269 : vector<8x8x8xf32>
    %c1_254 = arith.constant 1 : index
    %c1_255 = arith.constant 1 : index
    %c0_256 = arith.constant 0 : index
    %271 = vector.load %arg14[%c1_254, %c1_255, %c0_256] : memref<10x10x8xf32, #tpu.memory_space<vmem>>, vector<8x8x8xf32>
    tpu.vector_store %arg14[%c1_254, %c1_255, %c0_256], %270 {strides = array<i32>} : memref<10x10x8xf32, #tpu.memory_space<vmem>>, vector<8x8x8xf32>,
    %c0_257 = arith.constant 0 : index
    %c0_258 = arith.constant 0 : index
    %272 = vector.load %arg11[%c0_257, %c0_258] : memref<1x8xf32, #tpu.memory_space<vmem>>, vector<1x8xf32>
    %273 = vector.shape_cast %272 : vector<1x8xf32> to vector<1x8xf32>
    %274 = vector.broadcast %273 : vector<1x8xf32> to vector<64x8xf32>
    %c0_259 = arith.constant 0 : index
    %c0_260 = arith.constant 0 : index
    %c0_261 = arith.constant 0 : index
    %275 = vector.load %arg14[%c0_259, %c0_260, %c0_261] : memref<10x10x8xf32, #tpu.memory_space<vmem>>, vector<8x8x8xf32>
    %c0_262 = arith.constant 0 : index
    %c0_263 = arith.constant 0 : index
    %276 = vector.load %arg10[%c0_262, %c0_263] : memref<72x8xbf16, #tpu.memory_space<vmem>>, vector<8x8xbf16>
    %277 = vector.shape_cast %275 : vector<8x8x8xf32> to vector<64x8xf32>
    %278 = arith.truncf %277 : vector<64x8xf32> to vector<64x8xbf16>
    %cst_264 = arith.constant dense<0.000000e+00> : vector<64x8xf32>
    %279 = tpu.matmul %278, %276, %cst_264 {dimension_numbers = #tpu.dot_dimension_numbers<[1], [0], [0], [1], [0, 0, 1, 1], [], []>} : vector<64x8xbf16>, vector<8x8xbf16>, vector<64x8xf32> -> vector<64x8xf32>
    %280 = arith.addf %274, %279 : vector<64x8xf32>
    %c0_265 = arith.constant 0 : index
    %c1_266 = arith.constant 1 : index
    %c0_267 = arith.constant 0 : index
    %281 = vector.load %arg14[%c0_265, %c1_266, %c0_267] : memref<10x10x8xf32, #tpu.memory_space<vmem>>, vector<8x8x8xf32>
    %c8_268 = arith.constant 8 : index
    %c0_269 = arith.constant 0 : index
    %282 = vector.load %arg10[%c8_268, %c0_269] : memref<72x8xbf16, #tpu.memory_space<vmem>>, vector<8x8xbf16>
    %283 = vector.shape_cast %281 : vector<8x8x8xf32> to vector<64x8xf32>
    %284 = arith.truncf %283 : vector<64x8xf32> to vector<64x8xbf16>
    %cst_270 = arith.constant dense<0.000000e+00> : vector<64x8xf32>
    %285 = tpu.matmul %284, %282, %cst_270 {dimension_numbers = #tpu.dot_dimension_numbers<[1], [0], [0], [1], [0, 0, 1, 1], [], []>} : vector<64x8xbf16>, vector<8x8xbf16>, vector<64x8xf32> -> vector<64x8xf32>
    %286 = arith.addf %280, %285 : vector<64x8xf32>
    %c0_271 = arith.constant 0 : index
    %c2_272 = arith.constant 2 : index
    %c0_273 = arith.constant 0 : index
    %287 = vector.load %arg14[%c0_271, %c2_272, %c0_273] : memref<10x10x8xf32, #tpu.memory_space<vmem>>, vector<8x8x8xf32>
    %c16_274 = arith.constant 16 : index
    %c0_275 = arith.constant 0 : index
    %288 = vector.load %arg10[%c16_274, %c0_275] : memref<72x8xbf16, #tpu.memory_space<vmem>>, vector<8x8xbf16>
    %289 = vector.shape_cast %287 : vector<8x8x8xf32> to vector<64x8xf32>
    %290 = arith.truncf %289 : vector<64x8xf32> to vector<64x8xbf16>
    %cst_276 = arith.constant dense<0.000000e+00> : vector<64x8xf32>
    %291 = tpu.matmul %290, %288, %cst_276 {dimension_numbers = #tpu.dot_dimension_numbers<[1], [0], [0], [1], [0, 0, 1, 1], [], []>} : vector<64x8xbf16>, vector<8x8xbf16>, vector<64x8xf32> -> vector<64x8xf32>
    %292 = arith.addf %286, %291 : vector<64x8xf32>
    %c1_277 = arith.constant 1 : index
    %c0_278 = arith.constant 0 : index
    %c0_279 = arith.constant 0 : index
    %293 = vector.load %arg14[%c1_277, %c0_278, %c0_279] : memref<10x10x8xf32, #tpu.memory_space<vmem>>, vector<8x8x8xf32>
    %c24_280 = arith.constant 24 : index
    %c0_281 = arith.constant 0 : index
    %294 = vector.load %arg10[%c24_280, %c0_281] : memref<72x8xbf16, #tpu.memory_space<vmem>>, vector<8x8xbf16>
    %295 = vector.shape_cast %293 : vector<8x8x8xf32> to vector<64x8xf32>
    %296 = arith.truncf %295 : vector<64x8xf32> to vector<64x8xbf16>
    %cst_282 = arith.constant dense<0.000000e+00> : vector<64x8xf32>
    %297 = tpu.matmul %296, %294, %cst_282 {dimension_numbers = #tpu.dot_dimension_numbers<[1], [0], [0], [1], [0, 0, 1, 1], [], []>} : vector<64x8xbf16>, vector<8x8xbf16>, vector<64x8xf32> -> vector<64x8xf32>
    %298 = arith.addf %292, %297 : vector<64x8xf32>
    %c1_283 = arith.constant 1 : index
    %c1_284 = arith.constant 1 : index
    %c0_285 = arith.constant 0 : index
    %299 = vector.load %arg14[%c1_283, %c1_284, %c0_285] : memref<10x10x8xf32, #tpu.memory_space<vmem>>, vector<8x8x8xf32>
    %c32_286 = arith.constant 32 : index
    %c0_287 = arith.constant 0 : index
    %300 = vector.load %arg10[%c32_286, %c0_287] : memref<72x8xbf16, #tpu.memory_space<vmem>>, vector<8x8xbf16>
    %301 = vector.shape_cast %299 : vector<8x8x8xf32> to vector<64x8xf32>
    %302 = arith.truncf %301 : vector<64x8xf32> to vector<64x8xbf16>
    %cst_288 = arith.constant dense<0.000000e+00> : vector<64x8xf32>
    %303 = tpu.matmul %302, %300, %cst_288 {dimension_numbers = #tpu.dot_dimension_numbers<[1], [0], [0], [1], [0, 0, 1, 1], [], []>} : vector<64x8xbf16>, vector<8x8xbf16>, vector<64x8xf32> -> vector<64x8xf32>
    %304 = arith.addf %298, %303 : vector<64x8xf32>
    %c1_289 = arith.constant 1 : index
    %c2_290 = arith.constant 2 : index
    %c0_291 = arith.constant 0 : index
    %305 = vector.load %arg14[%c1_289, %c2_290, %c0_291] : memref<10x10x8xf32, #tpu.memory_space<vmem>>, vector<8x8x8xf32>
    %c40_292 = arith.constant 40 : index
    %c0_293 = arith.constant 0 : index
    %306 = vector.load %arg10[%c40_292, %c0_293] : memref<72x8xbf16, #tpu.memory_space<vmem>>, vector<8x8xbf16>
    %307 = vector.shape_cast %305 : vector<8x8x8xf32> to vector<64x8xf32>
    %308 = arith.truncf %307 : vector<64x8xf32> to vector<64x8xbf16>
    %cst_294 = arith.constant dense<0.000000e+00> : vector<64x8xf32>
    %309 = tpu.matmul %308, %306, %cst_294 {dimension_numbers = #tpu.dot_dimension_numbers<[1], [0], [0], [1], [0, 0, 1, 1], [], []>} : vector<64x8xbf16>, vector<8x8xbf16>, vector<64x8xf32> -> vector<64x8xf32>
    %310 = arith.addf %304, %309 : vector<64x8xf32>
    %c2_295 = arith.constant 2 : index
    %c0_296 = arith.constant 0 : index
    %c0_297 = arith.constant 0 : index
    %311 = vector.load %arg14[%c2_295, %c0_296, %c0_297] : memref<10x10x8xf32, #tpu.memory_space<vmem>>, vector<8x8x8xf32>
    %c48_298 = arith.constant 48 : index
    %c0_299 = arith.constant 0 : index
    %312 = vector.load %arg10[%c48_298, %c0_299] : memref<72x8xbf16, #tpu.memory_space<vmem>>, vector<8x8xbf16>
    %313 = vector.shape_cast %311 : vector<8x8x8xf32> to vector<64x8xf32>
    %314 = arith.truncf %313 : vector<64x8xf32> to vector<64x8xbf16>
    %cst_300 = arith.constant dense<0.000000e+00> : vector<64x8xf32>
    %315 = tpu.matmul %314, %312, %cst_300 {dimension_numbers = #tpu.dot_dimension_numbers<[1], [0], [0], [1], [0, 0, 1, 1], [], []>} : vector<64x8xbf16>, vector<8x8xbf16>, vector<64x8xf32> -> vector<64x8xf32>
    %316 = arith.addf %310, %315 : vector<64x8xf32>
    %c2_301 = arith.constant 2 : index
    %c1_302 = arith.constant 1 : index
    %c0_303 = arith.constant 0 : index
    %317 = vector.load %arg14[%c2_301, %c1_302, %c0_303] : memref<10x10x8xf32, #tpu.memory_space<vmem>>, vector<8x8x8xf32>
    %c56_304 = arith.constant 56 : index
    %c0_305 = arith.constant 0 : index
    %318 = vector.load %arg10[%c56_304, %c0_305] : memref<72x8xbf16, #tpu.memory_space<vmem>>, vector<8x8xbf16>
    %319 = vector.shape_cast %317 : vector<8x8x8xf32> to vector<64x8xf32>
    %320 = arith.truncf %319 : vector<64x8xf32> to vector<64x8xbf16>
    %cst_306 = arith.constant dense<0.000000e+00> : vector<64x8xf32>
    %321 = tpu.matmul %320, %318, %cst_306 {dimension_numbers = #tpu.dot_dimension_numbers<[1], [0], [0], [1], [0, 0, 1, 1], [], []>} : vector<64x8xbf16>, vector<8x8xbf16>, vector<64x8xf32> -> vector<64x8xf32>
    %322 = arith.addf %316, %321 : vector<64x8xf32>
    %c2_307 = arith.constant 2 : index
    %c2_308 = arith.constant 2 : index
    %c0_309 = arith.constant 0 : index
    %323 = vector.load %arg14[%c2_307, %c2_308, %c0_309] : memref<10x10x8xf32, #tpu.memory_space<vmem>>, vector<8x8x8xf32>
    %c64_310 = arith.constant 64 : index
    %c0_311 = arith.constant 0 : index
    %324 = vector.load %arg10[%c64_310, %c0_311] : memref<72x8xbf16, #tpu.memory_space<vmem>>, vector<8x8xbf16>
    %325 = vector.shape_cast %323 : vector<8x8x8xf32> to vector<64x8xf32>
    %326 = arith.truncf %325 : vector<64x8xf32> to vector<64x8xbf16>
    %cst_312 = arith.constant dense<0.000000e+00> : vector<64x8xf32>
    %327 = tpu.matmul %326, %324, %cst_312 {dimension_numbers = #tpu.dot_dimension_numbers<[1], [0], [0], [1], [0, 0, 1, 1], [], []>} : vector<64x8xbf16>, vector<8x8xbf16>, vector<64x8xf32> -> vector<64x8xf32>
    %328 = arith.addf %322, %327 : vector<64x8xf32>
    %c0_313 = arith.constant 0 : index
    %c0_314 = arith.constant 0 : index
    %c0_315 = arith.constant 0 : index
    %329 = vector.load %arg12[%c0_313, %c0_314, %c0_315] : memref<1x64x8xf32, #tpu.memory_space<vmem>>, vector<1x64x8xf32>
    %330 = vector.shape_cast %329 : vector<1x64x8xf32> to vector<64x8xf32>
    %331 = vector.shape_cast %328 : vector<64x8xf32> to vector<1x64x8xf32>
    tpu.vector_store %arg12[%c0_313, %c0_314, %c0_315], %331 {strides = array<i32>} : memref<1x64x8xf32, #tpu.memory_space<vmem>>, vector<1x64x8xf32>,
    return
  }
  func.func @transform_0(%arg0: i32) -> (i32, i32, i32, i32) {
    %c0_i32 = arith.constant 0 : i32
    %c0_i32_0 = arith.constant 0 : i32
    %c0_i32_1 = arith.constant 0 : i32
    %c0_i32_2 = arith.constant 0 : i32
    return %arg0, %c0_i32, %c0_i32_0, %c0_i32_1 : i32, i32, i32, i32
  }
  func.func @transform_1(%arg0: i32) -> (i32, i32) {
    %c0_i32 = arith.constant 0 : i32
    %c0_i32_0 = arith.constant 0 : i32
    %c0_i32_1 = arith.constant 0 : i32
    return %c0_i32, %c0_i32_0 : i32, i32
  }
  func.func @transform_2(%arg0: i32) -> (i32, i32) {
    %c0_i32 = arith.constant 0 : i32
    %c0_i32_0 = arith.constant 0 : i32
    %c0_i32_1 = arith.constant 0 : i32
    return %c0_i32, %c0_i32_0 : i32, i32
  }
  func.func @transform_3(%arg0: i32) -> (i32, i32) {
    %c0_i32 = arith.constant 0 : i32
    %c0_i32_0 = arith.constant 0 : i32
    %c0_i32_1 = arith.constant 0 : i32
    return %c0_i32, %c0_i32_0 : i32, i32
  }
  func.func @transform_4(%arg0: i32) -> (i32, i32) {
    %c0_i32 = arith.constant 0 : i32
    %c0_i32_0 = arith.constant 0 : i32
    %c0_i32_1 = arith.constant 0 : i32
    return %c0_i32, %c0_i32_0 : i32, i32
  }
  func.func @transform_5(%arg0: i32) -> (i32, i32) {
    %c0_i32 = arith.constant 0 : i32
    %c0_i32_0 = arith.constant 0 : i32
    %c0_i32_1 = arith.constant 0 : i32
    return %c0_i32, %c0_i32_0 : i32, i32
  }
  func.func @transform_6(%arg0: i32) -> (i32, i32) {
    %c0_i32 = arith.constant 0 : i32
    %c0_i32_0 = arith.constant 0 : i32
    %c0_i32_1 = arith.constant 0 : i32
    return %c0_i32, %c0_i32_0 : i32, i32
  }
  func.func @transform_7(%arg0: i32) -> (i32, i32) {
    %c0_i32 = arith.constant 0 : i32
    %c0_i32_0 = arith.constant 0 : i32
    %c0_i32_1 = arith.constant 0 : i32
    return %c0_i32, %c0_i32_0 : i32, i32
  }
  func.func @transform_8(%arg0: i32) -> (i32, i32) {
    %c0_i32 = arith.constant 0 : i32
    %c0_i32_0 = arith.constant 0 : i32
    %c0_i32_1 = arith.constant 0 : i32
    return %c0_i32, %c0_i32_0 : i32, i32
  }
  func.func @transform_9(%arg0: i32) -> (i32, i32) {
    %c0_i32 = arith.constant 0 : i32
    %c0_i32_0 = arith.constant 0 : i32
    %c0_i32_1 = arith.constant 0 : i32
    return %c0_i32, %c0_i32_0 : i32, i32
  }
  func.func @transform_10(%arg0: i32) -> (i32, i32) {
    %c0_i32 = arith.constant 0 : i32
    %c0_i32_0 = arith.constant 0 : i32
    %c0_i32_1 = arith.constant 0 : i32
    return %c0_i32, %c0_i32_0 : i32, i32
  }
  func.func @transform_11(%arg0: i32) -> (i32, i32, i32) {
    %c0_i32 = arith.constant 0 : i32
    %c0_i32_0 = arith.constant 0 : i32
    %c0_i32_1 = arith.constant 0 : i32
    return %arg0, %c0_i32, %c0_i32_0 : i32, i32, i32
  }
}

</mosaic_0001>

<bundles_post_ra>
// kernel: stack_forward.1
= control target key start
LH: loop header
LB: loop body
LE: loop exit
PB: predicated region body
PF: predicated region fallthrough
CT: control target
= control target key end

     0   :  { %s16216_s17 = smov 0   ;;  %s21555_s0 = inlined_call_operand.vmem [shape: f32[2,16,16,4], index: 0, kind: input, shape index: {}]   ;;  %s21556_s1 = inlined_call_operand.vmem [shape: bf16[36,8], index: 1, kind: input, shape index: {}]   ;;  %s21557_s2 = inlined_call_operand.vmem [shape: f32[1,8], index: 2, kind: input, shape index: {}]   ;;  %s21558_s3 = inlined_call_operand.vmem [shape: bf16[72,8], index: 3, kind: input, shape index: {}]   ;;  %s21559_s4 = inlined_call_operand.vmem [shape: f32[1,8], index: 4, kind: input, shape index: {}]   ;;  %s21560_s5 = inlined_call_operand.vmem [shape: bf16[72,8], index: 5, kind: input, shape index: {}]   ;;  %s21561_s6 = inlined_call_operand.vmem [shape: f32[1,8], index: 6, kind: input, shape index: {}]   ;;  %s21562_s7 = inlined_call_operand.vmem [shape: bf16[72,8], index: 7, kind: input, shape index: {}]   ;;  %s21563_s8 = inlined_call_operand.vmem [shape: f32[1,8], index: 8, kind: input, shape index: {}]   ;;  %s21564_s9 = inlined_call_operand.vmem [shape: bf16[72,8], index: 9, kind: input, shape index: {}]   ;;  %s21565_s10 = inlined_call_operand.vmem [shape: f32[1,8], index: 10, kind: input, shape index: {}]   ;;  %s21566_s11 = inlined_call_operand.vmem [shape: f32[2,64,8], index: 11, kind: output, shape index: {}]  }
   0x1 LB: > { %s13412_s18 = sadd.s32 4294967295, %s16152_s17   ;;  %p13416_p0 = scmp.ge.s32.totalorder %s16152_s17, 1  ;;  %s16152_s17 = sphi %s16216_s17, %s21_s17  }
   0x2   : > { %p337_p1 = scmp.lt.s32.totalorder %s16152_s17, 3 }
   0x4   : > { %p338_p2 = pnand %p13416_p0, %p337_p1 }
   0x6   : > { %341 = sbr.rel (%p338_p2) target bundleno = 2313 (0x909), region = 64 }
   0xb   : > { %v564_v0 = vld [vmem:[%s21556_s1] sm:$0x3]  ;;  %vm629_vm0 = vcmask 1041408   ;;  %vm388_vm1 = vcmask 64512   ;;  %vm397_vm2 = vcmask 57344   ;;  %v16154_v2 = vmov 0.0  }
   0xc   : > { %16083 = vmatprep.subr.msk.bf16.mxu0 %vm629_vm0, %v564_v0  ;;  %v631_v1 = vsel %vm629_vm0, %v564_v0, 0  ;;  %16084 = vmatprep.subr.msk.bf16.mxu1 %vm629_vm0, %v564_v0  ;;  %389 = vst.msk [vmem:[#allocation2] sm:$0xff] %vm388_vm1, %v16154_v2  ;;  %390 = vst.msk [vmem:[#allocation2 + $0x8] sm:$0xff] %vm388_vm1, %v16154_v2  ;;  %v16341_v3 = vld [vmem:[%s21556_s1 + $0x4] sm:$0x3]  ;;  %p16345_p3 = scmp.lt.s32.totalorder %s13412_s18, 1 }
   0xd   : > { %394 = vst.msk [vmem:[#allocation2 + $0x198] sm:$0xff] %vm388_vm1, %v16154_v2  ;;  %395 = vst.msk [vmem:[#allocation2 + $0x1a0] sm:$0xff] %vm388_vm1, %v16154_v2  ;;  %vm391_vm3 = vcmask 58368   ;;  %14768 = vmatpush3.bf16.msra.mxu0 %v631_v1  ;;  %16082 = vmatpush3.bf16.msra.mxu1 %v631_v1  ;;  %v16360_v4 = vld [vmem:[%s21556_s1] ss:$0 sps:$4 sm:$0xcc]  }
   0xe   : > { %399 = vst.msk [vmem:[#allocation2 + $0x18] sm:$0x1] %vm397_vm2, %v16154_v2  ;;  %400 = vst.msk [vmem:[#allocation2 + $0x30] sm:$0x1] %vm397_vm2, %v16154_v2  ;;  %16086 = vmatprep.subr.msk.bf16.mxu0 %vm629_vm0, %v16341_v3  ;;  %s22421_s18 = smov (!%p16345_p3, %s13412_s18), 1  ;;  %v878_v5 = vrot.slane %v16360_v4, 2 }
   0xf   : > { %401 = vst.msk [vmem:[#allocation2 + $0x48] sm:$0x1] %vm397_vm2, %v16154_v2  ;;  %402 = vst.msk [vmem:[#allocation2 + $0x60] sm:$0x1] %vm397_vm2, %v16154_v2  ;;  %vm492_vm4 = vcmask 31744   ;;  %s14108_s26 = sshll.u32 %s22421_s18, 8 }
  0x10   : > { %403 = vst.msk [vmem:[#allocation2 + $0x78] sm:$0x1] %vm397_vm2, %v16154_v2  ;;  %404 = vst.msk [vmem:[#allocation2 + $0x90] sm:$0x1] %vm397_vm2, %v16154_v2  ;;  %s16387_s29 = scalar_lea.vmem %s21555_s0, %s14108_s26  ;;  %16085 = vmatprep.subr.msk.bf16.mxu1 %vm629_vm0, %v878_v5  ;;  %v1221_v37 = vsel %vm629_vm0, %v16341_v3, 0  ;;  %v928_v44 = vsel %vm629_vm0, %v878_v5, 0 }
  0x11   : > { %405 = vst.msk [vmem:[#allocation2 + $0xa8] sm:$0x1] %vm397_vm2, %v16154_v2  ;;  %406 = vst.msk [vmem:[#allocation2 + $0xc0] sm:$0x1] %vm397_vm2, %v16154_v2  ;;  %v459_v6 = vld [vmem:[%s16387_s29] sm:$0xff]  ;;  %v460_v7 = vld [vmem:[%s16387_s29 + $0x8] sm:$0xff] }
  0x12   : > { %407 = vst.msk [vmem:[#allocation2 + $0xd8] sm:$0x1] %vm397_vm2, %v16154_v2  ;;  %408 = vst.msk [vmem:[#allocation2 + $0xf0] sm:$0x1] %vm397_vm2, %v16154_v2  ;;  %v485_v8 = vld [vmem:[%s16387_s29 + $0xd0] sm:$0xff]  ;;  %v486_v10 = vld [vmem:[%s16387_s29 + $0xd8] sm:$0xff] }
  0x13   : > { %409 = vst.msk [vmem:[#allocation2 + $0x108] sm:$0x1] %vm397_vm2, %v16154_v2  ;;  %410 = vst.msk [vmem:[#allocation2 + $0x120] sm:$0x1] %vm397_vm2, %v16154_v2  ;;  %v533_v9 = vld [vmem:[#allocation2 + $0x8] sm:$0xff]  ;;  %v487_v11 = vld [vmem:[%s16387_s29 + $0xe0] sm:$0xff] }
  0x14   : > { %411 = vst.msk [vmem:[#allocation2 + $0x138] sm:$0x1] %vm397_vm2, %v16154_v2  ;;  %412 = vst.msk [vmem:[#allocation2 + $0x150] sm:$0x1] %vm397_vm2, %v16154_v2  ;;  %v488_v13 = vld [vmem:[%s16387_s29 + $0xe8] sm:$0xff]  ;;  %v461_v14 = vld [vmem:[%s16387_s29 + $0x10] sm:$0xff] }
  0x15   : > { %413 = vst.msk [vmem:[#allocation2 + $0x168] sm:$0x1] %vm397_vm2, %v16154_v2  ;;  %414 = vst.msk [vmem:[#allocation2 + $0x180] sm:$0x1] %vm397_vm2, %v16154_v2  ;;  %v462_v16 = vld [vmem:[%s16387_s29 + $0x18] sm:$0xff]  ;;  %v463_v17 = vld [vmem:[%s16387_s29 + $0x20] sm:$0xff] }
  0x16   : > { %417 = vst.msk [vmem:[#allocation2 + $0x29] sm:$0x1] %vm397_vm2, %v16154_v2  ;;  %418 = vst.msk [vmem:[#allocation2 + $0x41] sm:$0x1] %vm397_vm2, %v16154_v2  ;;  %v464_v18 = vld [vmem:[%s16387_s29 + $0x28] sm:$0xff]  ;;  %v465_v19 = vld [vmem:[%s16387_s29 + $0x30] sm:$0xff] }
  0x17   : > { %419 = vst.msk [vmem:[#allocation2 + $0x59] sm:$0x1] %vm397_vm2, %v16154_v2  ;;  %420 = vst.msk [vmem:[#allocation2 + $0x71] sm:$0x1] %vm397_vm2, %v16154_v2  ;;  %v466_v20 = vld [vmem:[%s16387_s29 + $0x38] sm:$0xff]  ;;  %v467_v21 = vld [vmem:[%s16387_s29 + $0x40] sm:$0xff] }
  0x18   : > { %421 = vst.msk [vmem:[#allocation2 + $0x89] sm:$0x1] %vm397_vm2, %v16154_v2  ;;  %422 = vst.msk [vmem:[#allocation2 + $0xa1] sm:$0x1] %vm397_vm2, %v16154_v2  ;;  %v468_v22 = vld [vmem:[%s16387_s29 + $0x48] sm:$0xff]  ;;  %v469_v26 = vld [vmem:[%s16387_s29 + $0x50] sm:$0xff] }
  0x19   : > { %423 = vst.msk [vmem:[#allocation2 + $0xb9] sm:$0x1] %vm397_vm2, %v16154_v2  ;;  %424 = vst.msk [vmem:[#allocation2 + $0xd1] sm:$0x1] %vm397_vm2, %v16154_v2  ;;  %v826_v24 = vld [vmem:[#allocation2 + $0x1] sm:$0xff]  ;;  %v470_v27 = vld [vmem:[%s16387_s29 + $0x58] sm:$0xff] }
  0x1a   : > { %425 = vst.msk [vmem:[#allocation2 + $0xe9] sm:$0x1] %vm397_vm2, %v16154_v2  ;;  %426 = vst.msk [vmem:[#allocation2 + $0x101] sm:$0x1] %vm397_vm2, %v16154_v2  ;;  %v471_v28 = vld [vmem:[%s16387_s29 + $0x60] sm:$0xff]  ;;  %v472_v29 = vld [vmem:[%s16387_s29 + $0x68] sm:$0xff] }
  0x1b   : > { %427 = vst.msk [vmem:[#allocation2 + $0x119] sm:$0x1] %vm397_vm2, %v16154_v2  ;;  %428 = vst.msk [vmem:[#allocation2 + $0x131] sm:$0x1] %vm397_vm2, %v16154_v2  ;;  %v473_v30 = vld [vmem:[%s16387_s29 + $0x70] sm:$0xff]  ;;  %v474_v31 = vld [vmem:[%s16387_s29 + $0x78] sm:$0xff] }
  0x1c   : > { %429 = vst.msk [vmem:[#allocation2 + $0x149] sm:$0x1] %vm397_vm2, %v16154_v2  ;;  %430 = vst.msk [vmem:[#allocation2 + $0x161] sm:$0x1] %vm397_vm2, %v16154_v2  ;;  %v16447_v42 = vld [vmem:[%s21556_s1 + $0x8] sm:$0x3] }
  0x1d   : > { %431 = vst.msk [vmem:[#allocation2 + $0x179] sm:$0x1] %vm397_vm2, %v16154_v2  ;;  %432 = vst.msk [vmem:[#allocation2 + $0x191] sm:$0x1] %vm397_vm2, %v16154_v2  ;;  %v475_v62 = vld [vmem:[%s16387_s29 + $0x80] sm:$0xff]  ;;  %v476_v63 = vld [vmem:[%s16387_s29 + $0x88] sm:$0xff] }
  0x1e   : > { %434 = vst.msk [vmem:[#allocation3] sm:$0xff] %vm388_vm1, %v16154_v2  ;;  %437 = vst.msk [vmem:[#allocation3 + $0x90] sm:$0xff] %vm388_vm1, %v16154_v2  ;;  %v16421_v23 = vld [vmem:[%s21556_s1 + $0x4] ss:$0 sps:$4 sm:$0xcc]   ;;  %vm3355_vm5 = vcmask 1043456  }
  0x1f   : > { %440 = vst.msk [vmem:[#allocation3 + $0x10] sm:$0x1] %vm397_vm2, %v16154_v2  ;;  %441 = vst.msk [vmem:[#allocation3 + $0x20] sm:$0x1] %vm397_vm2, %v16154_v2  ;;  %v1468_v47 = vrot.slane %v16421_v23, 2  ;;  %vm12352_vm6 = vcmask 1041409  }
  0x20   : > { %442 = vst.msk [vmem:[#allocation3 + $0x30] sm:$0x1] %vm397_vm2, %v16154_v2  ;;  %443 = vst.msk [vmem:[#allocation3 + $0x40] sm:$0x1] %vm397_vm2, %v16154_v2  ;;  %vm12354_vm7 = vcmask 1042434   ;;  %vm12356_vm8 = vcmask 1043459  }
  0x21   : > { %444 = vst.msk [vmem:[#allocation3 + $0x50] sm:$0x1] %vm397_vm2, %v16154_v2  ;;  %445 = vst.msk [vmem:[#allocation3 + $0x60] sm:$0x1] %vm397_vm2, %v16154_v2  ;;  %vm12358_vm9 = vcmask 1044484   ;;  %vm12360_vm10 = vcmask 1045509  }
  0x22   : > { %446 = vst.msk [vmem:[#allocation3 + $0x70] sm:$0x1] %vm397_vm2, %v16154_v2  ;;  %447 = vst.msk [vmem:[#allocation3 + $0x80] sm:$0x1] %vm397_vm2, %v16154_v2  ;;  %vm12362_vm11 = vcmask 1046534   ;;  %vm12364_vm12 = vcmask 1047559  }
  0x23   : > { %450 = vst.msk [vmem:[#allocation3 + $0x19] sm:$0x1] %vm397_vm2, %v16154_v2  ;;  %451 = vst.msk [vmem:[#allocation3 + $0x29] sm:$0x1] %vm397_vm2, %v16154_v2  ;;  %s14109_s28 = sshll.u32 %s22421_s18, 6 }
  0x24   : > { %452 = vst.msk [vmem:[#allocation3 + $0x39] sm:$0x1] %vm397_vm2, %v16154_v2  ;;  %453 = vst.msk [vmem:[#allocation3 + $0x49] sm:$0x1] %vm397_vm2, %v16154_v2  ;;  %s21529_s12 = scalar_lea.vmem %s21566_s11, %s14109_s28 }
  0x25   : > { %454 = vst.msk [vmem:[#allocation3 + $0x59] sm:$0x1] %vm397_vm2, %v16154_v2  ;;  %455 = vst.msk [vmem:[#allocation3 + $0x69] sm:$0x1] %vm397_vm2, %v16154_v2 }
  0x26   : > { %456 = vst.msk [vmem:[#allocation3 + $0x79] sm:$0x1] %vm397_vm2, %v16154_v2  ;;  %457 = vst.msk [vmem:[#allocation3 + $0x89] sm:$0x1] %vm397_vm2, %v16154_v2 }
  0x27   : > { %398 = vst.msk [vmem:[#allocation2] sm:$0x1] %vm397_vm2, %v16154_v2  ;;  %415 = vst.msk [vmem:[#allocation2 + $0x198] sm:$0x1] %vm397_vm2, %v16154_v2 }
  0x28   : > { %439 = vst.msk [vmem:[#allocation3] sm:$0x1] %vm397_vm2, %v16154_v2  ;;  %448 = vst.msk [vmem:[#allocation3 + $0x90] sm:$0x1] %vm397_vm2, %v16154_v2 }
  0x29   : > { %392 = vst.msk [vmem:[#allocation2 + $0x10] sm:$0x3] %vm391_vm3, %v16154_v2  ;;  %396 = vst.msk [vmem:[#allocation2 + $0x1a8] sm:$0x3] %vm391_vm3, %v16154_v2 }
  0x2a   : > { %435 = vst.msk [vmem:[#allocation3 + $0x8] sm:$0x3] %vm391_vm3, %v16154_v2  ;;  %438 = vst.msk [vmem:[#allocation3 + $0x98] sm:$0x3] %vm391_vm3, %v16154_v2 }
  0x2b   : > { %416 = vst.msk [vmem:[#allocation2 + $0x11] sm:$0x1] %vm397_vm2, %v16154_v2  ;;  %433 = vst.msk [vmem:[#allocation2 + $0x1a9] sm:$0x1] %vm397_vm2, %v16154_v2 }
  0x2c   : > { %449 = vst.msk [vmem:[#allocation3 + $0x9] sm:$0x1] %vm397_vm2, %v16154_v2  ;;  %458 = vst.msk [vmem:[#allocation3 + $0x99] sm:$0x1] %vm397_vm2, %v16154_v2  ;;  %v1518_v2 = vsel %vm629_vm0, %v1468_v47, 0 }
  0x2d   : > { %493 = vst.msk [vmem:[#allocation2 + $0x19] sm:$0xff] %vm492_vm4, %v459_v6  ;;  %494 = vst.msk [vmem:[#allocation2 + $0x21] sm:$0xff] %vm492_vm4, %v460_v7  ;;  %v16474_v58 = vld [vmem:[%s21556_s1 + $0x8] ss:$0 sps:$4 sm:$0xcc]   ;;  %v477_v6 = vld [vmem:[%s16387_s29 + $0x90] sm:$0xff] }
  0x2e   : > { %519 = vst.msk [vmem:[#allocation2 + $0x151] sm:$0xff] %vm492_vm4, %v485_v8  ;;  %v532_v12 = vld [vmem:[#allocation2] sm:$0xff]  ;;  %520 = vst.msk [vmem:[#allocation2 + $0x159] sm:$0xff] %vm492_vm4, %v486_v10  ;;  %v2058_v3 = vrot.slane %v16474_v58, 2  ;;  %v478_v7 = vld [vmem:[%s16387_s29 + $0x98] sm:$0xff] }
  0x2f   : > { %521 = vst.msk [vmem:[#allocation2 + $0x169] sm:$0xff] %vm492_vm4, %v487_v11  ;;  %v565_v15 = vpack.c.bf16 %v533_v9, %v532_v12  ;;  %522 = vst.msk [vmem:[#allocation2 + $0x171] sm:$0xff] %vm492_vm4, %v488_v13  ;;  %v479_v8 = vld [vmem:[%s16387_s29 + $0xa0] sm:$0xff]  ;;  %v480_v11 = vld [vmem:[%s16387_s29 + $0xa8] sm:$0xff] }
  0x30   : > { %495 = vst.msk [vmem:[#allocation2 + $0x31] sm:$0xff] %vm492_vm4, %v461_v14  ;;  %496 = vst.msk [vmem:[#allocation2 + $0x39] sm:$0xff] %vm492_vm4, %v462_v16  ;;  %v827_v25 = vld [vmem:[#allocation2 + $0x9] sm:$0xff]  ;;  %v482_v13 = vld [vmem:[%s16387_s29 + $0xb8] sm:$0xff] }
  0x31   : > { %497 = vst.msk [vmem:[#allocation2 + $0x49] sm:$0xff] %vm492_vm4, %v463_v17  ;;  %498 = vst.msk [vmem:[#allocation2 + $0x51] sm:$0xff] %vm492_vm4, %v464_v18  ;;  %14769 = vmatprep.mubr.msk.bf16.mxu0 %vm492_vm4, %v565_v15  ;;  %v859_v46 = vpack.c.bf16 %v827_v25, %v826_v24  ;;  %v481_v12 = vld [vmem:[%s16387_s29 + $0xb0] sm:$0xff]  ;;  %v483_v14 = vld [vmem:[%s16387_s29 + $0xc0] sm:$0xff] }
  0x32   : > { %499 = vst.msk [vmem:[#allocation2 + $0x61] sm:$0xff] %vm492_vm4, %v465_v19  ;;  %500 = vst.msk [vmem:[#allocation2 + $0x69] sm:$0xff] %vm492_vm4, %v466_v20  ;;  %v484_v18 = vld [vmem:[%s16387_s29 + $0xc8] sm:$0xff] }
  0x33   : > { %501 = vst.msk [vmem:[#allocation2 + $0x79] sm:$0xff] %vm492_vm4, %v467_v21  ;;  %502 = vst.msk [vmem:[#allocation2 + $0x81] sm:$0xff] %vm492_vm4, %v468_v22 }
  0x34   : > { %503 = vst.msk [vmem:[#allocation2 + $0x91] sm:$0xff] %vm492_vm4, %v469_v26  ;;  %504 = vst.msk [vmem:[#allocation2 + $0x99] sm:$0xff] %vm492_vm4, %v470_v27  ;;  %v534_v32 = vld [vmem:[#allocation2 + $0x18] sm:$0xff]  ;;  %v535_v33 = vld [vmem:[#allocation2 + $0x20] sm:$0xff] }
  0x35   : > { %505 = vst.msk [vmem:[#allocation2 + $0xa9] sm:$0xff] %vm492_vm4, %v471_v28  ;;  %v560_v34 = vld [vmem:[#allocation2 + $0x150] sm:$0xff]  ;;  %506 = vst.msk [vmem:[#allocation2 + $0xb1] sm:$0xff] %vm492_vm4, %v472_v29  ;;  %v16438_v35 = vpack.c.bf16 %v535_v33, %v534_v32  ;;  %v561_v36 = vld [vmem:[#allocation2 + $0x158] sm:$0xff] }
  0x36   : > { %507 = vst.msk [vmem:[#allocation2 + $0xc1] sm:$0xff] %vm492_vm4, %v473_v30  ;;  %508 = vst.msk [vmem:[#allocation2 + $0xc9] sm:$0xff] %vm492_vm4, %v474_v31  ;;  %v562_v38 = vld [vmem:[#allocation2 + $0x168] sm:$0xff]  ;;  %v16442_v39 = vpack.c.bf16 %v561_v36, %v560_v34  ;;  %v563_v40 = vld [vmem:[#allocation2 + $0x170] sm:$0xff] }
  0x37   : > { %v536_v41 = vld [vmem:[#allocation2 + $0x30] sm:$0xff]  ;;  %14770 = vmatmul.mubr.msk.bf16.vlgmr.msra.gmra.mxu0 %vm492_vm4, %v16438_v35  ;;  %v16451_v43 = vpack.c.bf16 %v563_v40, %v562_v38  ;;  %v537_v45 = vld [vmem:[#allocation2 + $0x38] sm:$0xff]  ;;  %v829_v54 = vld [vmem:[#allocation2 + $0x21] sm:$0xff]  ;;  %509 = vst.msk [vmem:[#allocation2 + $0xd9] sm:$0xff] %vm492_vm4, %v475_v62 }
  0x38   : > { %14797 = vmatprep.mubr.msk.bf16.mxu1 %vm492_vm4, %v16442_v39  ;;  %14836 = vmatpush3.bf16.msra.mxu0 %v1221_v37  ;;  %v16459_v48 = vpack.c.bf16 %v537_v45, %v536_v41  ;;  %v538_v49 = vld [vmem:[#allocation2 + $0x48] sm:$0xff]  ;;  %v539_v50 = vld [vmem:[#allocation2 + $0x50] sm:$0xff]  ;;  %v828_v53 = vld [vmem:[#allocation2 + $0x19] sm:$0xff]  ;;  %510 = vst.msk [vmem:[#allocation2 + $0xe1] sm:$0xff] %vm492_vm4, %v476_v63 }
  0x39   : > { %14798 = vmatmul.mubr.msk.bf16.vlgmr.msra.gmra.mxu1 %vm492_vm4, %v16451_v43  ;;  %v540_v51 = vld [vmem:[#allocation2 + $0x60] sm:$0xff]  ;;  %v541_v52 = vld [vmem:[#allocation2 + $0x68] sm:$0xff]  ;;  %16088 = vmatprep.subr.msk.bf16.mxu0 %vm629_vm0, %v16447_v42  ;;  %v16467_v55 = vpack.c.bf16 %v539_v50, %v538_v49  ;;  %v830_v56 = vld [vmem:[#allocation2 + $0x31] sm:$0xff]  ;;  %v16478_v60 = vpack.c.bf16 %v829_v54, %v828_v53  ;;  %511 = vst.msk [vmem:[#allocation2 + $0xf1] sm:$0xff] %vm492_vm4, %v477_v6 }
  0x3a   : > { %14802 = vmatpush3.bf16.msra.mxu1 %v928_v44  ;;  %14773 = vmatprep.mubr.msk.bf16.mxu0 %vm492_vm4, %v16459_v48  ;;  %v831_v57 = vld [vmem:[#allocation2 + $0x39] sm:$0xff]  ;;  %v16476_v59 = vpack.c.bf16 %v541_v52, %v540_v51  ;;  %v832_v4 = vld [vmem:[#allocation2 + $0x49] sm:$0xff]  ;;  %v833_v5 = vld [vmem:[#allocation2 + $0x51] sm:$0xff]  ;;  %512 = vst.msk [vmem:[#allocation2 + $0xf9] sm:$0xff] %vm492_vm4, %v478_v7 }
  0x3b   : > { %14803 = vmatprep.mubr.msk.bf16.mxu1 %vm492_vm4, %v859_v46  ;;  %16087 = vmatprep.subr.msk.bf16.mxu1 %vm629_vm0, %v1468_v47  ;;  %v16480_v61 = vpack.c.bf16 %v831_v57, %v830_v56  ;;  %v542_v0 = vld [vmem:[#allocation2 + $0x78] sm:$0xff]  ;;  %v543_v1 = vld [vmem:[#allocation2 + $0x80] sm:$0xff]  ;;  %v544_v9 = vld [vmem:[#allocation2 + $0x90] sm:$0xff]  ;;  %513 = vst.msk [vmem:[#allocation2 + $0x109] sm:$0xff] %vm492_vm4, %v479_v8  ;;  %v16519_v20 = vpack.c.bf16 %v833_v5, %v832_v4 }
  0x3c   : > { %v545_v10 = vld [vmem:[#allocation2 + $0x98] sm:$0xff]  ;;  %514 = vst.msk [vmem:[#allocation2 + $0x111] sm:$0xff] %vm492_vm4, %v480_v11  ;;  %v16507_v15 = vpack.c.bf16 %v543_v1, %v542_v0  ;;  %v834_v16 = vld [vmem:[#allocation2 + $0x61] sm:$0xff]  ;;  %v835_v17 = vld [vmem:[#allocation2 + $0x69] sm:$0xff] }
  0x3d   : > { %515 = vst.msk [vmem:[#allocation2 + $0x121] sm:$0xff] %vm492_vm4, %v481_v12  ;;  %516 = vst.msk [vmem:[#allocation2 + $0x129] sm:$0xff] %vm492_vm4, %v482_v13  ;;  %v16516_v19 = vpack.c.bf16 %v545_v10, %v544_v9  ;;  %v16521_v21 = vpack.c.bf16 %v835_v17, %v834_v16  ;;  %v546_v22 = vld [vmem:[#allocation2 + $0xa8] sm:$0xff]  ;;  %v547_v23 = vld [vmem:[#allocation2 + $0xb0] sm:$0xff] }
  0x3e   : > { %517 = vst.msk [vmem:[#allocation2 + $0x139] sm:$0xff] %vm492_vm4, %v483_v14  ;;  %518 = vst.msk [vmem:[#allocation2 + $0x141] sm:$0xff] %vm492_vm4, %v484_v18  ;;  %v548_v24 = vld [vmem:[#allocation2 + $0xc0] sm:$0xff]  ;;  %v549_v25 = vld [vmem:[#allocation2 + $0xc8] sm:$0xff]  ;;  %v16531_v28 = vpack.c.bf16 %v547_v23, %v546_v22 }
  0x3f   : > { %14774 = vmatmul.mubr.msk.bf16.gmra.mxu0 %vm492_vm4, %v16467_v55  ;;  %v836_v26 = vld [vmem:[#allocation2 + $0x79] sm:$0xff]  ;;  %v837_v27 = vld [vmem:[#allocation2 + $0x81] sm:$0xff]  ;;  %v838_v29 = vld [vmem:[#allocation2 + $0x91] sm:$0xff]  ;;  %v16533_v31 = vpack.c.bf16 %v549_v25, %v548_v24 }
  0x40   : > { %14777 = vmatprep.mubr.msk.bf16.mxu0 %vm492_vm4, %v16476_v59  ;;  %v839_v30 = vld [vmem:[#allocation2 + $0x99] sm:$0xff]  ;;  %v16535_v32 = vpack.c.bf16 %v837_v27, %v836_v26  ;;  %v552_v37 = vld [vmem:[#allocation2 + $0xf0] sm:$0xff]  ;;  %v842_v45 = vld [vmem:[#allocation2 + $0xc1] sm:$0xff] }
  0x41   : > { %14804 = vmatmul.mubr.msk.bf16.vlgmr.msra.gmra.mxu1 %vm492_vm4, %v16478_v60  ;;  %v16537_v33 = vpack.c.bf16 %v839_v30, %v838_v29  ;;  %v550_v34 = vld [vmem:[#allocation2 + $0xd8] sm:$0xff]  ;;  %v551_v36 = vld [vmem:[#allocation2 + $0xe0] sm:$0xff]  ;;  %v840_v40 = vld [vmem:[#allocation2 + $0xa9] sm:$0xff] }
  0x42   : > { %14807 = vmatprep.mubr.msk.bf16.mxu1 %vm492_vm4, %v16480_v61  ;;  %14870 = vmatpush3.bf16.msra.mxu1 %v1518_v2  ;;  %v553_v38 = vld [vmem:[#allocation2 + $0xf8] sm:$0xff]  ;;  %v16547_v44 = vpack.c.bf16 %v551_v36, %v550_v34  ;;  %v843_v46 = vld [vmem:[#allocation2 + $0xc9] sm:$0xff]  ;;  %v845_v63 = vld [vmem:[#allocation2 + $0xe1] sm:$0xff] }
  0x43   : > { %16089 = vmatprep.subr.msk.bf16.mxu1 %vm629_vm0, %v2058_v3  ;;  %v841_v41 = vld [vmem:[#allocation2 + $0xb1] sm:$0xff]  ;;  %v16549_v47 = vpack.c.bf16 %v553_v38, %v552_v37  ;;  %v16553_v50 = vpack.c.bf16 %v843_v46, %v842_v45  ;;  %v554_v53 = vld [vmem:[#allocation2 + $0x108] sm:$0xff]  ;;  %v844_v62 = vld [vmem:[#allocation2 + $0xd9] sm:$0xff]  ;;  %v1811_v38 = vsel %vm629_vm0, %v16447_v42, 0 }
  0x44   : > { %v16551_v49 = vpack.c.bf16 %v841_v41, %v840_v40  ;;  %v489_v51 = vld [vmem:[%s16387_s29 + $0xf0] sm:$0xff]  ;;  %v490_v52 = vld [vmem:[%s16387_s29 + $0xf8] sm:$0xff]  ;;  %v556_v56 = vld [vmem:[#allocation2 + $0x120] sm:$0xff]  ;;  %v16571_v5 = vpack.c.bf16 %v845_v63, %v844_v62 }
  0x45   : > { %523 = vst.msk [vmem:[#allocation2 + $0x181] sm:$0xff] %vm492_vm4, %v489_v51  ;;  %524 = vst.msk [vmem:[#allocation2 + $0x189] sm:$0xff] %vm492_vm4, %v490_v52  ;;  %v555_v54 = vld [vmem:[#allocation2 + $0x110] sm:$0xff]  ;;  %v557_v57 = vld [vmem:[#allocation2 + $0x128] sm:$0xff] }
  0x46   : > { %v16567_v0 = vpack.c.bf16 %v555_v54, %v554_v53  ;;  %v846_v1 = vld [vmem:[#allocation2 + $0xf1] sm:$0xff]  ;;  %v847_v2 = vld [vmem:[#allocation2 + $0xf9] sm:$0xff]  ;;  %v16569_v4 = vpack.c.bf16 %v557_v57, %v556_v56  ;;  %v1123_v9 = vld [vmem:[#allocation2 + $0x2] sm:$0xff] }
  0x47   : > { %14778 = vmatmul.mubr.msk.bf16.gmra.mxu0 %vm492_vm4, %v16507_v15  ;;  %v16573_v6 = vpack.c.bf16 %v847_v2, %v846_v1  ;;  %v558_v7 = vld [vmem:[#allocation2 + $0x138] sm:$0xff]  ;;  %v559_v8 = vld [vmem:[#allocation2 + $0x140] sm:$0xff]  ;;  %v1124_v10 = vld [vmem:[#allocation2 + $0xa] sm:$0xff] }
  0x48   : > { %14781 = vmatprep.mubr.msk.bf16.mxu0 %vm492_vm4, %v16516_v19  ;;  %v848_v11 = vld [vmem:[#allocation2 + $0x109] sm:$0xff]  ;;  %v849_v12 = vld [vmem:[#allocation2 + $0x111] sm:$0xff]  ;;  %v16583_v13 = vpack.c.bf16 %v559_v8, %v558_v7  ;;  %v850_v14 = vld [vmem:[#allocation2 + $0x121] sm:$0xff]  ;;  %v1156_v17 = vpack.c.bf16 %v1124_v10, %v1123_v9 }
  0x49   : > { %14808 = vmatmul.mubr.msk.bf16.gmra.mxu1 %vm492_vm4, %v16519_v20  ;;  %v851_v16 = vld [vmem:[#allocation2 + $0x129] sm:$0xff]  ;;  %v16585_v18 = vpack.c.bf16 %v849_v12, %v848_v11  ;;  %v1125_v23 = vld [vmem:[#allocation2 + $0x1a] sm:$0xff]  ;;  %v1127_v25 = vld [vmem:[#allocation2 + $0x32] sm:$0xff]  ;;  %v2108_v11 = vsel %vm629_vm0, %v2058_v3, 0 }
  0x4a   : > { %14811 = vmatprep.mubr.msk.bf16.mxu1 %vm492_vm4, %v16521_v21  ;;  %v16587_v22 = vpack.c.bf16 %v851_v16, %v850_v14  ;;  %v1126_v24 = vld [vmem:[#allocation2 + $0x22] sm:$0xff]  ;;  %v1128_v26 = vld [vmem:[#allocation2 + $0x3a] sm:$0xff]  ;;  %v854_v34 = vld [vmem:[#allocation2 + $0x151] sm:$0xff] }
  0x4b   : > { %v852_v27 = vld [vmem:[#allocation2 + $0x139] sm:$0xff]  ;;  %v853_v29 = vld [vmem:[#allocation2 + $0x141] sm:$0xff]  ;;  %v16596_v30 = vpack.c.bf16 %v1126_v24, %v1125_v23  ;;  %v16598_v37 = vpack.c.bf16 %v1128_v26, %v1127_v25  ;;  %v16609_v45 = vld [vmem:[%s21556_s1 + $0xc] sm:$0x3] }
  0x4c   : > { %v855_v36 = vld [vmem:[#allocation2 + $0x159] sm:$0xff]  ;;  %v16602_v40 = vpack.c.bf16 %v853_v29, %v852_v27  ;;  %v1129_v46 = vld [vmem:[#allocation2 + $0x4a] sm:$0xff]  ;;  %v1131_v42 = vld [vmem:[#allocation2 + $0x62] sm:$0xff] }
  0x4d   : > { %v16604_v41 = vpack.c.bf16 %v855_v36, %v854_v34  ;;  %v1130_v51 = vld [vmem:[#allocation2 + $0x52] sm:$0xff]  ;;  %v1132_v52 = vld [vmem:[#allocation2 + $0x6a] sm:$0xff]  ;;  %v1133_v63 = vld [vmem:[#allocation2 + $0x7a] sm:$0xff] }
  0x4e   : > { %v856_v53 = vld [vmem:[#allocation2 + $0x169] sm:$0xff]  ;;  %v857_v54 = vld [vmem:[#allocation2 + $0x171] sm:$0xff]  ;;  %v16621_v56 = vpack.c.bf16 %v1130_v51, %v1129_v46  ;;  %v16623_v57 = vpack.c.bf16 %v1132_v52, %v1131_v42  ;;  %v1136_v7 = vld [vmem:[#allocation2 + $0x9a] sm:$0xff] }
  0x4f   : > { %14782 = vmatmul.mubr.msk.bf16.gmra.mxu0 %vm492_vm4, %v16531_v28  ;;  %v16625_v62 = vpack.c.bf16 %v857_v54, %v856_v53  ;;  %v1134_v1 = vld [vmem:[#allocation2 + $0x82] sm:$0xff]  ;;  %v1135_v2 = vld [vmem:[#allocation2 + $0x92] sm:$0xff]  ;;  %v16640_v9 = vld [vmem:[%s21556_s1 + $0xc] ss:$0 sps:$4 sm:$0xcc]  }
  0x50   : > { %14785 = vmatprep.mubr.msk.bf16.mxu0 %vm492_vm4, %v16533_v31  ;;  %v16635_v8 = vpack.c.bf16 %v1134_v1, %v1133_v63  ;;  %v16642_v10 = vpack.c.bf16 %v1136_v7, %v1135_v2  ;;  %v2649_v12 = vrot.slane %v16640_v9, 2  ;;  %v1138_v14 = vld [vmem:[#allocation2 + $0xb2] sm:$0xff]  ;;  %v1139_v16 = vld [vmem:[#allocation2 + $0xc2] sm:$0xff]  ;;  %v1141_v3 = vld [vmem:[#allocation2 + $0xda] sm:$0xff] }
  0x51   : > { %14812 = vmatmul.mubr.msk.bf16.gmra.mxu1 %vm492_vm4, %v16535_v32  ;;  %v1142_v24 = vld [vmem:[#allocation2 + $0xe2] sm:$0xff]  ;;  %v1143_v25 = vld [vmem:[#allocation2 + $0xf2] sm:$0xff]  ;;  %v1144_v26 = vld [vmem:[#allocation2 + $0xfa] sm:$0xff] }
  0x52   : > { %14815 = vmatprep.mubr.msk.bf16.mxu1 %vm492_vm4, %v16537_v33  ;;  %v16671_v27 = vpack.c.bf16 %v1142_v24, %v1141_v3  ;;  %v16673_v29 = vpack.c.bf16 %v1144_v26, %v1143_v25  ;;  %v1145_v34 = vld [vmem:[#allocation2 + $0x10a] sm:$0xff]  ;;  %v1146_v36 = vld [vmem:[#allocation2 + $0x112] sm:$0xff]  ;;  %v1149_v52 = vld [vmem:[#allocation2 + $0x13a] sm:$0xff] }
  0x53   : > { %v1148_v46 = vld [vmem:[#allocation2 + $0x12a] sm:$0xff]  ;;  %v1167_v51 = vpack.c.bf16 %v1146_v36, %v1145_v34  ;;  %v1150_v53 = vld [vmem:[#allocation2 + $0x142] sm:$0xff]  ;;  %v1151_v54 = vld [vmem:[#allocation2 + $0x152] sm:$0xff] }
  0x54   : > { %v1152_v63 = vld [vmem:[#allocation2 + $0x15a] sm:$0xff]  ;;  %v1169_v1 = vpack.c.bf16 %v1150_v53, %v1149_v52  ;;  %v1153_v7 = vld [vmem:[#allocation2 + $0x16a] sm:$0xff]  ;;  %v2036_v9 = vld [vmem:[#allocation2 + $0x182] sm:$0xff] }
  0x55   : > { %v1170_v2 = vpack.c.bf16 %v1152_v63, %v1151_v54  ;;  %v16804_v3 = vld [vmem:[%s21557_s2] ss:$0 sm:$0xff] }
  0x57   : > { %14786 = vmatmul.mubr.msk.bf16.gmra.mxu0 %vm492_vm4, %v16547_v44 }
  0x58   : > { %14789 = vmatprep.mubr.msk.bf16.mxu0 %vm492_vm4, %v16549_v47 }
  0x59   : > { %14816 = vmatmul.mubr.msk.bf16.gmra.mxu1 %vm492_vm4, %v16551_v49 }
  0x5a   : > { %14819 = vmatprep.mubr.msk.bf16.mxu1 %vm492_vm4, %v16553_v50 }
  0x5f   : > { %14790 = vmatmul.mubr.msk.bf16.gmra.mxu0 %vm492_vm4, %v16567_v0 }
  0x60   : > { %14793 = vmatprep.mubr.msk.bf16.mxu0 %vm492_vm4, %v16569_v4 }
  0x61   : > { %14820 = vmatmul.mubr.msk.bf16.gmra.mxu1 %vm492_vm4, %v16571_v5 }
  0x62   : > { %14823 = vmatprep.mubr.msk.bf16.mxu1 %vm492_vm4, %v16573_v6 }
  0x67   : > { %14794 = vmatmul.mubr.msk.bf16.gmra.mxu0 %vm492_vm4, %v16583_v13 }
  0x68   : > { %14837 = vmatprep.mubr.msk.bf16.mxu0 %vm492_vm4, %v1156_v17  ;;  %v1140_v17 = vld [vmem:[#allocation2 + $0xca] sm:$0xff] }
  0x69   : > { %14824 = vmatmul.mubr.msk.bf16.gmra.mxu1 %vm492_vm4, %v16585_v18  ;;  %v16661_v58 = vpack.c.bf16 %v1140_v17, %v1139_v16  ;;  %v2926_v16 = vld [vmem:[%s21556_s1 + $0x10] sm:$0x3] }
  0x6a   : > { %14827 = vmatprep.mubr.msk.bf16.mxu1 %vm492_vm4, %v16587_v22 }
  0x6f   : > { %14838 = vmatmul.mubr.msk.bf16.vlgmr.msra.gmra.mxu0 %vm492_vm4, %v16596_v30 }
  0x70   : > { %14904 = vmatpush3.bf16.msra.mxu0 %v1811_v38  ;;  %14841 = vmatprep.mubr.msk.bf16.mxu0 %vm492_vm4, %v16598_v37  ;;  %v1147_v38 = vld [vmem:[#allocation2 + $0x122] sm:$0xff] }
  0x71   : > { %14828 = vmatmul.mubr.msk.bf16.gmra.mxu1 %vm492_vm4, %v16602_v40  ;;  %16090 = vmatprep.subr.msk.bf16.mxu0 %vm629_vm0, %v16609_v45  ;;  %v16683_v42 = vpack.c.bf16 %v1148_v46, %v1147_v38 }
  0x72   : > { %14831 = vmatprep.mubr.msk.bf16.mxu1 %vm492_vm4, %v16604_v41 }
  0x77   : > { %14842 = vmatmul.mubr.msk.bf16.gmra.mxu0 %vm492_vm4, %v16621_v56 }
  0x78   : > { %14845 = vmatprep.mubr.msk.bf16.mxu0 %vm492_vm4, %v16623_v57 }
  0x79   : > { %14832 = vmatmul.mubr.msk.bf16.gmra.mxu1 %vm492_vm4, %v16625_v62 }
  0x7a   : > { %14871 = vmatprep.mubr.msk.bf16.mxu1 %vm492_vm4, %v16438_v35  ;;  %v1137_v35 = vld [vmem:[#allocation2 + $0xaa] sm:$0xff] }
  0x7b   : > { %v16656_v23 = vpack.c.bf16 %v1138_v14, %v1137_v35  ;;  %v2402_v14 = vsel %vm629_vm0, %v16609_v45, 0  ;;  %v1447_v45 = vld [vmem:[#allocation2 + $0x188] sm:$0xff] }
  0x7f   : > { %14846 = vmatmul.mubr.msk.bf16.gmra.mxu0 %vm492_vm4, %v16635_v8 }
  0x80   : > { %14849 = vmatprep.mubr.msk.bf16.mxu0 %vm492_vm4, %v16642_v10 }
  0x81   : > { %14872 = vmatmul.mubr.msk.bf16.vlgmr.msra.gmra.mxu1 %vm492_vm4, %v16459_v48 }
  0x82   : > { %14875 = vmatprep.mubr.msk.bf16.mxu1 %vm492_vm4, %v16467_v55  ;;  %14938 = vmatpush3.bf16.msra.mxu1 %v2108_v11  ;;  %v1154_v11 = vld [vmem:[#allocation2 + $0x172] sm:$0xff] }
  0x83   : > { %16091 = vmatprep.subr.msk.bf16.mxu1 %vm629_vm0, %v2649_v12  ;;  %v1171_v35 = vpack.c.bf16 %v1154_v11, %v1153_v7 }
  0x87   : > { %14850 = vmatmul.mubr.msk.bf16.gmra.mxu0 %vm492_vm4, %v16656_v23 }
  0x88   : > { %14853 = vmatprep.mubr.msk.bf16.mxu0 %vm492_vm4, %v16661_v58 }
  0x89   : > { %14876 = vmatmul.mubr.msk.bf16.gmra.mxu1 %vm492_vm4, %v16476_v59 }
  0x8a   : > { %14879 = vmatprep.mubr.msk.bf16.mxu1 %vm492_vm4, %v16507_v15 }
  0x8f   : > { %14854 = vmatmul.mubr.msk.bf16.gmra.mxu0 %vm492_vm4, %v16671_v27 }
  0x90   : > { %14857 = vmatprep.mubr.msk.bf16.mxu0 %vm492_vm4, %v16673_v29 }
  0x91   : > { %14880 = vmatmul.mubr.msk.bf16.gmra.mxu1 %vm492_vm4, %v16516_v19 }
  0x92   : > { %14883 = vmatprep.mubr.msk.bf16.mxu1 %vm492_vm4, %v16531_v28 }
  0x97   : > { %14858 = vmatmul.mubr.msk.bf16.gmra.mxu0 %vm492_vm4, %v1167_v51 }
  0x98   : > { %14861 = vmatprep.mubr.msk.bf16.mxu0 %vm492_vm4, %v16683_v42 }
  0x99   : > { %14884 = vmatmul.mubr.msk.bf16.gmra.mxu1 %vm492_vm4, %v16533_v31 }
  0x9a   : > { %14887 = vmatprep.mubr.msk.bf16.mxu1 %vm492_vm4, %v16547_v44 }
  0x9f   : > { %14862 = vmatmul.mubr.msk.bf16.gmra.mxu0 %vm492_vm4, %v1169_v1 }
  0xa0   : > { %14865 = vmatprep.mubr.msk.bf16.mxu0 %vm492_vm4, %v1170_v2 }
  0xa1   : > { %14888 = vmatmul.mubr.msk.bf16.gmra.mxu1 %vm492_vm4, %v16549_v47 }
  0xa2   : > { %14891 = vmatprep.mubr.msk.bf16.mxu1 %vm492_vm4, %v16567_v0 }
  0xa7   : > { %14866 = vmatmul.mubr.msk.bf16.gmra.mxu0 %vm492_vm4, %v1171_v35 }
  0xa8   : > { %14905 = vmatprep.mubr.msk.bf16.mxu0 %vm492_vm4, %v16478_v60  ;;  %v1446_v60 = vld [vmem:[#allocation2 + $0x180] sm:$0xff] }
  0xa9   : > { %14892 = vmatmul.mubr.msk.bf16.gmra.mxu1 %vm492_vm4, %v16569_v4  ;;  %v16719_v17 = vpack.c.bf16 %v1447_v45, %v1446_v60 }
  0xaa   : > { %14895 = vmatprep.mubr.msk.bf16.mxu1 %vm492_vm4, %v16583_v13 }
  0xaf   : > { %14906 = vmatmul.mubr.msk.bf16.vlgmr.msra.gmra.mxu0 %vm492_vm4, %v16480_v61 }
  0xb0   : > { %14972 = vmatpush3.bf16.msra.mxu0 %v2402_v14  ;;  %14909 = vmatprep.mubr.msk.bf16.mxu0 %vm492_vm4, %v16519_v20 }
  0xb1   : > { %14896 = vmatmul.mubr.msk.bf16.gmra.mxu1 %vm492_vm4, %v16442_v39  ;;  %16092 = vmatprep.subr.msk.bf16.mxu0 %vm629_vm0, %v2926_v16  ;;  %v2699_v39 = vsel %vm629_vm0, %v2649_v12, 0 }
  0xb2   : > { %14899 = vmatprep.mubr.msk.bf16.mxu1 %vm492_vm4, %v16451_v43  ;;  %v1743_v43 = vld [vmem:[#allocation2 + $0x181] sm:$0xff] }
  0xb7   : > { %14910 = vmatmul.mubr.msk.bf16.gmra.mxu0 %vm492_vm4, %v16521_v21 }
  0xb8   : > { %14913 = vmatprep.mubr.msk.bf16.mxu0 %vm492_vm4, %v16535_v32 }
  0xb9   : > { %14900 = vmatmul.mubr.msk.bf16.gmra.mxu1 %vm492_vm4, %v16719_v17 }
  0xba   : > { %14939 = vmatprep.mubr.msk.bf16.mxu1 %vm492_vm4, %v16596_v30  ;;  %v1744_v30 = vld [vmem:[#allocation2 + $0x189] sm:$0xff] }
  0xbf   : > { %14914 = vmatmul.mubr.msk.bf16.gmra.mxu0 %vm492_vm4, %v16537_v33 }
  0xc0   : > { %14917 = vmatprep.mubr.msk.bf16.mxu0 %vm492_vm4, %v16551_v49 }
  0xc1   : > { %14940 = vmatmul.mubr.msk.bf16.vlgmr.msra.gmra.mxu1 %vm492_vm4, %v16598_v37 }
  0xc2   : > { %14943 = vmatprep.mubr.msk.bf16.mxu1 %vm492_vm4, %v16621_v56  ;;  %15006 = vmatpush3.bf16.msra.mxu1 %v2699_v39 }
  0xc7   : > { %14918 = vmatmul.mubr.msk.bf16.gmra.mxu0 %vm492_vm4, %v16553_v50 }
  0xc8   : > { %14921 = vmatprep.mubr.msk.bf16.mxu0 %vm492_vm4, %v16571_v5 }
  0xc9   : > { %14944 = vmatmul.mubr.msk.bf16.gmra.mxu1 %vm492_vm4, %v16623_v57  ;;  %v16771_v57 = vpack.c.bf16 %v1744_v30, %v1743_v43 }
  0xca   : > { %14947 = vmatprep.mubr.msk.bf16.mxu1 %vm492_vm4, %v16635_v8  ;;  %v2992_v8 = vsel %vm629_vm0, %v2926_v16, 0 }
  0xcf   : > { %14922 = vmatmul.mubr.msk.bf16.gmra.mxu0 %vm492_vm4, %v16573_v6 }
  0xd0   : > { %14925 = vmatprep.mubr.msk.bf16.mxu0 %vm492_vm4, %v16585_v18 }
  0xd1   : > { %14948 = vmatmul.mubr.msk.bf16.gmra.mxu1 %vm492_vm4, %v16642_v10 }
  0xd2   : > { %14951 = vmatprep.mubr.msk.bf16.mxu1 %vm492_vm4, %v16656_v23 }
  0xd7   : > { %14926 = vmatmul.mubr.msk.bf16.gmra.mxu0 %vm492_vm4, %v16587_v22 }
  0xd8   : > { %14929 = vmatprep.mubr.msk.bf16.mxu0 %vm492_vm4, %v16602_v40 }
  0xd9   : > { %14952 = vmatmul.mubr.msk.bf16.gmra.mxu1 %vm492_vm4, %v16661_v58 }
  0xda   : > { %14955 = vmatprep.mubr.msk.bf16.mxu1 %vm492_vm4, %v16671_v27 }
  0xdf   : > { %14930 = vmatmul.mubr.msk.bf16.gmra.mxu0 %vm492_vm4, %v16604_v41 }
  0xe0   : > { %14933 = vmatprep.mubr.msk.bf16.mxu0 %vm492_vm4, %v16625_v62 }
  0xe1   : > { %14956 = vmatmul.mubr.msk.bf16.gmra.mxu1 %vm492_vm4, %v16673_v29 }
  0xe2   : > { %14959 = vmatprep.mubr.msk.bf16.mxu1 %vm492_vm4, %v1167_v51 }
  0xe7   : > { %14934 = vmatmul.mubr.msk.bf16.gmra.mxu0 %vm492_vm4, %v16771_v57 }
  0xe8   : > { %14973 = vmatprep.mubr.msk.bf16.mxu0 %vm492_vm4, %v16459_v48  ;;  %v2037_v48 = vld [vmem:[#allocation2 + $0x18a] sm:$0xff] }
  0xe9   : > { %14960 = vmatmul.mubr.msk.bf16.gmra.mxu1 %vm492_vm4, %v16683_v42  ;;  %v16787_v10 = vpack.c.bf16 %v2037_v48, %v2036_v9  ;;  %v2328_v9 = vld [vmem:[#allocation2 + $0x150] sm:$0xff]  ;;  %v2329_v48 = vld [vmem:[#allocation2 + $0x158] sm:$0xff] }
  0xea   : > { %14963 = vmatprep.mubr.msk.bf16.mxu1 %vm492_vm4, %v1169_v1 }
  0xef   : > { %14974 = vmatmul.mubr.msk.bf16.vlgmr.msra.gmra.mxu0 %vm492_vm4, %v16467_v55 }
  0xf0   : > { %15040 = vmatpush3.bf16.msra.mxu0 %v2992_v8  ;;  %14977 = vmatprep.mubr.msk.bf16.mxu0 %vm492_vm4, %v16476_v59 }
  0xf1   : > { %14964 = vmatmul.mubr.msk.bf16.gmra.mxu1 %vm492_vm4, %v1170_v2 }
  0xf2   : > { %14967 = vmatprep.mubr.msk.bf16.mxu1 %vm492_vm4, %v1171_v35 }
  0xf7   : > { %v14771_v12 = vpop.f32.mrf.mxu0  ;;  %14978 = vmatmul.mubr.msk.bf16.gmra.mxu0 %vm492_vm4, %v16507_v15 }
  0xf8   : > { %14981 = vmatprep.mubr.msk.bf16.mxu0 %vm492_vm4, %v16516_v19  ;;  %v796_v26 = vadd.f32 %v14771_v12, %v16804_v3 }
  0xf9   : > { %v16793_v55 = vpop.f32.mrf.mxu1  ;;  %14968 = vmatmul.mubr.msk.bf16.gmra.mxu1 %vm492_vm4, %v16787_v10  ;;  %v667_v59 = vpop.f32.mrf.mxu0 }
  0xfa   : > { %15007 = vmatprep.mubr.msk.bf16.mxu1 %vm492_vm4, %v16480_v61  ;;  %v794_v29 = vadd.f32 %v16804_v3, %v667_v59 }
  0xfb   : > { %v16799_v23 = vpop.f32.mrf.mxu1  ;;  %v14772_v58 = vpop.f32.mrf.mxu0 }
  0xfd   : > { %v16806_v15 = vpop.f32.mrf.mxu1  ;;  %v670_v19 = vpop.f32.mrf.mxu0 }
  0xfe   : > { %v795_v42 = vadd.f32 %v16804_v3, %v670_v19 }
  0xff   : > { %v16808_v24 = vpop.f32.mrf.mxu1  ;;  %v14775_v25 = vpop.f32.mrf.mxu0  ;;  %14982 = vmatmul.mubr.msk.bf16.gmra.mxu0 %vm492_vm4, %v16531_v28  ;;  %v797_v28 = vadd.f32 %v14772_v58, %v16804_v3 }
 0x100   : > { %21697 = vst [vmem:[#allocation4_spill] sm:$0xff] %v16808_v24  ;;  %14985 = vmatprep.mubr.msk.bf16.mxu0 %vm492_vm4, %v16533_v31  ;;  %v800_v54 = vadd.f32 %v14775_v25, %v16804_v3 }
 0x101   : > { %v14805_v61 = vpop.f32.mrf.mxu1  ;;  %15008 = vmatmul.mubr.msk.bf16.vlgmr.msra.gmra.mxu1 %vm492_vm4, %v16519_v20  ;;  %v683_v27 = vpop.f32.mrf.mxu0 }
 0x102   : > { %v16818_v34 = vadd.f32 %v14805_v61, %v796_v26  ;;  %15011 = vmatprep.mubr.msk.bf16.mxu1 %vm492_vm4, %v16521_v21  ;;  %v798_v2 = vadd.f32 %v16804_v3, %v683_v27 }
 0x103   : > { %v964_v36 = vpop.f32.mrf.mxu1  ;;  %v14776_v38 = vpop.f32.mrf.mxu0 }
 0x104   : > { %v16823_v46 = vadd.f32 %v964_v36, %v794_v29  ;;  %v801_v35 = vadd.f32 %v14776_v38, %v16804_v3 }
 0x105   : > { %v14806_v51 = vpop.f32.mrf.mxu1  ;;  %v686_v31 = vpop.f32.mrf.mxu0 }
 0x106   : > { %v16826_v52 = vadd.f32 %v14806_v51, %v797_v28  ;;  %v799_v60 = vadd.f32 %v16804_v3, %v686_v31  ;;  %v2330_v28 = vld [vmem:[#allocation2 + $0x168] sm:$0xff]  ;;  %v2331_v51 = vld [vmem:[#allocation2 + $0x170] sm:$0xff] }
 0x107   : > { %v967_v20 = vpop.f32.mrf.mxu1  ;;  %v14779_v53 = vpop.f32.mrf.mxu0  ;;  %14986 = vmatmul.mubr.msk.bf16.gmra.mxu0 %vm492_vm4, %v16547_v44 }
 0x108   : > { %v16831_v21 = vadd.f32 %v967_v20, %v795_v42  ;;  %14989 = vmatprep.mubr.msk.bf16.mxu0 %vm492_vm4, %v16549_v47  ;;  %v804_v43 = vadd.f32 %v14779_v53, %v16804_v3 }
 0x109   : > { %v14809_v63 = vpop.f32.mrf.mxu1  ;;  %15012 = vmatmul.mubr.msk.bf16.gmra.mxu1 %vm492_vm4, %v16535_v32  ;;  %v699_v1 = vpop.f32.mrf.mxu0 }
 0x10a   : > { %v16838_v7 = vadd.f32 %v14809_v63, %v800_v54  ;;  %15015 = vmatprep.mubr.msk.bf16.mxu1 %vm492_vm4, %v16537_v33  ;;  %v802_v12 = vadd.f32 %v16804_v3, %v699_v1  ;;  %v2350_v63 = vpack.c.bf16 %v2331_v51, %v2330_v28 }
 0x10b   : > { %v980_v44 = vpop.f32.mrf.mxu1  ;;  %v14780_v11 = vpop.f32.mrf.mxu0 }
 0x10c   : > { %v16843_v14 = vadd.f32 %v980_v44, %v798_v2  ;;  %v805_v19 = vadd.f32 %v14780_v11, %v16804_v3 }
 0x10d   : > { %v14810_v16 = vpop.f32.mrf.mxu1  ;;  %v702_v47 = vpop.f32.mrf.mxu0 }
 0x10e   : > { %v16846_v45 = vadd.f32 %v14810_v16, %v801_v35 }
 0x10f   : > { %v983_v32 = vpop.f32.mrf.mxu1  ;;  %v14783_v39 = vpop.f32.mrf.mxu0  ;;  %14990 = vmatmul.mubr.msk.bf16.gmra.mxu0 %vm492_vm4, %v16567_v0 }
 0x110   : > { %v16851_v33 = vadd.f32 %v983_v32, %v799_v60  ;;  %14993 = vmatprep.mubr.msk.bf16.mxu0 %vm492_vm4, %v16569_v4  ;;  %v2349_v4 = vpack.c.bf16 %v2329_v48, %v2328_v9  ;;  %v2334_v32 = vld [vmem:[#allocation2 + $0x198] sm:$0xff] }
 0x111   : > { %v14813_v30 = vpop.f32.mrf.mxu1  ;;  %15016 = vmatmul.mubr.msk.bf16.gmra.mxu1 %vm492_vm4, %v16551_v49  ;;  %v715_v8 = vpop.f32.mrf.mxu0  ;;  %v803_v49 = vadd.f32 %v16804_v3, %v702_v47 }
 0x112   : > { %v16858_v59 = vadd.f32 %v14813_v30, %v804_v43  ;;  %15019 = vmatprep.mubr.msk.bf16.mxu1 %vm492_vm4, %v16553_v50  ;;  %v808_v50 = vadd.f32 %v14783_v39, %v16804_v3  ;;  %v806_v20 = vadd.f32 %v16804_v3, %v715_v8  ;;  %v2335_v39 = vld [vmem:[#allocation2 + $0x1a0] sm:$0xff] }
 0x113   : > { %v996_v0 = vpop.f32.mrf.mxu1  ;;  %v14784_v58 = vpop.f32.mrf.mxu0 }
 0x114   : > { %v16863_v25 = vadd.f32 %v996_v0, %v802_v12  ;;  %v809_v1 = vadd.f32 %v14784_v58, %v16804_v3  ;;  %v2352_v0 = vpack.c.bf16 %v2335_v39, %v2334_v32  ;;  %v2902_v39 = vld [vmem:[#allocation2 + $0x92] sm:$0xff] }
 0x115   : > { %v14814_v26 = vpop.f32.mrf.mxu1  ;;  %v718_v61 = vpop.f32.mrf.mxu0 }
 0x116   : > { %v16866_v27 = vadd.f32 %v14814_v26, %v805_v19 }
 0x117   : > { %v999_v29 = vpop.f32.mrf.mxu1  ;;  %v14787_v36 = vpop.f32.mrf.mxu0  ;;  %14994 = vmatmul.mubr.msk.bf16.gmra.mxu0 %vm492_vm4, %v16583_v13 }
 0x118   : > { %v16871_v38 = vadd.f32 %v999_v29, %v803_v49  ;;  %14997 = vmatprep.mubr.msk.bf16.mxu0 %vm492_vm4, %v2349_v4 }
 0x119   : > { %v14817_v31 = vpop.f32.mrf.mxu1  ;;  %15020 = vmatmul.mubr.msk.bf16.gmra.mxu1 %vm492_vm4, %v16571_v5  ;;  %v731_v42 = vpop.f32.mrf.mxu0  ;;  %v807_v5 = vadd.f32 %v16804_v3, %v718_v61 }
 0x11a   : > { %v16877_v53 = vadd.f32 %v14817_v31, %v808_v50  ;;  %15023 = vmatprep.mubr.msk.bf16.mxu1 %vm492_vm4, %v16573_v6  ;;  %v812_v6 = vadd.f32 %v14787_v36, %v16804_v3  ;;  %v810_v8 = vadd.f32 %v16804_v3, %v731_v42  ;;  %v2898_v36 = vld [vmem:[#allocation2 + $0x62] sm:$0xff]  ;;  %v2899_v50 = vld [vmem:[#allocation2 + $0x6a] sm:$0xff] }
 0x11b   : > { %v1012_v13 = vpop.f32.mrf.mxu1  ;;  %v14788_v54 = vpop.f32.mrf.mxu0 }
 0x11c   : > { %v16882_v2 = vadd.f32 %v1012_v13, %v806_v20  ;;  %v813_v58 = vadd.f32 %v14788_v54, %v16804_v3 }
 0x11d   : > { %v14818_v44 = vpop.f32.mrf.mxu1  ;;  %v16884_v11 = vpop.f32.mrf.mxu0 }
 0x11e   : > { %21698 = vst [vmem:[#allocation5_spill] sm:$0xff] %v16884_v11  ;;  %v16887_v35 = vadd.f32 %v14818_v44, %v809_v1 }
 0x11f   : > { %v1015_v16 = vpop.f32.mrf.mxu1  ;;  %v14791_v47 = vpop.f32.mrf.mxu0  ;;  %14998 = vmatmul.mubr.msk.bf16.gmra.mxu0 %vm492_vm4, %v2350_v63 }
 0x120   : > { %v16891_v60 = vadd.f32 %v1015_v16, %v807_v5  ;;  %15001 = vmatprep.mubr.msk.bf16.mxu0 %vm492_vm4, %v16719_v17  ;;  %v816_v49 = vadd.f32 %v14791_v47, %v16804_v3  ;;  %v2900_v16 = vld [vmem:[#allocation2 + $0x7a] sm:$0xff]  ;;  %v2901_v47 = vld [vmem:[#allocation2 + $0x82] sm:$0xff] }
 0x121   : > { %v14821_v43 = vpop.f32.mrf.mxu1  ;;  %15024 = vmatmul.mubr.msk.bf16.gmra.mxu1 %vm492_vm4, %v16585_v18  ;;  %v747_v30 = vpop.f32.mrf.mxu0 }
 0x122   : > { %v16898_v9 = vadd.f32 %v14821_v43, %v812_v6  ;;  %15027 = vmatprep.mubr.msk.bf16.mxu1 %vm492_vm4, %v16587_v22  ;;  %v814_v28 = vadd.f32 %v16804_v3, %v747_v30  ;;  %v2903_v43 = vld [vmem:[#allocation2 + $0x9a] sm:$0xff] }
 0x123   : > { %v1028_v48 = vpop.f32.mrf.mxu1  ;;  %v14792_v12 = vpop.f32.mrf.mxu0 }
 0x124   : > { %v16903_v17 = vadd.f32 %v1028_v48, %v810_v8  ;;  %v817_v20 = vadd.f32 %v14792_v12, %v16804_v3  ;;  %v2628_v48 = vld [vmem:[#allocation2 + $0x1a1] sm:$0xff] }
 0x125   : > { %v14822_v19 = vpop.f32.mrf.mxu1  ;;  %v16905_v4 = vpop.f32.mrf.mxu0 }
 0x126   : > { %21699 = vst [vmem:[#allocation6_spill] sm:$0xff] %v16905_v4  ;;  %v16907_v26 = vadd.f32 %v14822_v19, %v813_v58  ;;  %v2930_v58 = vpack.c.bf16 %v2901_v47, %v2900_v16 }
 0x127   : > { %v16909_v18 = vpop.f32.mrf.mxu1  ;;  %v14795_v61 = vpop.f32.mrf.mxu0  ;;  %15002 = vmatmul.mubr.msk.bf16.gmra.mxu0 %vm492_vm4, %v2352_v0 }
 0x128   : > { %21700 = vst [vmem:[#allocation7_spill] sm:$0xff] %v16909_v18  ;;  %15041 = vmatprep.mubr.msk.bf16.mxu0 %vm492_vm4, %v16598_v37  ;;  %v2929_v37 = vpack.c.bf16 %v2899_v50, %v2898_v36 }
 0x129   : > { %v14825_v22 = vpop.f32.mrf.mxu1  ;;  %15028 = vmatmul.mubr.msk.bf16.gmra.mxu1 %vm492_vm4, %v16602_v40  ;;  %v763_v29 = vpop.f32.mrf.mxu0 }
 0x12a   : > { %v16918_v51 = vadd.f32 %v14825_v22, %v816_v49  ;;  %15031 = vmatprep.mubr.msk.bf16.mxu1 %vm492_vm4, %v16604_v41  ;;  %v820_v41 = vadd.f32 %v14795_v61, %v16804_v3  ;;  %v818_v30 = vadd.f32 %v16804_v3, %v763_v29  ;;  %v2931_v49 = vpack.c.bf16 %v2903_v43, %v2902_v39 }
 0x12b   : > { %v1044_v31 = vpop.f32.mrf.mxu1  ;;  %v14796_v42 = vpop.f32.mrf.mxu0 }
 0x12c   : > { %v16923_v13 = vadd.f32 %v1044_v31, %v814_v28  ;;  %v821_v19 = vadd.f32 %v14796_v42, %v16804_v3  ;;  %v824_v31 = vadd.f32 %v16793_v55, %v16804_v3 }
 0x12d   : > { %v14826_v54 = vpop.f32.mrf.mxu1  ;;  %v16925_v63 = vpop.f32.mrf.mxu0 }
 0x12e   : > { %21701 = vst [vmem:[#allocation8_spill] sm:$0xff] %v16925_v63  ;;  %v16927_v40 = vadd.f32 %v14826_v54, %v817_v20  ;;  %v2905_v20 = vld [vmem:[#allocation2 + $0xb2] sm:$0xff] }
 0x12f   : > { %v16929_v1 = vpop.f32.mrf.mxu1  ;;  %v14839_v44 = vpop.f32.mrf.mxu0  ;;  %15042 = vmatmul.mubr.msk.bf16.vlgmr.msra.gmra.mxu0 %vm492_vm4, %v16621_v56 }
 0x130   : > { %21702 = vst [vmem:[#allocation9_spill] sm:$0xff] %v16929_v1  ;;  %v16935_v5 = vadd.f32 %v14839_v44, %v16818_v34  ;;  %15045 = vmatprep.mubr.msk.bf16.mxu0 %vm492_vm4, %v2929_v37  ;;  %v2627_v34 = vld [vmem:[#allocation2 + $0x199] sm:$0xff]  ;;  %v2907_v44 = vld [vmem:[#allocation2 + $0xca] sm:$0xff] }
 0x131   : > { %v14829_v6 = vpop.f32.mrf.mxu1  ;;  %15032 = vmatmul.mubr.msk.bf16.gmra.mxu1 %vm492_vm4, %v16625_v62  ;;  %v1257_v32 = vpop.f32.mrf.mxu0  ;;  %v2645_v36 = vpack.c.bf16 %v2628_v48, %v2627_v34 }
 0x132   : > { %v16941_v8 = vadd.f32 %v14829_v6, %v820_v41  ;;  %v1384_v56 = vadd.f32 %v1257_v32, %v16823_v46  ;;  %15035 = vmatprep.mubr.msk.bf16.mxu1 %vm492_vm4, %v16771_v57  ;;  %v822_v41 = vadd.f32 %v16804_v3, %v16799_v23  ;;  %v825_v32 = vadd.f32 %v16806_v15, %v16804_v3  ;;  %v2908_v3 = vld [vmem:[#allocation2 + $0xda] sm:$0xff]  ;;  %v2909_v15 = vld [vmem:[#allocation2 + $0xe2] sm:$0xff] }
 0x133   : > { %v1060_v12 = vpop.f32.mrf.mxu1  ;;  %v14840_v0 = vpop.f32.mrf.mxu0 }
 0x134   : > { %v16947_v62 = vadd.f32 %v1060_v12, %v818_v30  ;;  %v1387_v61 = vadd.f32 %v14840_v0, %v16826_v52  ;;  %v2904_v52 = vld [vmem:[#allocation2 + $0xaa] sm:$0xff] }
 0x135   : > { %v14830_v22 = vpop.f32.mrf.mxu1  ;;  %v1260_v29 = vpop.f32.mrf.mxu0 }
 0x136   : > { %v16950_v50 = vadd.f32 %v14830_v22, %v821_v19  ;;  %v16953_v46 = vadd.f32 %v1260_v29, %v16831_v21  ;;  %v2906_v21 = vld [vmem:[#allocation2 + $0xc2] sm:$0xff]  ;;  %v2911_v22 = vld [vmem:[#allocation2 + $0xfa] sm:$0xff] }
 0x137   : > { %v16955_v57 = vpop.f32.mrf.mxu1  ;;  %v14843_v28 = vpop.f32.mrf.mxu0  ;;  %15046 = vmatmul.mubr.msk.bf16.gmra.mxu0 %vm492_vm4, %v2930_v58  ;;  %v2933_v30 = vpack.c.bf16 %v2907_v44, %v2906_v21 }
 0x138   : > { %21703 = vst [vmem:[#allocation10_spill] sm:$0xff] %v16955_v57  ;;  %v1390_v42 = vadd.f32 %v14843_v28, %v16838_v7  ;;  %15049 = vmatprep.mubr.msk.bf16.mxu0 %vm492_vm4, %v2931_v49  ;;  %v2932_v7 = vpack.c.bf16 %v2905_v20, %v2904_v52  ;;  %v2910_v49 = vld [vmem:[#allocation2 + $0xf2] sm:$0xff] }
 0x139   : > { %v14833_v37 = vpop.f32.mrf.mxu1  ;;  %15036 = vmatmul.mubr.msk.bf16.gmra.mxu1 %vm492_vm4, %v2645_v36  ;;  %v1273_v54 = vpop.f32.mrf.mxu0  ;;  %v2935_v20 = vpack.c.bf16 %v2911_v22, %v2910_v49 }
 0x13a   : > { %v16965_v16 = vadd.f32 %v14833_v37, %v824_v31  ;;  %v1388_v47 = vadd.f32 %v1273_v54, %v16843_v14  ;;  %v2934_v31 = vpack.c.bf16 %v2909_v15, %v2908_v3  ;;  %v3290_v37 = vld [vmem:[%s21558_s3] sm:$0xf] }
 0x13b   : > { %v1076_v55 = vpop.f32.mrf.mxu1  ;;  %v14844_v6 = vpop.f32.mrf.mxu0  ;;  %16093 = vmatprep.subr.msk.bf16.mxu1 %vm3355_vm5, %v3290_v37 }
 0x13c   : > { %v16970_v39 = vadd.f32 %v1076_v55, %v822_v41  ;;  %v1391_v43 = vadd.f32 %v14844_v6, %v16846_v45  ;;  %v2912_v55 = vld [vmem:[#allocation2 + $0x10a] sm:$0xff]  ;;  %v2913_v6 = vld [vmem:[#allocation2 + $0x112] sm:$0xff] }
 0x13d   : > { %v14834_v34 = vpop.f32.mrf.mxu1  ;;  %v1276_v48 = vpop.f32.mrf.mxu0  ;;  %v2936_v3 = vpack.c.bf16 %v2913_v6, %v2912_v55 }
 0x13e   : > { %v16973_v12 = vadd.f32 %v14834_v34, %v825_v32  ;;  %v16976_v23 = vadd.f32 %v1276_v48, %v16851_v33  ;;  %v2914_v32 = vld [vmem:[#allocation2 + $0x122] sm:$0xff] }
 0x13f   : > { %v16978_v0 = vpop.f32.mrf.mxu1  ;;  %v14847_v14 = vpop.f32.mrf.mxu0  ;;  %15050 = vmatmul.mubr.msk.bf16.gmra.mxu0 %vm492_vm4, %v2932_v7 }
 0x140   : > { %21704 = vst [vmem:[#allocation11_spill] sm:$0xff] %v16978_v0  ;;  %v1394_v58 = vadd.f32 %v14847_v14, %v16858_v59  ;;  %15053 = vmatprep.mubr.msk.bf16.mxu0 %vm492_vm4, %v2933_v30  ;;  %v2915_v30 = vld [vmem:[#allocation2 + $0x12a] sm:$0xff] }
 0x141   : > { %v14873_v45 = vpop.f32.mrf.mxu1  ;;  %v1289_v19 = vpop.f32.mrf.mxu0 }
 0x142   : > { %v16984_v29 = vadd.f32 %v14873_v45, %v16935_v5  ;;  %v1392_v33 = vadd.f32 %v1289_v19, %v16863_v25 }
 0x143   : > { %v1554_v36 = vpop.f32.mrf.mxu1  ;;  %v14848_v28 = vpop.f32.mrf.mxu0 }
 0x144   : > { %v16987_v52 = vadd.f32 %v1554_v36, %v1384_v56  ;;  %v1395_v59 = vadd.f32 %v14848_v28, %v16866_v27  ;;  %v3357_v56 = vsel %vm3355_vm5, %v3290_v37, 0  ;;  %v2918_v37 = vld [vmem:[#allocation2 + $0x152] sm:$0xff] }
 0x145   : > { %v14874_v54 = vpop.f32.mrf.mxu1  ;;  %v1292_v21 = vpop.f32.mrf.mxu0  ;;  %15074 = vmatpush3.bf16.msra.mxu1 %v3357_v56 }
 0x146   : > { %v16994_v5 = vadd.f32 %v14874_v54, %v1387_v61  ;;  %v16997_v25 = vadd.f32 %v1292_v21, %v16871_v38  ;;  %v2919_v54 = vld [vmem:[#allocation2 + $0x15a] sm:$0xff] }
 0x147   : > { %v17000_v44 = vpop.f32.mrf.mxu1  ;;  %v14851_v27 = vpop.f32.mrf.mxu0  ;;  %15054 = vmatmul.mubr.msk.bf16.gmra.mxu0 %vm492_vm4, %v2934_v31  ;;  %v2917_v31 = vld [vmem:[#allocation2 + $0x142] sm:$0xff] }
 0x148   : > { %v1398_v41 = vadd.f32 %v14851_v27, %v16877_v53  ;;  %15057 = vmatprep.mubr.msk.bf16.mxu0 %vm492_vm4, %v2935_v20  ;;  %v2937_v53 = vpack.c.bf16 %v2915_v30, %v2914_v32 }
 0x149   : > { %v14877_v7 = vpop.f32.mrf.mxu1  ;;  %v1305_v61 = vpop.f32.mrf.mxu0 }
 0x14a   : > { %v17005_v38 = vadd.f32 %v14877_v7, %v1390_v42  ;;  %v1396_v34 = vadd.f32 %v1305_v61, %v16882_v2 }
 0x14b   : > { %v1570_v48 = vpop.f32.mrf.mxu1  ;;  %v14852_v14 = vpop.f32.mrf.mxu0 }
 0x14c   : > { %v17008_v15 = vadd.f32 %v1570_v48, %v1388_v47  ;;  %v1399_v45 = vadd.f32 %v14852_v14, %v16887_v35  ;;  %v2916_v47 = vld [vmem:[#allocation2 + $0x13a] sm:$0xff] }
 0x14d   : > { %v14878_v19 = vpop.f32.mrf.mxu1  ;;  %v1308_v49 = vpop.f32.mrf.mxu0  ;;  %v2938_v27 = vpack.c.bf16 %v2917_v31, %v2916_v47 }
 0x14e   : > { %v17011_v22 = vadd.f32 %v14878_v19, %v1391_v43  ;;  %v17014_v36 = vadd.f32 %v1308_v49, %v16891_v60 }
 0x14f   : > { %v17016_v28 = vpop.f32.mrf.mxu1  ;;  %v14855_v42 = vpop.f32.mrf.mxu0  ;;  %15058 = vmatmul.mubr.msk.bf16.gmra.mxu0 %vm492_vm4, %v2936_v3 }
 0x150   : > { %v1402_v2 = vadd.f32 %v14855_v42, %v16898_v9  ;;  %15061 = vmatprep.mubr.msk.bf16.mxu0 %vm492_vm4, %v2937_v53  ;;  %v2939_v9 = vpack.c.bf16 %v2919_v54, %v2918_v37 }
 0x151   : > { %v14881_v35 = vpop.f32.mrf.mxu1  ;;  %v1321_v20 = vpop.f32.mrf.mxu0 }
 0x152   : > { %v17021_v43 = vadd.f32 %v14881_v35, %v1394_v58  ;;  %v1400_v60 = vadd.f32 %v1321_v20, %v16903_v17  ;;  %v2920_v58 = vld [vmem:[#allocation2 + $0x16a] sm:$0xff] }
 0x153   : > { %v1586_v21 = vpop.f32.mrf.mxu1  ;;  %v14856_v56 = vpop.f32.mrf.mxu0 }
 0x154   : > { %v17024_v55 = vadd.f32 %v1586_v21, %v1392_v33  ;;  %v1403_v6 = vadd.f32 %v14856_v56, %v16907_v26  ;;  %v2921_v33 = vld [vmem:[#allocation2 + $0x172] sm:$0xff] }
 0x155   : > { %v14882_v7 = vpop.f32.mrf.mxu1  ;;  %v17027_v61 = vpop.f32.mrf.mxu0  ;;  %v2940_v49 = vpack.c.bf16 %v2921_v33, %v2920_v58 }
 0x156   : > { %21705 = vst [vmem:[#allocation12_spill] sm:$0xff] %v17027_v61  ;;  %v17029_v32 = vadd.f32 %v14882_v7, %v1395_v59 }
 0x157   : > { %v17031_v30 = vpop.f32.mrf.mxu1  ;;  %v14859_v48 = vpop.f32.mrf.mxu0  ;;  %15062 = vmatmul.mubr.msk.bf16.gmra.mxu0 %vm492_vm4, %v2938_v27 }
 0x158   : > { %v1406_v17 = vadd.f32 %v14859_v48, %v16918_v51  ;;  %15065 = vmatprep.mubr.msk.bf16.mxu0 %vm492_vm4, %v2939_v9 }
 0x159   : > { %v14885_v14 = vpop.f32.mrf.mxu1  ;;  %v1337_v3 = vpop.f32.mrf.mxu0 }
 0x15a   : > { %v17036_v26 = vadd.f32 %v14885_v14, %v1398_v41  ;;  %v1404_v53 = vadd.f32 %v1337_v3, %v16923_v13  ;;  %v2924_v13 = vld [vmem:[#allocation2 + $0x19a] sm:$0xff] }
 0x15b   : > { %v1602_v19 = vpop.f32.mrf.mxu1  ;;  %v14860_v59 = vpop.f32.mrf.mxu0 }
 0x15c   : > { %v17039_v42 = vadd.f32 %v1602_v19, %v1396_v34  ;;  %v1407_v47 = vadd.f32 %v14860_v59, %v16927_v40  ;;  %v2925_v34 = vld [vmem:[#allocation2 + $0x1a2] sm:$0xff] }
 0x15d   : > { %v14886_v31 = vpop.f32.mrf.mxu1  ;;  %v17042_v35 = vpop.f32.mrf.mxu0  ;;  %v2942_v9 = vpack.c.bf16 %v2925_v34, %v2924_v13 }
 0x15e   : > { %21706 = vst [vmem:[#allocation13_spill] sm:$0xff] %v17042_v35  ;;  %v17044_v51 = vadd.f32 %v14886_v31, %v1399_v45 }
 0x15f   : > { %v17046_v20 = vpop.f32.mrf.mxu1  ;;  %v14863_v37 = vpop.f32.mrf.mxu0  ;;  %15066 = vmatmul.mubr.msk.bf16.gmra.mxu0 %vm492_vm4, %v2940_v49 }
 0x160   : > { %v1410_v41 = vadd.f32 %v14863_v37, %v16941_v8  ;;  %15069 = vmatprep.mubr.msk.bf16.mxu0 %vm492_vm4, %v16787_v10 }
 0x161   : > { %v14889_v54 = vpop.f32.mrf.mxu1  ;;  %v1353_v21 = vpop.f32.mrf.mxu0 }
 0x162   : > { %v17052_v40 = vadd.f32 %v14889_v54, %v1402_v2  ;;  %v1408_v56 = vadd.f32 %v1353_v21, %v16947_v62 }
 0x163   : > { %v1618_v45 = vpop.f32.mrf.mxu1  ;;  %v14864_v27 = vpop.f32.mrf.mxu0 }
 0x164   : > { %v17055_v7 = vadd.f32 %v1618_v45, %v1400_v60  ;;  %v1411_v48 = vadd.f32 %v14864_v27, %v16950_v50 }
 0x165   : > { %v14890_v58 = vpop.f32.mrf.mxu1  ;;  %v17058_v8 = vpop.f32.mrf.mxu0 }
 0x166   : > { %21707 = vst [vmem:[#allocation14_spill] sm:$0xff] %v17058_v8  ;;  %v17060_v33 = vadd.f32 %v14890_v58, %v1403_v6 }
 0x167   : > { %v17062_v10 = vpop.f32.mrf.mxu1  ;;  %v14867_v14 = vpop.f32.mrf.mxu0  ;;  %15070 = vmatmul.mubr.msk.bf16.gmra.mxu0 %vm492_vm4, %v2942_v9 }
 0x168   : > { %21708 = vst [vmem:[#allocation15_spill] sm:$0xff] %v17062_v10  ;;  %v1414_v2 = vadd.f32 %v14867_v14, %v16965_v16 }
 0x169   : > { %v14893_v62 = vpop.f32.mrf.mxu1  ;;  %v1369_v3 = vpop.f32.mrf.mxu0 }
 0x16a   : > { %v17066_v19 = vadd.f32 %v14893_v62, %v1406_v17  ;;  %v1412_v60 = vadd.f32 %v1369_v3, %v16970_v39 }
 0x16b   : > { %v1634_v59 = vpop.f32.mrf.mxu1  ;;  %v14868_v50 = vpop.f32.mrf.mxu0 }
 0x16c   : > { %v17069_v49 = vadd.f32 %v1634_v59, %v1404_v53  ;;  %v1415_v6 = vadd.f32 %v14868_v50, %v16973_v12 }
 0x16d   : > { %v14894_v31 = vpop.f32.mrf.mxu1  ;;  %v17072_v37 = vpop.f32.mrf.mxu0 }
 0x16e   : > { %21709 = vst [vmem:[#allocation16_spill] sm:$0xff] %v17072_v37  ;;  %v17074_v13 = vadd.f32 %v14894_v31, %v1407_v47 }
 0x16f   : > { %v17076_v34 = vpop.f32.mrf.mxu1  ;;  %v14907_v16 = vpop.f32.mrf.mxu0 }
 0x170   : > { %21710 = vst [vmem:[#allocation17_spill] sm:$0xff] %v17076_v34  ;;  %v17079_v54 = vadd.f32 %v14907_v16, %v16984_v29 }
 0x171   : > { %v14897_v17 = vpop.f32.mrf.mxu1  ;;  %v1847_v21 = vpop.f32.mrf.mxu0 }
 0x172   : > { %v17081_v39 = vadd.f32 %v14897_v17, %v1410_v41  ;;  %v17084_v53 = vadd.f32 %v1847_v21, %v16987_v52 }
 0x173   : > { %v1650_v45 = vpop.f32.mrf.mxu1  ;;  %v14908_v12 = vpop.f32.mrf.mxu0 }
 0x174   : > { %v17086_v27 = vadd.f32 %v1650_v45, %v1408_v56  ;;  %v17089_v47 = vadd.f32 %v14908_v12, %v16994_v5 }
 0x175   : > { %v14898_v9 = vpop.f32.mrf.mxu1  ;;  %v17091_v58 = vpop.f32.mrf.mxu0 }
 0x176   : > { %v17093_v14 = vadd.f32 %v14898_v9, %v1411_v48  ;;  %v3258_v9 = vld [vmem:[#allocation2] sm:$0xff] }
 0x177   : > { %v17095_v29 = vpop.f32.mrf.mxu1  ;;  %v14911_v62 = vpop.f32.mrf.mxu0 }
 0x178   : > { %21711 = vst [vmem:[#allocation18_spill] sm:$0xff] %v17095_v29  ;;  %v17098_v41 = vadd.f32 %v14911_v62, %v17005_v38  ;;  %v3552_v62 = vld [vmem:[#allocation2 + $0x1] sm:$0xff] }
 0x179   : > { %v14901_v52 = vpop.f32.mrf.mxu1  ;;  %v1863_v3 = vpop.f32.mrf.mxu0 }
 0x17a   : > { %v17100_v59 = vadd.f32 %v14901_v52, %v1414_v2  ;;  %v17103_v56 = vadd.f32 %v1863_v3, %v17008_v15  ;;  %v3584_v15 = vld [vmem:[%s21558_s3 + $0x4] sm:$0xf]  ;;  %v3553_v3 = vld [vmem:[#allocation2 + $0x9] sm:$0xff] }
 0x17b   : > { %v1666_v5 = vpop.f32.mrf.mxu1  ;;  %v14912_v50 = vpop.f32.mrf.mxu0  ;;  %16094 = vmatprep.subr.msk.bf16.mxu0 %vm3355_vm5, %v3584_v15 }
 0x17c   : > { %v17105_v31 = vadd.f32 %v1666_v5, %v1412_v60  ;;  %v17108_v48 = vadd.f32 %v14912_v50, %v17011_v22  ;;  %v3650_v22 = vsel %vm3355_vm5, %v3584_v15, 0 }
 0x17d   : > { %v14902_v16 = vpop.f32.mrf.mxu1  ;;  %v17110_v17 = vpop.f32.mrf.mxu0  ;;  %15108 = vmatpush3.bf16.msra.mxu0 %v3650_v22 }
 0x17e   : > { %v17112_v21 = vadd.f32 %v14902_v16, %v1415_v6  ;;  %v3259_v6 = vld [vmem:[#allocation2 + $0x8] sm:$0xff]  ;;  %v3585_v16 = vpack.c.bf16 %v3553_v3, %v3552_v62 }
 0x17f   : > { %v17114_v38 = vpop.f32.mrf.mxu1  ;;  %v14915_v45 = vpop.f32.mrf.mxu0 }
 0x180   : > { %21712 = vst [vmem:[#allocation19_spill] sm:$0xff] %v17114_v38  ;;  %v17117_v2 = vadd.f32 %v14915_v45, %v17021_v43  ;;  %v3291_v43 = vpack.c.bf16 %v3259_v6, %v3258_v9  ;;  %15109 = vmatprep.mubr.msk.bf16.mxu0 %vm388_vm1, %v3585_v16  ;;  %v17148_v9 = vld [vmem:[%s21558_s3 + $0x8] sm:$0xf] }
 0x181   : > { %v17122_v60 = vpop.f32.mrf.mxu1  ;;  %v1879_v12 = vpop.f32.mrf.mxu0  ;;  %21714 = vst [vmem:[#allocation21_spill] sm:$0xff] %v17148_v9  ;;  %16095 = vmatprep.subr.msk.bf16.mxu1 %vm3355_vm5, %v17148_v9 }
 0x182   : > { %v17127_v52 = vadd.f32 %v1879_v12, %v17024_v55  ;;  %15075 = vmatprep.mubr.msk.bf16.mxu1 %vm388_vm1, %v3291_v43 }
 0x183   : > { %v17129_v5 = vpop.f32.mrf.mxu1  ;;  %v14916_v50 = vpop.f32.mrf.mxu0 }
 0x184   : > { %v17132_v45 = vadd.f32 %v14916_v50, %v17029_v32 }
 0x185   : > { %v17135_v38 = vpop.f32.mrf.mxu1  ;;  %v17137_v15 = vpop.f32.mrf.mxu0 }
 0x187   : > { %v17140_v55 = vpop.f32.mrf.mxu1  ;;  %v14919_v12 = vpop.f32.mrf.mxu0 }
 0x188   : > { %v17143_v22 = vadd.f32 %v14919_v12, %v17036_v26 }
 0x189   : > { %v17150_v32 = vpop.f32.mrf.mxu1  ;;  %v1895_v6 = vpop.f32.mrf.mxu0 }
 0x18a   : > { %21713 = vst [vmem:[#allocation20_spill] sm:$0xff] %v17143_v22  ;;  %v17155_v62 = vadd.f32 %v1895_v6, %v17039_v42 }
 0x18b   : > { %v17157_v43 = vpop.f32.mrf.mxu1  ;;  %v14920_v3 = vpop.f32.mrf.mxu0 }
 0x18c   : > { %21715 = vst [vmem:[#allocation22_spill] sm:$0xff] %v17155_v62  ;;  %v17160_v26 = vadd.f32 %v14920_v3, %v17044_v51 }
 0x18d   : > { %v17162_v50 = vpop.f32.mrf.mxu1  ;;  %v17164_v16 = vpop.f32.mrf.mxu0 }
 0x18e   : > { %21716 = vst [vmem:[#allocation23_spill] sm:$0xff] %v17160_v26  ;;  %21717 = vst [vmem:[#allocation24_spill] sm:$0xff] %v17164_v16 }
 0x18f   : > { %v17166_v12 = vpop.f32.mrf.mxu1  ;;  %v14923_v37 = vpop.f32.mrf.mxu0 }
 0x190   : > { %v17169_v0 = vadd.f32 %v14923_v37, %v17052_v40 }
 0x191   : > { %v17171_v24 = vpop.f32.mrf.mxu1  ;;  %v1911_v42 = vpop.f32.mrf.mxu0 }
 0x192   : > { %21718 = vst [vmem:[#allocation25_spill] sm:$0xff] %v17169_v0  ;;  %v17174_v6 = vadd.f32 %v1911_v42, %v17055_v7 }
 0x193   : > { %v17176_v29 = vpop.f32.mrf.mxu1  ;;  %v14924_v51 = vpop.f32.mrf.mxu0 }
 0x194   : > { %21719 = vst [vmem:[#allocation26_spill] sm:$0xff] %v17174_v6  ;;  %v17179_v3 = vadd.f32 %v14924_v51, %v17060_v33 }
 0x195   : > { %v17181_v8 = vpop.f32.mrf.mxu1  ;;  %v17183_v57 = vpop.f32.mrf.mxu0 }
 0x196   : > { %21720 = vst [vmem:[#allocation27_spill] sm:$0xff] %v17179_v3  ;;  %21721 = vst [vmem:[#allocation28_spill] sm:$0xff] %v17183_v57 }
 0x197   : > { %v17185_v63 = vpop.f32.mrf.mxu1  ;;  %v14927_v40 = vpop.f32.mrf.mxu0 }
 0x198   : > { %v17188_v37 = vadd.f32 %v14927_v40, %v17066_v19 }
 0x199   : > { %v17190_v34 = vpop.f32.mrf.mxu1  ;;  %v1927_v7 = vpop.f32.mrf.mxu0 }
 0x19a   : > { %21722 = vst [vmem:[#allocation29_spill] sm:$0xff] %v17188_v37  ;;  %21723 = vst [vmem:[#allocation30_spill] sm:$0xff] %v17190_v34  ;;  %v17193_v42 = vadd.f32 %v1927_v7, %v17069_v49 }
 0x19b   : > { %v17195_v35 = vpop.f32.mrf.mxu1  ;;  %v14928_v33 = vpop.f32.mrf.mxu0 }
 0x19c   : > { %21724 = vst [vmem:[#allocation31_spill] sm:$0xff] %v17193_v42  ;;  %21725 = vst [vmem:[#allocation32_spill] sm:$0xff] %v17195_v35  ;;  %v17198_v51 = vadd.f32 %v14928_v33, %v17074_v13 }
 0x19d   : > { %v17200_v1 = vpop.f32.mrf.mxu1  ;;  %v17202_v3 = vpop.f32.mrf.mxu0 }
 0x19e   : > { %21726 = vst [vmem:[#allocation33_spill] sm:$0xff] %v17198_v51  ;;  %21727 = vst [vmem:[#allocation34_spill] sm:$0xff] %v17200_v1 }
 0x19f   : > { %21728 = vst [vmem:[#allocation35_spill] sm:$0xff] %v17202_v3  ;;  %v17204_v57 = vpop.f32.mrf.mxu1  ;;  %v14931_v19 = vpop.f32.mrf.mxu0 }
 0x1a0   : > { %21729 = vst [vmem:[#allocation36_spill] sm:$0xff] %v17204_v57  ;;  %v17207_v40 = vadd.f32 %v14931_v19, %v17081_v39 }
 0x1a1   : > { %v17209_v37 = vpop.f32.mrf.mxu1  ;;  %v1943_v49 = vpop.f32.mrf.mxu0 }
 0x1a2   : > { %21730 = vst [vmem:[#allocation37_spill] sm:$0xff] %v17207_v40  ;;  %21731 = vst [vmem:[#allocation38_spill] sm:$0xff] %v17209_v37  ;;  %v17212_v7 = vadd.f32 %v1943_v49, %v17086_v27 }
 0x1a3   : > { %v17214_v42 = vpop.f32.mrf.mxu1  ;;  %v14932_v13 = vpop.f32.mrf.mxu0 }
 0x1a4   : > { %21732 = vst [vmem:[#allocation39_spill] sm:$0xff] %v17212_v7  ;;  %21733 = vst [vmem:[#allocation40_spill] sm:$0xff] %v17214_v42  ;;  %v17217_v33 = vadd.f32 %v14932_v13, %v17093_v14 }
 0x1a5   : > { %v17219_v51 = vpop.f32.mrf.mxu1  ;;  %v17221_v3 = vpop.f32.mrf.mxu0 }
 0x1a6   : > { %21734 = vst [vmem:[#allocation41_spill] sm:$0xff] %v17217_v33  ;;  %21735 = vst [vmem:[#allocation42_spill] sm:$0xff] %v17219_v51 }
 0x1a7   : > { %21736 = vst [vmem:[#allocation43_spill] sm:$0xff] %v17221_v3  ;;  %v17223_v4 = vpop.f32.mrf.mxu1  ;;  %v14935_v39 = vpop.f32.mrf.mxu0 }
 0x1a8   : > { %21737 = vst [vmem:[#allocation44_spill] sm:$0xff] %v17223_v4  ;;  %v17226_v19 = vadd.f32 %v14935_v39, %v17100_v59 }
 0x1a9   : > { %v17228_v40 = vpop.f32.mrf.mxu1  ;;  %v1959_v27 = vpop.f32.mrf.mxu0 }
 0x1aa   : > { %21738 = vst [vmem:[#allocation45_spill] sm:$0xff] %v17226_v19  ;;  %21739 = vst [vmem:[#allocation46_spill] sm:$0xff] %v17228_v40  ;;  %v17231_v49 = vadd.f32 %v1959_v27, %v17105_v31 }
 0x1ab   : > { %v17233_v7 = vpop.f32.mrf.mxu1  ;;  %v14936_v14 = vpop.f32.mrf.mxu0 }
 0x1ac   : > { %21740 = vst [vmem:[#allocation47_spill] sm:$0xff] %v17231_v49  ;;  %21741 = vst [vmem:[#allocation48_spill] sm:$0xff] %v17233_v7  ;;  %v17236_v13 = vadd.f32 %v14936_v14, %v17112_v21 }
 0x1ad   : > { %v17238_v33 = vpop.f32.mrf.mxu1  ;;  %v17240_v3 = vpop.f32.mrf.mxu0 }
 0x1ae   : > { %21742 = vst [vmem:[#allocation49_spill] sm:$0xff] %v17236_v13  ;;  %21743 = vst [vmem:[#allocation50_spill] sm:$0xff] %v17238_v33 }
 0x1af   : > { %21744 = vst [vmem:[#allocation51_spill] sm:$0xff] %v17240_v3  ;;  %v17242_v4 = vpop.f32.mrf.mxu1  ;;  %v14975_v59 = vpop.f32.mrf.mxu0 }
 0x1b0   : > { %21745 = vst [vmem:[#allocation52_spill] sm:$0xff] %v17242_v4 }
 0x1b1   : > { %v17244_v39 = vpop.f32.mrf.mxu1  ;;  %v17246_v19 = vpop.f32.mrf.mxu0 }
 0x1b2   : > { %21746 = vst [vmem:[#allocation53_spill] sm:$0xff] %v17244_v39 }
 0x1b3   : > { %v17248_v40 = vpop.f32.mrf.mxu1  ;;  %v17250_v31 = vpop.f32.mrf.mxu0 }
 0x1b4   : > { %21747 = vst [vmem:[#allocation54_spill] sm:$0xff] %v17248_v40 }
 0x1b5   : > { %v17252_v27 = vpop.f32.mrf.mxu1  ;;  %v17254_v49 = vpop.f32.mrf.mxu0 }
 0x1b6   : > { %21748 = vst [vmem:[#allocation55_spill] sm:$0xff] %v17252_v27  ;;  %v17275_v27 = vld [vmem:[%s21558_s3 + $0xc] sm:$0xf] }
 0x1b7   : > { %v17256_v21 = vpop.f32.mrf.mxu1  ;;  %v17258_v14 = vpop.f32.mrf.mxu0  ;;  %21753 = vst [vmem:[#allocation60_spill] sm:$0xff] %v17275_v27  ;;  %16096 = vmatprep.subr.msk.bf16.mxu0 %vm3355_vm5, %v17275_v27 }
 0x1b8   : > { %21749 = vst [vmem:[#allocation56_spill] sm:$0xff] %v17256_v21 }
 0x1b9   : > { %v17260_v13 = vpop.f32.mrf.mxu1  ;;  %v17262_v3 = vpop.f32.mrf.mxu0 }
 0x1ba   : > { %21750 = vst [vmem:[#allocation57_spill] sm:$0xff] %v17260_v13 }
 0x1bb   : > { %v17264_v4 = vpop.f32.mrf.mxu1  ;;  %v17266_v39 = vpop.f32.mrf.mxu0 }
 0x1bc   : > { %21751 = vst [vmem:[#allocation58_spill] sm:$0xff] %v17264_v4 }
 0x1bd   : > { %v17268_v33 = vpop.f32.mrf.mxu1  ;;  %v17270_v40 = vpop.f32.mrf.mxu0 }
 0x1be   : > { %21752 = vst [vmem:[#allocation59_spill] sm:$0xff] %v17268_v33 }
 0x1bf   : > { %v17279_v21 = vpop.f32.mrf.mxu1  ;;  %v17281_v13 = vpop.f32.mrf.mxu0 }
 0x1c0   : > { %21754 = vst [vmem:[#allocation61_spill] sm:$0xff] %v17279_v21 }
 0x1c1   : > { %v15009_v7 = vpop.f32.mrf.mxu1  ;;  %v17283_v4 = vpop.f32.mrf.mxu0 }
 0x1c3   : > { %v2735_v51 = vpop.f32.mrf.mxu1  ;;  %v17285_v42 = vpop.f32.mrf.mxu0 }
 0x1c5   : > { %v15010_v33 = vpop.f32.mrf.mxu1  ;;  %v17287_v6 = vpop.f32.mrf.mxu0 }
 0x1c6   : > { %21755 = vst [vmem:[#allocation62_spill] sm:$0xff] %v17287_v6 }
 0x1c7   : > { %v2738_v10 = vpop.f32.mrf.mxu1  ;;  %v17289_v37 = vpop.f32.mrf.mxu0 }
 0x1c8   : > { %21756 = vst [vmem:[#allocation63_spill] sm:$0xff] %v17289_v37 }
 0x1c9   : > { %v17291_v0 = vpop.f32.mrf.mxu1  ;;  %v17293_v61 = vpop.f32.mrf.mxu0 }
 0x1ca   : > { %21757 = vst [vmem:[#allocation64_spill] sm:$0xff] %v17293_v61 }
 0x1cb   : > { %v17295_v57 = vpop.f32.mrf.mxu1  ;;  %v17297_v21 = vpop.f32.mrf.mxu0 }
 0x1cc   : > { %21758 = vst [vmem:[#allocation65_spill] sm:$0xff] %v17297_v21 }
 0x1cd   : > { %v17299_v18 = vpop.f32.mrf.mxu1  ;;  %v17301_v1 = vpop.f32.mrf.mxu0 }
 0x1ce   : > { %21759 = vst [vmem:[#allocation66_spill] sm:$0xff] %v17301_v1 }
 0x1cf   : > { %v17303_v26 = vpop.f32.mrf.mxu1  ;;  %v17305_v16 = vpop.f32.mrf.mxu0 }
 0x1d0   : > { %21760 = vst [vmem:[#allocation67_spill] sm:$0xff] %v17305_v16 }
 0x1d1   : > { %v17307_v11 = vpop.f32.mrf.mxu1  ;;  %v17309_v27 = vpop.f32.mrf.mxu0 }
 0x1d2   : > { %21761 = vst [vmem:[#allocation68_spill] sm:$0xff] %v17309_v27 }
 0x1d3   : > { %v17311_v37 = vpop.f32.mrf.mxu1  ;;  %v17313_v35 = vpop.f32.mrf.mxu0 }
 0x1d4   : > { %21762 = vst [vmem:[#allocation69_spill] sm:$0xff] %v17313_v35 }
 0x1d5   : > { %v17315_v61 = vpop.f32.mrf.mxu1  ;;  %v17317_v62 = vpop.f32.mrf.mxu0 }
 0x1d6   : > { %21763 = vst [vmem:[#allocation70_spill] sm:$0xff] %v17315_v61  ;;  %21764 = vst [vmem:[#allocation71_spill] sm:$0xff] %v17317_v62 }
 0x1d7   : > { %v17319_v21 = vpop.f32.mrf.mxu0  ;;  %v17321_v9 = vpop.f32.mrf.mxu1 }
 0x1d8   : > { %21765 = vst [vmem:[#allocation72_spill] sm:$0xff] %v17319_v21  ;;  %21766 = vst [vmem:[#allocation73_spill] sm:$0xff] %v17321_v9 }
 0x1d9   : > { %v17323_v1 = vpop.f32.mrf.mxu0  ;;  %v17327_v16 = vpop.f32.mrf.mxu1 }
 0x1da   : > { %21767 = vst [vmem:[#allocation74_spill] sm:$0xff] %v17323_v1 }
 0x1db   : > { %v17325_v6 = vpop.f32.mrf.mxu0  ;;  %v17333_v22 = vpop.f32.mrf.mxu1 }
 0x1dc   : > { %21768 = vst [vmem:[#allocation75_spill] sm:$0xff] %v17325_v6  ;;  %21771 = vst [vmem:[#allocation78_spill] sm:$0xff] %v17333_v22 }
 0x1dd   : > { %v17329_v34 = vpop.f32.mrf.mxu0  ;;  %v17339_v62 = vpop.f32.mrf.mxu1 }
 0x1de   : > { %21769 = vst [vmem:[#allocation76_spill] sm:$0xff] %v17329_v34  ;;  %21774 = vst [vmem:[#allocation81_spill] sm:$0xff] %v17339_v62  ;;  %v2273_v34 = vadd.f32 %v17122_v60, %v17079_v54 }
 0x1df   : > { %v17331_v27 = vpop.f32.mrf.mxu0  ;;  %v17345_v1 = vpop.f32.mrf.mxu1 }
 0x1e0   : > { %21770 = vst [vmem:[#allocation77_spill] sm:$0xff] %v17331_v27  ;;  %21777 = vst [vmem:[#allocation84_spill] sm:$0xff] %v17345_v1  ;;  %v2567_v62 = vadd.f32 %v14975_v59, %v2273_v34  ;;  %v2277_v34 = vadd.f32 %v17150_v32, %v17098_v41 }
 0x1e1   : > { %v17335_v35 = vpop.f32.mrf.mxu0  ;;  %v17357_v22 = vpop.f32.mrf.mxu1 }
 0x1e2   : > { %21772 = vst [vmem:[#allocation79_spill] sm:$0xff] %v17335_v35  ;;  %v1682_v35 = vadd.f32 %v17000_v44, %v16953_v46  ;;  %v2864_v60 = vadd.f32 %v15009_v7, %v2567_v62 }
 0x1e3   : > { %v17337_v61 = vpop.f32.mrf.mxu0 }
 0x1e4   : > { %21773 = vst [vmem:[#allocation80_spill] sm:$0xff] %v17337_v61  ;;  %v2271_v61 = vadd.f32 %v17129_v5, %v17084_v53  ;;  %v17371_v5 = vpop.f32.mrf.mxu1 }
 0x1e5   : > { %v17341_v21 = vpop.f32.mrf.mxu0 }
 0x1e6   : > { %21775 = vst [vmem:[#allocation82_spill] sm:$0xff] %v17341_v21  ;;  %v2565_v54 = vadd.f32 %v17246_v19, %v2271_v61 }
 0x1e7   : > { %v17343_v9 = vpop.f32.mrf.mxu0 }
 0x1e8   : > { %21776 = vst [vmem:[#allocation83_spill] sm:$0xff] %v17343_v9  ;;  %v1975_v9 = vadd.f32 %v17091_v58, %v1682_v35  ;;  %v2862_v44 = vadd.f32 %v2735_v51, %v2565_v54 }
 0x1e9   : > { %v17347_v6 = vpop.f32.mrf.mxu0 }
 0x1ea   : > { %21778 = vst [vmem:[#allocation85_spill] sm:$0xff] %v17347_v6  ;;  %v2274_v6 = vadd.f32 %v17135_v38, %v17089_v47  ;;  %v2272_v1 = vadd.f32 %v17140_v55, %v1975_v9  ;;  %v1686_v55 = vadd.f32 %v17016_v28, %v16976_v23  ;;  %v2275_v9 = vadd.f32 %v17157_v43, %v17103_v56  ;;  %v17391_v28 = vpop.f32.mrf.mxu1 }
 0x1eb   : > { %v17351_v27 = vpop.f32.mrf.mxu0  ;;  %v2278_v23 = vadd.f32 %v17162_v50, %v17108_v48 }
 0x1ec   : > { %21779 = vst [vmem:[#allocation86_spill] sm:$0xff] %v17351_v27  ;;  %v2568_v46 = vadd.f32 %v17250_v31, %v2274_v6  ;;  %v2566_v58 = vadd.f32 %v17254_v49, %v2272_v1  ;;  %v2571_v6 = vadd.f32 %v17258_v14, %v2277_v34  ;;  %v1979_v51 = vadd.f32 %v17110_v17, %v1686_v55  ;;  %v17412_v59 = vpop.f32.mrf.mxu1 }
 0x1ed   : > { %v17359_v21 = vpop.f32.mrf.mxu0  ;;  %v2569_v43 = vadd.f32 %v17262_v3, %v2275_v9  ;;  %v2572_v48 = vadd.f32 %v17266_v39, %v2278_v23  ;;  %v2281_v49 = vadd.f32 %v17171_v24, %v17117_v2  ;;  %v1690_v14 = vadd.f32 %v17031_v30, %v16997_v25  ;;  %v21788_v9 = vld [vmem:[#allocation30_spill] sm:$0xff] }
 0x1ee   : > { %v2865_v47 = vadd.f32 %v15010_v33, %v2568_v46  ;;  %v2863_v41 = vadd.f32 %v2738_v10, %v2566_v58  ;;  %v2868_v10 = vadd.f32 %v17291_v0, %v2571_v6  ;;  %v2276_v17 = vadd.f32 %v17166_v12, %v1979_v51  ;;  %v17437_v30 = vpop.f32.mrf.mxu1 }
 0x1ef   : > { %v15043_v27 = vpop.f32.mrf.mxu0  ;;  %v2866_v50 = vadd.f32 %v17295_v57, %v2569_v43  ;;  %v2869_v39 = vadd.f32 %v17299_v18, %v2572_v48  ;;  %v2279_v24 = vadd.f32 %v17176_v29, %v17127_v52  ;;  %v2575_v54 = vadd.f32 %v17281_v13, %v2281_v49 }
 0x1f0   : > { %v17367_v53 = vadd.f32 %v15043_v27, %v2864_v60  ;;  %v2570_v12 = vadd.f32 %v17270_v40, %v2276_v17  ;;  %v1983_v46 = vadd.f32 %v17137_v15, %v1690_v14  ;;  %v2282_v25 = vadd.f32 %v17181_v8, %v17132_v45  ;;  %v21795_v14 = vld [vmem:[#allocation63_spill] sm:$0xff] }
 0x1f1   : > { %v3028_v35 = vpop.f32.mrf.mxu0  ;;  %v2573_v52 = vadd.f32 %v17283_v4, %v2279_v24  ;;  %v1694_v45 = vadd.f32 %v17046_v20, %v17014_v36  ;;  %v17462_v20 = vpop.f32.mrf.mxu1 }
 0x1f2   : > { %v21584_v61 = vmax.f32 %v17367_v53, 0.0  ;;  %v17375_v38 = vadd.f32 %v3028_v35, %v2862_v44  ;;  %v2867_v40 = vadd.f32 %v17303_v26, %v2570_v12  ;;  %v2872_v26 = vadd.f32 %v17307_v11, %v2575_v54  ;;  %v21794_v12 = vld [vmem:[#allocation32_spill] sm:$0xff] }
 0x1f3   : > { %v15044_v62 = vpop.f32.mrf.mxu0  ;;  %v2280_v15 = vadd.f32 %v17185_v63, %v1983_v46  ;;  %v2576_v34 = vadd.f32 %v17285_v42, %v2282_v25  ;;  %v2870_v4 = vadd.f32 %v17311_v37, %v2573_v52  ;;  %v21787_v63 = vld [vmem:[#allocation20_spill] sm:$0xff] }
 0x1f4   : > { %3221 = vst.msk [vmem:[#allocation2 + $0x31] sm:$0xff] %vm388_vm1, %v21584_v61  ;;  %v21582_v1 = vmax.f32 %v17375_v38, 0.0  ;;  %v17386_v32 = vadd.f32 %v15044_v62, %v2865_v47  ;;  %v2285_v42 = vadd.f32 %v21788_v9, %v21787_v63  ;;  %v21789_v62 = vld [vmem:[#allocation62_spill] sm:$0xff]  ;;  %v21796_v46 = vld [vmem:[#allocation60_spill] sm:$0xff] }
 0x1f5   : > { %v3031_v56 = vpop.f32.mrf.mxu0  ;;  %v2574_v6 = vadd.f32 %v21789_v62, %v2280_v15  ;;  %v4236_v25 = vsel %vm3355_vm5, %v21796_v46, 0  ;;  %v21800_v63 = vld [vmem:[#allocation24_spill] sm:$0xff]  ;;  %v21802_v62 = vld [vmem:[#allocation34_spill] sm:$0xff] }
 0x1f6   : > { %21780 = vst [vmem:[#allocation87_spill] sm:$0xff] %v17386_v32  ;;  %3219 = vst.msk [vmem:[#allocation2 + $0x19] sm:$0xff] %vm388_vm1, %v21582_v1  ;;  %v21581_v7 = vmax.f32 %v17386_v32, 0.0  ;;  %v17399_v33 = vadd.f32 %v3031_v56, %v2863_v41  ;;  %v21790_v41 = vld [vmem:[#allocation70_spill] sm:$0xff]  ;;  %v21791_v56 = vld [vmem:[#allocation21_spill] sm:$0xff]  ;;  %v2579_v24 = vadd.f32 %v21795_v14, %v2285_v42  ;;  %v1987_v9 = vadd.f32 %v21800_v63, %v1694_v45 }
 0x1f7   : > { %v15047_v19 = vpop.f32.mrf.mxu0  ;;  %v2873_v36 = vadd.f32 %v21790_v41, %v2576_v34  ;;  %v3943_v43 = vsel %vm3355_vm5, %v21791_v56, 0  ;;  %v21801_v42 = vld [vmem:[#allocation23_spill] sm:$0xff]  ;;  %v17516_v41 = vpop.f32.mrf.mxu1  ;;  %v21812_v63 = vld [vmem:[#allocation38_spill] sm:$0xff] }
 0x1f8   : > { %21781 = vst [vmem:[#allocation88_spill] sm:$0xff] %v17399_v33  ;;  %3222 = vst.msk [vmem:[#allocation2 + $0x39] sm:$0xff] %vm388_vm1, %v21581_v7  ;;  %v21580_v0 = vmax.f32 %v17399_v33, 0.0  ;;  %v17408_v3 = vadd.f32 %v15047_v19, %v2868_v10 }
 0x1f9   : > { %v3044_v31 = vpop.f32.mrf.mxu0 }
 0x1fa   : > { %21782 = vst [vmem:[#allocation89_spill] sm:$0xff] %v17408_v3  ;;  %3220 = vst.msk [vmem:[#allocation2 + $0x21] sm:$0xff] %vm388_vm1, %v21580_v0  ;;  %v21579_v57 = vmax.f32 %v17408_v3, 0.0  ;;  %v17420_v27 = vadd.f32 %v3044_v31, %v2866_v50  ;;  %v21793_v31 = vld [vmem:[#allocation22_spill] sm:$0xff] }
 0x1fb   : > { %v15048_v2 = vpop.f32.mrf.mxu0  ;;  %v3262_v49 = vld [vmem:[#allocation2 + $0x30] sm:$0xff] }
 0x1fc   : > { %21783 = vst [vmem:[#allocation90_spill] sm:$0xff] %v17420_v27  ;;  %3225 = vst.msk [vmem:[#allocation2 + $0x61] sm:$0xff] %vm388_vm1, %v21579_v57  ;;  %v21578_v18 = vmax.f32 %v17420_v27, 0.0  ;;  %v17432_v60 = vadd.f32 %v15048_v2, %v2869_v39  ;;  %v2283_v39 = vadd.f32 %v21794_v12, %v21793_v31  ;;  %v21807_v12 = vld [vmem:[#allocation65_spill] sm:$0xff] }
 0x1fd   : > { %v3047_v29 = vpop.f32.mrf.mxu0  ;;  %v3260_v58 = vld [vmem:[#allocation2 + $0x18] sm:$0xff] }
 0x1fe   : > { %21784 = vst [vmem:[#allocation91_spill] sm:$0xff] %v17432_v60  ;;  %3223 = vst.msk [vmem:[#allocation2 + $0x49] sm:$0xff] %vm388_vm1, %v21578_v18  ;;  %v21577_v13 = vmax.f32 %v17432_v60, 0.0  ;;  %v17445_v44 = vadd.f32 %v3047_v29, %v2867_v40  ;;  %v3554_v47 = vld [vmem:[#allocation2 + $0x19] sm:$0xff]  ;;  %v3556_v40 = vld [vmem:[#allocation2 + $0x31] sm:$0xff] }
 0x1ff   : > { %v15051_v8 = vpop.f32.mrf.mxu0  ;;  %v3263_v55 = vld [vmem:[#allocation2 + $0x38] sm:$0xff] }
 0x200   : > { %21785 = vst [vmem:[#allocation92_spill] sm:$0xff] %v17445_v44  ;;  %3226 = vst.msk [vmem:[#allocation2 + $0x69] sm:$0xff] %vm388_vm1, %v21577_v13  ;;  %v21573_v11 = vmax.f32 %v17445_v44, 0.0  ;;  %v17456_v35 = vadd.f32 %v15051_v8, %v2872_v26  ;;  %v3557_v10 = vld [vmem:[#allocation2 + $0x39] sm:$0xff]  ;;  %v17479_v54 = vpack.c.bf16 %v3263_v55, %v3262_v49  ;;  %v17499_v8 = vld [vmem:[%s21558_s3 + $0x10] sm:$0xf] }
 0x201   : > { %v3060_v37 = vpop.f32.mrf.mxu0  ;;  %v3261_v51 = vld [vmem:[#allocation2 + $0x20] sm:$0xff]  ;;  %v21797_v29 = vld [vmem:[#allocation73_spill] sm:$0xff]  ;;  %v17494_v34 = vpack.c.bf16 %v3557_v10, %v3556_v40  ;;  %v21806_v49 = vld [vmem:[#allocation36_spill] sm:$0xff] }
 0x202   : > { %21786 = vst [vmem:[#allocation93_spill] sm:$0xff] %v17456_v35  ;;  %v3555_v23 = vld [vmem:[#allocation2 + $0x21] sm:$0xff]  ;;  %3224 = vst.msk [vmem:[#allocation2 + $0x51] sm:$0xff] %vm388_vm1, %v21573_v11  ;;  %v21571_v17 = vmax.f32 %v17456_v35, 0.0  ;;  %v17470_v19 = vadd.f32 %v3060_v37, %v2870_v4  ;;  %v17472_v48 = vpack.c.bf16 %v3261_v51, %v3260_v58  ;;  %v2871_v52 = vadd.f32 %v21797_v29, %v2574_v6  ;;  %v17504_v4 = vld [vmem:[%s21558_s3 + $0x14] sm:$0xf] }
 0x203   : > { %v17474_v50 = vpack.c.bf16 %v3555_v23, %v3554_v47  ;;  %v15052_v2 = vpop.f32.mrf.mxu0  ;;  %v17509_v58 = vld [vmem:[%s21557_s2] ss:$0 sm:$0xff]  ;;  %v21799_v47 = vld [vmem:[#allocation5_spill] sm:$0xff]  ;;  %v2286_v6 = vadd.f32 %v21802_v62, %v21801_v42  ;;  %v21803_v37 = vld [vmem:[#allocation64_spill] sm:$0xff]  ;;  %v2876_v23 = vadd.f32 %v17327_v16, %v2579_v24  ;;  %v2284_v31 = vadd.f32 %v21806_v49, %v1987_v9 }
 0x204   : > { %21792 = vst [vmem:[#allocation20_spill] sm:$0xff] %v17470_v19  ;;  %3229 = vst.msk [vmem:[#allocation2 + $0x91] sm:$0xff] %vm388_vm1, %v21571_v17  ;;  %v21570_v26 = vmax.f32 %v17470_v19, 0.0  ;;  %v17488_v15 = vadd.f32 %v15052_v2, %v2873_v36  ;;  %15076 = vmatmul.mubr.msk.bf16.vlgmr.msra.gmra.mxu1 %vm388_vm1, %v17472_v48  ;;  %v811_v55 = vadd.f32 %v17509_v58, %v21799_v47  ;;  %v21808_v16 = vld [vmem:[#allocation78_spill] sm:$0xff] }
 0x205   : > { %15110 = vmatmul.mubr.msk.bf16.vlgmr.msra.gmra.mxu0 %vm388_vm1, %v17474_v50  ;;  %15142 = vmatpush3.bf16.msra.mxu1 %v3943_v43  ;;  %v3063_v36 = vpop.f32.mrf.mxu0  ;;  %v2577_v51 = vadd.f32 %v21803_v37, %v2283_v39  ;;  %v21805_v43 = vld [vmem:[#allocation7_spill] sm:$0xff]  ;;  %v2580_v39 = vadd.f32 %v21807_v12, %v2286_v6  ;;  %v21813_v42 = vld [vmem:[#allocation66_spill] sm:$0xff]  ;;  %v21814_v6 = vld [vmem:[#allocation81_spill] sm:$0xff]  ;;  %v17549_v37 = vpop.f32.mrf.mxu1 }
 0x206   : > { %21798 = vst [vmem:[#allocation30_spill] sm:$0xff] %v17488_v15  ;;  %15079 = vmatprep.mubr.msk.bf16.mxu1 %vm388_vm1, %v17479_v54  ;;  %3227 = vst.msk [vmem:[#allocation2 + $0x79] sm:$0xff] %vm388_vm1, %v21570_v26  ;;  %v21569_v45 = vmax.f32 %v17488_v15, 0.0  ;;  %v17526_v56 = vadd.f32 %v3063_v36, %v2871_v52  ;;  %15113 = vmatprep.mubr.msk.bf16.mxu0 %vm388_vm1, %v17494_v34  ;;  %v1108_v10 = vadd.f32 %v21805_v43, %v811_v55  ;;  %v3264_v46 = vld [vmem:[#allocation2 + $0x48] sm:$0xff]  ;;  %v21810_v52 = vld [vmem:[#allocation12_spill] sm:$0xff] }
 0x207   : > { %15176 = vmatpush3.bf16.msra.mxu0 %v4236_v25  ;;  %v15055_v14 = vpop.f32.mrf.mxu0  ;;  %16097 = vmatprep.subr.msk.bf16.mxu1 %vm3355_vm5, %v17499_v8  ;;  %v2874_v24 = vadd.f32 %v21808_v16, %v2577_v51  ;;  %v3267_v25 = vld [vmem:[#allocation2 + $0x68] sm:$0xff]  ;;  %v21811_v55 = vld [vmem:[#allocation25_spill] sm:$0xff]  ;;  %v2578_v62 = vadd.f32 %v21813_v42, %v2284_v31  ;;  %v2877_v36 = vadd.f32 %v21814_v6, %v2580_v39  ;;  %v3266_v31 = vld [vmem:[#allocation2 + $0x60] sm:$0xff] }
 0x208   : > { %21804 = vst [vmem:[#allocation62_spill] sm:$0xff] %v17526_v56  ;;  %16098 = vmatprep.subr.msk.bf16.mxu0 %vm3355_vm5, %v17504_v4  ;;  %3230 = vst.msk [vmem:[#allocation2 + $0x99] sm:$0xff] %vm388_vm1, %v21569_v45  ;;  %v21572_v2 = vmax.f32 %v17526_v56, 0.0  ;;  %v17542_v40 = vadd.f32 %v15055_v14, %v2876_v23  ;;  %v3561_v29 = vld [vmem:[#allocation2 + $0x69] sm:$0xff]  ;;  %v1401_v47 = vadd.f32 %v21810_v52, %v1108_v10  ;;  %v3560_v39 = vld [vmem:[#allocation2 + $0x61] sm:$0xff] }
 0x209   : > { %v2289_v9 = vadd.f32 %v21812_v63, %v21811_v55  ;;  %v3076_v51 = vpop.f32.mrf.mxu0  ;;  %v3265_v43 = vld [vmem:[#allocation2 + $0x50] sm:$0xff]  ;;  %v21816_v52 = vld [vmem:[#allocation15_spill] sm:$0xff]  ;;  %v21817_v63 = vld [vmem:[#allocation26_spill] sm:$0xff]  ;;  %v17564_v26 = vpack.c.bf16 %v3267_v25, %v3266_v31  ;;  %v17566_v17 = vpack.c.bf16 %v3561_v29, %v3560_v39 }
 0x20a   : > { %21809 = vst [vmem:[#allocation70_spill] sm:$0xff] %v17542_v40  ;;  %v3558_v49 = vld [vmem:[#allocation2 + $0x49] sm:$0xff]  ;;  %v3559_v12 = vld [vmem:[#allocation2 + $0x51] sm:$0xff]  ;;  %3228 = vst.msk [vmem:[#allocation2 + $0x81] sm:$0xff] %vm388_vm1, %v21572_v2  ;;  %v21574_v23 = vmax.f32 %v17542_v40, 0.0  ;;  %v17555_v10 = vadd.f32 %v3076_v51, %v2874_v24  ;;  %v17557_v14 = vpack.c.bf16 %v3265_v43, %v3264_v46  ;;  %v1698_v55 = vadd.f32 %v21816_v52, %v1401_v47 }
 0x20b   : > { %v17559_v16 = vpack.c.bf16 %v3559_v12, %v3558_v49  ;;  %v21818_v42 = vld [vmem:[#allocation40_spill] sm:$0xff]  ;;  %v15056_v45 = vpop.f32.mrf.mxu0  ;;  %v21819_v2 = vld [vmem:[#allocation67_spill] sm:$0xff]  ;;  %v21822_v25 = vld [vmem:[#allocation6_spill] sm:$0xff]  ;;  %v17585_v12 = vpop.f32.mrf.mxu1 }
 0x20c   : > { %21815 = vst [vmem:[#allocation21_spill] sm:$0xff] %v17555_v10  ;;  %v2287_v6 = vadd.f32 %v21818_v42, %v21817_v63  ;;  %v2583_v11 = vadd.f32 %v21819_v2, %v2289_v9  ;;  %v21820_v24 = vld [vmem:[#allocation84_spill] sm:$0xff]  ;;  %3233 = vst.msk [vmem:[#allocation2 + $0xc1] sm:$0xff] %vm388_vm1, %v21574_v23  ;;  %v21575_v46 = vmax.f32 %v17555_v10, 0.0  ;;  %v17574_v43 = vadd.f32 %v15056_v45, %v2877_v36  ;;  %v21824_v9 = vld [vmem:[#allocation27_spill] sm:$0xff] }
 0x20d   : > { %v2875_v51 = vadd.f32 %v21820_v24, %v2578_v62  ;;  %15080 = vmatmul.mubr.msk.bf16.gmra.mxu1 %vm388_vm1, %v17557_v14  ;;  %15114 = vmatmul.mubr.msk.bf16.gmra.mxu0 %vm388_vm1, %v17559_v16  ;;  %v815_v29 = vadd.f32 %v17509_v58, %v21822_v25  ;;  %v21823_v2 = vld [vmem:[#allocation28_spill] sm:$0xff]  ;;  %v21825_v62 = vld [vmem:[#allocation42_spill] sm:$0xff]  ;;  %v3079_v31 = vpop.f32.mrf.mxu0  ;;  %v21828_v63 = vld [vmem:[#allocation9_spill] sm:$0xff] }
 0x20e   : > { %21821 = vst [vmem:[#allocation22_spill] sm:$0xff] %v17574_v43  ;;  %v1991_v47 = vadd.f32 %v21823_v2, %v1698_v55  ;;  %v2290_v49 = vadd.f32 %v21825_v62, %v21824_v9  ;;  %15083 = vmatprep.mubr.msk.bf16.mxu1 %vm388_vm1, %v17564_v26  ;;  %15117 = vmatprep.mubr.msk.bf16.mxu0 %vm388_vm1, %v17566_v17  ;;  %v21826_v45 = vld [vmem:[#allocation68_spill] sm:$0xff]  ;;  %3231 = vst.msk [vmem:[#allocation2 + $0xa9] sm:$0xff] %vm388_vm1, %v21575_v46  ;;  %v21576_v52 = vmax.f32 %v17574_v43, 0.0  ;;  %v21830_v2 = vld [vmem:[#allocation69_spill] sm:$0xff] }
 0x20f   : > { %v2581_v36 = vadd.f32 %v21826_v45, %v2287_v6  ;;  %v2880_v39 = vadd.f32 %v17357_v22, %v2583_v11  ;;  %v17597_v55 = vadd.f32 %v3079_v31, %v2875_v51  ;;  %v1112_v42 = vadd.f32 %v21828_v63, %v815_v29  ;;  %v21829_v24 = vld [vmem:[#allocation44_spill] sm:$0xff]  ;;  %v15059_v62 = vpop.f32.mrf.mxu0  ;;  %v3268_v6 = vld [vmem:[#allocation2 + $0x78] sm:$0xff] }
 0x210   : > { %v2288_v25 = vadd.f32 %v21829_v24, %v1991_v47  ;;  %v2584_v9 = vadd.f32 %v21830_v2, %v2290_v49  ;;  %3234 = vst.msk [vmem:[#allocation2 + $0xc9] sm:$0xff] %vm388_vm1, %v21576_v52  ;;  %v3271_v51 = vld [vmem:[#allocation2 + $0x98] sm:$0xff]  ;;  %v21834_v47 = vld [vmem:[#allocation46_spill] sm:$0xff]  ;;  %v21835_v49 = vld [vmem:[#allocation71_spill] sm:$0xff] }
 0x211   : > { %21827 = vst [vmem:[#allocation32_spill] sm:$0xff] %v17597_v55  ;;  %v2878_v23 = vadd.f32 %v17371_v5, %v2581_v36  ;;  %v21583_v22 = vmax.f32 %v17597_v55, 0.0  ;;  %v17607_v11 = vadd.f32 %v15059_v62, %v2880_v39  ;;  %v3565_v31 = vld [vmem:[#allocation2 + $0x99] sm:$0xff]  ;;  %v17614_v36 = vpop.f32.mrf.mxu1  ;;  %v3092_v46 = vpop.f32.mrf.mxu0  ;;  %v3563_v18 = vld [vmem:[#allocation2 + $0x81] sm:$0xff] }
 0x212   : > { %v21832_v45 = vld [vmem:[#allocation13_spill] sm:$0xff]  ;;  %v2582_v2 = vadd.f32 %v21835_v49, %v2288_v25  ;;  %v2881_v5 = vadd.f32 %v17391_v28, %v2584_v9  ;;  %v3269_v52 = vld [vmem:[#allocation2 + $0x80] sm:$0xff]  ;;  %v3270_v25 = vld [vmem:[#allocation2 + $0x90] sm:$0xff] }
 0x213   : > { %21831 = vst [vmem:[#allocation63_spill] sm:$0xff] %v17607_v11  ;;  %v1405_v29 = vadd.f32 %v21832_v45, %v1112_v42  ;;  %v21833_v63 = vld [vmem:[#allocation29_spill] sm:$0xff]  ;;  %3232 = vst.msk [vmem:[#allocation2 + $0xb1] sm:$0xff] %vm388_vm1, %v21583_v22  ;;  %v21587_v39 = vmax.f32 %v17607_v11, 0.0  ;;  %v17620_v42 = vadd.f32 %v3092_v46, %v2878_v23  ;;  %v17622_v62 = vpack.c.bf16 %v3269_v52, %v3268_v6  ;;  %v21839_v49 = vld [vmem:[#allocation48_spill] sm:$0xff]  ;;  %v15060_v0 = vpop.f32.mrf.mxu0 }
 0x214   : > { %v2293_v24 = vadd.f32 %v21834_v47, %v21833_v63  ;;  %v3562_v13 = vld [vmem:[#allocation2 + $0x79] sm:$0xff]  ;;  %v3564_v28 = vld [vmem:[#allocation2 + $0x91] sm:$0xff]  ;;  %v21838_v47 = vld [vmem:[#allocation31_spill] sm:$0xff]  ;;  %v17629_v7 = vpack.c.bf16 %v3271_v51, %v3270_v25  ;;  %v2879_v23 = vadd.f32 %v17412_v59, %v2582_v2 }
 0x215   : > { %21836 = vst [vmem:[#allocation60_spill] sm:$0xff] %v17620_v42  ;;  %v17624_v45 = vpack.c.bf16 %v3563_v18, %v3562_v13  ;;  %v21837_v9 = vld [vmem:[#allocation17_spill] sm:$0xff]  ;;  %v2291_v57 = vadd.f32 %v21839_v49, %v21838_v47  ;;  %v17631_v1 = vpack.c.bf16 %v3565_v31, %v3564_v28  ;;  %v21840_v22 = vld [vmem:[#allocation72_spill] sm:$0xff]  ;;  %3237 = vst.msk [vmem:[#allocation2 + $0xf1] sm:$0xff] %vm388_vm1, %v21587_v39  ;;  %v21585_v18 = vmax.f32 %v17620_v42, 0.0 }
 0x216   : > { %v1702_v63 = vadd.f32 %v21837_v9, %v1405_v29  ;;  %v2587_v61 = vadd.f32 %v21840_v22, %v2293_v24  ;;  %v17639_v13 = vadd.f32 %v15060_v0, %v2881_v5  ;;  %15084 = vmatmul.mubr.msk.bf16.gmra.mxu1 %vm388_vm1, %v17622_v62  ;;  %v21842_v46 = vld [vmem:[#allocation8_spill] sm:$0xff]  ;;  %v21843_v22 = vld [vmem:[#allocation35_spill] sm:$0xff]  ;;  %v21844_v59 = vld [vmem:[#allocation33_spill] sm:$0xff]  ;;  %v17650_v29 = vpop.f32.mrf.mxu1  ;;  %v3095_v24 = vpop.f32.mrf.mxu0 }
 0x217   : > { %15118 = vmatmul.mubr.msk.bf16.gmra.mxu0 %vm388_vm1, %v17624_v45  ;;  %v819_v52 = vadd.f32 %v17509_v58, %v21842_v46  ;;  %v21845_v51 = vld [vmem:[#allocation50_spill] sm:$0xff]  ;;  %15087 = vmatprep.mubr.msk.bf16.mxu1 %vm388_vm1, %v17629_v7  ;;  %3235 = vst.msk [vmem:[#allocation2 + $0xd9] sm:$0xff] %vm388_vm1, %v21585_v18  ;;  %v17662_v28 = vadd.f32 %v3095_v24, %v2879_v23  ;;  %v21849_v47 = vld [vmem:[#allocation52_spill] sm:$0xff]  ;;  %v21850_v46 = vld [vmem:[#allocation75_spill] sm:$0xff] }
 0x218   : > { %21841 = vst [vmem:[#allocation73_spill] sm:$0xff] %v17639_v13  ;;  %v1995_v6 = vadd.f32 %v21843_v22, %v1702_v63  ;;  %v2294_v31 = vadd.f32 %v21845_v51, %v21844_v59  ;;  %15121 = vmatprep.mubr.msk.bf16.mxu0 %vm388_vm1, %v17631_v1  ;;  %v21846_v0 = vld [vmem:[#allocation74_spill] sm:$0xff]  ;;  %v2884_v5 = vadd.f32 %v17437_v30, %v2587_v61  ;;  %v21586_v25 = vmax.f32 %v17639_v13, 0.0  ;;  %v15063_v59 = vpop.f32.mrf.mxu0  ;;  %v3272_v30 = vld [vmem:[#allocation2 + $0xa8] sm:$0xff] }
 0x219   : > { %v2585_v2 = vadd.f32 %v21846_v0, %v2291_v57  ;;  %21847 = vst [vmem:[#allocation5_spill] sm:$0xff] %v17662_v28  ;;  %v21848_v9 = vld [vmem:[#allocation10_spill] sm:$0xff]  ;;  %v3275_v23 = vld [vmem:[#allocation2 + $0xc8] sm:$0xff] }
 0x21a   : > { %v1116_v63 = vadd.f32 %v21848_v9, %v819_v52  ;;  %v2292_v49 = vadd.f32 %v21849_v47, %v1995_v6  ;;  %v2588_v22 = vadd.f32 %v21850_v46, %v2294_v31  ;;  %3238 = vst.msk [vmem:[#allocation2 + $0xf9] sm:$0xff] %vm388_vm1, %v21586_v25  ;;  %v17672_v57 = vadd.f32 %v15063_v59, %v2884_v5  ;;  %v3569_v24 = vld [vmem:[#allocation2 + $0xc9] sm:$0xff]  ;;  %v21852_v0 = vld [vmem:[#allocation14_spill] sm:$0xff]  ;;  %v21853_v9 = vld [vmem:[#allocation37_spill] sm:$0xff]  ;;  %v3108_v18 = vpop.f32.mrf.mxu0 }
 0x21b   : > { %v2882_v51 = vadd.f32 %v17462_v20, %v2585_v2  ;;  %v21854_v6 = vld [vmem:[#allocation53_spill] sm:$0xff]  ;;  %v21855_v31 = vld [vmem:[#allocation76_spill] sm:$0xff]  ;;  %v17679_v2 = vpop.f32.mrf.mxu1  ;;  %v21856_v5 = vmax.f32 %v17662_v28, 0.0  ;;  %v21860_v13 = vld [vmem:[#allocation54_spill] sm:$0xff] }
 0x21c   : > { %21851 = vst [vmem:[#allocation24_spill] sm:$0xff] %v17672_v57  ;;  %v1409_v52 = vadd.f32 %v21852_v0, %v1116_v63  ;;  %v2297_v47 = vadd.f32 %v21854_v6, %v21853_v9  ;;  %v2586_v46 = vadd.f32 %v21855_v31, %v2292_v49  ;;  %v2885_v20 = vadd.f32 %v17516_v41, %v2588_v22  ;;  %v3273_v25 = vld [vmem:[#allocation2 + $0xb0] sm:$0xff]  ;;  %v3274_v49 = vld [vmem:[#allocation2 + $0xc0] sm:$0xff]  ;;  %v21859_v31 = vld [vmem:[#allocation39_spill] sm:$0xff]  ;;  %v15064_v11 = vpop.f32.mrf.mxu0 }
 0x21d   : > { %v3566_v39 = vld [vmem:[#allocation2 + $0xa9] sm:$0xff]  ;;  %v3567_v61 = vld [vmem:[#allocation2 + $0xb1] sm:$0xff]  ;;  %3236 = vst.msk [vmem:[#allocation2 + $0xe1] sm:$0xff] %vm388_vm1, %v21856_v5  ;;  %v17685_v63 = vadd.f32 %v3108_v18, %v2882_v51  ;;  %v17687_v0 = vpack.c.bf16 %v3273_v25, %v3272_v30  ;;  %v3568_v41 = vld [vmem:[#allocation2 + $0xc1] sm:$0xff]  ;;  %v2295_v42 = vadd.f32 %v21860_v13, %v21859_v31  ;;  %v17694_v55 = vpack.c.bf16 %v3275_v23, %v3274_v49 }
 0x21e   : > { %v17689_v9 = vpack.c.bf16 %v3567_v61, %v3566_v39  ;;  %v21858_v22 = vld [vmem:[#allocation18_spill] sm:$0xff]  ;;  %v17696_v28 = vpack.c.bf16 %v3569_v24, %v3568_v41  ;;  %v21861_v5 = vld [vmem:[#allocation77_spill] sm:$0xff]  ;;  %v2883_v18 = vadd.f32 %v17549_v37, %v2586_v46  ;;  %v21862_v25 = vmax.f32 %v17672_v57, 0.0  ;;  %v21864_v13 = vld [vmem:[#allocation4_spill] sm:$0xff]  ;;  %v3111_v46 = vpop.f32.mrf.mxu0 }
 0x21f   : > { %21857 = vst [vmem:[#allocation23_spill] sm:$0xff] %v17685_v63  ;;  %v1706_v6 = vadd.f32 %v21858_v22, %v1409_v52  ;;  %v2591_v59 = vadd.f32 %v21861_v5, %v2297_v47  ;;  %v21593_v39 = vmax.f32 %v17685_v63, 0.0  ;;  %v17704_v51 = vadd.f32 %v15064_v11, %v2885_v20  ;;  %15088 = vmatmul.mubr.msk.bf16.gmra.mxu1 %vm388_vm1, %v17687_v0  ;;  %v21865_v30 = vld [vmem:[#allocation43_spill] sm:$0xff]  ;;  %v21866_v37 = vld [vmem:[#allocation41_spill] sm:$0xff]  ;;  %v15037_v47 = vpop.f32.mrf.mxu1  ;;  %v21871_v31 = vld [vmem:[#allocation56_spill] sm:$0xff] }
 0x220   : > { %3241 = vst.msk [vmem:[#allocation2 + $0x121] sm:$0xff] %vm388_vm1, %v21862_v25  ;;  %15122 = vmatmul.mubr.msk.bf16.gmra.mxu0 %vm388_vm1, %v17689_v9  ;;  %v823_v61 = vadd.f32 %v17509_v58, %v21864_v13  ;;  %v21867_v24 = vld [vmem:[#allocation55_spill] sm:$0xff]  ;;  %15091 = vmatprep.mubr.msk.bf16.mxu1 %vm388_vm1, %v17694_v55  ;;  %v17725_v41 = vadd.f32 %v3111_v46, %v2883_v18  ;;  %v21872_v25 = vld [vmem:[#allocation80_spill] sm:$0xff] }
 0x221   : > { %21863 = vst [vmem:[#allocation34_spill] sm:$0xff] %v17704_v51  ;;  %v1999_v23 = vadd.f32 %v21865_v30, %v1706_v6  ;;  %v2298_v52 = vadd.f32 %v21867_v24, %v21866_v37  ;;  %15125 = vmatprep.mubr.msk.bf16.mxu0 %vm388_vm1, %v17696_v28  ;;  %v21868_v11 = vld [vmem:[#allocation79_spill] sm:$0xff]  ;;  %v2888_v49 = vadd.f32 %v17585_v12, %v2591_v59  ;;  %3239 = vst.msk [vmem:[#allocation2 + $0x109] sm:$0xff] %vm388_vm1, %v21593_v39  ;;  %v15067_v30 = vpop.f32.mrf.mxu0  ;;  %v3276_v59 = vld [vmem:[#allocation2 + $0xd8] sm:$0xff] }
 0x222   : > { %v2589_v20 = vadd.f32 %v21868_v11, %v2295_v42  ;;  %v21594_v58 = vmax.f32 %v17704_v51, 0.0  ;;  %21869 = vst [vmem:[#allocation64_spill] sm:$0xff] %v17725_v41  ;;  %v21870_v22 = vld [vmem:[#allocation11_spill] sm:$0xff]  ;;  %v21600_v12 = vmax.f32 %v17725_v41, 0.0  ;;  %v3279_v18 = vld [vmem:[#allocation2 + $0xf8] sm:$0xff]  ;;  %v21874_v46 = vld [vmem:[#allocation16_spill] sm:$0xff] }
 0x223   : > { %v1120_v6 = vadd.f32 %v21870_v22, %v823_v61  ;;  %v2296_v5 = vadd.f32 %v21871_v31, %v1999_v23  ;;  %v2592_v13 = vadd.f32 %v21872_v25, %v2298_v52  ;;  %v17735_v42 = vadd.f32 %v15067_v30, %v2888_v49  ;;  %v3573_v24 = vld [vmem:[#allocation2 + $0xf9] sm:$0xff]  ;;  %v3124_v25 = vpop.f32.mrf.mxu0 }
 0x224   : > { %v2886_v37 = vadd.f32 %v17614_v36, %v2589_v20  ;;  %3242 = vst.msk [vmem:[#allocation2 + $0x129] sm:$0xff] %vm388_vm1, %v21594_v58  ;;  %v21875_v11 = vld [vmem:[#allocation45_spill] sm:$0xff]  ;;  %v21877_v52 = vld [vmem:[#allocation82_spill] sm:$0xff]  ;;  %v2847_v20 = vpop.f32.mrf.mxu1  ;;  %3240 = vst.msk [vmem:[#allocation2 + $0x111] sm:$0xff] %vm388_vm1, %v21600_v12 }
 0x225   : > { %21873 = vst [vmem:[#allocation7_spill] sm:$0xff] %v17735_v42  ;;  %v1413_v61 = vadd.f32 %v21874_v46, %v1120_v6  ;;  %v21876_v23 = vld [vmem:[#allocation57_spill] sm:$0xff]  ;;  %v2590_v31 = vadd.f32 %v21877_v52, %v2296_v5  ;;  %v2889_v36 = vadd.f32 %v17650_v29, %v2592_v13  ;;  %v3277_v39 = vld [vmem:[#allocation2 + $0xe0] sm:$0xff]  ;;  %v3278_v5 = vld [vmem:[#allocation2 + $0xf0] sm:$0xff]  ;;  %v15068_v57 = vpop.f32.mrf.mxu0 }
 0x226   : > { %v2301_v22 = vadd.f32 %v21876_v23, %v21875_v11  ;;  %v3570_v58 = vld [vmem:[#allocation2 + $0xd9] sm:$0xff]  ;;  %v3571_v51 = vld [vmem:[#allocation2 + $0xe1] sm:$0xff]  ;;  %v17746_v30 = vadd.f32 %v3124_v25, %v2886_v37  ;;  %v17748_v6 = vpack.c.bf16 %v3277_v39, %v3276_v59  ;;  %v3572_v11 = vld [vmem:[#allocation2 + $0xf1] sm:$0xff]  ;;  %v17755_v43 = vpack.c.bf16 %v3279_v18, %v3278_v5 }
 0x227   : > { %v17750_v46 = vpack.c.bf16 %v3571_v51, %v3570_v58  ;;  %v21879_v29 = vld [vmem:[#allocation19_spill] sm:$0xff]  ;;  %v21881_v52 = vld [vmem:[#allocation58_spill] sm:$0xff]  ;;  %v17757_v41 = vpack.c.bf16 %v3573_v24, %v3572_v11  ;;  %v2887_v37 = vadd.f32 %v17679_v2, %v2590_v31  ;;  %v21883_v39 = vmax.f32 %v17735_v42, 0.0  ;;  %v21886_v24 = vld [vmem:[#allocation49_spill] sm:$0xff]  ;;  %v15038_v2 = vpop.f32.mrf.mxu1 }
 0x228   : > { %21878 = vst [vmem:[#allocation36_spill] sm:$0xff] %v17746_v30  ;;  %v1710_v13 = vadd.f32 %v21879_v29, %v1413_v61  ;;  %v21880_v23 = vld [vmem:[#allocation47_spill] sm:$0xff]  ;;  %v21607_v51 = vmax.f32 %v17746_v30, 0.0  ;;  %v17765_v58 = vadd.f32 %v15068_v57, %v2889_v36  ;;  %15092 = vmatmul.mubr.msk.bf16.gmra.mxu1 %vm388_vm1, %v17748_v6  ;;  %v21888_v57 = vld [vmem:[#allocation85_spill] sm:$0xff] }
 0x229   : > { %v2299_v63 = vadd.f32 %v21881_v52, %v21880_v23  ;;  %v21882_v12 = vld [vmem:[#allocation83_spill] sm:$0xff]  ;;  %3245 = vst.msk [vmem:[#allocation2 + $0x151] sm:$0xff] %vm388_vm1, %v21883_v39  ;;  %15126 = vmatmul.mubr.msk.bf16.gmra.mxu0 %vm388_vm1, %v17750_v46  ;;  %15095 = vmatprep.mubr.msk.bf16.mxu1 %vm388_vm1, %v17755_v43  ;;  %v21890_v11 = vld [vmem:[#allocation61_spill] sm:$0xff] }
 0x22a   : > { %v2595_v49 = vadd.f32 %v21882_v12, %v2301_v22  ;;  %21884 = vst [vmem:[#allocation65_spill] sm:$0xff] %v17765_v58  ;;  %v21885_v59 = vld [vmem:[#allocation51_spill] sm:$0xff]  ;;  %v3127_v22 = vpop.f32.mrf.mxu0  ;;  %15129 = vmatprep.mubr.msk.bf16.mxu0 %vm388_vm1, %v17757_v41  ;;  %3243 = vst.msk [vmem:[#allocation2 + $0x139] sm:$0xff] %vm388_vm1, %v21607_v51  ;;  %v21601_v25 = vmax.f32 %v17765_v58, 0.0  ;;  %v3849_v51 = vld [vmem:[#allocation2 + $0x32] sm:$0xff] }
 0x22b   : > { %v2003_v18 = vadd.f32 %v21885_v59, %v1710_v13  ;;  %v21887_v12 = vld [vmem:[#allocation59_spill] sm:$0xff]  ;;  %v2593_v31 = vadd.f32 %v21888_v57, %v2299_v63  ;;  %v17783_v5 = vadd.f32 %v3127_v22, %v2887_v37  ;;  %v21891_v13 = vld [vmem:[#allocation86_spill] sm:$0xff]  ;;  %v2850_v22 = vpop.f32.mrf.mxu1  ;;  %v3281_v57 = vld [vmem:[#allocation2 + $0x110] sm:$0xff] }
 0x22c   : > { %v2302_v61 = vadd.f32 %v21887_v12, %v21886_v24  ;;  %v2892_v36 = vadd.f32 %v15037_v47, %v2595_v49  ;;  %v15071_v52 = vpop.f32.mrf.mxu0  ;;  %3246 = vst.msk [vmem:[#allocation2 + $0x159] sm:$0xff] %vm388_vm1, %v21601_v25  ;;  %v3280_v49 = vld [vmem:[#allocation2 + $0x108] sm:$0xff] }
 0x22d   : > { %21889 = vst [vmem:[#allocation78_spill] sm:$0xff] %v17783_v5  ;;  %v2300_v29 = vadd.f32 %v21890_v11, %v2003_v18  ;;  %v2890_v39 = vadd.f32 %v2847_v20, %v2593_v31  ;;  %v21602_v63 = vmax.f32 %v17783_v5, 0.0  ;;  %v3283_v59 = vld [vmem:[#allocation2 + $0x128] sm:$0xff]  ;;  %v3575_v11 = vld [vmem:[#allocation2 + $0x111] sm:$0xff]  ;;  %v3866_v5 = vld [vmem:[#allocation2 + $0xfa] sm:$0xff] }
 0x22e   : > { %v2596_v23 = vadd.f32 %v21891_v13, %v2302_v61  ;;  %v17791_v47 = vadd.f32 %v15071_v52, %v2892_v36  ;;  %v3577_v24 = vld [vmem:[#allocation2 + $0x129] sm:$0xff]  ;;  %v3140_v18 = vpop.f32.mrf.mxu0  ;;  %v17800_v36 = vpack.c.bf16 %v3281_v57, %v3280_v49  ;;  %v3282_v52 = vld [vmem:[#allocation2 + $0x120] sm:$0xff] }
 0x22f   : > { %v2594_v37 = vadd.f32 %v17359_v21, %v2300_v29  ;;  %v3574_v61 = vld [vmem:[#allocation2 + $0x109] sm:$0xff]  ;;  %3244 = vst.msk [vmem:[#allocation2 + $0x141] sm:$0xff] %vm388_vm1, %v21602_v63  ;;  %v17798_v31 = vadd.f32 %v3140_v18, %v2890_v39  ;;  %v3576_v21 = vld [vmem:[#allocation2 + $0x121] sm:$0xff]  ;;  %v17804_v29 = vpack.c.bf16 %v3283_v59, %v3282_v52 }
 0x230   : > { %21892 = vst [vmem:[#allocation12_spill] sm:$0xff] %v17791_v47  ;;  %v2893_v12 = vadd.f32 %v15038_v2, %v2596_v23  ;;  %v21606_v20 = vmax.f32 %v17791_v47, 0.0  ;;  %v17802_v13 = vpack.c.bf16 %v3575_v11, %v3574_v61  ;;  %v15072_v2 = vpop.f32.mrf.mxu0  ;;  %v17806_v23 = vpack.c.bf16 %v3577_v24, %v3576_v21  ;;  %15096 = vmatmul.mubr.msk.bf16.gmra.mxu1 %vm388_vm1, %v17800_v36  ;;  %v3286_v21 = vld [vmem:[#allocation2 + $0x150] sm:$0xff]  ;;  %v3869_v58 = vld [vmem:[#allocation2 + $0x122] sm:$0xff] }
 0x231   : > { %21893 = vst [vmem:[#allocation25_spill] sm:$0xff] %v17798_v31  ;;  %v2891_v25 = vadd.f32 %v2850_v22, %v2594_v37  ;;  %v21605_v63 = vmax.f32 %v17798_v31, 0.0  ;;  %15099 = vmatprep.mubr.msk.bf16.mxu1 %vm388_vm1, %v17804_v29  ;;  %v3578_v61 = vld [vmem:[#allocation2 + $0x139] sm:$0xff]  ;;  %v3862_v31 = vld [vmem:[#allocation2 + $0xca] sm:$0xff] }
 0x232   : > { %3249 = vst.msk [vmem:[#allocation2 + $0x181] sm:$0xff] %vm388_vm1, %v21606_v20  ;;  %v17812_v39 = vadd.f32 %v15072_v2, %v2893_v12  ;;  %15130 = vmatmul.mubr.msk.bf16.gmra.mxu0 %vm388_vm1, %v17802_v13  ;;  %v3143_v49 = vpop.f32.mrf.mxu0  ;;  %v3284_v12 = vld [vmem:[#allocation2 + $0x138] sm:$0xff]  ;;  %v3848_v20 = vld [vmem:[#allocation2 + $0x22] sm:$0xff]  ;;  %v3870_v30 = vld [vmem:[#allocation2 + $0x12a] sm:$0xff] }
 0x233   : > { %15133 = vmatprep.mubr.msk.bf16.mxu0 %vm388_vm1, %v17806_v23  ;;  %3247 = vst.msk [vmem:[#allocation2 + $0x169] sm:$0xff] %vm388_vm1, %v21605_v63  ;;  %v17826_v24 = vadd.f32 %v3143_v49, %v2891_v25  ;;  %v3287_v22 = vld [vmem:[#allocation2 + $0x158] sm:$0xff]  ;;  %v3890_v10 = vpack.c.bf16 %v3870_v30, %v3869_v58 }
 0x234   : > { %21894 = vst [vmem:[#allocation38_spill] sm:$0xff] %v17812_v39  ;;  %v21603_v59 = vmax.f32 %v17812_v39, 0.0  ;;  %v3581_v18 = vld [vmem:[#allocation2 + $0x159] sm:$0xff]  ;;  %v3580_v2 = vld [vmem:[#allocation2 + $0x151] sm:$0xff]  ;;  %v17839_v49 = vpack.c.bf16 %v3287_v22, %v3286_v21  ;;  %v3861_v39 = vld [vmem:[#allocation2 + $0xc2] sm:$0xff] }
 0x235   : > { %21895 = vst [vmem:[#allocation66_spill] sm:$0xff] %v17826_v24  ;;  %v21604_v37 = vmax.f32 %v17826_v24, 0.0  ;;  %v3847_v63 = vld [vmem:[#allocation2 + $0x1a] sm:$0xff]  ;;  %v3865_v47 = vld [vmem:[#allocation2 + $0xf2] sm:$0xff] }
 0x236   : > { %3250 = vst.msk [vmem:[#allocation2 + $0x189] sm:$0xff] %vm388_vm1, %v21603_v59  ;;  %v3285_v57 = vld [vmem:[#allocation2 + $0x140] sm:$0xff]  ;;  %v17841_v59 = vpack.c.bf16 %v3581_v18, %v3580_v2 }
 0x237   : > { %v3579_v11 = vld [vmem:[#allocation2 + $0x141] sm:$0xff]  ;;  %3248 = vst.msk [vmem:[#allocation2 + $0x171] sm:$0xff] %vm388_vm1, %v21604_v37  ;;  %v17835_v52 = vpack.c.bf16 %v3285_v57, %v3284_v12  ;;  %v3846_v57 = vld [vmem:[#allocation2 + $0xa] sm:$0xff] }
 0x238   : > { %v17837_v25 = vpack.c.bf16 %v3579_v11, %v3578_v61  ;;  %v3845_v12 = vld [vmem:[#allocation2 + $0x2] sm:$0xff]  ;;  %v3850_v24 = vld [vmem:[#allocation2 + $0x3a] sm:$0xff] }
 0x239   : > { %15100 = vmatmul.mubr.msk.bf16.gmra.mxu1 %vm388_vm1, %v17835_v52  ;;  %v3878_v18 = vpack.c.bf16 %v3846_v57, %v3845_v12  ;;  %v17862_v12 = vpack.c.bf16 %v3848_v20, %v3847_v63  ;;  %v4529_v57 = vsel %vm3355_vm5, %v17499_v8, 0  ;;  %v17882_v8 = vld [vmem:[%s21558_s3 + $0x1c] sm:$0xf]  ;;  %v3853_v63 = vld [vmem:[#allocation2 + $0x62] sm:$0xff]  ;;  %v3854_v20 = vld [vmem:[#allocation2 + $0x6a] sm:$0xff] }
 0x23a   : > { %15134 = vmatmul.mubr.msk.bf16.gmra.mxu0 %vm388_vm1, %v17837_v25  ;;  %15103 = vmatprep.mubr.msk.bf16.mxu1 %vm388_vm1, %v17839_v49  ;;  %v3288_v61 = vld [vmem:[#allocation2 + $0x168] sm:$0xff] }
 0x23b   : > { %15137 = vmatprep.mubr.msk.bf16.mxu0 %vm388_vm1, %v17841_v59  ;;  %v3582_v22 = vld [vmem:[#allocation2 + $0x169] sm:$0xff] }
 0x23e   : > { %v3289_v11 = vld [vmem:[#allocation2 + $0x170] sm:$0xff] }
 0x23f   : > { %v3583_v21 = vld [vmem:[#allocation2 + $0x171] sm:$0xff]  ;;  %v17851_v2 = vpack.c.bf16 %v3289_v11, %v3288_v61  ;;  %v17866_v61 = vpack.c.bf16 %v3850_v24, %v3849_v51  ;;  %v4822_v11 = vsel %vm3355_vm5, %v17504_v4, 0 }
 0x240   : > { %v17853_v37 = vpack.c.bf16 %v3583_v21, %v3582_v22  ;;  %v3851_v4 = vld [vmem:[#allocation2 + $0x4a] sm:$0xff]  ;;  %v3852_v51 = vld [vmem:[#allocation2 + $0x52] sm:$0xff]  ;;  %v17894_v22 = vpack.c.bf16 %v3854_v20, %v3853_v63  ;;  %v3855_v21 = vld [vmem:[#allocation2 + $0x7a] sm:$0xff] }
 0x241   : > { %15104 = vmatmul.mubr.msk.bf16.gmra.mxu1 %vm388_vm1, %v17851_v2  ;;  %v17892_v24 = vpack.c.bf16 %v3852_v51, %v3851_v4  ;;  %v3859_v63 = vld [vmem:[#allocation2 + $0xaa] sm:$0xff]  ;;  %v3860_v20 = vld [vmem:[#allocation2 + $0xb2] sm:$0xff] }
 0x242   : > { %15138 = vmatmul.mubr.msk.bf16.gmra.mxu0 %vm388_vm1, %v17853_v37  ;;  %15143 = vmatprep.mubr.msk.bf16.mxu1 %vm388_vm1, %v3878_v18  ;;  %v3856_v18 = vld [vmem:[#allocation2 + $0x82] sm:$0xff]  ;;  %v3875_v30 = vld [vmem:[#allocation2 + $0x16a] sm:$0xff]  ;;  %v3876_v58 = vld [vmem:[#allocation2 + $0x172] sm:$0xff] }
 0x243   : > { %15177 = vmatprep.mubr.msk.bf16.mxu0 %vm388_vm1, %v17472_v48  ;;  %v17877_v48 = vld [vmem:[%s21558_s3 + $0x18] sm:$0xf]  ;;  %v17904_v4 = vpack.c.bf16 %v3856_v18, %v3855_v21  ;;  %v17916_v21 = vpack.c.bf16 %v3860_v20, %v3859_v63  ;;  %v17918_v18 = vpack.c.bf16 %v3862_v31, %v3861_v39  ;;  %v3888_v20 = vpack.c.bf16 %v3866_v5, %v3865_v47  ;;  %v3867_v31 = vld [vmem:[#allocation2 + $0x10a] sm:$0xff]  ;;  %v3872_v47 = vld [vmem:[#allocation2 + $0x142] sm:$0xff] }
 0x244   : > { %v3868_v39 = vld [vmem:[#allocation2 + $0x112] sm:$0xff]  ;;  %v3871_v5 = vld [vmem:[#allocation2 + $0x13a] sm:$0xff]  ;;  %v3893_v15 = vpack.c.bf16 %v3876_v58, %v3875_v30 }
 0x245   : > { %v3889_v42 = vpack.c.bf16 %v3868_v39, %v3867_v31  ;;  %v3891_v40 = vpack.c.bf16 %v3872_v47, %v3871_v5  ;;  %v4169_v31 = vld [vmem:[#allocation2 + $0x188] sm:$0xff]  ;;  %v4168_v39 = vld [vmem:[#allocation2 + $0x180] sm:$0xff]  ;;  %v5115_v5 = vsel %vm3355_vm5, %v17877_v48, 0  ;;  %v5408_v47 = vsel %vm3355_vm5, %v17882_v8, 0 }
 0x246   : > { %v17946_v19 = vpack.c.bf16 %v4169_v31, %v4168_v39 }
 0x249   : > { %15144 = vmatmul.mubr.msk.bf16.vlgmr.msra.gmra.mxu1 %vm388_vm1, %v17862_v12 }
 0x24a   : > { %15178 = vmatmul.mubr.msk.bf16.vlgmr.msra.gmra.mxu0 %vm388_vm1, %v17479_v54  ;;  %15210 = vmatpush3.bf16.msra.mxu1 %v4529_v57  ;;  %v3857_v57 = vld [vmem:[#allocation2 + $0x92] sm:$0xff] }
 0x24b   : > { %15147 = vmatprep.mubr.msk.bf16.mxu1 %vm388_vm1, %v17866_v61  ;;  %15181 = vmatprep.mubr.msk.bf16.mxu0 %vm388_vm1, %v17557_v14 }
 0x24c   : > { %15244 = vmatpush3.bf16.msra.mxu0 %v4822_v11  ;;  %16099 = vmatprep.subr.msk.bf16.mxu1 %vm3355_vm5, %v17877_v48  ;;  %v3858_v11 = vld [vmem:[#allocation2 + $0x9a] sm:$0xff] }
 0x24d   : > { %16100 = vmatprep.subr.msk.bf16.mxu0 %vm3355_vm5, %v17882_v8  ;;  %v17906_v51 = vpack.c.bf16 %v3858_v11, %v3857_v57  ;;  %v3863_v57 = vld [vmem:[#allocation2 + $0xda] sm:$0xff]  ;;  %v3864_v11 = vld [vmem:[#allocation2 + $0xe2] sm:$0xff] }
 0x24e   : > { %v3887_v63 = vpack.c.bf16 %v3864_v11, %v3863_v57  ;;  %v3873_v57 = vld [vmem:[#allocation2 + $0x152] sm:$0xff]  ;;  %v3874_v11 = vld [vmem:[#allocation2 + $0x15a] sm:$0xff] }
 0x24f   : > { %v3892_v56 = vpack.c.bf16 %v3874_v11, %v3873_v57  ;;  %v5635_v57 = vld [vmem:[%s21558_s3 + $0x20] sm:$0xf] }
 0x250   : > { %v4461_v48 = vld [vmem:[#allocation2 + $0x181] sm:$0xff] }
 0x251   : > { %15148 = vmatmul.mubr.msk.bf16.gmra.mxu1 %vm388_vm1, %v17892_v24 }
 0x252   : > { %15182 = vmatmul.mubr.msk.bf16.gmra.mxu0 %vm388_vm1, %v17564_v26  ;;  %15151 = vmatprep.mubr.msk.bf16.mxu1 %vm388_vm1, %v17894_v22 }
 0x253   : > { %15185 = vmatprep.mubr.msk.bf16.mxu0 %vm388_vm1, %v17622_v62 }
 0x259   : > { %15152 = vmatmul.mubr.msk.bf16.gmra.mxu1 %vm388_vm1, %v17904_v4 }
 0x25a   : > { %15186 = vmatmul.mubr.msk.bf16.gmra.mxu0 %vm388_vm1, %v17629_v7  ;;  %15155 = vmatprep.mubr.msk.bf16.mxu1 %vm388_vm1, %v17906_v51 }
 0x25b   : > { %15189 = vmatprep.mubr.msk.bf16.mxu0 %vm388_vm1, %v17687_v0 }
 0x261   : > { %15156 = vmatmul.mubr.msk.bf16.gmra.mxu1 %vm388_vm1, %v17916_v21 }
 0x262   : > { %15190 = vmatmul.mubr.msk.bf16.gmra.mxu0 %vm388_vm1, %v17694_v55  ;;  %15159 = vmatprep.mubr.msk.bf16.mxu1 %vm388_vm1, %v17918_v18 }
 0x263   : > { %15193 = vmatprep.mubr.msk.bf16.mxu0 %vm388_vm1, %v17748_v6 }
 0x269   : > { %15160 = vmatmul.mubr.msk.bf16.gmra.mxu1 %vm388_vm1, %v3887_v63 }
 0x26a   : > { %15194 = vmatmul.mubr.msk.bf16.gmra.mxu0 %vm388_vm1, %v17755_v43  ;;  %15163 = vmatprep.mubr.msk.bf16.mxu1 %vm388_vm1, %v3888_v20 }
 0x26b   : > { %15197 = vmatprep.mubr.msk.bf16.mxu0 %vm388_vm1, %v17800_v36 }
 0x271   : > { %15164 = vmatmul.mubr.msk.bf16.gmra.mxu1 %vm388_vm1, %v3889_v42 }
 0x272   : > { %15198 = vmatmul.mubr.msk.bf16.gmra.mxu0 %vm388_vm1, %v17804_v29  ;;  %15167 = vmatprep.mubr.msk.bf16.mxu1 %vm388_vm1, %v3890_v10 }
 0x273   : > { %15201 = vmatprep.mubr.msk.bf16.mxu0 %vm388_vm1, %v17835_v52 }
 0x279   : > { %15168 = vmatmul.mubr.msk.bf16.gmra.mxu1 %vm388_vm1, %v3891_v40 }
 0x27a   : > { %15202 = vmatmul.mubr.msk.bf16.gmra.mxu0 %vm388_vm1, %v17839_v49  ;;  %15171 = vmatprep.mubr.msk.bf16.mxu1 %vm388_vm1, %v3892_v56 }
 0x27b   : > { %15205 = vmatprep.mubr.msk.bf16.mxu0 %vm388_vm1, %v17851_v2 }
 0x281   : > { %15172 = vmatmul.mubr.msk.bf16.gmra.mxu1 %vm388_vm1, %v3893_v15 }
 0x282   : > { %15206 = vmatmul.mubr.msk.bf16.gmra.mxu0 %vm388_vm1, %v17946_v19  ;;  %15211 = vmatprep.mubr.msk.bf16.mxu1 %vm388_vm1, %v17474_v50  ;;  %v4462_v50 = vld [vmem:[#allocation2 + $0x189] sm:$0xff] }
 0x283   : > { %15245 = vmatprep.mubr.msk.bf16.mxu0 %vm388_vm1, %v17862_v12  ;;  %v4755_v12 = vld [vmem:[#allocation2 + $0x18a] sm:$0xff] }
 0x289   : > { %15212 = vmatmul.mubr.msk.bf16.vlgmr.msra.gmra.mxu1 %vm388_vm1, %v17494_v34 }
 0x28a   : > { %15246 = vmatmul.mubr.msk.bf16.vlgmr.msra.gmra.mxu0 %vm388_vm1, %v17866_v61  ;;  %15278 = vmatpush3.bf16.msra.mxu1 %v5115_v5 }
 0x28b   : > { %15215 = vmatprep.mubr.msk.bf16.mxu1 %vm388_vm1, %v17559_v16  ;;  %15249 = vmatprep.mubr.msk.bf16.mxu0 %vm388_vm1, %v17892_v24 }
 0x28c   : > { %15312 = vmatpush3.bf16.msra.mxu0 %v5408_v47  ;;  %16101 = vmatprep.subr.msk.bf16.mxu1 %vm3355_vm5, %v5635_v57 }
 0x291   : > { %15216 = vmatmul.mubr.msk.bf16.gmra.mxu1 %vm388_vm1, %v17566_v17 }
 0x292   : > { %15250 = vmatmul.mubr.msk.bf16.gmra.mxu0 %vm388_vm1, %v17894_v22  ;;  %15219 = vmatprep.mubr.msk.bf16.mxu1 %vm388_vm1, %v17624_v45 }
 0x293   : > { %15253 = vmatprep.mubr.msk.bf16.mxu0 %vm388_vm1, %v17904_v4 }
 0x299   : > { %15220 = vmatmul.mubr.msk.bf16.gmra.mxu1 %vm388_vm1, %v17631_v1 }
 0x29a   : > { %15254 = vmatmul.mubr.msk.bf16.gmra.mxu0 %vm388_vm1, %v17906_v51  ;;  %15223 = vmatprep.mubr.msk.bf16.mxu1 %vm388_vm1, %v17689_v9 }
 0x29b   : > { %15257 = vmatprep.mubr.msk.bf16.mxu0 %vm388_vm1, %v17916_v21 }
 0x2a1   : > { %15224 = vmatmul.mubr.msk.bf16.gmra.mxu1 %vm388_vm1, %v17696_v28 }
 0x2a2   : > { %15258 = vmatmul.mubr.msk.bf16.gmra.mxu0 %vm388_vm1, %v17918_v18  ;;  %15227 = vmatprep.mubr.msk.bf16.mxu1 %vm388_vm1, %v17750_v46 }
 0x2a3   : > { %15261 = vmatprep.mubr.msk.bf16.mxu0 %vm388_vm1, %v3887_v63 }
 0x2a9   : > { %15228 = vmatmul.mubr.msk.bf16.gmra.mxu1 %vm388_vm1, %v17757_v41 }
 0x2aa   : > { %15262 = vmatmul.mubr.msk.bf16.gmra.mxu0 %vm388_vm1, %v3888_v20  ;;  %15231 = vmatprep.mubr.msk.bf16.mxu1 %vm388_vm1, %v17802_v13 }
 0x2ab   : > { %15265 = vmatprep.mubr.msk.bf16.mxu0 %vm388_vm1, %v3889_v42  ;;  %v4754_v42 = vld [vmem:[#allocation2 + $0x182] sm:$0xff] }
 0x2ac   : > { %v18014_v8 = vpack.c.bf16 %v4755_v12, %v4754_v42 }
 0x2b1   : > { %15232 = vmatmul.mubr.msk.bf16.gmra.mxu1 %vm388_vm1, %v17806_v23 }
 0x2b2   : > { %15266 = vmatmul.mubr.msk.bf16.gmra.mxu0 %vm388_vm1, %v3890_v10  ;;  %15235 = vmatprep.mubr.msk.bf16.mxu1 %vm388_vm1, %v17837_v25  ;;  %v18012_v10 = vpack.c.bf16 %v4462_v50, %v4461_v48 }
 0x2b3   : > { %15269 = vmatprep.mubr.msk.bf16.mxu0 %vm388_vm1, %v3891_v40 }
 0x2b9   : > { %15236 = vmatmul.mubr.msk.bf16.gmra.mxu1 %vm388_vm1, %v17841_v59 }
 0x2ba   : > { %15270 = vmatmul.mubr.msk.bf16.gmra.mxu0 %vm388_vm1, %v3892_v56  ;;  %15239 = vmatprep.mubr.msk.bf16.mxu1 %vm388_vm1, %v17853_v37  ;;  %v5701_v56 = vsel %vm3355_vm5, %v5635_v57, 0 }
 0x2bb   : > { %15273 = vmatprep.mubr.msk.bf16.mxu0 %vm388_vm1, %v3893_v15  ;;  %v18027_v15 = vld [vmem:[%s21559_s4] ss:$0 sm:$0xff] }
 0x2c1   : > { %15240 = vmatmul.mubr.msk.bf16.gmra.mxu1 %vm388_vm1, %v18012_v10 }
 0x2c2   : > { %15274 = vmatmul.mubr.msk.bf16.gmra.mxu0 %vm388_vm1, %v18014_v8  ;;  %15279 = vmatprep.mubr.msk.bf16.mxu1 %vm388_vm1, %v17479_v54 }
 0x2c3   : > { %15313 = vmatprep.mubr.msk.bf16.mxu0 %vm388_vm1, %v17494_v34 }
 0x2c4   : > { %v15077_v40 = vpop.f32.mrf.mxu1 }
 0x2c5   : > { %v15111_v24 = vpop.f32.mrf.mxu0  ;;  %v3522_v54 = vadd.f32 %v15077_v40, %v18027_v15 }
 0x2c6   : > { %v3393_v34 = vpop.f32.mrf.mxu1 }
 0x2c7   : > { %v3686_v4 = vpop.f32.mrf.mxu0  ;;  %v18039_v51 = vadd.f32 %v15111_v24, %v3522_v54  ;;  %v3520_v21 = vadd.f32 %v18027_v15, %v3393_v34 }
 0x2c8   : > { %v15078_v18 = vpop.f32.mrf.mxu1 }
 0x2c9   : > { %15280 = vmatmul.mubr.msk.bf16.vlgmr.msra.gmra.mxu1 %vm388_vm1, %v17557_v14  ;;  %v15112_v14 = vpop.f32.mrf.mxu0  ;;  %v18042_v63 = vadd.f32 %v3686_v4, %v3520_v21 }
 0x2ca   : > { %15314 = vmatmul.mubr.msk.bf16.vlgmr.msra.gmra.mxu0 %vm388_vm1, %v17559_v16  ;;  %15346 = vmatpush3.bf16.msra.mxu1 %v5701_v56  ;;  %v3523_v16 = vadd.f32 %v15078_v18, %v18027_v15  ;;  %v3396_v20 = vpop.f32.mrf.mxu1 }
 0x2cb   : > { %15283 = vmatprep.mubr.msk.bf16.mxu1 %vm388_vm1, %v17564_v26  ;;  %15317 = vmatprep.mubr.msk.bf16.mxu0 %vm388_vm1, %v17566_v17  ;;  %v3689_v11 = vpop.f32.mrf.mxu0  ;;  %v3521_v26 = vadd.f32 %v18027_v15, %v3396_v20 }
 0x2cc   : > { %v18045_v30 = vadd.f32 %v15112_v14, %v3523_v16 }
 0x2cd   : > { %v15081_v58 = vpop.f32.mrf.mxu1  ;;  %v15115_v17 = vpop.f32.mrf.mxu0  ;;  %v18052_v31 = vadd.f32 %v3689_v11, %v3521_v26 }
 0x2ce   : > { %v3526_v39 = vadd.f32 %v15081_v58, %v18027_v15 }
 0x2cf   : > { %v3409_v5 = vpop.f32.mrf.mxu1  ;;  %v3702_v47 = vpop.f32.mrf.mxu0 }
 0x2d0   : > { %v18059_v57 = vadd.f32 %v15115_v17, %v3526_v39  ;;  %v3524_v50 = vadd.f32 %v18027_v15, %v3409_v5 }
 0x2d1   : > { %15284 = vmatmul.mubr.msk.bf16.gmra.mxu1 %vm388_vm1, %v17622_v62  ;;  %v15082_v62 = vpop.f32.mrf.mxu1  ;;  %v15116_v42 = vpop.f32.mrf.mxu0 }
 0x2d2   : > { %15318 = vmatmul.mubr.msk.bf16.gmra.mxu0 %vm388_vm1, %v17624_v45  ;;  %15287 = vmatprep.mubr.msk.bf16.mxu1 %vm388_vm1, %v17629_v7  ;;  %v18062_v12 = vadd.f32 %v3702_v47, %v3524_v50  ;;  %v3527_v45 = vadd.f32 %v15082_v62, %v18027_v15 }
 0x2d3   : > { %15321 = vmatprep.mubr.msk.bf16.mxu0 %vm388_vm1, %v17631_v1  ;;  %v3412_v48 = vpop.f32.mrf.mxu1  ;;  %v3705_v56 = vpop.f32.mrf.mxu0 }
 0x2d4   : > { %v18065_v40 = vadd.f32 %v15116_v42, %v3527_v45  ;;  %v3525_v7 = vadd.f32 %v18027_v15, %v3412_v48 }
 0x2d6   : > { %v15085_v24 = vpop.f32.mrf.mxu1  ;;  %v18072_v54 = vadd.f32 %v3705_v56, %v3525_v7 }
 0x2d7   : > { %v15119_v1 = vpop.f32.mrf.mxu0  ;;  %v3530_v34 = vadd.f32 %v15085_v24, %v18027_v15 }
 0x2d8   : > { %v3425_v4 = vpop.f32.mrf.mxu1 }
 0x2d9   : > { %15288 = vmatmul.mubr.msk.bf16.gmra.mxu1 %vm388_vm1, %v17687_v0  ;;  %v3718_v21 = vpop.f32.mrf.mxu0  ;;  %v18079_v18 = vadd.f32 %v15119_v1, %v3530_v34  ;;  %v3528_v14 = vadd.f32 %v18027_v15, %v3425_v4 }
 0x2da   : > { %15322 = vmatmul.mubr.msk.bf16.gmra.mxu0 %vm388_vm1, %v17689_v9  ;;  %15291 = vmatprep.mubr.msk.bf16.mxu1 %vm388_vm1, %v17694_v55  ;;  %v15086_v0 = vpop.f32.mrf.mxu1 }
 0x2db   : > { %15325 = vmatprep.mubr.msk.bf16.mxu0 %vm388_vm1, %v17696_v28  ;;  %v15120_v16 = vpop.f32.mrf.mxu0  ;;  %v18082_v20 = vadd.f32 %v3718_v21, %v3528_v14  ;;  %v3531_v9 = vadd.f32 %v15086_v0, %v18027_v15 }
 0x2dc   : > { %v3428_v11 = vpop.f32.mrf.mxu1 }
 0x2dd   : > { %v3721_v26 = vpop.f32.mrf.mxu0  ;;  %v18085_v58 = vadd.f32 %v15120_v16, %v3531_v9  ;;  %v3529_v55 = vadd.f32 %v18027_v15, %v3428_v11 }
 0x2df   : > { %v15089_v17 = vpop.f32.mrf.mxu1  ;;  %v18092_v39 = vadd.f32 %v3721_v26, %v3529_v55 }
 0x2e0   : > { %v15123_v28 = vpop.f32.mrf.mxu0  ;;  %v3534_v5 = vadd.f32 %v15089_v17, %v18027_v15 }
 0x2e1   : > { %15292 = vmatmul.mubr.msk.bf16.gmra.mxu1 %vm388_vm1, %v17748_v6  ;;  %v3441_v47 = vpop.f32.mrf.mxu1 }
 0x2e2   : > { %15326 = vmatmul.mubr.msk.bf16.gmra.mxu0 %vm388_vm1, %v17750_v46  ;;  %15295 = vmatprep.mubr.msk.bf16.mxu1 %vm388_vm1, %v17755_v43  ;;  %v3734_v50 = vpop.f32.mrf.mxu0  ;;  %v18099_v62 = vadd.f32 %v15123_v28, %v3534_v5  ;;  %v3532_v42 = vadd.f32 %v18027_v15, %v3441_v47 }
 0x2e3   : > { %15329 = vmatprep.mubr.msk.bf16.mxu0 %vm388_vm1, %v17757_v41  ;;  %v15090_v6 = vpop.f32.mrf.mxu1 }
 0x2e4   : > { %v15124_v45 = vpop.f32.mrf.mxu0  ;;  %v18102_v48 = vadd.f32 %v3734_v50, %v3532_v42  ;;  %v3535_v46 = vadd.f32 %v15090_v6, %v18027_v15 }
 0x2e5   : > { %v3444_v56 = vpop.f32.mrf.mxu1 }
 0x2e6   : > { %v3737_v7 = vpop.f32.mrf.mxu0  ;;  %v18105_v24 = vadd.f32 %v15124_v45, %v3535_v46  ;;  %v3533_v43 = vadd.f32 %v18027_v15, %v3444_v56 }
 0x2e8   : > { %v15093_v1 = vpop.f32.mrf.mxu1  ;;  %v18112_v34 = vadd.f32 %v3737_v7, %v3533_v43  ;;  %v5047_v43 = vld [vmem:[#allocation2 + $0x198] sm:$0xff] }
 0x2e9   : > { %v15127_v41 = vpop.f32.mrf.mxu0  ;;  %15296 = vmatmul.mubr.msk.bf16.gmra.mxu1 %vm388_vm1, %v17800_v36  ;;  %v3538_v4 = vadd.f32 %v15093_v1, %v18027_v15 }
 0x2ea   : > { %15330 = vmatmul.mubr.msk.bf16.gmra.mxu0 %vm388_vm1, %v17802_v13  ;;  %15299 = vmatprep.mubr.msk.bf16.mxu1 %vm388_vm1, %v17804_v29  ;;  %v3457_v21 = vpop.f32.mrf.mxu1 }
 0x2eb   : > { %15333 = vmatprep.mubr.msk.bf16.mxu0 %vm388_vm1, %v17806_v23  ;;  %v3750_v14 = vpop.f32.mrf.mxu0  ;;  %v18119_v0 = vadd.f32 %v15127_v41, %v3538_v4  ;;  %v3536_v16 = vadd.f32 %v18027_v15, %v3457_v21  ;;  %v5048_v41 = vld [vmem:[#allocation2 + $0x1a0] sm:$0xff] }
 0x2ec   : > { %v15094_v36 = vpop.f32.mrf.mxu1  ;;  %v5340_v4 = vld [vmem:[#allocation2 + $0x199] sm:$0xff]  ;;  %v5341_v21 = vld [vmem:[#allocation2 + $0x1a1] sm:$0xff] }
 0x2ed   : > { %v15128_v9 = vpop.f32.mrf.mxu0  ;;  %v18122_v11 = vadd.f32 %v3750_v14, %v3536_v16  ;;  %v3539_v13 = vadd.f32 %v15094_v36, %v18027_v15 }
 0x2ee   : > { %v18125_v26 = vpop.f32.mrf.mxu1 }
 0x2ef   : > { %v18127_v55 = vpop.f32.mrf.mxu0  ;;  %v18129_v29 = vadd.f32 %v15128_v9, %v3539_v13  ;;  %v5065_v13 = vpack.c.bf16 %v5048_v41, %v5047_v43  ;;  %v5605_v43 = vld [vmem:[#allocation2 + $0x4a] sm:$0xff] }
 0x2f0   : > { %v15097_v17 = vpop.f32.mrf.mxu1 }
 0x2f1   : > { %15300 = vmatmul.mubr.msk.bf16.gmra.mxu1 %vm388_vm1, %v17835_v52  ;;  %v3542_v28 = vadd.f32 %v15097_v17, %v18027_v15  ;;  %v5358_v17 = vpack.c.bf16 %v5341_v21, %v5340_v4 }
 0x2f2   : > { %v15131_v23 = vpop.f32.mrf.mxu0  ;;  %15334 = vmatmul.mubr.msk.bf16.gmra.mxu0 %vm388_vm1, %v17837_v25  ;;  %15303 = vmatprep.mubr.msk.bf16.mxu1 %vm388_vm1, %v17839_v49  ;;  %v3473_v5 = vpop.f32.mrf.mxu1 }
 0x2f3   : > { %15337 = vmatprep.mubr.msk.bf16.mxu0 %vm388_vm1, %v17841_v59  ;;  %v18140_v50 = vadd.f32 %v15131_v23, %v3542_v28  ;;  %v3540_v42 = vadd.f32 %v18027_v15, %v3473_v5 }
 0x2f4   : > { %v3766_v47 = vpop.f32.mrf.mxu0  ;;  %v15098_v6 = vpop.f32.mrf.mxu1 }
 0x2f5   : > { %v18143_v52 = vadd.f32 %v3766_v47, %v3540_v42  ;;  %v3543_v25 = vadd.f32 %v15098_v6, %v18027_v15 }
 0x2f6   : > { %v15132_v45 = vpop.f32.mrf.mxu0  ;;  %v18146_v46 = vpop.f32.mrf.mxu1 }
 0x2f7   : > { %v18150_v49 = vadd.f32 %v15132_v45, %v3543_v25 }
 0x2f8   : > { %v18148_v56 = vpop.f32.mrf.mxu0 }
 0x2f9   : > { %v15101_v7 = vpop.f32.mrf.mxu1  ;;  %15304 = vmatmul.mubr.msk.bf16.gmra.mxu1 %vm388_vm1, %v17851_v2 }
 0x2fa   : > { %v15135_v59 = vpop.f32.mrf.mxu0  ;;  %15338 = vmatmul.mubr.msk.bf16.gmra.mxu0 %vm388_vm1, %v17853_v37  ;;  %v3546_v1 = vadd.f32 %v15101_v7, %v18027_v15  ;;  %15307 = vmatprep.mubr.msk.bf16.mxu1 %vm388_vm1, %v17946_v19 }
 0x2fb   : > { %15341 = vmatprep.mubr.msk.bf16.mxu0 %vm388_vm1, %v18012_v10  ;;  %v3489_v14 = vpop.f32.mrf.mxu1 }
 0x2fc   : > { %v3782_v16 = vpop.f32.mrf.mxu0  ;;  %v18161_v36 = vadd.f32 %v15135_v59, %v3546_v1  ;;  %v3544_v2 = vadd.f32 %v18027_v15, %v3489_v14  ;;  %v5606_v1 = vld [vmem:[#allocation2 + $0x52] sm:$0xff] }
 0x2fd   : > { %v15102_v9 = vpop.f32.mrf.mxu1 }
 0x2fe   : > { %v15136_v37 = vpop.f32.mrf.mxu0  ;;  %v18164_v23 = vadd.f32 %v3782_v16, %v3544_v2  ;;  %v3547_v19 = vadd.f32 %v15102_v9, %v18027_v15  ;;  %v5637_v9 = vpack.c.bf16 %v5606_v1, %v5605_v43  ;;  %v5611_v1 = vld [vmem:[#allocation2 + $0x92] sm:$0xff] }
 0x2ff   : > { %v18167_v28 = vpop.f32.mrf.mxu1 }
 0x300   : > { %v18169_v10 = vpop.f32.mrf.mxu0  ;;  %v18171_v5 = vadd.f32 %v15136_v37, %v3547_v19 }
 0x301   : > { %v15105_v47 = vpop.f32.mrf.mxu1  ;;  %15308 = vmatmul.mubr.msk.bf16.gmra.mxu1 %vm388_vm1, %v5065_v13 }
 0x302   : > { %v15139_v42 = vpop.f32.mrf.mxu0  ;;  %15342 = vmatmul.mubr.msk.bf16.gmra.mxu0 %vm388_vm1, %v5358_v17  ;;  %v3550_v6 = vadd.f32 %v15105_v47, %v18027_v15  ;;  %15347 = vmatprep.mubr.msk.bf16.mxu1 %vm388_vm1, %v17866_v61 }
 0x303   : > { %v3505_v45 = vpop.f32.mrf.mxu1 }
 0x304   : > { %v3798_v25 = vpop.f32.mrf.mxu0  ;;  %v18178_v7 = vadd.f32 %v15139_v42, %v3550_v6  ;;  %v3548_v59 = vadd.f32 %v18027_v15, %v3505_v45  ;;  %v5609_v45 = vld [vmem:[#allocation2 + $0x7a] sm:$0xff] }
 0x305   : > { %v15106_v41 = vpop.f32.mrf.mxu1 }
 0x306   : > { %v15140_v4 = vpop.f32.mrf.mxu0  ;;  %v18181_v21 = vadd.f32 %v3798_v25, %v3548_v59  ;;  %v3551_v14 = vadd.f32 %v15106_v41, %v18027_v15  ;;  %v5610_v25 = vld [vmem:[#allocation2 + $0x82] sm:$0xff]  ;;  %v5612_v41 = vld [vmem:[#allocation2 + $0x9a] sm:$0xff] }
 0x307   : > { %v18184_v16 = vpop.f32.mrf.mxu1 }
 0x308   : > { %v18186_v2 = vpop.f32.mrf.mxu0  ;;  %v18188_v61 = vadd.f32 %v15140_v4, %v3551_v14 }
 0x309   : > { %21896 = vst [vmem:[#allocation81_spill] sm:$0xff] %v18186_v2  ;;  %v15145_v37 = vpop.f32.mrf.mxu1  ;;  %15348 = vmatmul.mubr.msk.bf16.vlgmr.msra.gmra.mxu1 %vm388_vm1, %v5637_v9  ;;  %v5999_v2 = vld [vmem:[#allocation2] sm:$0xff] }
 0x30a   : > { %v15179_v13 = vpop.f32.mrf.mxu0  ;;  %v4108_v17 = vadd.f32 %v15145_v37, %v18039_v51  ;;  %15351 = vmatprep.mubr.msk.bf16.mxu1 %vm388_vm1, %v17894_v22  ;;  %v5639_v22 = vpack.c.bf16 %v5610_v25, %v5609_v45  ;;  %v5613_v25 = vld [vmem:[#allocation2 + $0xaa] sm:$0xff] }
 0x30b   : > { %v3979_v19 = vpop.f32.mrf.mxu1 }
 0x30c   : > { %v4272_v47 = vpop.f32.mrf.mxu0  ;;  %v18194_v42 = vadd.f32 %v15179_v13, %v4108_v17  ;;  %v4106_v6 = vadd.f32 %v3979_v19, %v18042_v63  ;;  %v5640_v63 = vpack.c.bf16 %v5612_v41, %v5611_v1  ;;  %v5616_v1 = vld [vmem:[#allocation2 + $0xca] sm:$0xff] }
 0x30d   : > { %v15146_v59 = vpop.f32.mrf.mxu1 }
 0x30e   : > { %v15180_v43 = vpop.f32.mrf.mxu0  ;;  %v18197_v4 = vadd.f32 %v4272_v47, %v4106_v6  ;;  %v4109_v14 = vadd.f32 %v15146_v59, %v18045_v30  ;;  %v5614_v59 = vld [vmem:[#allocation2 + $0xb2] sm:$0xff] }
 0x30f   : > { %v3982_v51 = vpop.f32.mrf.mxu1 }
 0x310   : > { %v18200_v9 = vpop.f32.mrf.mxu0  ;;  %v18202_v37 = vadd.f32 %v15180_v43, %v4109_v14  ;;  %v18205_v13 = vadd.f32 %v3982_v51, %v18052_v31  ;;  %v5615_v14 = vld [vmem:[#allocation2 + $0xc2] sm:$0xff] }
 0x311   : > { %v15149_v17 = vpop.f32.mrf.mxu1  ;;  %15352 = vmatmul.mubr.msk.bf16.gmra.mxu1 %vm388_vm1, %v5639_v22 }
 0x312   : > { %v15183_v19 = vpop.f32.mrf.mxu0  ;;  %v4112_v35 = vadd.f32 %v15149_v17, %v18059_v57  ;;  %15355 = vmatprep.mubr.msk.bf16.mxu1 %vm388_vm1, %v5640_v63  ;;  %v5641_v63 = vpack.c.bf16 %v5614_v59, %v5613_v25  ;;  %v5617_v59 = vld [vmem:[#allocation2 + $0xda] sm:$0xff] }
 0x313   : > { %v3995_v47 = vpop.f32.mrf.mxu1 }
 0x314   : > { %v4288_v30 = vpop.f32.mrf.mxu0  ;;  %v18210_v6 = vadd.f32 %v15183_v19, %v4112_v35  ;;  %v4110_v45 = vadd.f32 %v3995_v47, %v18062_v12  ;;  %v5642_v12 = vpack.c.bf16 %v5616_v1, %v5615_v14  ;;  %v5620_v14 = vld [vmem:[#allocation2 + $0xfa] sm:$0xff] }
 0x315   : > { %v15150_v43 = vpop.f32.mrf.mxu1 }
 0x316   : > { %v15184_v31 = vpop.f32.mrf.mxu0  ;;  %v18213_v41 = vadd.f32 %v4288_v30, %v4110_v45  ;;  %v4113_v51 = vadd.f32 %v15150_v43, %v18065_v40  ;;  %v5618_v43 = vld [vmem:[#allocation2 + $0xe2] sm:$0xff] }
 0x317   : > { %v3998_v22 = vpop.f32.mrf.mxu1 }
 0x318   : > { %v18216_v57 = vpop.f32.mrf.mxu0  ;;  %v18218_v17 = vadd.f32 %v15184_v31, %v4113_v51  ;;  %v18221_v35 = vadd.f32 %v3998_v22, %v18072_v54  ;;  %v5619_v51 = vld [vmem:[#allocation2 + $0xf2] sm:$0xff] }
 0x319   : > { %v15153_v19 = vpop.f32.mrf.mxu1  ;;  %15356 = vmatmul.mubr.msk.bf16.gmra.mxu1 %vm388_vm1, %v5641_v63 }
 0x31a   : > { %v15187_v47 = vpop.f32.mrf.mxu0  ;;  %v4116_v44 = vadd.f32 %v15153_v19, %v18079_v18  ;;  %15359 = vmatprep.mubr.msk.bf16.mxu1 %vm388_vm1, %v5642_v12  ;;  %v5643_v12 = vpack.c.bf16 %v5618_v43, %v5617_v59 }
 0x31b   : > { %v4011_v30 = vpop.f32.mrf.mxu1 }
 0x31c   : > { %v4304_v40 = vpop.f32.mrf.mxu0  ;;  %v18226_v45 = vadd.f32 %v15187_v47, %v4116_v44  ;;  %v4114_v25 = vadd.f32 %v4011_v30, %v18082_v20  ;;  %v5644_v20 = vpack.c.bf16 %v5620_v14, %v5619_v51  ;;  %v5623_v14 = vld [vmem:[#allocation2 + $0x122] sm:$0xff] }
 0x31d   : > { %v15154_v31 = vpop.f32.mrf.mxu1 }
 0x31e   : > { %v15188_v54 = vpop.f32.mrf.mxu0  ;;  %v18229_v1 = vadd.f32 %v4304_v40, %v4114_v25  ;;  %v4117_v22 = vadd.f32 %v15154_v31, %v18085_v58  ;;  %v6031_v58 = vld [vmem:[%s21560_s5] sm:$0xf]  ;;  %v5621_v31 = vld [vmem:[#allocation2 + $0x10a] sm:$0xff] }
 0x31f   : > { %v4014_v63 = vpop.f32.mrf.mxu1  ;;  %16102 = vmatprep.subr.msk.bf16.mxu0 %vm3355_vm5, %v6031_v58 }
 0x320   : > { %v18232_v18 = vpop.f32.mrf.mxu0  ;;  %v18234_v19 = vadd.f32 %v15188_v54, %v4117_v22  ;;  %v18237_v44 = vadd.f32 %v4014_v63, %v18092_v39  ;;  %v6097_v39 = vsel %vm3355_vm5, %v6031_v58, 0  ;;  %v5622_v54 = vld [vmem:[#allocation2 + $0x112] sm:$0xff]  ;;  %v5624_v22 = vld [vmem:[#allocation2 + $0x12a] sm:$0xff] }
 0x321   : > { %v15157_v47 = vpop.f32.mrf.mxu1  ;;  %15360 = vmatmul.mubr.msk.bf16.gmra.mxu1 %vm388_vm1, %v5643_v12  ;;  %15380 = vmatpush3.bf16.msra.mxu0 %v6097_v39  ;;  %v5645_v27 = vpack.c.bf16 %v5622_v54, %v5621_v31  ;;  %v5625_v54 = vld [vmem:[#allocation2 + $0x13a] sm:$0xff] }
 0x322   : > { %v15191_v30 = vpop.f32.mrf.mxu0  ;;  %v4120_v60 = vadd.f32 %v15157_v47, %v18099_v62  ;;  %15363 = vmatprep.mubr.msk.bf16.mxu1 %vm388_vm1, %v5644_v20 }
 0x323   : > { %v4027_v40 = vpop.f32.mrf.mxu1 }
 0x324   : > { %v4320_v25 = vpop.f32.mrf.mxu0  ;;  %v18247_v59 = vadd.f32 %v15191_v30, %v4120_v60  ;;  %v4118_v43 = vadd.f32 %v4027_v40, %v18102_v48  ;;  %v5646_v48 = vpack.c.bf16 %v5624_v22, %v5623_v14  ;;  %v5628_v14 = vld [vmem:[#allocation2 + $0x15a] sm:$0xff] }
 0x325   : > { %v15158_v62 = vpop.f32.mrf.mxu1 }
 0x326   : > { %v15192_v51 = vpop.f32.mrf.mxu0  ;;  %v18250_v63 = vadd.f32 %v4320_v25, %v4118_v43  ;;  %v4121_v12 = vadd.f32 %v15158_v62, %v18105_v24  ;;  %v5626_v62 = vld [vmem:[#allocation2 + $0x142] sm:$0xff] }
 0x327   : > { %v4030_v20 = vpop.f32.mrf.mxu1 }
 0x328   : > { %v18253_v47 = vpop.f32.mrf.mxu0  ;;  %v18255_v58 = vadd.f32 %v15192_v51, %v4121_v12  ;;  %v18258_v60 = vadd.f32 %v4030_v20, %v18112_v34  ;;  %v5627_v12 = vld [vmem:[#allocation2 + $0x152] sm:$0xff] }
 0x329   : > { %21897 = vst [vmem:[#allocation15_spill] sm:$0xff] %v18253_v47  ;;  %v15161_v30 = vpop.f32.mrf.mxu1  ;;  %15364 = vmatmul.mubr.msk.bf16.gmra.mxu1 %vm388_vm1, %v5645_v27 }
 0x32a   : > { %21898 = vst [vmem:[#allocation26_spill] sm:$0xff] %v18258_v60  ;;  %v15195_v40 = vpop.f32.mrf.mxu0  ;;  %v4124_v39 = vadd.f32 %v15161_v30, %v18119_v0  ;;  %15367 = vmatprep.mubr.msk.bf16.mxu1 %vm388_vm1, %v5646_v48  ;;  %v5647_v48 = vpack.c.bf16 %v5626_v62, %v5625_v54 }
 0x32b   : > { %v4043_v25 = vpop.f32.mrf.mxu1 }
 0x32c   : > { %v4336_v24 = vpop.f32.mrf.mxu0  ;;  %v18263_v43 = vadd.f32 %v15195_v40, %v4124_v39  ;;  %v4122_v31 = vadd.f32 %v4043_v25, %v18122_v11  ;;  %v5648_v40 = vpack.c.bf16 %v5628_v14, %v5627_v12 }
 0x32d   : > { %v15162_v51 = vpop.f32.mrf.mxu1 }
 0x32e   : > { %v15196_v34 = vpop.f32.mrf.mxu0  ;;  %v18266_v22 = vadd.f32 %v4336_v24, %v4122_v31  ;;  %v4125_v27 = vadd.f32 %v15162_v51, %v18129_v29  ;;  %v5629_v51 = vld [vmem:[#allocation2 + $0x16a] sm:$0xff] }
 0x32f   : > { %v18269_v20 = vpop.f32.mrf.mxu1 }
 0x330   : > { %21899 = vst [vmem:[#allocation40_spill] sm:$0xff] %v18269_v20  ;;  %v18271_v0 = vpop.f32.mrf.mxu0  ;;  %v18273_v30 = vadd.f32 %v15196_v34, %v4125_v27 }
 0x331   : > { %21900 = vst [vmem:[#allocation67_spill] sm:$0xff] %v18271_v0  ;;  %v15165_v39 = vpop.f32.mrf.mxu1  ;;  %15368 = vmatmul.mubr.msk.bf16.gmra.mxu1 %vm388_vm1, %v5647_v48  ;;  %v5630_v0 = vld [vmem:[#allocation2 + $0x172] sm:$0xff] }
 0x332   : > { %v15199_v11 = vpop.f32.mrf.mxu0  ;;  %v4128_v25 = vadd.f32 %v15165_v39, %v18140_v50  ;;  %15371 = vmatprep.mubr.msk.bf16.mxu1 %vm388_vm1, %v5648_v40  ;;  %v5649_v50 = vpack.c.bf16 %v5630_v0, %v5629_v51 }
 0x333   : > { %v4059_v24 = vpop.f32.mrf.mxu1 }
 0x334   : > { %v4352_v31 = vpop.f32.mrf.mxu0  ;;  %v18278_v47 = vadd.f32 %v15199_v11, %v4128_v25  ;;  %v4126_v29 = vadd.f32 %v4059_v24, %v18143_v52  ;;  %v5633_v11 = vld [vmem:[#allocation2 + $0x19a] sm:$0xff]  ;;  %v5634_v25 = vld [vmem:[#allocation2 + $0x1a2] sm:$0xff] }
 0x335   : > { %v15166_v54 = vpop.f32.mrf.mxu1 }
 0x336   : > { %v15200_v62 = vpop.f32.mrf.mxu0  ;;  %v18281_v34 = vadd.f32 %v4352_v31, %v4126_v29  ;;  %v4129_v12 = vadd.f32 %v15166_v54, %v18150_v49  ;;  %v5651_v54 = vpack.c.bf16 %v5634_v25, %v5633_v11 }
 0x337   : > { %v18284_v14 = vpop.f32.mrf.mxu1 }
 0x338   : > { %21901 = vst [vmem:[#allocation84_spill] sm:$0xff] %v18284_v14  ;;  %v18286_v27 = vpop.f32.mrf.mxu0  ;;  %v18288_v48 = vadd.f32 %v15200_v62, %v4129_v12 }
 0x339   : > { %21902 = vst [vmem:[#allocation6_spill] sm:$0xff] %v18286_v27  ;;  %v15169_v40 = vpop.f32.mrf.mxu1  ;;  %15372 = vmatmul.mubr.msk.bf16.gmra.mxu1 %vm388_vm1, %v5649_v50 }
 0x33a   : > { %v15203_v39 = vpop.f32.mrf.mxu0  ;;  %v4132_v52 = vadd.f32 %v15169_v40, %v18161_v36  ;;  %15375 = vmatprep.mubr.msk.bf16.mxu1 %vm388_vm1, %v18014_v8 }
 0x33b   : > { %v4075_v24 = vpop.f32.mrf.mxu1 }
 0x33c   : > { %v4368_v49 = vpop.f32.mrf.mxu0  ;;  %v18294_v31 = vadd.f32 %v15203_v39, %v4132_v52  ;;  %v4130_v29 = vadd.f32 %v4075_v24, %v18164_v23 }
 0x33d   : > { %v15170_v0 = vpop.f32.mrf.mxu1 }
 0x33e   : > { %v15204_v51 = vpop.f32.mrf.mxu0  ;;  %v18297_v62 = vadd.f32 %v4368_v49, %v4130_v29  ;;  %v4133_v12 = vadd.f32 %v15170_v0, %v18171_v5 }
 0x33f   : > { %v18300_v50 = vpop.f32.mrf.mxu1 }
 0x340   : > { %21903 = vst [vmem:[#allocation28_spill] sm:$0xff] %v18300_v50  ;;  %v18302_v36 = vpop.f32.mrf.mxu0  ;;  %v18304_v8 = vadd.f32 %v15204_v51, %v4133_v12 }
 0x341   : > { %21904 = vst [vmem:[#allocation27_spill] sm:$0xff] %v18302_v36  ;;  %v15173_v40 = vpop.f32.mrf.mxu1  ;;  %15376 = vmatmul.mubr.msk.bf16.gmra.mxu1 %vm388_vm1, %v5651_v54 }
 0x342   : > { %v15207_v27 = vpop.f32.mrf.mxu0  ;;  %v4136_v39 = vadd.f32 %v15173_v40, %v18178_v7 }
 0x343   : > { %v4091_v23 = vpop.f32.mrf.mxu1 }
 0x344   : > { %v4384_v52 = vpop.f32.mrf.mxu0  ;;  %v18308_v24 = vadd.f32 %v15207_v27, %v4136_v39  ;;  %v4134_v11 = vadd.f32 %v4091_v23, %v18181_v21 }
 0x345   : > { %v15174_v25 = vpop.f32.mrf.mxu1 }
 0x346   : > { %v15208_v5 = vpop.f32.mrf.mxu0  ;;  %v18311_v49 = vadd.f32 %v4384_v52, %v4134_v11  ;;  %v4137_v29 = vadd.f32 %v15174_v25, %v18188_v61 }
 0x347   : > { %v18314_v0 = vpop.f32.mrf.mxu1 }
 0x348   : > { %21905 = vst [vmem:[#allocation42_spill] sm:$0xff] %v18314_v0  ;;  %v18316_v51 = vpop.f32.mrf.mxu0  ;;  %v18318_v12 = vadd.f32 %v15208_v5, %v4137_v29 }
 0x349   : > { %21906 = vst [vmem:[#allocation68_spill] sm:$0xff] %v18316_v51  ;;  %v15213_v54 = vpop.f32.mrf.mxu1 }
 0x34a   : > { %v18320_v7 = vpop.f32.mrf.mxu0  ;;  %v18323_v27 = vadd.f32 %v15213_v54, %v18194_v42 }
 0x34b   : > { %v4565_v40 = vpop.f32.mrf.mxu1 }
 0x34c   : > { %v18325_v21 = vpop.f32.mrf.mxu0  ;;  %v18328_v39 = vadd.f32 %v4565_v40, %v18197_v4 }
 0x34d   : > { %v15214_v23 = vpop.f32.mrf.mxu1 }
 0x34e   : > { %v18330_v61 = vpop.f32.mrf.mxu0  ;;  %v18333_v52 = vadd.f32 %v15214_v23, %v18202_v37 }
 0x34f   : > { %v18335_v11 = vpop.f32.mrf.mxu1 }
 0x350   : > { %v18337_v25 = vpop.f32.mrf.mxu0 }
 0x351   : > { %v15217_v5 = vpop.f32.mrf.mxu1 }
 0x352   : > { %v18339_v29 = vpop.f32.mrf.mxu0  ;;  %v18342_v42 = vadd.f32 %v15217_v5, %v18210_v6 }
 0x353   : > { %v4581_v54 = vpop.f32.mrf.mxu1 }
 0x354   : > { %v18344_v51 = vpop.f32.mrf.mxu0  ;;  %v18347_v4 = vadd.f32 %v4581_v54, %v18213_v41 }
 0x355   : > { %v15218_v40 = vpop.f32.mrf.mxu1 }
 0x356   : > { %v18349_v0 = vpop.f32.mrf.mxu0  ;;  %v18352_v37 = vadd.f32 %v15218_v40, %v18218_v17  ;;  %v6324_v17 = vld [vmem:[%s21560_s5 + $0x4] sm:$0xf] }
 0x357   : > { %v18354_v23 = vpop.f32.mrf.mxu1  ;;  %16103 = vmatprep.subr.msk.bf16.mxu1 %vm3355_vm5, %v6324_v17  ;;  %v6390_v14 = vsel %vm3355_vm5, %v6324_v17, 0 }
 0x358   : > { %v18356_v36 = vpop.f32.mrf.mxu0  ;;  %15414 = vmatpush3.bf16.msra.mxu1 %v6390_v14 }
 0x359   : > { %v15221_v50 = vpop.f32.mrf.mxu1 }
 0x35a   : > { %v18358_v60 = vpop.f32.mrf.mxu0  ;;  %v18361_v6 = vadd.f32 %v15221_v50, %v18226_v45  ;;  %v6000_v45 = vld [vmem:[#allocation2 + $0x8] sm:$0xff] }
 0x35b   : > { %v4597_v5 = vpop.f32.mrf.mxu1  ;;  %v6292_v50 = vld [vmem:[#allocation2 + $0x1] sm:$0xff] }
 0x35c   : > { %v18363_v3 = vpop.f32.mrf.mxu0  ;;  %v18366_v41 = vadd.f32 %v4597_v5, %v18229_v1  ;;  %v6032_v1 = vpack.c.bf16 %v6000_v45, %v5999_v2  ;;  %v6293_v5 = vld [vmem:[#allocation2 + $0x9] sm:$0xff] }
 0x35d   : > { %21907 = vst [vmem:[#allocation9_spill] sm:$0xff] %v18363_v3  ;;  %v15222_v54 = vpop.f32.mrf.mxu1  ;;  %v6325_v20 = vpack.c.bf16 %v6293_v5, %v6292_v50 }
 0x35e   : > { %21908 = vst [vmem:[#allocation44_spill] sm:$0xff] %v18366_v41  ;;  %v18371_v40 = vpop.f32.mrf.mxu0  ;;  %v18376_v33 = vadd.f32 %v15222_v54, %v18234_v19  ;;  %15381 = vmatprep.mubr.msk.bf16.mxu0 %vm388_vm1, %v6032_v1  ;;  %v18402_v1 = vld [vmem:[%s21560_s5 + $0x8] sm:$0xf] }
 0x35f   : > { %21909 = vst [vmem:[#allocation69_spill] sm:$0xff] %v18371_v40  ;;  %v18378_v3 = vpop.f32.mrf.mxu1  ;;  %15415 = vmatprep.mubr.msk.bf16.mxu1 %vm388_vm1, %v6325_v20  ;;  %21917 = vst [vmem:[#allocation72_spill] sm:$0xff] %v18402_v1  ;;  %16104 = vmatprep.subr.msk.bf16.mxu0 %vm3355_vm5, %v18402_v1 }
 0x360   : > { %v18380_v41 = vpop.f32.mrf.mxu0 }
 0x361   : > { %21910 = vst [vmem:[#allocation13_spill] sm:$0xff] %v18380_v41  ;;  %v15225_v40 = vpop.f32.mrf.mxu1 }
 0x362   : > { %v18383_v32 = vpop.f32.mrf.mxu0  ;;  %v18387_v17 = vadd.f32 %v15225_v40, %v18247_v59 }
 0x363   : > { %21911 = vst [vmem:[#allocation29_spill] sm:$0xff] %v18383_v32  ;;  %v4613_v19 = vpop.f32.mrf.mxu1 }
 0x364   : > { %21912 = vst [vmem:[#allocation46_spill] sm:$0xff] %v18387_v17  ;;  %v18389_v54 = vpop.f32.mrf.mxu0  ;;  %v18392_v2 = vadd.f32 %v4613_v19, %v18250_v63 }
 0x365   : > { %21913 = vst [vmem:[#allocation71_spill] sm:$0xff] %v18389_v54  ;;  %v15226_v14 = vpop.f32.mrf.mxu1 }
 0x366   : > { %21914 = vst [vmem:[#allocation17_spill] sm:$0xff] %v18392_v2  ;;  %v18394_v45 = vpop.f32.mrf.mxu0  ;;  %v18397_v50 = vadd.f32 %v15226_v14, %v18255_v58 }
 0x367   : > { %21915 = vst [vmem:[#allocation31_spill] sm:$0xff] %v18394_v45  ;;  %v18404_v20 = vpop.f32.mrf.mxu1 }
 0x368   : > { %21916 = vst [vmem:[#allocation48_spill] sm:$0xff] %v18397_v50  ;;  %21918 = vst [vmem:[#allocation8_spill] sm:$0xff] %v18404_v20  ;;  %v18406_v59 = vpop.f32.mrf.mxu0 }
 0x369   : > { %21919 = vst [vmem:[#allocation35_spill] sm:$0xff] %v18406_v59  ;;  %v15229_v63 = vpop.f32.mrf.mxu1 }
 0x36a   : > { %v18410_v40 = vpop.f32.mrf.mxu0  ;;  %v18413_v5 = vadd.f32 %v15229_v63, %v18263_v43 }
 0x36b   : > { %21920 = vst [vmem:[#allocation33_spill] sm:$0xff] %v18410_v40  ;;  %v4629_v58 = vpop.f32.mrf.mxu1 }
 0x36c   : > { %21921 = vst [vmem:[#allocation50_spill] sm:$0xff] %v18413_v5  ;;  %v18415_v19 = vpop.f32.mrf.mxu0  ;;  %v18418_v14 = vadd.f32 %v4629_v58, %v18266_v22 }
 0x36d   : > { %21922 = vst [vmem:[#allocation74_spill] sm:$0xff] %v18415_v19  ;;  %v15230_v45 = vpop.f32.mrf.mxu1 }
 0x36e   : > { %21923 = vst [vmem:[#allocation10_spill] sm:$0xff] %v18418_v14  ;;  %v18420_v50 = vpop.f32.mrf.mxu0  ;;  %v18423_v59 = vadd.f32 %v15230_v45, %v18273_v30 }
 0x36f   : > { %21924 = vst [vmem:[#allocation52_spill] sm:$0xff] %v18420_v50  ;;  %v18425_v54 = vpop.f32.mrf.mxu1 }
 0x370   : > { %21925 = vst [vmem:[#allocation75_spill] sm:$0xff] %v18423_v59  ;;  %21926 = vst [vmem:[#allocation14_spill] sm:$0xff] %v18425_v54  ;;  %v18427_v1 = vpop.f32.mrf.mxu0 }
 0x371   : > { %21927 = vst [vmem:[#allocation37_spill] sm:$0xff] %v18427_v1  ;;  %v15233_v40 = vpop.f32.mrf.mxu1 }
 0x372   : > { %v18429_v2 = vpop.f32.mrf.mxu0  ;;  %v18432_v43 = vadd.f32 %v15233_v40, %v18278_v47 }
 0x373   : > { %21928 = vst [vmem:[#allocation53_spill] sm:$0xff] %v18429_v2  ;;  %v4645_v63 = vpop.f32.mrf.mxu1 }
 0x374   : > { %21929 = vst [vmem:[#allocation76_spill] sm:$0xff] %v18432_v43  ;;  %v18434_v19 = vpop.f32.mrf.mxu0  ;;  %v18437_v22 = vadd.f32 %v4645_v63, %v18281_v34 }
 0x375   : > { %21930 = vst [vmem:[#allocation18_spill] sm:$0xff] %v18434_v19  ;;  %v15234_v58 = vpop.f32.mrf.mxu1 }
 0x376   : > { %21931 = vst [vmem:[#allocation39_spill] sm:$0xff] %v18437_v22  ;;  %v18439_v50 = vpop.f32.mrf.mxu0  ;;  %v18442_v30 = vadd.f32 %v15234_v58, %v18288_v48 }
 0x377   : > { %21932 = vst [vmem:[#allocation54_spill] sm:$0xff] %v18439_v50  ;;  %v18444_v45 = vpop.f32.mrf.mxu1 }
 0x378   : > { %21933 = vst [vmem:[#allocation77_spill] sm:$0xff] %v18442_v30  ;;  %21934 = vst [vmem:[#allocation4_spill] sm:$0xff] %v18444_v45  ;;  %v18446_v1 = vpop.f32.mrf.mxu0 }
 0x379   : > { %21935 = vst [vmem:[#allocation43_spill] sm:$0xff] %v18446_v1  ;;  %v15237_v2 = vpop.f32.mrf.mxu1 }
 0x37a   : > { %v18448_v59 = vpop.f32.mrf.mxu0  ;;  %v18451_v47 = vadd.f32 %v15237_v2, %v18294_v31 }
 0x37b   : > { %21936 = vst [vmem:[#allocation41_spill] sm:$0xff] %v18448_v59  ;;  %v4661_v40 = vpop.f32.mrf.mxu1 }
 0x37c   : > { %21937 = vst [vmem:[#allocation55_spill] sm:$0xff] %v18451_v47  ;;  %v18453_v19 = vpop.f32.mrf.mxu0  ;;  %v18456_v34 = vadd.f32 %v4661_v40, %v18297_v62 }
 0x37d   : > { %21938 = vst [vmem:[#allocation79_spill] sm:$0xff] %v18453_v19  ;;  %v15238_v63 = vpop.f32.mrf.mxu1 }
 0x37e   : > { %21939 = vst [vmem:[#allocation11_spill] sm:$0xff] %v18456_v34  ;;  %v18458_v50 = vpop.f32.mrf.mxu0  ;;  %v18461_v48 = vadd.f32 %v15238_v63, %v18304_v8 }
 0x37f   : > { %21940 = vst [vmem:[#allocation56_spill] sm:$0xff] %v18458_v50  ;;  %v18463_v58 = vpop.f32.mrf.mxu1 }
 0x380   : > { %21941 = vst [vmem:[#allocation80_spill] sm:$0xff] %v18461_v48  ;;  %21942 = vst [vmem:[#allocation16_spill] sm:$0xff] %v18463_v58  ;;  %v18465_v1 = vpop.f32.mrf.mxu0 }
 0x381   : > { %21943 = vst [vmem:[#allocation45_spill] sm:$0xff] %v18465_v1  ;;  %v15241_v59 = vpop.f32.mrf.mxu1 }
 0x382   : > { %v18467_v30 = vpop.f32.mrf.mxu0  ;;  %v18470_v31 = vadd.f32 %v15241_v59, %v18308_v24 }
 0x383   : > { %21944 = vst [vmem:[#allocation57_spill] sm:$0xff] %v18467_v30  ;;  %v4677_v2 = vpop.f32.mrf.mxu1 }
 0x384   : > { %21945 = vst [vmem:[#allocation82_spill] sm:$0xff] %v18470_v31  ;;  %v18472_v19 = vpop.f32.mrf.mxu0  ;;  %v18475_v62 = vadd.f32 %v4677_v2, %v18311_v49 }
 0x385   : > { %21946 = vst [vmem:[#allocation19_spill] sm:$0xff] %v18472_v19  ;;  %v15242_v40 = vpop.f32.mrf.mxu1 }
 0x386   : > { %21947 = vst [vmem:[#allocation47_spill] sm:$0xff] %v18475_v62  ;;  %v18477_v50 = vpop.f32.mrf.mxu0  ;;  %v18480_v8 = vadd.f32 %v15242_v40, %v18318_v12  ;;  %v18507_v62 = vld [vmem:[%s21560_s5 + $0xc] sm:$0xf] }
 0x387   : > { %21948 = vst [vmem:[#allocation58_spill] sm:$0xff] %v18477_v50  ;;  %v18482_v63 = vpop.f32.mrf.mxu1  ;;  %21952 = vst [vmem:[#allocation59_spill] sm:$0xff] %v18507_v62  ;;  %16105 = vmatprep.subr.msk.bf16.mxu1 %vm3355_vm5, %v18507_v62 }
 0x388   : > { %21949 = vst [vmem:[#allocation83_spill] sm:$0xff] %v18480_v8  ;;  %21950 = vst [vmem:[#allocation51_spill] sm:$0xff] %v18482_v63  ;;  %v18484_v1 = vpop.f32.mrf.mxu0 }
 0x389   : > { %21951 = vst [vmem:[#allocation49_spill] sm:$0xff] %v18484_v1  ;;  %v15281_v30 = vpop.f32.mrf.mxu1 }
 0x38a   : > { %v15315_v48 = vpop.f32.mrf.mxu0 }
 0x38b   : > { %v5151_v24 = vpop.f32.mrf.mxu1 }
 0x38c   : > { %v18486_v59 = vpop.f32.mrf.mxu0 }
 0x38d   : > { %v15282_v31 = vpop.f32.mrf.mxu1 }
 0x38e   : > { %v18488_v34 = vpop.f32.mrf.mxu0 }
 0x38f   : > { %v5154_v19 = vpop.f32.mrf.mxu1 }
 0x390   : > { %v18494_v50 = vpop.f32.mrf.mxu0 }
 0x391   : > { %v18490_v49 = vpop.f32.mrf.mxu1 }
 0x392   : > { %v18500_v1 = vpop.f32.mrf.mxu0 }
 0x393   : > { %v18492_v2 = vpop.f32.mrf.mxu1 }
 0x394   : > { %v18513_v58 = vpop.f32.mrf.mxu0 }
 0x395   : > { %v18496_v12 = vpop.f32.mrf.mxu1 }
 0x396   : > { %v18519_v45 = vpop.f32.mrf.mxu0 }
 0x397   : > { %v18498_v40 = vpop.f32.mrf.mxu1 }
 0x398   : > { %v18525_v54 = vpop.f32.mrf.mxu0 }
 0x399   : > { %v18502_v8 = vpop.f32.mrf.mxu1 }
 0x39a   : > { %v18531_v32 = vpop.f32.mrf.mxu0 }
 0x39b   : > { %v18509_v63 = vpop.f32.mrf.mxu1  ;;  %21960 = vst [vmem:[#allocation98_spill] sm:$0xff] %v18531_v32 }
 0x39c   : > { %21953 = vst [vmem:[#allocation85_spill] sm:$0xff] %v18509_v63 }
 0x39d   : > { %v18515_v47 = vpop.f32.mrf.mxu1 }
 0x39e   : > { %21954 = vst [vmem:[#allocation61_spill] sm:$0xff] %v18515_v47  ;;  %v18537_v47 = vpop.f32.mrf.mxu0 }
 0x39f   : > { %v18517_v22 = vpop.f32.mrf.mxu1  ;;  %21963 = vst [vmem:[#allocation101_spill] sm:$0xff] %v18537_v47 }
 0x3a0   : > { %21955 = vst [vmem:[#allocation86_spill] sm:$0xff] %v18517_v22 }
 0x3a1   : > { %v18521_v43 = vpop.f32.mrf.mxu1 }
 0x3a2   : > { %21956 = vst [vmem:[#allocation94_spill] sm:$0xff] %v18521_v43  ;;  %v18543_v43 = vpop.f32.mrf.mxu0 }
 0x3a3   : > { %v18523_v14 = vpop.f32.mrf.mxu1  ;;  %21966 = vst [vmem:[#allocation104_spill] sm:$0xff] %v18543_v43 }
 0x3a4   : > { %21957 = vst [vmem:[#allocation95_spill] sm:$0xff] %v18523_v14 }
 0x3a5   : > { %v18527_v5 = vpop.f32.mrf.mxu1 }
 0x3a6   : > { %21958 = vst [vmem:[#allocation96_spill] sm:$0xff] %v18527_v5  ;;  %v18549_v5 = vpop.f32.mrf.mxu0 }
 0x3a7   : > { %v18529_v20 = vpop.f32.mrf.mxu1 }
 0x3a8   : > { %21959 = vst [vmem:[#allocation97_spill] sm:$0xff] %v18529_v20 }
 0x3a9   : > { %v18533_v62 = vpop.f32.mrf.mxu1 }
 0x3aa   : > { %21961 = vst [vmem:[#allocation99_spill] sm:$0xff] %v18533_v62  ;;  %v18555_v62 = vpop.f32.mrf.mxu0 }
 0x3ab   : > { %v18535_v17 = vpop.f32.mrf.mxu1  ;;  %21971 = vst [vmem:[#allocation109_spill] sm:$0xff] %v18555_v62 }
 0x3ac   : > { %21962 = vst [vmem:[#allocation100_spill] sm:$0xff] %v18535_v17 }
 0x3ad   : > { %v18539_v22 = vpop.f32.mrf.mxu1 }
 0x3ae   : > { %21964 = vst [vmem:[#allocation102_spill] sm:$0xff] %v18539_v22  ;;  %v18561_v22 = vpop.f32.mrf.mxu0 }
 0x3af   : > { %v18541_v41 = vpop.f32.mrf.mxu1  ;;  %21974 = vst [vmem:[#allocation112_spill] sm:$0xff] %v18561_v22 }
 0x3b0   : > { %21965 = vst [vmem:[#allocation103_spill] sm:$0xff] %v18541_v41 }
 0x3b1   : > { %v18545_v14 = vpop.f32.mrf.mxu1 }
 0x3b2   : > { %21967 = vst [vmem:[#allocation105_spill] sm:$0xff] %v18545_v14  ;;  %v18567_v14 = vpop.f32.mrf.mxu0 }
 0x3b3   : > { %v18547_v63 = vpop.f32.mrf.mxu1  ;;  %21977 = vst [vmem:[#allocation115_spill] sm:$0xff] %v18567_v14 }
 0x3b4   : > { %21968 = vst [vmem:[#allocation106_spill] sm:$0xff] %v18547_v63  ;;  %v4400_v63 = vadd.f32 %v18200_v9, %v18205_v13  ;;  %v18580_v22 = vpop.f32.mrf.mxu0  ;;  %v4988_v9 = vadd.f32 %v18330_v61, %v18333_v52 }
 0x3b5   : > { %v18551_v20 = vpop.f32.mrf.mxu1 }
 0x3b6   : > { %21969 = vst [vmem:[#allocation107_spill] sm:$0xff] %v18551_v20 }
 0x3b7   : > { %v18553_v32 = vpop.f32.mrf.mxu1 }
 0x3b8   : > { %21970 = vst [vmem:[#allocation108_spill] sm:$0xff] %v18553_v32  ;;  %v4987_v32 = vadd.f32 %v18320_v7, %v18323_v27  ;;  %v5281_v27 = vadd.f32 %v15282_v31, %v4988_v9  ;;  %v21979_v31 = vmax.f32 %v17367_v53, 0.0  ;;  %v21980_v53 = vmax.f32 %v17375_v38, 0.0 }
 0x3b9   : > { %v18557_v17 = vpop.f32.mrf.mxu1 }
 0x3ba   : > { %21972 = vst [vmem:[#allocation110_spill] sm:$0xff] %v18557_v17  ;;  %v4693_v17 = vadd.f32 %v18335_v11, %v4400_v63  ;;  %v18589_v11 = vpop.f32.mrf.mxu0 }
 0x3bb   : > { %v18559_v47 = vpop.f32.mrf.mxu1 }
 0x3bc   : > { %21973 = vst [vmem:[#allocation111_spill] sm:$0xff] %v18559_v47  ;;  %v4985_v47 = vadd.f32 %v18325_v21, %v18328_v39  ;;  %v3537_v21 = vadd.f32 %v18027_v15, %v18125_v26  ;;  %v4991_v39 = vadd.f32 %v18339_v29, %v18342_v42  ;;  %v18607_v29 = vpop.f32.mrf.mxu0 }
 0x3bd   : > { %v18563_v41 = vpop.f32.mrf.mxu1 }
 0x3be   : > { %21975 = vst [vmem:[#allocation113_spill] sm:$0xff] %v18563_v41  ;;  %v5280_v41 = vadd.f32 %v15281_v30, %v4987_v32  ;;  %v5278_v13 = vadd.f32 %v5151_v24, %v4985_v47  ;;  %v4404_v32 = vadd.f32 %v18216_v57, %v18221_v35  ;;  %v5284_v26 = vadd.f32 %v18490_v49, %v4991_v39 }
 0x3bf   : > { %v18565_v43 = vpop.f32.mrf.mxu1  ;;  %v4989_v57 = vadd.f32 %v18344_v51, %v18347_v4  ;;  %v5574_v35 = vadd.f32 %v18488_v34, %v5281_v27 }
 0x3c0   : > { %21976 = vst [vmem:[#allocation114_spill] sm:$0xff] %v18565_v43  ;;  %v5573_v7 = vadd.f32 %v15315_v48, %v5280_v41  ;;  %v5571_v52 = vadd.f32 %v18486_v59, %v5278_v13  ;;  %v3541_v41 = vadd.f32 %v18027_v15, %v18146_v46  ;;  %v4697_v47 = vadd.f32 %v18354_v23, %v4404_v32 }
 0x3c1   : > { %v18571_v20 = vpop.f32.mrf.mxu1  ;;  %v4992_v46 = vadd.f32 %v18349_v0, %v18352_v37  ;;  %v5282_v23 = vadd.f32 %v18492_v2, %v4989_v57  ;;  %v5577_v59 = vadd.f32 %v18500_v1, %v5284_v26  ;;  %v4995_v1 = vadd.f32 %v18358_v60, %v18361_v6 }
 0x3c2   : > { %21978 = vst [vmem:[#allocation116_spill] sm:$0xff] %v18571_v20  ;;  %v4986_v20 = vadd.f32 %v18337_v25, %v4693_v17  ;;  %v3545_v17 = vadd.f32 %v18027_v15, %v18167_v28  ;;  %v3834_v34 = vadd.f32 %v18148_v56, %v3541_v41  ;;  %v16144_v56 = vld [vmem:[%s21559_s4] ss:$0 sm:$0xff] }
 0x3c3   : > { %v18576_v62 = vpop.f32.mrf.mxu1  ;;  %v5285_v37 = vadd.f32 %v18496_v12, %v4992_v46  ;;  %v5575_v38 = vadd.f32 %v18513_v58, %v5282_v23  ;;  %v5288_v60 = vadd.f32 %v18502_v8, %v4995_v1 }
 0x3c4   : > { %v5279_v30 = vadd.f32 %v5154_v19, %v4986_v20  ;;  %v3830_v19 = vadd.f32 %v18127_v55, %v3537_v21  ;;  %v18618_v24 = vadd.f32 %v18169_v10, %v3545_v17  ;;  %v4990_v55 = vadd.f32 %v18356_v36, %v4697_v47 }
 0x3c5   : > { %v18582_v43 = vpop.f32.mrf.mxu1  ;;  %v3549_v10 = vadd.f32 %v16144_v56, %v18184_v16  ;;  %v4408_v36 = vadd.f32 %v18232_v18, %v18237_v44  ;;  %v22000_v56 = vld [vmem:[#allocation90_spill] sm:$0xff] }
 0x3c6   : > { %v5572_v15 = vadd.f32 %v18494_v50, %v5279_v30  ;;  %v18623_v50 = vpop.f32.mrf.mxu0  ;;  %v5283_v12 = vadd.f32 %v18498_v40, %v4990_v55  ;;  %v21983_v30 = vld [vmem:[#allocation40_spill] sm:$0xff]  ;;  %v5578_v40 = vadd.f32 %v18519_v45, %v5285_v37  ;;  %v21998_v37 = vld [vmem:[#allocation98_spill] sm:$0xff] }
 0x3c7   : > { %v18587_v14 = vpop.f32.mrf.mxu1  ;;  %v4123_v16 = vadd.f32 %v21983_v30, %v3830_v19  ;;  %v4701_v44 = vadd.f32 %v18378_v3, %v4408_v36  ;;  %v21990_v3 = vld [vmem:[#allocation69_spill] sm:$0xff]  ;;  %v22006_v30 = vld [vmem:[#allocation86_spill] sm:$0xff] }
 0x3c8   : > { %v18647_v58 = vpop.f32.mrf.mxu0  ;;  %v4996_v8 = vadd.f32 %v21990_v3, %v18376_v33  ;;  %v21991_v19 = vld [vmem:[#allocation85_spill] sm:$0xff] }
 0x3c9   : > { %v15349_v61 = vpop.f32.mrf.mxu1 }
 0x3ca   : > { %v5866_v25 = vadd.f32 %v15349_v61, %v5573_v7  ;;  %v21981_v7 = vld [vmem:[#allocation87_spill] sm:$0xff]  ;;  %v21984_v61 = vld [vmem:[#allocation44_spill] sm:$0xff] }
 0x3cb   : > { %v5737_v48 = vpop.f32.mrf.mxu1  ;;  %v21982_v27 = vmax.f32 %v21981_v7, 0.0  ;;  %v22003_v7 = vld [vmem:[#allocation46_spill] sm:$0xff] }
 0x3cc   : > { %v5898_v42 = vmax.f32 %v5866_v25, 0.0  ;;  %v5864_v20 = vadd.f32 %v5737_v48, %v5571_v52  ;;  %v21985_v52 = vld [vmem:[#allocation9_spill] sm:$0xff]  ;;  %v21986_v25 = vld [vmem:[#allocation88_spill] sm:$0xff] }
 0x3cd   : > { %v15350_v28 = vpop.f32.mrf.mxu1  ;;  %v4993_v18 = vadd.f32 %v21985_v52, %v21984_v61  ;;  %v21987_v41 = vmax.f32 %v21986_v25, 0.0  ;;  %v21988_v48 = vld [vmem:[#allocation81_spill] sm:$0xff] }
 0x3ce   : > { %v5930_v63 = vadd.f32 %v5898_v42, %v21979_v31  ;;  %v5896_v51 = vmax.f32 %v5864_v20, 0.0  ;;  %v5867_v4 = vadd.f32 %v15350_v28, %v5574_v35  ;;  %v18653_v57 = vadd.f32 %v21988_v48, %v3549_v10  ;;  %v21989_v35 = vld [vmem:[#allocation84_spill] sm:$0xff]  ;;  %v22007_v52 = vld [vmem:[#allocation101_spill] sm:$0xff]  ;;  %v22013_v48 = vld [vmem:[#allocation31_spill] sm:$0xff] }
 0x3cf   : > { %v5740_v0 = vpop.f32.mrf.mxu1  ;;  %v4127_v42 = vadd.f32 %v21989_v35, %v3834_v34  ;;  %v5576_v20 = vadd.f32 %v18525_v54, %v5283_v12  ;;  %v5286_v46 = vadd.f32 %v21991_v19, %v4993_v18  ;;  %v5581_v54 = vadd.f32 %v21998_v37, %v5288_v60  ;;  %v22016_v19 = vld [vmem:[#allocation104_spill] sm:$0xff]  ;;  %v22020_v37 = vld [vmem:[#allocation95_spill] sm:$0xff] }
 0x3d0   : > { %5962 = vst.msk [vmem:[#allocation2 + $0x31] sm:$0xff] %vm388_vm1, %v5930_v63  ;;  %v5928_v49 = vadd.f32 %v5896_v51, %v21980_v53  ;;  %v5899_v2 = vmax.f32 %v5867_v4, 0.0  ;;  %v5865_v9 = vadd.f32 %v5740_v0, %v5572_v15  ;;  %v21992_v15 = vld [vmem:[#allocation89_spill] sm:$0xff]  ;;  %v21994_v51 = vld [vmem:[#allocation26_spill] sm:$0xff]  ;;  %v21995_v4 = vld [vmem:[#allocation15_spill] sm:$0xff]  ;;  %v22001_v10 = vmax.f32 %v22000_v56, 0.0 }
 0x3d1   : > { %v15353_v13 = vpop.f32.mrf.mxu1  ;;  %v21993_v28 = vmax.f32 %v21992_v15, 0.0  ;;  %v4412_v55 = vadd.f32 %v21995_v4, %v21994_v51  ;;  %v21997_v0 = vld [vmem:[#allocation13_spill] sm:$0xff]  ;;  %v5579_v18 = vadd.f32 %v22007_v52, %v5286_v46 }
 0x3d2   : > { %5960 = vst.msk [vmem:[#allocation2 + $0x19] sm:$0xff] %vm388_vm1, %v5928_v49  ;;  %v5931_v21 = vadd.f32 %v5899_v2, %v21982_v27  ;;  %v5897_v32 = vmax.f32 %v5865_v9, 0.0  ;;  %v5870_v39 = vadd.f32 %v15353_v13, %v5577_v59  ;;  %v21996_v59 = vld [vmem:[#allocation67_spill] sm:$0xff]  ;;  %v4994_v33 = vadd.f32 %v21997_v0, %v4701_v44  ;;  %v21999_v49 = vld [vmem:[#allocation61_spill] sm:$0xff]  ;;  %v18671_v9 = vpop.f32.mrf.mxu0  ;;  %v22002_v13 = vld [vmem:[#allocation6_spill] sm:$0xff] }
 0x3d3   : > { %v5753_v6 = vpop.f32.mrf.mxu1  ;;  %v18666_v34 = vadd.f32 %v21996_v59, %v4123_v16  ;;  %v5289_v2 = vadd.f32 %v21999_v49, %v4996_v8  ;;  %v22004_v27 = vld [vmem:[#allocation29_spill] sm:$0xff]  ;;  %v22008_v44 = vld [vmem:[#allocation91_spill] sm:$0xff] }
 0x3d4   : > { %5963 = vst.msk [vmem:[#allocation2 + $0x39] sm:$0xff] %vm388_vm1, %v5931_v21  ;;  %v5929_v17 = vadd.f32 %v5897_v32, %v21987_v41  ;;  %v5902_v47 = vmax.f32 %v5870_v39, 0.0  ;;  %v5868_v26 = vadd.f32 %v5753_v6, %v5575_v38  ;;  %v18677_v38 = vadd.f32 %v22002_v13, %v4127_v42  ;;  %v22005_v32 = vld [vmem:[#allocation8_spill] sm:$0xff]  ;;  %v22010_v41 = vld [vmem:[#allocation17_spill] sm:$0xff]  ;;  %v22014_v42 = vld [vmem:[#allocation94_spill] sm:$0xff]  ;;  %v18695_v15 = vpop.f32.mrf.mxu0 }
 0x3d5   : > { %v15354_v45 = vpop.f32.mrf.mxu1  ;;  %v4999_v21 = vadd.f32 %v22004_v27, %v22003_v7  ;;  %v4705_v39 = vadd.f32 %v22005_v32, %v4412_v55  ;;  %v5287_v16 = vadd.f32 %v22006_v30, %v4994_v33  ;;  %v22009_v60 = vmax.f32 %v22008_v44, 0.0  ;;  %v22019_v59 = vld [vmem:[#allocation35_spill] sm:$0xff] }
 0x3d6   : > { %5961 = vst.msk [vmem:[#allocation2 + $0x21] sm:$0xff] %vm388_vm1, %v5929_v17  ;;  %v5934_v23 = vadd.f32 %v5902_v47, %v21993_v28  ;;  %v5900_v31 = vmax.f32 %v5868_v26, 0.0  ;;  %v5871_v63 = vadd.f32 %v15354_v45, %v5578_v40  ;;  %v22011_v17 = vld [vmem:[#allocation71_spill] sm:$0xff]  ;;  %v22012_v26 = vld [vmem:[#allocation48_spill] sm:$0xff]  ;;  %v5582_v46 = vadd.f32 %v22016_v19, %v5289_v2  ;;  %v22031_v19 = vld [vmem:[#allocation97_spill] sm:$0xff] }
 0x3d7   : > { %v5756_v53 = vpop.f32.mrf.mxu1  ;;  %v4997_v47 = vadd.f32 %v22011_v17, %v22010_v41  ;;  %v5000_v35 = vadd.f32 %v22013_v48, %v22012_v26  ;;  %v5292_v3 = vadd.f32 %v22014_v42, %v4999_v21  ;;  %v22017_v28 = vld [vmem:[#allocation92_spill] sm:$0xff]  ;;  %v4998_v0 = vadd.f32 %v22019_v59, %v4705_v39  ;;  %v22024_v39 = vld [vmem:[#allocation109_spill] sm:$0xff] }
 0x3d8   : > { %5966 = vst.msk [vmem:[#allocation2 + $0x61] sm:$0xff] %vm388_vm1, %v5934_v23  ;;  %v5932_v36 = vadd.f32 %v5900_v31, %v22001_v10  ;;  %v5903_v1 = vmax.f32 %v5871_v63, 0.0  ;;  %v5869_v12 = vadd.f32 %v5756_v53, %v5576_v20  ;;  %v22015_v20 = vld [vmem:[#allocation72_spill] sm:$0xff]  ;;  %v22018_v23 = vmax.f32 %v22017_v28, 0.0  ;;  %v22021_v10 = vld [vmem:[#allocation59_spill] sm:$0xff]  ;;  %v22029_v42 = vld [vmem:[#allocation33_spill] sm:$0xff] }
 0x3d9   : > { %v15357_v61 = vpop.f32.mrf.mxu1  ;;  %v6683_v45 = vsel %vm3355_vm5, %v22015_v20, 0  ;;  %v6001_v4 = vld [vmem:[#allocation2 + $0x18] sm:$0xff]  ;;  %v5580_v33 = vadd.f32 %v18549_v5, %v5287_v16  ;;  %v6003_v5 = vld [vmem:[#allocation2 + $0x30] sm:$0xff]  ;;  %v5585_v30 = vadd.f32 %v22024_v39, %v5292_v3 }
 0x3da   : > { %5964 = vst.msk [vmem:[#allocation2 + $0x49] sm:$0xff] %vm388_vm1, %v5932_v36  ;;  %v5935_v6 = vadd.f32 %v5903_v1, %v22009_v60  ;;  %v5901_v40 = vmax.f32 %v5869_v12, 0.0  ;;  %v5874_v25 = vadd.f32 %v15357_v61, %v5581_v54  ;;  %v5290_v54 = vadd.f32 %v22020_v37, %v4997_v47  ;;  %v22022_v1 = vld [vmem:[#allocation93_spill] sm:$0xff]  ;;  %v22025_v16 = vld [vmem:[#allocation96_spill] sm:$0xff]  ;;  %v22037_v37 = vld [vmem:[#allocation74_spill] sm:$0xff] }
 0x3db   : > { %v5769_v8 = vpop.f32.mrf.mxu1  ;;  %v6004_v55 = vld [vmem:[#allocation2 + $0x38] sm:$0xff]  ;;  %v6976_v36 = vsel %vm3355_vm5, %v22021_v10, 0  ;;  %v22023_v12 = vmax.f32 %v22022_v1, 0.0  ;;  %v5293_v61 = vadd.f32 %v22025_v16, %v5000_v35  ;;  %v18728_v48 = vld [vmem:[%s21560_s5 + $0x10] sm:$0xf]  ;;  %v22028_v35 = vld [vmem:[#allocation50_spill] sm:$0xff] }
 0x3dc   : > { %5967 = vst.msk [vmem:[#allocation2 + $0x69] sm:$0xff] %vm388_vm1, %v5935_v6  ;;  %v5933_v31 = vadd.f32 %v5901_v40, %v22018_v23  ;;  %v5906_v63 = vmax.f32 %v5874_v25, 0.0  ;;  %v5872_v51 = vadd.f32 %v5769_v8, %v5579_v18  ;;  %v6297_v56 = vld [vmem:[#allocation2 + $0x39] sm:$0xff]  ;;  %v18714_v44 = vpack.c.bf16 %v6004_v55, %v6003_v5  ;;  %v6296_v60 = vld [vmem:[#allocation2 + $0x31] sm:$0xff]  ;;  %v18716_v6 = vpop.f32.mrf.mxu0 }
 0x3dd   : > { %v15358_v53 = vpop.f32.mrf.mxu1  ;;  %v6002_v49 = vld [vmem:[#allocation2 + $0x20] sm:$0xff]  ;;  %v22026_v40 = vld [vmem:[#allocation20_spill] sm:$0xff]  ;;  %v18723_v26 = vpack.c.bf16 %v6297_v56, %v6296_v60  ;;  %v5003_v3 = vadd.f32 %v22029_v42, %v22028_v35  ;;  %v22039_v56 = vld [vmem:[#allocation115_spill] sm:$0xff] }
 0x3de   : > { %v6295_v2 = vld [vmem:[#allocation2 + $0x21] sm:$0xff]  ;;  %5965 = vst.msk [vmem:[#allocation2 + $0x51] sm:$0xff] %vm388_vm1, %v5933_v31  ;;  %v5938_v13 = vadd.f32 %v5906_v63, %v22023_v12  ;;  %v5904_v7 = vmax.f32 %v5872_v51, 0.0  ;;  %v5875_v27 = vadd.f32 %v15358_v53, %v5582_v46  ;;  %v18708_v21 = vpack.c.bf16 %v6002_v49, %v6001_v4  ;;  %v6294_v32 = vld [vmem:[#allocation2 + $0x19] sm:$0xff]  ;;  %v18740_v23 = vld [vmem:[%s21560_s5 + $0x14] sm:$0xf]  ;;  %v18758_v1 = vpop.f32.mrf.mxu0 }
 0x3df   : > { %v5772_v52 = vpop.f32.mrf.mxu1  ;;  %v18712_v18 = vpack.c.bf16 %v6295_v2, %v6294_v32  ;;  %v22027_v25 = vmax.f32 %v22026_v40, 0.0  ;;  %v22030_v8 = vld [vmem:[#allocation14_spill] sm:$0xff]  ;;  %v5291_v46 = vadd.f32 %v22031_v19, %v4998_v0  ;;  %v22032_v31 = vld [vmem:[#allocation112_spill] sm:$0xff]  ;;  %v5586_v10 = vadd.f32 %v22039_v56, %v5293_v61  ;;  %v22044_v16 = vld [vmem:[#allocation37_spill] sm:$0xff] }
 0x3e0   : > { %5970 = vst.msk [vmem:[#allocation2 + $0x91] sm:$0xff] %vm388_vm1, %v5938_v13  ;;  %v5907_v17 = vmax.f32 %v5875_v27, 0.0  ;;  %v5873_v47 = vadd.f32 %v5772_v52, %v5580_v33  ;;  %15382 = vmatmul.mubr.msk.bf16.vlgmr.msra.gmra.mxu0 %vm388_vm1, %v18708_v21  ;;  %v4709_v20 = vadd.f32 %v22030_v8, %v18666_v34  ;;  %v5583_v63 = vadd.f32 %v22032_v31, %v5290_v54  ;;  %v22033_v51 = vld [vmem:[#allocation30_spill] sm:$0xff]  ;;  %v22038_v54 = vld [vmem:[#allocation99_spill] sm:$0xff]  ;;  %v22043_v39 = vld [vmem:[#allocation52_spill] sm:$0xff] }
 0x3e1   : > { %v5936_v41 = vadd.f32 %v5904_v7, %v22027_v25  ;;  %15416 = vmatmul.mubr.msk.bf16.vlgmr.msra.gmra.mxu1 %vm388_vm1, %v18712_v18  ;;  %15448 = vmatpush3.bf16.msra.mxu0 %v6683_v45  ;;  %v15361_v28 = vpop.f32.mrf.mxu1  ;;  %v22034_v4 = vmax.f32 %v22033_v51, 0.0  ;;  %v22035_v45 = vld [vmem:[#allocation28_spill] sm:$0xff]  ;;  %v22036_v33 = vld [vmem:[#allocation10_spill] sm:$0xff]  ;;  %v5296_v49 = vadd.f32 %v22038_v54, %v5003_v3  ;;  %v6005_v32 = vld [vmem:[#allocation2 + $0x48] sm:$0xff]  ;;  %v5584_v61 = vadd.f32 %v18580_v22, %v5291_v46 }
 0x3e2   : > { %v5905_v34 = vmax.f32 %v5873_v47, 0.0  ;;  %v5878_v59 = vadd.f32 %v15361_v28, %v5585_v30  ;;  %15385 = vmatprep.mubr.msk.bf16.mxu0 %vm388_vm1, %v18714_v44  ;;  %15419 = vmatprep.mubr.msk.bf16.mxu1 %vm388_vm1, %v18723_v26  ;;  %v4131_v0 = vadd.f32 %v22035_v45, %v18618_v24  ;;  %v5001_v53 = vadd.f32 %v22037_v37, %v22036_v33  ;;  %v22040_v12 = vld [vmem:[#allocation62_spill] sm:$0xff]  ;;  %v22045_v60 = vld [vmem:[#allocation100_spill] sm:$0xff]  ;;  %v22049_v45 = vld [vmem:[#allocation21_spill] sm:$0xff] }
 0x3e3   : > { %5968 = vst.msk [vmem:[#allocation2 + $0x79] sm:$0xff] %vm388_vm1, %v5936_v41  ;;  %v5939_v55 = vadd.f32 %v5907_v17, %v22034_v4  ;;  %v5785_v2 = vpop.f32.mrf.mxu1  ;;  %15482 = vmatpush3.bf16.msra.mxu1 %v6976_v36  ;;  %16106 = vmatprep.subr.msk.bf16.mxu0 %vm3355_vm5, %v18728_v48  ;;  %v22041_v13 = vmax.f32 %v22040_v12, 0.0  ;;  %v6008_v5 = vld [vmem:[#allocation2 + $0x68] sm:$0xff]  ;;  %v5002_v52 = vadd.f32 %v22044_v16, %v4709_v20  ;;  %v22046_v35 = vld [vmem:[#allocation70_spill] sm:$0xff]  ;;  %v22050_v33 = vmax.f32 %v22049_v45, 0.0 }
 0x3e4   : > { %v5910_v24 = vmax.f32 %v5878_v59, 0.0  ;;  %v5876_v27 = vadd.f32 %v5785_v2, %v5583_v63  ;;  %16107 = vmatprep.subr.msk.bf16.mxu1 %vm3355_vm5, %v18740_v23  ;;  %v22042_v36 = vld [vmem:[#allocation75_spill] sm:$0xff]  ;;  %v5294_v40 = vadd.f32 %v22045_v60, %v5001_v53  ;;  %v22047_v42 = vmax.f32 %v22046_v35, 0.0  ;;  %v6007_v63 = vld [vmem:[#allocation2 + $0x60] sm:$0xff]  ;;  %v18781_v59 = vpop.f32.mrf.mxu0  ;;  %v22052_v2 = vld [vmem:[#allocation53_spill] sm:$0xff] }
 0x3e5   : > { %5971 = vst.msk [vmem:[#allocation2 + $0x99] sm:$0xff] %vm388_vm1, %v5939_v55  ;;  %v5937_v7 = vadd.f32 %v5905_v34, %v22041_v13  ;;  %v5004_v30 = vadd.f32 %v22043_v39, %v22042_v36  ;;  %v15362_v25 = vpop.f32.mrf.mxu1  ;;  %v6006_v41 = vld [vmem:[#allocation2 + $0x50] sm:$0xff]  ;;  %v5589_v20 = vadd.f32 %v18589_v11, %v5296_v49  ;;  %v22048_v22 = vld [vmem:[#allocation102_spill] sm:$0xff]  ;;  %v18779_v55 = vpack.c.bf16 %v6008_v5, %v6007_v63  ;;  %v22054_v13 = vld [vmem:[#allocation103_spill] sm:$0xff] }
 0x3e6   : > { %v6299_v17 = vld [vmem:[#allocation2 + $0x51] sm:$0xff]  ;;  %v6301_v47 = vld [vmem:[#allocation2 + $0x69] sm:$0xff]  ;;  %v5942_v3 = vadd.f32 %v5910_v24, %v22047_v42  ;;  %v5908_v8 = vmax.f32 %v5876_v27, 0.0  ;;  %v5879_v19 = vadd.f32 %v15362_v25, %v5586_v10  ;;  %v18773_v28 = vpack.c.bf16 %v6006_v41, %v6005_v32  ;;  %v6300_v34 = vld [vmem:[#allocation2 + $0x61] sm:$0xff]  ;;  %v18812_v35 = vpop.f32.mrf.mxu0 }
 0x3e7   : > { %5969 = vst.msk [vmem:[#allocation2 + $0x81] sm:$0xff] %vm388_vm1, %v5937_v7  ;;  %v6298_v31 = vld [vmem:[#allocation2 + $0x49] sm:$0xff]  ;;  %v5297_v46 = vadd.f32 %v22048_v22, %v5004_v30  ;;  %v5788_v51 = vpop.f32.mrf.mxu1  ;;  %v18788_v11 = vpack.c.bf16 %v6301_v47, %v6300_v34  ;;  %v5295_v7 = vadd.f32 %v22054_v13, %v5002_v52  ;;  %v5587_v27 = vadd.f32 %v18607_v29, %v5294_v40  ;;  %v22055_v32 = vld [vmem:[#allocation22_spill] sm:$0xff] }
 0x3e8   : > { %v18777_v4 = vpack.c.bf16 %v6299_v17, %v6298_v31  ;;  %5974 = vst.msk [vmem:[#allocation2 + $0xc1] sm:$0xff] %vm388_vm1, %v5942_v3  ;;  %v5940_v37 = vadd.f32 %v5908_v8, %v22050_v33  ;;  %v5911_v53 = vmax.f32 %v5879_v19, 0.0  ;;  %v5877_v54 = vadd.f32 %v5788_v51, %v5584_v61  ;;  %15386 = vmatmul.mubr.msk.bf16.gmra.mxu0 %vm388_vm1, %v18773_v28  ;;  %v22051_v49 = vld [vmem:[#allocation76_spill] sm:$0xff]  ;;  %v22058_v52 = vld [vmem:[#allocation42_spill] sm:$0xff]  ;;  %v22059_v60 = vld [vmem:[#allocation39_spill] sm:$0xff] }
 0x3e9   : > { %v5007_v56 = vadd.f32 %v22052_v2, %v22051_v49  ;;  %v22053_v10 = vld [vmem:[#allocation4_spill] sm:$0xff]  ;;  %v15365_v24 = vpop.f32.mrf.mxu1  ;;  %15389 = vmatprep.mubr.msk.bf16.mxu0 %vm388_vm1, %v18779_v55  ;;  %v22056_v5 = vmax.f32 %v22055_v32, 0.0  ;;  %v4135_v61 = vadd.f32 %v22058_v52, %v18653_v57  ;;  %v22060_v25 = vld [vmem:[#allocation18_spill] sm:$0xff]  ;;  %v22061_v17 = vld [vmem:[#allocation105_spill] sm:$0xff]  ;;  %v5590_v47 = vadd.f32 %v18623_v50, %v5297_v46 }
 0x3ea   : > { %v4713_v12 = vadd.f32 %v22053_v10, %v18677_v38  ;;  %15420 = vmatmul.mubr.msk.bf16.gmra.mxu1 %vm388_vm1, %v18777_v4  ;;  %5972 = vst.msk [vmem:[#allocation2 + $0xa9] sm:$0xff] %vm388_vm1, %v5940_v37  ;;  %v5909_v39 = vmax.f32 %v5877_v54, 0.0  ;;  %v5882_v30 = vadd.f32 %v15365_v24, %v5589_v20  ;;  %v22057_v38 = vld [vmem:[#allocation27_spill] sm:$0xff]  ;;  %v5005_v41 = vadd.f32 %v22060_v25, %v22059_v60  ;;  %v22062_v42 = vld [vmem:[#allocation32_spill] sm:$0xff]  ;;  %v6009_v31 = vld [vmem:[#allocation2 + $0x78] sm:$0xff] }
 0x3eb   : > { %v5943_v36 = vadd.f32 %v5911_v53, %v22056_v5  ;;  %15423 = vmatprep.mubr.msk.bf16.mxu1 %vm388_vm1, %v18788_v11  ;;  %v4424_v16 = vadd.f32 %v22057_v38, %v4131_v0  ;;  %v5300_v29 = vadd.f32 %v22061_v17, %v5007_v56  ;;  %v5801_v40 = vpop.f32.mrf.mxu1  ;;  %v22063_v3 = vmax.f32 %v22062_v42, 0.0  ;;  %v22064_v57 = vld [vmem:[#allocation77_spill] sm:$0xff]  ;;  %v22065_v20 = vld [vmem:[#allocation54_spill] sm:$0xff]  ;;  %v22066_v51 = vld [vmem:[#allocation43_spill] sm:$0xff]  ;;  %v18833_v38 = vpop.f32.mrf.mxu0 }
 0x3ec   : > { %v5914_v19 = vmax.f32 %v5882_v30, 0.0  ;;  %v5880_v0 = vadd.f32 %v5801_v40, %v5587_v27  ;;  %v6012_v63 = vld [vmem:[#allocation2 + $0x98] sm:$0xff]  ;;  %v5008_v22 = vadd.f32 %v22065_v20, %v22064_v57  ;;  %v5006_v34 = vadd.f32 %v22066_v51, %v4713_v12  ;;  %v22067_v33 = vld [vmem:[#allocation106_spill] sm:$0xff]  ;;  %v22068_v49 = vld [vmem:[#allocation63_spill] sm:$0xff] }
 0x3ed   : > { %5975 = vst.msk [vmem:[#allocation2 + $0xc9] sm:$0xff] %vm388_vm1, %v5943_v36  ;;  %v5941_v8 = vadd.f32 %v5909_v39, %v22063_v3  ;;  %v5588_v45 = vadd.f32 %v18647_v58, %v5295_v7  ;;  %v5298_v50 = vadd.f32 %v22067_v33, %v5005_v41  ;;  %v15366_v46 = vpop.f32.mrf.mxu1  ;;  %v6305_v54 = vld [vmem:[#allocation2 + $0x99] sm:$0xff]  ;;  %v22069_v2 = vmax.f32 %v22068_v49, 0.0  ;;  %v6011_v32 = vld [vmem:[#allocation2 + $0x90] sm:$0xff]  ;;  %v22070_v58 = vld [vmem:[#allocation107_spill] sm:$0xff] }
 0x3ee   : > { %v6010_v37 = vld [vmem:[#allocation2 + $0x80] sm:$0xff]  ;;  %v5912_v10 = vmax.f32 %v5880_v0, 0.0  ;;  %v5883_v13 = vadd.f32 %v15366_v46, %v5590_v47  ;;  %v5593_v12 = vadd.f32 %v18671_v9, %v5300_v29  ;;  %v5301_v7 = vadd.f32 %v22070_v58, %v5008_v22  ;;  %v6304_v30 = vld [vmem:[#allocation2 + $0x91] sm:$0xff]  ;;  %v22073_v29 = vld [vmem:[#allocation55_spill] sm:$0xff] }
 0x3ef   : > { %v6303_v53 = vld [vmem:[#allocation2 + $0x81] sm:$0xff]  ;;  %5973 = vst.msk [vmem:[#allocation2 + $0xb1] sm:$0xff] %vm388_vm1, %v5941_v8  ;;  %v5946_v56 = vadd.f32 %v5914_v19, %v22069_v2  ;;  %v18825_v24 = vpack.c.bf16 %v6010_v37, %v6009_v31  ;;  %v6302_v27 = vld [vmem:[#allocation2 + $0x79] sm:$0xff]  ;;  %v5804_v5 = vpop.f32.mrf.mxu1  ;;  %v18831_v39 = vpack.c.bf16 %v6012_v63, %v6011_v32  ;;  %v22071_v52 = vld [vmem:[#allocation60_spill] sm:$0xff]  ;;  %v18840_v9 = vpack.c.bf16 %v6305_v54, %v6304_v30 }
 0x3f0   : > { %v18829_v36 = vpack.c.bf16 %v6303_v53, %v6302_v27  ;;  %v22072_v60 = vmax.f32 %v22071_v52, 0.0  ;;  %v5915_v41 = vmax.f32 %v5883_v13, 0.0  ;;  %v5881_v17 = vadd.f32 %v5804_v5, %v5588_v45  ;;  %v22074_v40 = vld [vmem:[#allocation41_spill] sm:$0xff]  ;;  %v22075_v42 = vld [vmem:[#allocation16_spill] sm:$0xff]  ;;  %v22080_v45 = vld [vmem:[#allocation11_spill] sm:$0xff] }
 0x3f1   : > { %5978 = vst.msk [vmem:[#allocation2 + $0xf1] sm:$0xff] %vm388_vm1, %v5946_v56  ;;  %15390 = vmatmul.mubr.msk.bf16.gmra.mxu0 %vm388_vm1, %v18825_v24  ;;  %v5011_v47 = vadd.f32 %v22074_v40, %v22073_v29  ;;  %v4717_v3 = vadd.f32 %v22075_v42, %v4424_v16  ;;  %v22076_v8 = vld [vmem:[#allocation108_spill] sm:$0xff]  ;;  %v15369_v0 = vpop.f32.mrf.mxu1  ;;  %v5591_v31 = vadd.f32 %v18695_v15, %v5298_v50  ;;  %v22077_v63 = vld [vmem:[#allocation73_spill] sm:$0xff]  ;;  %v22081_v33 = vld [vmem:[#allocation79_spill] sm:$0xff]  ;;  %v5543_v50 = vpop.f32.mrf.mxu0 }
 0x3f2   : > { %v5944_v25 = vadd.f32 %v5912_v10, %v22072_v60  ;;  %v5299_v19 = vadd.f32 %v22076_v8, %v5006_v34  ;;  %15424 = vmatmul.mubr.msk.bf16.gmra.mxu1 %vm388_vm1, %v18829_v36  ;;  %15393 = vmatprep.mubr.msk.bf16.mxu0 %vm388_vm1, %v18831_v39  ;;  %v22078_v57 = vmax.f32 %v22077_v63, 0.0  ;;  %v5913_v22 = vmax.f32 %v5881_v17, 0.0  ;;  %v22079_v16 = vld [vmem:[#allocation68_spill] sm:$0xff]  ;;  %v22082_v37 = vld [vmem:[#allocation110_spill] sm:$0xff]  ;;  %v22083_v49 = vld [vmem:[#allocation5_spill] sm:$0xff] }
 0x3f3   : > { %v5886_v51 = vadd.f32 %v15369_v0, %v5593_v12  ;;  %15427 = vmatprep.mubr.msk.bf16.mxu1 %vm388_vm1, %v18840_v9  ;;  %v4428_v34 = vadd.f32 %v22079_v16, %v4135_v61  ;;  %v5009_v46 = vadd.f32 %v22081_v33, %v22080_v45  ;;  %v5304_v53 = vadd.f32 %v22082_v37, %v5011_v47  ;;  %v5817_v54 = vpop.f32.mrf.mxu1  ;;  %v6013_v27 = vld [vmem:[#allocation2 + $0xa8] sm:$0xff]  ;;  %v22085_v12 = vld [vmem:[#allocation80_spill] sm:$0xff]  ;;  %v22087_v5 = vld [vmem:[#allocation45_spill] sm:$0xff]  ;;  %v15343_v29 = vpop.f32.mrf.mxu0 }
 0x3f4   : > { %5976 = vst.msk [vmem:[#allocation2 + $0xd9] sm:$0xff] %vm388_vm1, %v5944_v25  ;;  %v5947_v20 = vadd.f32 %v5915_v41, %v22078_v57  ;;  %v5594_v15 = vadd.f32 %v18716_v6, %v5301_v7  ;;  %v22084_v2 = vmax.f32 %v22083_v49, 0.0  ;;  %v5884_v13 = vadd.f32 %v5817_v54, %v5591_v31  ;;  %v6016_v32 = vld [vmem:[#allocation2 + $0xc8] sm:$0xff]  ;;  %v22086_v61 = vld [vmem:[#allocation56_spill] sm:$0xff] }
 0x3f5   : > { %v5918_v10 = vmax.f32 %v5886_v51, 0.0  ;;  %v5012_v58 = vadd.f32 %v22086_v61, %v22085_v12  ;;  %v5010_v30 = vadd.f32 %v22087_v5, %v4717_v3  ;;  %v5592_v52 = vadd.f32 %v18758_v1, %v5299_v19  ;;  %v22088_v60 = vld [vmem:[#allocation111_spill] sm:$0xff]  ;;  %v15370_v6 = vpop.f32.mrf.mxu1  ;;  %v22089_v40 = vld [vmem:[#allocation24_spill] sm:$0xff]  ;;  %v6015_v3 = vld [vmem:[#allocation2 + $0xc0] sm:$0xff]  ;;  %v5556_v12 = vpop.f32.mrf.mxu0 }
 0x3f6   : > { %5979 = vst.msk [vmem:[#allocation2 + $0xf9] sm:$0xff] %vm388_vm1, %v5947_v20  ;;  %v5945_v56 = vadd.f32 %v5913_v22, %v22084_v2  ;;  %v5302_v25 = vadd.f32 %v22088_v60, %v5009_v46  ;;  %v6014_v7 = vld [vmem:[#allocation2 + $0xb0] sm:$0xff]  ;;  %v22090_v47 = vmax.f32 %v22089_v40, 0.0  ;;  %v5916_v8 = vmax.f32 %v5884_v13, 0.0  ;;  %v22091_v19 = vld [vmem:[#allocation113_spill] sm:$0xff]  ;;  %v6308_v16 = vld [vmem:[#allocation2 + $0xc1] sm:$0xff] }
 0x3f7   : > { %v6307_v41 = vld [vmem:[#allocation2 + $0xb1] sm:$0xff]  ;;  %v6309_v17 = vld [vmem:[#allocation2 + $0xc9] sm:$0xff]  ;;  %v5887_v0 = vadd.f32 %v15370_v6, %v5594_v15  ;;  %v18872_v31 = vpack.c.bf16 %v6014_v7, %v6013_v27  ;;  %v5597_v1 = vadd.f32 %v18781_v59, %v5304_v53  ;;  %v5305_v57 = vadd.f32 %v22091_v19, %v5012_v58  ;;  %v5820_v20 = vpop.f32.mrf.mxu1  ;;  %v22094_v59 = vld [vmem:[#allocation82_spill] sm:$0xff] }
 0x3f8   : > { %5977 = vst.msk [vmem:[#allocation2 + $0xe1] sm:$0xff] %vm388_vm1, %v5945_v56  ;;  %v5950_v42 = vadd.f32 %v5918_v10, %v22090_v47  ;;  %v6306_v63 = vld [vmem:[#allocation2 + $0xa9] sm:$0xff]  ;;  %v18878_v51 = vpack.c.bf16 %v6016_v32, %v6015_v3  ;;  %v5885_v54 = vadd.f32 %v5820_v20, %v5592_v52  ;;  %v18885_v15 = vpack.c.bf16 %v6309_v17, %v6308_v16  ;;  %v22095_v53 = vld [vmem:[#allocation57_spill] sm:$0xff]  ;;  %v22097_v10 = vld [vmem:[#allocation114_spill] sm:$0xff] }
 0x3f9   : > { %v18876_v22 = vpack.c.bf16 %v6307_v41, %v6306_v63  ;;  %v22092_v45 = vld [vmem:[#allocation23_spill] sm:$0xff]  ;;  %v5919_v37 = vmax.f32 %v5887_v0, 0.0  ;;  %15394 = vmatmul.mubr.msk.bf16.gmra.mxu0 %vm388_vm1, %v18872_v31  ;;  %v5015_v49 = vadd.f32 %v22095_v53, %v22094_v59  ;;  %v5303_v13 = vadd.f32 %v22097_v10, %v5010_v30  ;;  %v15373_v27 = vpop.f32.mrf.mxu1  ;;  %v22098_v61 = vld [vmem:[#allocation34_spill] sm:$0xff]  ;;  %v22102_v7 = vld [vmem:[#allocation116_spill] sm:$0xff] }
 0x3fa   : > { %5982 = vst.msk [vmem:[#allocation2 + $0x121] sm:$0xff] %vm388_vm1, %v5950_v42  ;;  %v22093_v33 = vmax.f32 %v22092_v45, 0.0  ;;  %v22096_v2 = vld [vmem:[#allocation51_spill] sm:$0xff]  ;;  %15397 = vmatprep.mubr.msk.bf16.mxu0 %vm388_vm1, %v18878_v51  ;;  %v5595_v32 = vadd.f32 %v18812_v35, %v5302_v25  ;;  %v22099_v58 = vmax.f32 %v22098_v61, 0.0  ;;  %v5917_v52 = vmax.f32 %v5885_v54, 0.0  ;;  %v22103_v35 = vld [vmem:[#allocation64_spill] sm:$0xff]  ;;  %v15344_v54 = vpop.f32.mrf.mxu0 }
 0x3fb   : > { %v4721_v56 = vadd.f32 %v22096_v2, %v4428_v34  ;;  %15428 = vmatmul.mubr.msk.bf16.gmra.mxu1 %vm388_vm1, %v18876_v22  ;;  %v5890_v60 = vadd.f32 %v15373_v27, %v5597_v1  ;;  %v22100_v34 = vld [vmem:[#allocation47_spill] sm:$0xff]  ;;  %v5308_v41 = vadd.f32 %v22102_v7, %v5015_v49  ;;  %v5833_v17 = vpop.f32.mrf.mxu1  ;;  %v5598_v40 = vadd.f32 %v18833_v38, %v5305_v57  ;;  %v6017_v0 = vld [vmem:[#allocation2 + $0xd8] sm:$0xff]  ;;  %v22106_v1 = vld [vmem:[#allocation58_spill] sm:$0xff] }
 0x3fc   : > { %v5948_v46 = vadd.f32 %v5916_v8, %v22093_v33  ;;  %v5951_v5 = vadd.f32 %v5919_v37, %v22099_v58  ;;  %15431 = vmatprep.mubr.msk.bf16.mxu1 %vm388_vm1, %v18885_v15  ;;  %v22101_v30 = vld [vmem:[#allocation19_spill] sm:$0xff]  ;;  %v22104_v25 = vmax.f32 %v22103_v35, 0.0  ;;  %v5888_v8 = vadd.f32 %v5833_v17, %v5595_v32  ;;  %v22107_v20 = vld [vmem:[#allocation49_spill] sm:$0xff]  ;;  %v6019_v61 = vld [vmem:[#allocation2 + $0xf0] sm:$0xff]  ;;  %v5559_v17 = vpop.f32.mrf.mxu0 }
 0x3fd   : > { %v5013_v6 = vadd.f32 %v22101_v30, %v22100_v34  ;;  %v5922_v42 = vmax.f32 %v5890_v60, 0.0  ;;  %v6020_v63 = vld [vmem:[#allocation2 + $0xf8] sm:$0xff]  ;;  %v22105_v3 = vld [vmem:[#allocation83_spill] sm:$0xff]  ;;  %v5014_v16 = vadd.f32 %v22107_v20, %v4721_v56  ;;  %v5596_v45 = vadd.f32 %v5543_v50, %v5303_v13 }
 0x3fe   : > { %5980 = vst.msk [vmem:[#allocation2 + $0x109] sm:$0xff] %vm388_vm1, %v5948_v46  ;;  %5983 = vst.msk [vmem:[#allocation2 + $0x129] sm:$0xff] %vm388_vm1, %v5951_v5  ;;  %v5949_v47 = vadd.f32 %v5917_v52, %v22104_v25  ;;  %v5016_v19 = vadd.f32 %v22106_v1, %v22105_v3  ;;  %v15374_v46 = vpop.f32.mrf.mxu1  ;;  %v6313_v57 = vld [vmem:[#allocation2 + $0xf9] sm:$0xff]  ;;  %v22108_v59 = vld [vmem:[#allocation7_spill] sm:$0xff]  ;;  %v5920_v2 = vmax.f32 %v5888_v8, 0.0  ;;  %v5601_v56 = vadd.f32 %v15343_v29, %v5308_v41 }
 0x3ff   : > { %v5306_v33 = vadd.f32 %v18576_v62, %v5013_v6  ;;  %v6018_v37 = vld [vmem:[#allocation2 + $0xe0] sm:$0xff]  ;;  %v22109_v53 = vmax.f32 %v22108_v59, 0.0  ;;  %v5891_v10 = vadd.f32 %v15374_v46, %v5598_v40  ;;  %v18920_v58 = vpack.c.bf16 %v6020_v63, %v6019_v61  ;;  %v6312_v5 = vld [vmem:[#allocation2 + $0xf1] sm:$0xff] }
 0x400   : > { %v6311_v38 = vld [vmem:[#allocation2 + $0xe1] sm:$0xff]  ;;  %5981 = vst.msk [vmem:[#allocation2 + $0x111] sm:$0xff] %vm388_vm1, %v5949_v47  ;;  %v18915_v27 = vpack.c.bf16 %v6018_v37, %v6017_v0  ;;  %v6310_v32 = vld [vmem:[#allocation2 + $0xd9] sm:$0xff]  ;;  %v5309_v50 = vadd.f32 %v18582_v43, %v5016_v19  ;;  %v5836_v62 = vpop.f32.mrf.mxu1  ;;  %v22110_v52 = vld [vmem:[#allocation36_spill] sm:$0xff]  ;;  %v18927_v7 = vpack.c.bf16 %v6313_v57, %v6312_v5  ;;  %v5307_v43 = vadd.f32 %v18587_v14, %v5014_v16 }
 0x401   : > { %v5954_v49 = vadd.f32 %v5922_v42, %v22109_v53  ;;  %v18918_v13 = vpack.c.bf16 %v6311_v38, %v6310_v32  ;;  %v22111_v60 = vmax.f32 %v22110_v52, 0.0  ;;  %v5923_v30 = vmax.f32 %v5891_v10, 0.0  ;;  %v22112_v40 = vld [vmem:[#allocation65_spill] sm:$0xff]  ;;  %v22114_v0 = vld [vmem:[#allocation78_spill] sm:$0xff]  ;;  %v22116_v38 = vld [vmem:[#allocation12_spill] sm:$0xff] }
 0x402   : > { %v5889_v6 = vadd.f32 %v5836_v62, %v5596_v45  ;;  %15398 = vmatmul.mubr.msk.bf16.gmra.mxu0 %vm388_vm1, %v18915_v27  ;;  %v15377_v29 = vpop.f32.mrf.mxu1  ;;  %v5599_v41 = vadd.f32 %v5556_v12, %v5306_v33  ;;  %v22113_v35 = vmax.f32 %v22112_v40, 0.0  ;;  %v5602_v8 = vadd.f32 %v15344_v54, %v5309_v50  ;;  %v6023_v10 = vld [vmem:[#allocation2 + $0x120] sm:$0xff]  ;;  %v22118_v62 = vld [vmem:[#allocation25_spill] sm:$0xff] }
 0x403   : > { %5986 = vst.msk [vmem:[#allocation2 + $0x151] sm:$0xff] %vm388_vm1, %v5954_v49  ;;  %v5952_v34 = vadd.f32 %v5920_v2, %v22111_v60  ;;  %15432 = vmatmul.mubr.msk.bf16.gmra.mxu1 %vm388_vm1, %v18918_v13  ;;  %15401 = vmatprep.mubr.msk.bf16.mxu0 %vm388_vm1, %v18920_v58  ;;  %v5894_v42 = vadd.f32 %v15377_v29, %v5601_v56  ;;  %v22115_v63 = vmax.f32 %v22114_v0, 0.0  ;;  %v22117_v57 = vmax.f32 %v22116_v38, 0.0  ;;  %v6316_v50 = vld [vmem:[#allocation2 + $0x121] sm:$0xff] }
 0x404   : > { %v5955_v25 = vadd.f32 %v5923_v30, %v22113_v35  ;;  %v5921_v47 = vmax.f32 %v5889_v6, 0.0  ;;  %15435 = vmatprep.mubr.msk.bf16.mxu1 %vm388_vm1, %v18927_v7  ;;  %v5849_v14 = vpop.f32.mrf.mxu1  ;;  %v5600_v16 = vadd.f32 %v5559_v17, %v5307_v43  ;;  %v22119_v5 = vmax.f32 %v22118_v62, 0.0  ;;  %v22120_v6 = vld [vmem:[#allocation38_spill] sm:$0xff] }
 0x405   : > { %5984 = vst.msk [vmem:[#allocation2 + $0x139] sm:$0xff] %vm388_vm1, %v5952_v34  ;;  %v5926_v1 = vmax.f32 %v5894_v42, 0.0  ;;  %v5892_v12 = vadd.f32 %v5849_v14, %v5599_v41  ;;  %v6021_v19 = vld [vmem:[#allocation2 + $0x108] sm:$0xff]  ;;  %v22121_v43 = vmax.f32 %v22120_v6, 0.0  ;;  %v22122_v17 = vld [vmem:[#allocation66_spill] sm:$0xff]  ;;  %v7269_v62 = vsel %vm3355_vm5, %v18728_v48, 0 }
 0x406   : > { %5987 = vst.msk [vmem:[#allocation2 + $0x159] sm:$0xff] %vm388_vm1, %v5955_v25  ;;  %v5953_v3 = vadd.f32 %v5921_v47, %v22115_v63  ;;  %v6024_v20 = vld [vmem:[#allocation2 + $0x128] sm:$0xff]  ;;  %v15378_v45 = vpop.f32.mrf.mxu1  ;;  %v22123_v40 = vmax.f32 %v22122_v17, 0.0  ;;  %v19018_v48 = vld [vmem:[%s21560_s5 + $0x1c] sm:$0xf] }
 0x407   : > { %v6022_v33 = vld [vmem:[#allocation2 + $0x110] sm:$0xff]  ;;  %v5958_v59 = vadd.f32 %v5926_v1, %v22117_v57  ;;  %v5924_v54 = vmax.f32 %v5892_v12, 0.0  ;;  %v5895_v53 = vadd.f32 %v15378_v45, %v5602_v8  ;;  %v18949_v56 = vpack.c.bf16 %v6024_v20, %v6023_v10  ;;  %v6596_v17 = vld [vmem:[#allocation2 + $0x82] sm:$0xff] }
 0x408   : > { %v6315_v46 = vld [vmem:[#allocation2 + $0x111] sm:$0xff]  ;;  %v6317_v37 = vld [vmem:[#allocation2 + $0x129] sm:$0xff]  ;;  %5985 = vst.msk [vmem:[#allocation2 + $0x141] sm:$0xff] %vm388_vm1, %v5953_v3  ;;  %v18945_v49 = vpack.c.bf16 %v6022_v33, %v6021_v19  ;;  %v5852_v32 = vpop.f32.mrf.mxu1 }
 0x409   : > { %v6314_v2 = vld [vmem:[#allocation2 + $0x109] sm:$0xff]  ;;  %5990 = vst.msk [vmem:[#allocation2 + $0x181] sm:$0xff] %vm388_vm1, %v5958_v59  ;;  %v5956_v52 = vadd.f32 %v5924_v54, %v22119_v5  ;;  %v5927_v60 = vmax.f32 %v5895_v53, 0.0  ;;  %v5893_v34 = vadd.f32 %v5852_v32, %v5600_v16  ;;  %v18956_v30 = vpack.c.bf16 %v6317_v37, %v6316_v50  ;;  %v6587_v53 = vld [vmem:[#allocation2 + $0x1a] sm:$0xff]  ;;  %v6589_v10 = vld [vmem:[#allocation2 + $0x32] sm:$0xff] }
 0x40a   : > { %v18947_v61 = vpack.c.bf16 %v6315_v46, %v6314_v2  ;;  %15402 = vmatmul.mubr.msk.bf16.gmra.mxu0 %vm388_vm1, %v18945_v49  ;;  %v6027_v1 = vld [vmem:[#allocation2 + $0x150] sm:$0xff]  ;;  %v6585_v16 = vld [vmem:[#allocation2 + $0x2] sm:$0xff]  ;;  %v6590_v32 = vld [vmem:[#allocation2 + $0x3a] sm:$0xff] }
 0x40b   : > { %15405 = vmatprep.mubr.msk.bf16.mxu0 %vm388_vm1, %v18949_v56  ;;  %5988 = vst.msk [vmem:[#allocation2 + $0x169] sm:$0xff] %vm388_vm1, %v5956_v52  ;;  %v5959_v29 = vadd.f32 %v5927_v60, %v22121_v43  ;;  %v5925_v41 = vmax.f32 %v5893_v34, 0.0  ;;  %v6320_v19 = vld [vmem:[#allocation2 + $0x151] sm:$0xff]  ;;  %v6588_v2 = vld [vmem:[#allocation2 + $0x22] sm:$0xff]  ;;  %v19004_v5 = vpack.c.bf16 %v6590_v32, %v6589_v10  ;;  %v7562_v52 = vsel %vm3355_vm5, %v18740_v23, 0 }
 0x40c   : > { %15436 = vmatmul.mubr.msk.bf16.gmra.mxu1 %vm388_vm1, %v18947_v61  ;;  %v6025_v25 = vld [vmem:[#allocation2 + $0x138] sm:$0xff]  ;;  %v6586_v45 = vld [vmem:[#allocation2 + $0xa] sm:$0xff]  ;;  %v18998_v50 = vpack.c.bf16 %v6588_v2, %v6587_v53  ;;  %v6593_v34 = vld [vmem:[#allocation2 + $0x62] sm:$0xff] }
 0x40d   : > { %15439 = vmatprep.mubr.msk.bf16.mxu1 %vm388_vm1, %v18956_v30  ;;  %5991 = vst.msk [vmem:[#allocation2 + $0x189] sm:$0xff] %vm388_vm1, %v5959_v29  ;;  %v5957_v35 = vadd.f32 %v5925_v41, %v22123_v40  ;;  %v6318_v47 = vld [vmem:[#allocation2 + $0x139] sm:$0xff]  ;;  %v6618_v57 = vpack.c.bf16 %v6586_v45, %v6585_v16  ;;  %v6591_v23 = vld [vmem:[#allocation2 + $0x4a] sm:$0xff]  ;;  %v6604_v45 = vld [vmem:[#allocation2 + $0xe2] sm:$0xff] }
 0x40e   : > { %v6028_v42 = vld [vmem:[#allocation2 + $0x158] sm:$0xff]  ;;  %v6594_v6 = vld [vmem:[#allocation2 + $0x6a] sm:$0xff]  ;;  %v6609_v2 = vld [vmem:[#allocation2 + $0x122] sm:$0xff] }
 0x40f   : > { %v6026_v14 = vld [vmem:[#allocation2 + $0x140] sm:$0xff]  ;;  %5989 = vst.msk [vmem:[#allocation2 + $0x171] sm:$0xff] %vm388_vm1, %v5957_v35  ;;  %v18975_v12 = vpack.c.bf16 %v6028_v42, %v6027_v1  ;;  %v6592_v60 = vld [vmem:[#allocation2 + $0x52] sm:$0xff]  ;;  %v19030_v29 = vpack.c.bf16 %v6594_v6, %v6593_v34  ;;  %v6599_v42 = vld [vmem:[#allocation2 + $0xaa] sm:$0xff] }
 0x410   : > { %v6319_v8 = vld [vmem:[#allocation2 + $0x141] sm:$0xff]  ;;  %v6321_v0 = vld [vmem:[#allocation2 + $0x159] sm:$0xff]  ;;  %v18971_v63 = vpack.c.bf16 %v6026_v14, %v6025_v25  ;;  %v19028_v43 = vpack.c.bf16 %v6592_v60, %v6591_v23  ;;  %v6610_v10 = vld [vmem:[#allocation2 + $0x12a] sm:$0xff] }
 0x411   : > { %v18973_v3 = vpack.c.bf16 %v6319_v8, %v6318_v47  ;;  %v18979_v20 = vpack.c.bf16 %v6321_v0, %v6320_v19  ;;  %v6595_v41 = vld [vmem:[#allocation2 + $0x7a] sm:$0xff]  ;;  %v6597_v40 = vld [vmem:[#allocation2 + $0x92] sm:$0xff]  ;;  %v6601_v8 = vld [vmem:[#allocation2 + $0xc2] sm:$0xff] }
 0x412   : > { %15406 = vmatmul.mubr.msk.bf16.gmra.mxu0 %vm388_vm1, %v18971_v63  ;;  %v6029_v33 = vld [vmem:[#allocation2 + $0x168] sm:$0xff]  ;;  %v6598_v35 = vld [vmem:[#allocation2 + $0x9a] sm:$0xff]  ;;  %v19040_v25 = vpack.c.bf16 %v6596_v17, %v6595_v41  ;;  %v6600_v14 = vld [vmem:[#allocation2 + $0xb2] sm:$0xff] }
 0x413   : > { %15409 = vmatprep.mubr.msk.bf16.mxu0 %vm388_vm1, %v18975_v12  ;;  %v6322_v37 = vld [vmem:[#allocation2 + $0x169] sm:$0xff]  ;;  %v19042_v47 = vpack.c.bf16 %v6598_v35, %v6597_v40  ;;  %v19052_v1 = vpack.c.bf16 %v6600_v14, %v6599_v42  ;;  %v6603_v16 = vld [vmem:[#allocation2 + $0xda] sm:$0xff]  ;;  %v6608_v53 = vld [vmem:[#allocation2 + $0x112] sm:$0xff] }
 0x414   : > { %15440 = vmatmul.mubr.msk.bf16.gmra.mxu1 %vm388_vm1, %v18973_v3  ;;  %v6602_v0 = vld [vmem:[#allocation2 + $0xca] sm:$0xff]  ;;  %v6612_v23 = vld [vmem:[#allocation2 + $0x142] sm:$0xff]  ;;  %v6613_v60 = vld [vmem:[#allocation2 + $0x152] sm:$0xff] }
 0x415   : > { %15443 = vmatprep.mubr.msk.bf16.mxu1 %vm388_vm1, %v18979_v20  ;;  %v19054_v19 = vpack.c.bf16 %v6602_v0, %v6601_v8  ;;  %v6614_v34 = vld [vmem:[#allocation2 + $0x15a] sm:$0xff]  ;;  %v6909_v35 = vld [vmem:[#allocation2 + $0x188] sm:$0xff] }
 0x416   : > { %v6030_v46 = vld [vmem:[#allocation2 + $0x170] sm:$0xff]  ;;  %v6632_v41 = vpack.c.bf16 %v6614_v34, %v6613_v60  ;;  %v6908_v14 = vld [vmem:[#allocation2 + $0x180] sm:$0xff] }
 0x417   : > { %v6323_v38 = vld [vmem:[#allocation2 + $0x171] sm:$0xff]  ;;  %v18987_v59 = vpack.c.bf16 %v6030_v46, %v6029_v33  ;;  %v6606_v46 = vld [vmem:[#allocation2 + $0xfa] sm:$0xff]  ;;  %v19082_v8 = vpack.c.bf16 %v6909_v35, %v6908_v14 }
 0x418   : > { %v18989_v54 = vpack.c.bf16 %v6323_v38, %v6322_v37  ;;  %v6605_v33 = vld [vmem:[#allocation2 + $0xf2] sm:$0xff]  ;;  %v6627_v37 = vpack.c.bf16 %v6604_v45, %v6603_v16  ;;  %v6615_v17 = vld [vmem:[#allocation2 + $0x16a] sm:$0xff]  ;;  %v8148_v16 = vsel %vm3355_vm5, %v19018_v48, 0  ;;  %v8375_v45 = vld [vmem:[%s21560_s5 + $0x20] sm:$0xf] }
 0x419   : > { %v6628_v38 = vpack.c.bf16 %v6606_v46, %v6605_v33  ;;  %v6616_v40 = vld [vmem:[#allocation2 + $0x172] sm:$0xff] }
 0x41a   : > { %15410 = vmatmul.mubr.msk.bf16.gmra.mxu0 %vm388_vm1, %v18987_v59  ;;  %v6633_v42 = vpack.c.bf16 %v6616_v40, %v6615_v17 }
 0x41b   : > { %15449 = vmatprep.mubr.msk.bf16.mxu0 %vm388_vm1, %v6618_v57  ;;  %v6607_v57 = vld [vmem:[#allocation2 + $0x10a] sm:$0xff] }
 0x41c   : > { %15444 = vmatmul.mubr.msk.bf16.gmra.mxu1 %vm388_vm1, %v18989_v54  ;;  %v6629_v32 = vpack.c.bf16 %v6608_v53, %v6607_v57 }
 0x41d   : > { %15483 = vmatprep.mubr.msk.bf16.mxu1 %vm388_vm1, %v18708_v21  ;;  %v19011_v21 = vld [vmem:[%s21560_s5 + $0x18] sm:$0xf] }
 0x41e   : > { %v7855_v0 = vsel %vm3355_vm5, %v19011_v21, 0 }
 0x422   : > { %15450 = vmatmul.mubr.msk.bf16.vlgmr.msra.gmra.mxu0 %vm388_vm1, %v18998_v50 }
 0x423   : > { %15516 = vmatpush3.bf16.msra.mxu0 %v7269_v62  ;;  %15453 = vmatprep.mubr.msk.bf16.mxu0 %vm388_vm1, %v19004_v5  ;;  %v6630_v62 = vpack.c.bf16 %v6610_v10, %v6609_v2 }
 0x424   : > { %15484 = vmatmul.mubr.msk.bf16.vlgmr.msra.gmra.mxu1 %vm388_vm1, %v18714_v44  ;;  %16108 = vmatprep.subr.msk.bf16.mxu0 %vm3355_vm5, %v19011_v21  ;;  %v7495_v21 = vld [vmem:[#allocation2 + $0x18a] sm:$0xff] }
 0x425   : > { %15487 = vmatprep.mubr.msk.bf16.mxu1 %vm388_vm1, %v18773_v28  ;;  %15550 = vmatpush3.bf16.msra.mxu1 %v7562_v52  ;;  %v6611_v52 = vld [vmem:[#allocation2 + $0x13a] sm:$0xff] }
 0x426   : > { %16109 = vmatprep.subr.msk.bf16.mxu1 %vm3355_vm5, %v19018_v48  ;;  %v6631_v6 = vpack.c.bf16 %v6612_v23, %v6611_v52  ;;  %v7201_v48 = vld [vmem:[#allocation2 + $0x181] sm:$0xff] }
 0x42a   : > { %15454 = vmatmul.mubr.msk.bf16.gmra.mxu0 %vm388_vm1, %v19028_v43 }
 0x42b   : > { %15457 = vmatprep.mubr.msk.bf16.mxu0 %vm388_vm1, %v19030_v29 }
 0x42c   : > { %15488 = vmatmul.mubr.msk.bf16.gmra.mxu1 %vm388_vm1, %v18779_v55 }
 0x42d   : > { %15491 = vmatprep.mubr.msk.bf16.mxu1 %vm388_vm1, %v18825_v24 }
 0x432   : > { %15458 = vmatmul.mubr.msk.bf16.gmra.mxu0 %vm388_vm1, %v19040_v25 }
 0x433   : > { %15461 = vmatprep.mubr.msk.bf16.mxu0 %vm388_vm1, %v19042_v47 }
 0x434   : > { %15492 = vmatmul.mubr.msk.bf16.gmra.mxu1 %vm388_vm1, %v18831_v39 }
 0x435   : > { %15495 = vmatprep.mubr.msk.bf16.mxu1 %vm388_vm1, %v18872_v31 }
 0x43a   : > { %15462 = vmatmul.mubr.msk.bf16.gmra.mxu0 %vm388_vm1, %v19052_v1 }
 0x43b   : > { %15465 = vmatprep.mubr.msk.bf16.mxu0 %vm388_vm1, %v19054_v19 }
 0x43c   : > { %15496 = vmatmul.mubr.msk.bf16.gmra.mxu1 %vm388_vm1, %v18878_v51 }
 0x43d   : > { %15499 = vmatprep.mubr.msk.bf16.mxu1 %vm388_vm1, %v18915_v27 }
 0x442   : > { %15466 = vmatmul.mubr.msk.bf16.gmra.mxu0 %vm388_vm1, %v6627_v37 }
 0x443   : > { %15469 = vmatprep.mubr.msk.bf16.mxu0 %vm388_vm1, %v6628_v38 }
 0x444   : > { %15500 = vmatmul.mubr.msk.bf16.gmra.mxu1 %vm388_vm1, %v18920_v58 }
 0x445   : > { %15503 = vmatprep.mubr.msk.bf16.mxu1 %vm388_vm1, %v18945_v49 }
 0x44a   : > { %15470 = vmatmul.mubr.msk.bf16.gmra.mxu0 %vm388_vm1, %v6629_v32 }
 0x44b   : > { %15473 = vmatprep.mubr.msk.bf16.mxu0 %vm388_vm1, %v6630_v62 }
 0x44c   : > { %15504 = vmatmul.mubr.msk.bf16.gmra.mxu1 %vm388_vm1, %v18949_v56 }
 0x44d   : > { %15507 = vmatprep.mubr.msk.bf16.mxu1 %vm388_vm1, %v18971_v63 }
 0x452   : > { %15474 = vmatmul.mubr.msk.bf16.gmra.mxu0 %vm388_vm1, %v6631_v6 }
 0x453   : > { %15477 = vmatprep.mubr.msk.bf16.mxu0 %vm388_vm1, %v6632_v41 }
 0x454   : > { %15508 = vmatmul.mubr.msk.bf16.gmra.mxu1 %vm388_vm1, %v18975_v12 }
 0x455   : > { %15511 = vmatprep.mubr.msk.bf16.mxu1 %vm388_vm1, %v18987_v59 }
 0x45a   : > { %15478 = vmatmul.mubr.msk.bf16.gmra.mxu0 %vm388_vm1, %v6633_v42 }
 0x45b   : > { %15517 = vmatprep.mubr.msk.bf16.mxu0 %vm388_vm1, %v18712_v18  ;;  %v7202_v18 = vld [vmem:[#allocation2 + $0x189] sm:$0xff] }
 0x45c   : > { %15512 = vmatmul.mubr.msk.bf16.gmra.mxu1 %vm388_vm1, %v19082_v8 }
 0x45d   : > { %15551 = vmatprep.mubr.msk.bf16.mxu1 %vm388_vm1, %v18998_v50  ;;  %v7494_v50 = vld [vmem:[#allocation2 + $0x182] sm:$0xff] }
 0x462   : > { %15518 = vmatmul.mubr.msk.bf16.vlgmr.msra.gmra.mxu0 %vm388_vm1, %v18723_v26 }
 0x463   : > { %15584 = vmatpush3.bf16.msra.mxu0 %v7855_v0  ;;  %15521 = vmatprep.mubr.msk.bf16.mxu0 %vm388_vm1, %v18777_v4 }
 0x464   : > { %15552 = vmatmul.mubr.msk.bf16.vlgmr.msra.gmra.mxu1 %vm388_vm1, %v19004_v5  ;;  %16110 = vmatprep.subr.msk.bf16.mxu0 %vm3355_vm5, %v8375_v45 }
 0x465   : > { %15555 = vmatprep.mubr.msk.bf16.mxu1 %vm388_vm1, %v19028_v43  ;;  %15618 = vmatpush3.bf16.msra.mxu1 %v8148_v16  ;;  %v19148_v43 = vpack.c.bf16 %v7202_v18, %v7201_v48 }
 0x46a   : > { %15522 = vmatmul.mubr.msk.bf16.gmra.mxu0 %vm388_vm1, %v18788_v11 }
 0x46b   : > { %15525 = vmatprep.mubr.msk.bf16.mxu0 %vm388_vm1, %v18829_v36 }
 0x46c   : > { %15556 = vmatmul.mubr.msk.bf16.gmra.mxu1 %vm388_vm1, %v19030_v29 }
 0x46d   : > { %15559 = vmatprep.mubr.msk.bf16.mxu1 %vm388_vm1, %v19040_v25  ;;  %v19150_v25 = vpack.c.bf16 %v7495_v21, %v7494_v50 }
 0x472   : > { %15526 = vmatmul.mubr.msk.bf16.gmra.mxu0 %vm388_vm1, %v18840_v9 }
 0x473   : > { %15529 = vmatprep.mubr.msk.bf16.mxu0 %vm388_vm1, %v18876_v22 }
 0x474   : > { %15560 = vmatmul.mubr.msk.bf16.gmra.mxu1 %vm388_vm1, %v19042_v47  ;;  %v19163_v47 = vld [vmem:[%s21561_s6] ss:$0 sm:$0xff] }
 0x475   : > { %15563 = vmatprep.mubr.msk.bf16.mxu1 %vm388_vm1, %v19052_v1  ;;  %v8441_v1 = vsel %vm3355_vm5, %v8375_v45, 0 }
 0x47a   : > { %15530 = vmatmul.mubr.msk.bf16.gmra.mxu0 %vm388_vm1, %v18885_v15 }
 0x47b   : > { %15533 = vmatprep.mubr.msk.bf16.mxu0 %vm388_vm1, %v18918_v13 }
 0x47c   : > { %15564 = vmatmul.mubr.msk.bf16.gmra.mxu1 %vm388_vm1, %v19054_v19 }
 0x47d   : > { %15567 = vmatprep.mubr.msk.bf16.mxu1 %vm388_vm1, %v6627_v37 }
 0x482   : > { %15534 = vmatmul.mubr.msk.bf16.gmra.mxu0 %vm388_vm1, %v18927_v7 }
 0x483   : > { %15537 = vmatprep.mubr.msk.bf16.mxu0 %vm388_vm1, %v18947_v61 }
 0x484   : > { %15568 = vmatmul.mubr.msk.bf16.gmra.mxu1 %vm388_vm1, %v6628_v38 }
 0x485   : > { %15571 = vmatprep.mubr.msk.bf16.mxu1 %vm388_vm1, %v6629_v32 }
 0x48a   : > { %15538 = vmatmul.mubr.msk.bf16.gmra.mxu0 %vm388_vm1, %v18956_v30 }
 0x48b   : > { %15541 = vmatprep.mubr.msk.bf16.mxu0 %vm388_vm1, %v18973_v3 }
 0x48c   : > { %15572 = vmatmul.mubr.msk.bf16.gmra.mxu1 %vm388_vm1, %v6630_v62 }
 0x48d   : > { %15575 = vmatprep.mubr.msk.bf16.mxu1 %vm388_vm1, %v6631_v6 }
 0x492   : > { %15542 = vmatmul.mubr.msk.bf16.gmra.mxu0 %vm388_vm1, %v18979_v20 }
 0x493   : > { %15545 = vmatprep.mubr.msk.bf16.mxu0 %vm388_vm1, %v18989_v54 }
 0x494   : > { %15576 = vmatmul.mubr.msk.bf16.gmra.mxu1 %vm388_vm1, %v6632_v41 }
 0x495   : > { %15579 = vmatprep.mubr.msk.bf16.mxu1 %vm388_vm1, %v6633_v42 }
 0x49a   : > { %15546 = vmatmul.mubr.msk.bf16.gmra.mxu0 %vm388_vm1, %v19148_v43 }
 0x49b   : > { %15585 = vmatprep.mubr.msk.bf16.mxu0 %vm388_vm1, %v18714_v44 }
 0x49c   : > { %15580 = vmatmul.mubr.msk.bf16.gmra.mxu1 %vm388_vm1, %v19150_v25 }
 0x49d   : > { %15619 = vmatprep.mubr.msk.bf16.mxu1 %vm388_vm1, %v18723_v26 }
 0x4a0   : > { %v15383_v19 = vpop.f32.mrf.mxu0 }
 0x4a1   : > { %v6262_v33 = vadd.f32 %v15383_v19, %v19163_v47  ;;  %v15417_v46 = vpop.f32.mrf.mxu1 }
 0x4a2   : > { %15586 = vmatmul.mubr.msk.bf16.vlgmr.msra.gmra.mxu0 %vm388_vm1, %v18773_v28  ;;  %v6133_v44 = vpop.f32.mrf.mxu0 }
 0x4a3   : > { %15652 = vmatpush3.bf16.msra.mxu0 %v8441_v1  ;;  %15589 = vmatprep.mubr.msk.bf16.mxu0 %vm388_vm1, %v18779_v55  ;;  %v19175_v26 = vadd.f32 %v15417_v46, %v6262_v33  ;;  %v6260_v37 = vadd.f32 %v19163_v47, %v6133_v44  ;;  %v6426_v38 = vpop.f32.mrf.mxu1 }
 0x4a4   : > { %15620 = vmatmul.mubr.msk.bf16.vlgmr.msra.gmra.mxu1 %vm388_vm1, %v18777_v4  ;;  %v15384_v28 = vpop.f32.mrf.mxu0 }
 0x4a5   : > { %15623 = vmatprep.mubr.msk.bf16.mxu1 %vm388_vm1, %v18788_v11  ;;  %v19178_v57 = vadd.f32 %v6426_v38, %v6260_v37  ;;  %v6263_v53 = vadd.f32 %v15384_v28, %v19163_v47  ;;  %v15418_v2 = vpop.f32.mrf.mxu1 }
 0x4a6   : > { %v6136_v4 = vpop.f32.mrf.mxu0 }
 0x4a7   : > { %v19181_v10 = vadd.f32 %v15418_v2, %v6263_v53  ;;  %v6261_v55 = vadd.f32 %v19163_v47, %v6136_v4  ;;  %v6429_v32 = vpop.f32.mrf.mxu1 }
 0x4a8   : > { %v15387_v62 = vpop.f32.mrf.mxu0 }
 0x4a9   : > { %v19186_v11 = vadd.f32 %v6429_v32, %v6261_v55  ;;  %v6266_v52 = vadd.f32 %v15387_v62, %v19163_v47 }
 0x4aa   : > { %15590 = vmatmul.mubr.msk.bf16.gmra.mxu0 %vm388_vm1, %v18825_v24  ;;  %v15421_v23 = vpop.f32.mrf.mxu1  ;;  %v6149_v60 = vpop.f32.mrf.mxu0 }
 0x4ab   : > { %15593 = vmatprep.mubr.msk.bf16.mxu0 %vm388_vm1, %v18831_v39  ;;  %v19195_v34 = vadd.f32 %v15421_v23, %v6266_v52  ;;  %v6264_v6 = vadd.f32 %v19163_v47, %v6149_v60 }
 0x4ac   : > { %15624 = vmatmul.mubr.msk.bf16.gmra.mxu1 %vm388_vm1, %v18829_v36  ;;  %v6442_v24 = vpop.f32.mrf.mxu1  ;;  %v15388_v41 = vpop.f32.mrf.mxu0 }
 0x4ad   : > { %15627 = vmatprep.mubr.msk.bf16.mxu1 %vm388_vm1, %v18840_v9  ;;  %v19198_v17 = vadd.f32 %v6442_v24, %v6264_v6  ;;  %v6267_v40 = vadd.f32 %v15388_v41, %v19163_v47 }
 0x4ae   : > { %v15422_v35 = vpop.f32.mrf.mxu1  ;;  %v6152_v42 = vpop.f32.mrf.mxu0 }
 0x4af   : > { %v19201_v36 = vadd.f32 %v15422_v35, %v6267_v40  ;;  %v6265_v39 = vadd.f32 %v19163_v47, %v6152_v42 }
 0x4b0   : > { %v6445_v14 = vpop.f32.mrf.mxu1 }
 0x4b1   : > { %v15391_v0 = vpop.f32.mrf.mxu0  ;;  %v19206_v9 = vadd.f32 %v6445_v14, %v6265_v39 }
 0x4b2   : > { %15594 = vmatmul.mubr.msk.bf16.gmra.mxu0 %vm388_vm1, %v18872_v31  ;;  %v6270_v16 = vadd.f32 %v15391_v0, %v19163_v47  ;;  %v15425_v45 = vpop.f32.mrf.mxu1 }
 0x4b3   : > { %15597 = vmatprep.mubr.msk.bf16.mxu0 %vm388_vm1, %v18878_v51  ;;  %v6165_v18 = vpop.f32.mrf.mxu0 }
 0x4b4   : > { %15628 = vmatmul.mubr.msk.bf16.gmra.mxu1 %vm388_vm1, %v18876_v22  ;;  %v19215_v50 = vadd.f32 %v15425_v45, %v6270_v16  ;;  %v6268_v21 = vadd.f32 %v19163_v47, %v6165_v18  ;;  %v6458_v31 = vpop.f32.mrf.mxu1 }
 0x4b5   : > { %15631 = vmatprep.mubr.msk.bf16.mxu1 %vm388_vm1, %v18885_v15  ;;  %v15392_v48 = vpop.f32.mrf.mxu0 }
 0x4b6   : > { %v19218_v1 = vadd.f32 %v6458_v31, %v6268_v21  ;;  %v6271_v19 = vadd.f32 %v15392_v48, %v19163_v47  ;;  %v15426_v33 = vpop.f32.mrf.mxu1 }
 0x4b7   : > { %v6168_v46 = vpop.f32.mrf.mxu0 }
 0x4b8   : > { %v19221_v22 = vadd.f32 %v15426_v33, %v6271_v19  ;;  %v6269_v51 = vadd.f32 %v19163_v47, %v6168_v46  ;;  %v6461_v44 = vpop.f32.mrf.mxu1 }
 0x4b9   : > { %v15395_v37 = vpop.f32.mrf.mxu0 }
 0x4ba   : > { %15598 = vmatmul.mubr.msk.bf16.gmra.mxu0 %vm388_vm1, %v18915_v27  ;;  %v19226_v15 = vadd.f32 %v6461_v44, %v6269_v51  ;;  %v6274_v38 = vadd.f32 %v15395_v37, %v19163_v47 }
 0x4bb   : > { %v15429_v28 = vpop.f32.mrf.mxu1  ;;  %15601 = vmatprep.mubr.msk.bf16.mxu0 %vm388_vm1, %v18920_v58  ;;  %v6181_v53 = vpop.f32.mrf.mxu0 }
 0x4bc   : > { %15632 = vmatmul.mubr.msk.bf16.gmra.mxu1 %vm388_vm1, %v18918_v13  ;;  %v19235_v2 = vadd.f32 %v15429_v28, %v6274_v38  ;;  %v6272_v4 = vadd.f32 %v19163_v47, %v6181_v53  ;;  %v7787_v53 = vld [vmem:[#allocation2 + $0x198] sm:$0xff] }
 0x4bd   : > { %15635 = vmatprep.mubr.msk.bf16.mxu1 %vm388_vm1, %v18927_v7  ;;  %v6474_v27 = vpop.f32.mrf.mxu1  ;;  %v15396_v55 = vpop.f32.mrf.mxu0 }
 0x4be   : > { %v19238_v32 = vadd.f32 %v6474_v27, %v6272_v4  ;;  %v6275_v62 = vadd.f32 %v15396_v55, %v19163_v47  ;;  %v7788_v4 = vld [vmem:[#allocation2 + $0x1a0] sm:$0xff] }
 0x4bf   : > { %v15430_v52 = vpop.f32.mrf.mxu1  ;;  %v6184_v23 = vpop.f32.mrf.mxu0  ;;  %v8080_v55 = vld [vmem:[#allocation2 + $0x199] sm:$0xff] }
 0x4c0   : > { %v19241_v13 = vadd.f32 %v15430_v52, %v6275_v62  ;;  %v6273_v58 = vadd.f32 %v19163_v47, %v6184_v23  ;;  %v8081_v62 = vld [vmem:[#allocation2 + $0x1a1] sm:$0xff] }
 0x4c1   : > { %v6477_v60 = vpop.f32.mrf.mxu1 }
 0x4c2   : > { %v15399_v6 = vpop.f32.mrf.mxu0  ;;  %15602 = vmatmul.mubr.msk.bf16.gmra.mxu0 %vm388_vm1, %v18945_v49  ;;  %v19246_v7 = vadd.f32 %v6477_v60, %v6273_v58  ;;  %v7805_v60 = vpack.c.bf16 %v7788_v4, %v7787_v53 }
 0x4c3   : > { %v6278_v24 = vadd.f32 %v15399_v6, %v19163_v47  ;;  %v15433_v41 = vpop.f32.mrf.mxu1  ;;  %15605 = vmatprep.mubr.msk.bf16.mxu0 %vm388_vm1, %v18949_v56 }
 0x4c4   : > { %15636 = vmatmul.mubr.msk.bf16.gmra.mxu1 %vm388_vm1, %v18947_v61  ;;  %v6197_v40 = vpop.f32.mrf.mxu0 }
 0x4c5   : > { %15639 = vmatprep.mubr.msk.bf16.mxu1 %vm388_vm1, %v18956_v30  ;;  %v19255_v35 = vadd.f32 %v15433_v41, %v6278_v24  ;;  %v6276_v42 = vadd.f32 %v19163_v47, %v6197_v40  ;;  %v6490_v49 = vpop.f32.mrf.mxu1  ;;  %v8098_v24 = vpack.c.bf16 %v8081_v62, %v8080_v55 }
 0x4c6   : > { %v15400_v39 = vpop.f32.mrf.mxu0 }
 0x4c7   : > { %v19258_v14 = vadd.f32 %v6490_v49, %v6276_v42  ;;  %v6279_v0 = vadd.f32 %v15400_v39, %v19163_v47  ;;  %v15434_v16 = vpop.f32.mrf.mxu1 }
 0x4c8   : > { %v19261_v45 = vpop.f32.mrf.mxu0 }
 0x4c9   : > { %v19263_v61 = vadd.f32 %v15434_v16, %v6279_v0  ;;  %v19265_v56 = vpop.f32.mrf.mxu1 }
 0x4ca   : > { %v15403_v18 = vpop.f32.mrf.mxu0  ;;  %15606 = vmatmul.mubr.msk.bf16.gmra.mxu0 %vm388_vm1, %v18971_v63 }
 0x4cb   : > { %v6282_v30 = vadd.f32 %v15403_v18, %v19163_v47  ;;  %15609 = vmatprep.mubr.msk.bf16.mxu0 %vm388_vm1, %v18975_v12 }
 0x4cc   : > { %v15437_v21 = vpop.f32.mrf.mxu1  ;;  %15640 = vmatmul.mubr.msk.bf16.gmra.mxu1 %vm388_vm1, %v18973_v3  ;;  %v6213_v31 = vpop.f32.mrf.mxu0 }
 0x4cd   : > { %15643 = vmatprep.mubr.msk.bf16.mxu1 %vm388_vm1, %v18979_v20  ;;  %v19276_v48 = vadd.f32 %v15437_v21, %v6282_v30  ;;  %v6280_v19 = vadd.f32 %v19163_v47, %v6213_v31  ;;  %v8345_v21 = vld [vmem:[#allocation2 + $0x4a] sm:$0xff]  ;;  %v8346_v31 = vld [vmem:[#allocation2 + $0x52] sm:$0xff] }
 0x4ce   : > { %v6506_v33 = vpop.f32.mrf.mxu1  ;;  %v15404_v46 = vpop.f32.mrf.mxu0 }
 0x4cf   : > { %v19279_v63 = vadd.f32 %v6506_v33, %v6280_v19  ;;  %v6283_v51 = vadd.f32 %v15404_v46, %v19163_v47 }
 0x4d0   : > { %v15438_v44 = vpop.f32.mrf.mxu1  ;;  %v19282_v37 = vpop.f32.mrf.mxu0 }
 0x4d1   : > { %v19284_v3 = vadd.f32 %v15438_v44, %v6283_v51 }
 0x4d2   : > { %v19286_v12 = vpop.f32.mrf.mxu1  ;;  %v15407_v38 = vpop.f32.mrf.mxu0  ;;  %15610 = vmatmul.mubr.msk.bf16.gmra.mxu0 %vm388_vm1, %v18987_v59 }
 0x4d3   : > { %22124 = vst [vmem:[#allocation87_spill] sm:$0xff] %v19286_v12  ;;  %v6286_v20 = vadd.f32 %v15407_v38, %v19163_v47  ;;  %15613 = vmatprep.mubr.msk.bf16.mxu0 %vm388_vm1, %v19082_v8  ;;  %v8377_v38 = vpack.c.bf16 %v8346_v31, %v8345_v21 }
 0x4d4   : > { %v15441_v28 = vpop.f32.mrf.mxu1  ;;  %15644 = vmatmul.mubr.msk.bf16.gmra.mxu1 %vm388_vm1, %v18989_v54  ;;  %v6229_v27 = vpop.f32.mrf.mxu0 }
 0x4d5   : > { %15647 = vmatprep.mubr.msk.bf16.mxu1 %vm388_vm1, %v19148_v43  ;;  %v19297_v52 = vadd.f32 %v15441_v28, %v6286_v20  ;;  %v6284_v59 = vadd.f32 %v19163_v47, %v6229_v27 }
 0x4d6   : > { %v6522_v23 = vpop.f32.mrf.mxu1  ;;  %v15408_v58 = vpop.f32.mrf.mxu0 }
 0x4d7   : > { %v19300_v6 = vadd.f32 %v6522_v23, %v6284_v59  ;;  %v6287_v54 = vadd.f32 %v15408_v58, %v19163_v47  ;;  %v8349_v59 = vld [vmem:[#allocation2 + $0x7a] sm:$0xff]  ;;  %v8350_v23 = vld [vmem:[#allocation2 + $0x82] sm:$0xff] }
 0x4d8   : > { %v15442_v8 = vpop.f32.mrf.mxu1  ;;  %v19303_v41 = vpop.f32.mrf.mxu0 }
 0x4d9   : > { %22125 = vst [vmem:[#allocation40_spill] sm:$0xff] %v19303_v41  ;;  %v19305_v40 = vadd.f32 %v15442_v8, %v6287_v54  ;;  %v8352_v54 = vld [vmem:[#allocation2 + $0x9a] sm:$0xff] }
 0x4da   : > { %v19307_v43 = vpop.f32.mrf.mxu1  ;;  %v15411_v42 = vpop.f32.mrf.mxu0  ;;  %15614 = vmatmul.mubr.msk.bf16.gmra.mxu0 %vm388_vm1, %v7805_v60  ;;  %v8351_v60 = vld [vmem:[#allocation2 + $0x92] sm:$0xff] }
 0x4db   : > { %22126 = vst [vmem:[#allocation44_spill] sm:$0xff] %v19307_v43  ;;  %v6290_v49 = vadd.f32 %v15411_v42, %v19163_v47  ;;  %15653 = vmatprep.mubr.msk.bf16.mxu0 %vm388_vm1, %v19004_v5 }
 0x4dc   : > { %v15445_v39 = vpop.f32.mrf.mxu1  ;;  %15648 = vmatmul.mubr.msk.bf16.gmra.mxu1 %vm388_vm1, %v8098_v24  ;;  %v6245_v0 = vpop.f32.mrf.mxu0 }
 0x4dd   : > { %v19314_v16 = vadd.f32 %v15445_v39, %v6290_v49  ;;  %v6288_v18 = vadd.f32 %v19163_v47, %v6245_v0  ;;  %v8379_v49 = vpack.c.bf16 %v8350_v23, %v8349_v59 }
 0x4de   : > { %v6538_v30 = vpop.f32.mrf.mxu1  ;;  %v15412_v19 = vpop.f32.mrf.mxu0 }
 0x4df   : > { %v19317_v33 = vadd.f32 %v6538_v30, %v6288_v18  ;;  %v6291_v46 = vadd.f32 %v15412_v19, %v19163_v47 }
 0x4e0   : > { %v15446_v51 = vpop.f32.mrf.mxu1  ;;  %v19320_v44 = vpop.f32.mrf.mxu0 }
 0x4e1   : > { %22127 = vst [vmem:[#allocation9_spill] sm:$0xff] %v19320_v44  ;;  %v19322_v5 = vadd.f32 %v15446_v51, %v6291_v46  ;;  %v8353_v51 = vld [vmem:[#allocation2 + $0xaa] sm:$0xff] }
 0x4e2   : > { %v19324_v20 = vpop.f32.mrf.mxu1  ;;  %v15451_v28 = vpop.f32.mrf.mxu0  ;;  %15654 = vmatmul.mubr.msk.bf16.vlgmr.msra.gmra.mxu0 %vm388_vm1, %v8377_v38 }
 0x4e3   : > { %22128 = vst [vmem:[#allocation88_spill] sm:$0xff] %v19324_v20  ;;  %v6848_v53 = vadd.f32 %v15451_v28, %v19175_v26  ;;  %15657 = vmatprep.mubr.msk.bf16.mxu0 %vm388_vm1, %v19030_v29  ;;  %v8355_v28 = vld [vmem:[#allocation2 + $0xc2] sm:$0xff] }
 0x4e4   : > { %v15485_v4 = vpop.f32.mrf.mxu1  ;;  %v6719_v27 = vpop.f32.mrf.mxu0 }
 0x4e5   : > { %v19330_v55 = vadd.f32 %v15485_v4, %v6848_v53  ;;  %v6846_v47 = vadd.f32 %v6719_v27, %v19178_v57  ;;  %v8380_v57 = vpack.c.bf16 %v8352_v54, %v8351_v60  ;;  %v8356_v53 = vld [vmem:[#allocation2 + $0xca] sm:$0xff] }
 0x4e6   : > { %v7012_v62 = vpop.f32.mrf.mxu1  ;;  %v15452_v58 = vpop.f32.mrf.mxu0 }
 0x4e7   : > { %v19333_v8 = vadd.f32 %v7012_v62, %v6846_v47  ;;  %v6849_v24 = vadd.f32 %v15452_v58, %v19181_v10 }
 0x4e8   : > { %v15486_v26 = vpop.f32.mrf.mxu1  ;;  %v6722_v42 = vpop.f32.mrf.mxu0 }
 0x4e9   : > { %v19336_v39 = vadd.f32 %v15486_v26, %v6849_v24  ;;  %v19339_v29 = vadd.f32 %v6722_v42, %v19186_v11  ;;  %v8354_v11 = vld [vmem:[#allocation2 + $0xb2] sm:$0xff] }
 0x4ea   : > { %v19341_v0 = vpop.f32.mrf.mxu1  ;;  %v15455_v18 = vpop.f32.mrf.mxu0  ;;  %15658 = vmatmul.mubr.msk.bf16.gmra.mxu0 %vm388_vm1, %v8379_v49  ;;  %v8381_v62 = vpack.c.bf16 %v8354_v11, %v8353_v51 }
 0x4eb   : > { %v6852_v30 = vadd.f32 %v15455_v18, %v19195_v34  ;;  %15661 = vmatprep.mubr.msk.bf16.mxu0 %vm388_vm1, %v8380_v57  ;;  %v8357_v57 = vld [vmem:[#allocation2 + $0xda] sm:$0xff] }
 0x4ec   : > { %v15489_v21 = vpop.f32.mrf.mxu1  ;;  %v6735_v10 = vpop.f32.mrf.mxu0 }
 0x4ed   : > { %v19346_v31 = vadd.f32 %v15489_v21, %v6852_v30  ;;  %v6850_v19 = vadd.f32 %v6735_v10, %v19198_v17  ;;  %v8382_v17 = vpack.c.bf16 %v8356_v53, %v8355_v28  ;;  %v8359_v30 = vld [vmem:[#allocation2 + $0xf2] sm:$0xff]  ;;  %v8360_v21 = vld [vmem:[#allocation2 + $0xfa] sm:$0xff] }
 0x4ee   : > { %v7028_v46 = vpop.f32.mrf.mxu1  ;;  %v15456_v38 = vpop.f32.mrf.mxu0  ;;  %v8739_v53 = vld [vmem:[%s21562_s7] sm:$0xf] }
 0x4ef   : > { %v19349_v4 = vadd.f32 %v7028_v46, %v6850_v19  ;;  %v6853_v27 = vadd.f32 %v15456_v38, %v19201_v36  ;;  %16111 = vmatprep.subr.msk.bf16.mxu1 %vm3355_vm5, %v8739_v53 }
 0x4f0   : > { %v15490_v47 = vpop.f32.mrf.mxu1  ;;  %v6738_v34 = vpop.f32.mrf.mxu0 }
 0x4f1   : > { %v19352_v59 = vadd.f32 %v15490_v47, %v6853_v27  ;;  %v19355_v23 = vadd.f32 %v6738_v34, %v19206_v9  ;;  %v8358_v9 = vld [vmem:[#allocation2 + $0xe2] sm:$0xff] }
 0x4f2   : > { %v19357_v58 = vpop.f32.mrf.mxu1  ;;  %v15459_v60 = vpop.f32.mrf.mxu0  ;;  %15662 = vmatmul.mubr.msk.bf16.gmra.mxu0 %vm388_vm1, %v8381_v62  ;;  %v8383_v51 = vpack.c.bf16 %v8358_v9, %v8357_v57 }
 0x4f3   : > { %v6856_v54 = vadd.f32 %v15459_v60, %v19215_v50  ;;  %15665 = vmatprep.mubr.msk.bf16.mxu0 %vm388_vm1, %v8382_v17 }
 0x4f4   : > { %v15493_v24 = vpop.f32.mrf.mxu1  ;;  %v6751_v36 = vpop.f32.mrf.mxu0 }
 0x4f5   : > { %v19362_v26 = vadd.f32 %v15493_v24, %v6856_v54  ;;  %v6854_v42 = vadd.f32 %v6751_v36, %v19218_v1  ;;  %v8384_v1 = vpack.c.bf16 %v8360_v21, %v8359_v30  ;;  %v8361_v54 = vld [vmem:[#allocation2 + $0x10a] sm:$0xff]  ;;  %v8362_v24 = vld [vmem:[#allocation2 + $0x112] sm:$0xff] }
 0x4f6   : > { %v7044_v49 = vpop.f32.mrf.mxu1  ;;  %v15460_v18 = vpop.f32.mrf.mxu0  ;;  %v8385_v30 = vpack.c.bf16 %v8362_v24, %v8361_v54 }
 0x4f7   : > { %v19365_v10 = vadd.f32 %v7044_v49, %v6854_v42  ;;  %v6857_v19 = vadd.f32 %v15460_v18, %v19221_v22  ;;  %v8805_v22 = vsel %vm3355_vm5, %v8739_v53, 0  ;;  %v8363_v42 = vld [vmem:[#allocation2 + $0x122] sm:$0xff]  ;;  %v8364_v49 = vld [vmem:[#allocation2 + $0x12a] sm:$0xff] }
 0x4f8   : > { %v15494_v46 = vpop.f32.mrf.mxu1  ;;  %v6754_v50 = vpop.f32.mrf.mxu0  ;;  %15686 = vmatpush3.bf16.msra.mxu1 %v8805_v22 }
 0x4f9   : > { %v19368_v11 = vadd.f32 %v15494_v46, %v6857_v19  ;;  %v19371_v38 = vadd.f32 %v6754_v50, %v19226_v15 }
 0x4fa   : > { %v19373_v28 = vpop.f32.mrf.mxu1  ;;  %v15463_v27 = vpop.f32.mrf.mxu0  ;;  %15666 = vmatmul.mubr.msk.bf16.gmra.mxu0 %vm388_vm1, %v8383_v51 }
 0x4fb   : > { %v6860_v47 = vadd.f32 %v15463_v27, %v19235_v2  ;;  %15669 = vmatprep.mubr.msk.bf16.mxu0 %vm388_vm1, %v8384_v1 }
 0x4fc   : > { %v15497_v34 = vpop.f32.mrf.mxu1  ;;  %v6767_v15 = vpop.f32.mrf.mxu0 }
 0x4fd   : > { %v19383_v62 = vadd.f32 %v15497_v34, %v6860_v47  ;;  %v6858_v17 = vadd.f32 %v6767_v15, %v19238_v32  ;;  %v8386_v32 = vpack.c.bf16 %v8364_v49, %v8363_v42  ;;  %v8365_v47 = vld [vmem:[#allocation2 + $0x13a] sm:$0xff]  ;;  %v8367_v15 = vld [vmem:[#allocation2 + $0x152] sm:$0xff] }
 0x4fe   : > { %v7060_v60 = vpop.f32.mrf.mxu1  ;;  %v15464_v36 = vpop.f32.mrf.mxu0 }
 0x4ff   : > { %v19386_v57 = vadd.f32 %v7060_v60, %v6858_v17  ;;  %v6861_v9 = vadd.f32 %v15464_v36, %v19241_v13  ;;  %v8368_v17 = vld [vmem:[#allocation2 + $0x15a] sm:$0xff] }
 0x500   : > { %v15498_v2 = vpop.f32.mrf.mxu1  ;;  %v6770_v18 = vpop.f32.mrf.mxu0 }
 0x501   : > { %v19389_v21 = vadd.f32 %v15498_v2, %v6861_v9  ;;  %v19392_v19 = vadd.f32 %v6770_v18, %v19246_v7  ;;  %v8366_v7 = vld [vmem:[#allocation2 + $0x142] sm:$0xff]  ;;  %v8388_v9 = vpack.c.bf16 %v8368_v17, %v8367_v15 }
 0x502   : > { %v19394_v46 = vpop.f32.mrf.mxu1  ;;  %v15467_v50 = vpop.f32.mrf.mxu0  ;;  %15670 = vmatmul.mubr.msk.bf16.gmra.mxu0 %vm388_vm1, %v8385_v30  ;;  %v8387_v36 = vpack.c.bf16 %v8366_v7, %v8365_v47 }
 0x503   : > { %22129 = vst [vmem:[#allocation81_spill] sm:$0xff] %v19392_v19  ;;  %22130 = vst [vmem:[#allocation84_spill] sm:$0xff] %v19394_v46  ;;  %v6864_v51 = vadd.f32 %v15467_v50, %v19255_v35  ;;  %15673 = vmatprep.mubr.msk.bf16.mxu0 %vm388_vm1, %v8386_v32 }
 0x504   : > { %v15501_v1 = vpop.f32.mrf.mxu1  ;;  %v6783_v13 = vpop.f32.mrf.mxu0 }
 0x505   : > { %v19399_v53 = vadd.f32 %v15501_v1, %v6864_v51  ;;  %v6862_v27 = vadd.f32 %v6783_v13, %v19258_v14  ;;  %v8369_v51 = vld [vmem:[#allocation2 + $0x16a] sm:$0xff]  ;;  %v8370_v1 = vld [vmem:[#allocation2 + $0x172] sm:$0xff] }
 0x506   : > { %v7076_v22 = vpop.f32.mrf.mxu1  ;;  %v15468_v34 = vpop.f32.mrf.mxu0 }
 0x507   : > { %v19402_v60 = vadd.f32 %v7076_v22, %v6862_v27  ;;  %v6865_v54 = vadd.f32 %v15468_v34, %v19263_v61 }
 0x508   : > { %v15502_v24 = vpop.f32.mrf.mxu1  ;;  %v19405_v35 = vpop.f32.mrf.mxu0 }
 0x509   : > { %22131 = vst [vmem:[#allocation69_spill] sm:$0xff] %v19405_v35  ;;  %v19407_v42 = vadd.f32 %v15502_v24, %v6865_v54  ;;  %v8373_v24 = vld [vmem:[#allocation2 + $0x19a] sm:$0xff] }
 0x50a   : > { %v19409_v49 = vpop.f32.mrf.mxu1  ;;  %v15471_v14 = vpop.f32.mrf.mxu0  ;;  %15674 = vmatmul.mubr.msk.bf16.gmra.mxu0 %vm388_vm1, %v8387_v36  ;;  %v8374_v36 = vld [vmem:[#allocation2 + $0x1a2] sm:$0xff] }
 0x50b   : > { %22132 = vst [vmem:[#allocation85_spill] sm:$0xff] %v19409_v49  ;;  %v6868_v2 = vadd.f32 %v15471_v14, %v19276_v48  ;;  %15677 = vmatprep.mubr.msk.bf16.mxu0 %vm388_vm1, %v8388_v9  ;;  %v8389_v48 = vpack.c.bf16 %v8370_v1, %v8369_v51 }
 0x50c   : > { %v15505_v18 = vpop.f32.mrf.mxu1  ;;  %v6799_v30 = vpop.f32.mrf.mxu0 }
 0x50d   : > { %v19414_v32 = vadd.f32 %v15505_v18, %v6868_v2  ;;  %v6866_v61 = vadd.f32 %v6799_v30, %v19279_v63  ;;  %v8391_v30 = vpack.c.bf16 %v8374_v36, %v8373_v24 }
 0x50e   : > { %v7092_v50 = vpop.f32.mrf.mxu1  ;;  %v15472_v13 = vpop.f32.mrf.mxu0 }
 0x50f   : > { %v19417_v27 = vadd.f32 %v7092_v50, %v6866_v61  ;;  %v6869_v22 = vadd.f32 %v15472_v13, %v19284_v3 }
 0x510   : > { %v15506_v47 = vpop.f32.mrf.mxu1  ;;  %v19420_v7 = vpop.f32.mrf.mxu0 }
 0x511   : > { %22133 = vst [vmem:[#allocation89_spill] sm:$0xff] %v19420_v7  ;;  %v19422_v34 = vadd.f32 %v15506_v47, %v6869_v22 }
 0x512   : > { %v19424_v15 = vpop.f32.mrf.mxu1  ;;  %v15475_v17 = vpop.f32.mrf.mxu0  ;;  %15678 = vmatmul.mubr.msk.bf16.gmra.mxu0 %vm388_vm1, %v8389_v48 }
 0x513   : > { %22134 = vst [vmem:[#allocation26_spill] sm:$0xff] %v19424_v15  ;;  %v6872_v63 = vadd.f32 %v15475_v17, %v19297_v52  ;;  %15681 = vmatprep.mubr.msk.bf16.mxu0 %vm388_vm1, %v19150_v25 }
 0x514   : > { %v15509_v54 = vpop.f32.mrf.mxu1  ;;  %v6815_v3 = vpop.f32.mrf.mxu0 }
 0x515   : > { %v19430_v9 = vadd.f32 %v15509_v54, %v6872_v63  ;;  %v6870_v14 = vadd.f32 %v6815_v3, %v19300_v6 }
 0x516   : > { %v7108_v2 = vpop.f32.mrf.mxu1  ;;  %v15476_v18 = vpop.f32.mrf.mxu0 }
 0x517   : > { %v19433_v61 = vadd.f32 %v7108_v2, %v6870_v14  ;;  %v6873_v50 = vadd.f32 %v15476_v18, %v19305_v40 }
 0x518   : > { %v15510_v51 = vpop.f32.mrf.mxu1  ;;  %v19436_v52 = vpop.f32.mrf.mxu0 }
 0x519   : > { %22135 = vst [vmem:[#allocation15_spill] sm:$0xff] %v19436_v52  ;;  %v19438_v1 = vadd.f32 %v15510_v51, %v6873_v50 }
 0x51a   : > { %v19440_v25 = vpop.f32.mrf.mxu1  ;;  %v15479_v13 = vpop.f32.mrf.mxu0  ;;  %15682 = vmatmul.mubr.msk.bf16.gmra.mxu0 %vm388_vm1, %v8391_v30 }
 0x51b   : > { %22136 = vst [vmem:[#allocation67_spill] sm:$0xff] %v19440_v25  ;;  %v6876_v22 = vadd.f32 %v15479_v13, %v19314_v16  ;;  %v9000_v25 = vld [vmem:[#allocation2 + $0x1] sm:$0xff] }
 0x51c   : > { %v15513_v6 = vpop.f32.mrf.mxu1  ;;  %v6831_v47 = vpop.f32.mrf.mxu0 }
 0x51d   : > { %v19444_v48 = vadd.f32 %v15513_v6, %v6876_v22  ;;  %v6874_v17 = vadd.f32 %v6831_v47, %v19317_v33 }
 0x51e   : > { %v7124_v63 = vpop.f32.mrf.mxu1  ;;  %v15480_v40 = vpop.f32.mrf.mxu0 }
 0x51f   : > { %v19447_v54 = vadd.f32 %v7124_v63, %v6874_v17  ;;  %v6877_v24 = vadd.f32 %v15480_v40, %v19322_v5 }
 0x520   : > { %v15514_v36 = vpop.f32.mrf.mxu1  ;;  %v19450_v3 = vpop.f32.mrf.mxu0 }
 0x521   : > { %22137 = vst [vmem:[#allocation13_spill] sm:$0xff] %v19450_v3  ;;  %v19452_v14 = vadd.f32 %v15514_v36, %v6877_v24  ;;  %v8708_v3 = vld [vmem:[#allocation2 + $0x8] sm:$0xff] }
 0x522   : > { %v19454_v2 = vpop.f32.mrf.mxu1  ;;  %v15519_v16 = vpop.f32.mrf.mxu0 }
 0x523   : > { %22138 = vst [vmem:[#allocation98_spill] sm:$0xff] %v19454_v2  ;;  %v19457_v18 = vadd.f32 %v15519_v16, %v19330_v55 }
 0x524   : > { %v19459_v30 = vpop.f32.mrf.mxu1  ;;  %v7305_v33 = vpop.f32.mrf.mxu0 }
 0x525   : > { %v19462_v50 = vadd.f32 %v7305_v33, %v19333_v8 }
 0x526   : > { %v19464_v51 = vpop.f32.mrf.mxu1  ;;  %v15520_v5 = vpop.f32.mrf.mxu0 }
 0x527   : > { %v19467_v13 = vadd.f32 %v15520_v5, %v19336_v39 }
 0x528   : > { %v19469_v22 = vpop.f32.mrf.mxu1  ;;  %v19471_v6 = vpop.f32.mrf.mxu0 }
 0x52a   : > { %v19473_v47 = vpop.f32.mrf.mxu1  ;;  %v15523_v55 = vpop.f32.mrf.mxu0 }
 0x52b   : > { %v19476_v17 = vadd.f32 %v15523_v55, %v19346_v31 }
 0x52c   : > { %v19478_v63 = vpop.f32.mrf.mxu1  ;;  %v7321_v8 = vpop.f32.mrf.mxu0 }
 0x52d   : > { %v19481_v40 = vadd.f32 %v7321_v8, %v19349_v4  ;;  %v9032_v4 = vld [vmem:[%s21562_s7 + $0x4] sm:$0xf] }
 0x52e   : > { %v19483_v24 = vpop.f32.mrf.mxu1  ;;  %v15524_v39 = vpop.f32.mrf.mxu0  ;;  %16112 = vmatprep.subr.msk.bf16.mxu0 %vm3355_vm5, %v9032_v4 }
 0x52f   : > { %v19486_v36 = vadd.f32 %v15524_v39, %v19352_v59  ;;  %v9098_v59 = vsel %vm3355_vm5, %v9032_v4, 0  ;;  %v8707_v39 = vld [vmem:[#allocation2] sm:$0xff] }
 0x530   : > { %v19488_v16 = vpop.f32.mrf.mxu1  ;;  %v19490_v33 = vpop.f32.mrf.mxu0  ;;  %15720 = vmatpush3.bf16.msra.mxu0 %v9098_v59 }
 0x532   : > { %v19492_v5 = vpop.f32.mrf.mxu1  ;;  %v15527_v31 = vpop.f32.mrf.mxu0 }
 0x533   : > { %v19495_v55 = vadd.f32 %v15527_v31, %v19362_v26  ;;  %v8740_v26 = vpack.c.bf16 %v8708_v3, %v8707_v39  ;;  %v9001_v31 = vld [vmem:[#allocation2 + $0x9] sm:$0xff] }
 0x534   : > { %v19497_v2 = vpop.f32.mrf.mxu1  ;;  %v7337_v8 = vpop.f32.mrf.mxu0  ;;  %v9033_v44 = vpack.c.bf16 %v9001_v31, %v9000_v25 }
 0x535   : > { %v19505_v20 = vadd.f32 %v7337_v8, %v19365_v10  ;;  %15687 = vmatprep.mubr.msk.bf16.mxu1 %vm388_vm1, %v8740_v26 }
 0x536   : > { %v19507_v52 = vpop.f32.mrf.mxu1  ;;  %v15528_v15 = vpop.f32.mrf.mxu0  ;;  %15721 = vmatprep.mubr.msk.bf16.mxu0 %vm388_vm1, %v9033_v44 }
 0x537   : > { %v19510_v43 = vadd.f32 %v15528_v15, %v19368_v11  ;;  %v19528_v11 = vld [vmem:[%s21562_s7 + $0x8] sm:$0xf] }
 0x538   : > { %v19512_v7 = vpop.f32.mrf.mxu1  ;;  %v19515_v4 = vpop.f32.mrf.mxu0  ;;  %22141 = vst [vmem:[#allocation6_spill] sm:$0xff] %v19528_v11  ;;  %16113 = vmatprep.subr.msk.bf16.mxu1 %vm3355_vm5, %v19528_v11 }
 0x53a   : > { %v19518_v10 = vpop.f32.mrf.mxu1  ;;  %v15531_v8 = vpop.f32.mrf.mxu0 }
 0x53b   : > { %v19521_v59 = vadd.f32 %v15531_v8, %v19383_v62 }
 0x53c   : > { %v19523_v3 = vpop.f32.mrf.mxu1  ;;  %v7353_v15 = vpop.f32.mrf.mxu0 }
 0x53d   : > { %22139 = vst [vmem:[#allocation61_spill] sm:$0xff] %v19521_v59  ;;  %22140 = vst [vmem:[#allocation90_spill] sm:$0xff] %v19523_v3  ;;  %v19533_v25 = vadd.f32 %v7353_v15, %v19386_v57 }
 0x53e   : > { %v19535_v44 = vpop.f32.mrf.mxu1  ;;  %v15532_v39 = vpop.f32.mrf.mxu0 }
 0x53f   : > { %22142 = vst [vmem:[#allocation46_spill] sm:$0xff] %v19533_v25  ;;  %22143 = vst [vmem:[#allocation29_spill] sm:$0xff] %v19535_v44  ;;  %v19538_v62 = vadd.f32 %v15532_v39, %v19389_v21 }
 0x540   : > { %v19540_v26 = vpop.f32.mrf.mxu1  ;;  %v19542_v31 = vpop.f32.mrf.mxu0 }
 0x541   : > { %22144 = vst [vmem:[#allocation8_spill] sm:$0xff] %v19538_v62  ;;  %22145 = vst [vmem:[#allocation86_spill] sm:$0xff] %v19540_v26 }
 0x542   : > { %22146 = vst [vmem:[#allocation101_spill] sm:$0xff] %v19542_v31  ;;  %v19544_v8 = vpop.f32.mrf.mxu1  ;;  %v15535_v49 = vpop.f32.mrf.mxu0 }
 0x543   : > { %22147 = vst [vmem:[#allocation91_spill] sm:$0xff] %v19544_v8  ;;  %v19547_v41 = vadd.f32 %v15535_v49, %v19399_v53 }
 0x544   : > { %v19549_v12 = vpop.f32.mrf.mxu1  ;;  %v7369_v57 = vpop.f32.mrf.mxu0 }
 0x545   : > { %22148 = vst [vmem:[#allocation17_spill] sm:$0xff] %v19547_v41  ;;  %22149 = vst [vmem:[#allocation71_spill] sm:$0xff] %v19549_v12  ;;  %v19552_v15 = vadd.f32 %v7369_v57, %v19402_v60 }
 0x546   : > { %v19554_v44 = vpop.f32.mrf.mxu1  ;;  %v15536_v21 = vpop.f32.mrf.mxu0 }
 0x547   : > { %22150 = vst [vmem:[#allocation48_spill] sm:$0xff] %v19552_v15  ;;  %22151 = vst [vmem:[#allocation31_spill] sm:$0xff] %v19554_v44  ;;  %v19557_v39 = vadd.f32 %v15536_v21, %v19407_v42 }
 0x548   : > { %v19559_v26 = vpop.f32.mrf.mxu1  ;;  %v19561_v62 = vpop.f32.mrf.mxu0 }
 0x549   : > { %22152 = vst [vmem:[#allocation94_spill] sm:$0xff] %v19557_v39  ;;  %22153 = vst [vmem:[#allocation72_spill] sm:$0xff] %v19559_v26 }
 0x54a   : > { %22154 = vst [vmem:[#allocation104_spill] sm:$0xff] %v19561_v62  ;;  %v19563_v8 = vpop.f32.mrf.mxu1  ;;  %v15539_v53 = vpop.f32.mrf.mxu0 }
 0x54b   : > { %22155 = vst [vmem:[#allocation92_spill] sm:$0xff] %v19563_v8  ;;  %v19566_v49 = vadd.f32 %v15539_v53, %v19414_v32 }
 0x54c   : > { %v19568_v12 = vpop.f32.mrf.mxu1  ;;  %v7385_v60 = vpop.f32.mrf.mxu0 }
 0x54d   : > { %22156 = vst [vmem:[#allocation35_spill] sm:$0xff] %v19566_v49  ;;  %22157 = vst [vmem:[#allocation95_spill] sm:$0xff] %v19568_v12  ;;  %v19571_v57 = vadd.f32 %v7385_v60, %v19417_v27 }
 0x54e   : > { %v19573_v44 = vpop.f32.mrf.mxu1  ;;  %v15540_v42 = vpop.f32.mrf.mxu0 }
 0x54f   : > { %22158 = vst [vmem:[#allocation59_spill] sm:$0xff] %v19571_v57  ;;  %22159 = vst [vmem:[#allocation93_spill] sm:$0xff] %v19573_v44  ;;  %v19576_v21 = vadd.f32 %v15540_v42, %v19422_v34 }
 0x550   : > { %v19578_v26 = vpop.f32.mrf.mxu1  ;;  %v19580_v39 = vpop.f32.mrf.mxu0 }
 0x551   : > { %22160 = vst [vmem:[#allocation109_spill] sm:$0xff] %v19576_v21  ;;  %22161 = vst [vmem:[#allocation96_spill] sm:$0xff] %v19578_v26 }
 0x552   : > { %22162 = vst [vmem:[#allocation20_spill] sm:$0xff] %v19580_v39  ;;  %v19582_v8 = vpop.f32.mrf.mxu1  ;;  %v15543_v32 = vpop.f32.mrf.mxu0 }
 0x553   : > { %22163 = vst [vmem:[#allocation50_spill] sm:$0xff] %v19582_v8  ;;  %v19585_v53 = vadd.f32 %v15543_v32, %v19430_v9 }
 0x554   : > { %v19587_v12 = vpop.f32.mrf.mxu1  ;;  %v7401_v27 = vpop.f32.mrf.mxu0 }
 0x555   : > { %22164 = vst [vmem:[#allocation33_spill] sm:$0xff] %v19585_v53  ;;  %22165 = vst [vmem:[#allocation14_spill] sm:$0xff] %v19587_v12  ;;  %v19590_v60 = vadd.f32 %v7401_v27, %v19433_v61 }
 0x556   : > { %v19592_v44 = vpop.f32.mrf.mxu1  ;;  %v15544_v34 = vpop.f32.mrf.mxu0 }
 0x557   : > { %22166 = vst [vmem:[#allocation97_spill] sm:$0xff] %v19590_v60  ;;  %22167 = vst [vmem:[#allocation112_spill] sm:$0xff] %v19592_v44  ;;  %v19595_v42 = vadd.f32 %v15544_v34, %v19438_v1 }
 0x558   : > { %v19597_v26 = vpop.f32.mrf.mxu1  ;;  %v19599_v21 = vpop.f32.mrf.mxu0 }
 0x559   : > { %22168 = vst [vmem:[#allocation30_spill] sm:$0xff] %v19595_v42  ;;  %22169 = vst [vmem:[#allocation28_spill] sm:$0xff] %v19597_v26 }
 0x55a   : > { %22170 = vst [vmem:[#allocation10_spill] sm:$0xff] %v19599_v21  ;;  %v19601_v8 = vpop.f32.mrf.mxu1  ;;  %v15547_v9 = vpop.f32.mrf.mxu0 }
 0x55b   : > { %22171 = vst [vmem:[#allocation74_spill] sm:$0xff] %v19601_v8  ;;  %v19604_v32 = vadd.f32 %v15547_v9, %v19444_v48 }
 0x55c   : > { %v19606_v12 = vpop.f32.mrf.mxu1  ;;  %v7417_v61 = vpop.f32.mrf.mxu0 }
 0x55d   : > { %22172 = vst [vmem:[#allocation99_spill] sm:$0xff] %v19604_v32  ;;  %22173 = vst [vmem:[#allocation115_spill] sm:$0xff] %v19606_v12  ;;  %v19609_v27 = vadd.f32 %v7417_v61, %v19447_v54 }
 0x55e   : > { %v19611_v44 = vpop.f32.mrf.mxu1  ;;  %v15548_v1 = vpop.f32.mrf.mxu0 }
 0x55f   : > { %22174 = vst [vmem:[#allocation62_spill] sm:$0xff] %v19609_v27  ;;  %22175 = vst [vmem:[#allocation75_spill] sm:$0xff] %v19611_v44  ;;  %v19614_v34 = vadd.f32 %v15548_v1, %v19452_v14 }
 0x560   : > { %v19616_v26 = vpop.f32.mrf.mxu1  ;;  %v19618_v42 = vpop.f32.mrf.mxu0 }
 0x561   : > { %22176 = vst [vmem:[#allocation52_spill] sm:$0xff] %v19614_v34  ;;  %22177 = vst [vmem:[#allocation37_spill] sm:$0xff] %v19616_v26 }
 0x562   : > { %22178 = vst [vmem:[#allocation100_spill] sm:$0xff] %v19618_v42  ;;  %v19620_v8 = vpop.f32.mrf.mxu1  ;;  %v15587_v48 = vpop.f32.mrf.mxu0 }
 0x563   : > { %22179 = vst [vmem:[#allocation70_spill] sm:$0xff] %v19620_v8  ;;  %v19637_v8 = vld [vmem:[%s21562_s7 + $0xc] sm:$0xf] }
 0x564   : > { %v15621_v9 = vpop.f32.mrf.mxu1  ;;  %v7891_v32 = vpop.f32.mrf.mxu0  ;;  %22180 = vst [vmem:[#allocation102_spill] sm:$0xff] %v19637_v8  ;;  %16114 = vmatprep.subr.msk.bf16.mxu0 %vm3355_vm5, %v19637_v8 }
 0x566   : > { %v8184_v12 = vpop.f32.mrf.mxu1  ;;  %v15588_v21 = vpop.f32.mrf.mxu0 }
 0x568   : > { %v7894_v60 = vpop.f32.mrf.mxu0  ;;  %v19622_v54 = vpop.f32.mrf.mxu1 }
 0x56a   : > { %v19624_v61 = vpop.f32.mrf.mxu0  ;;  %v19628_v14 = vpop.f32.mrf.mxu1 }
 0x56c   : > { %v19626_v44 = vpop.f32.mrf.mxu0  ;;  %v19641_v34 = vpop.f32.mrf.mxu1 }
 0x56e   : > { %v19630_v1 = vpop.f32.mrf.mxu0  ;;  %v19647_v53 = vpop.f32.mrf.mxu1 }
 0x570   : > { %v19632_v26 = vpop.f32.mrf.mxu0  ;;  %v19653_v49 = vpop.f32.mrf.mxu1 }
 0x572   : > { %v19643_v42 = vpop.f32.mrf.mxu0  ;;  %v19659_v41 = vpop.f32.mrf.mxu1 }
 0x574   : > { %v19645_v27 = vpop.f32.mrf.mxu0  ;;  %v19665_v25 = vpop.f32.mrf.mxu1 }
 0x576   : > { %v19649_v39 = vpop.f32.mrf.mxu0  ;;  %v19671_v59 = vpop.f32.mrf.mxu1 }
 0x577   : > { %22188 = vst [vmem:[#allocation42_spill] sm:$0xff] %v19671_v59 }
 0x578   : > { %v19651_v57 = vpop.f32.mrf.mxu0 }
 0x579   : > { %22181 = vst [vmem:[#allocation21_spill] sm:$0xff] %v19651_v57 }
 0x57a   : > { %v19655_v62 = vpop.f32.mrf.mxu0 }
 0x57b   : > { %22182 = vst [vmem:[#allocation76_spill] sm:$0xff] %v19655_v62  ;;  %v19677_v62 = vpop.f32.mrf.mxu1 }
 0x57c   : > { %v19657_v15 = vpop.f32.mrf.mxu0  ;;  %22191 = vst [vmem:[#allocation105_spill] sm:$0xff] %v19677_v62 }
 0x57d   : > { %22183 = vst [vmem:[#allocation53_spill] sm:$0xff] %v19657_v15 }
 0x57e   : > { %v19661_v8 = vpop.f32.mrf.mxu0 }
 0x57f   : > { %22184 = vst [vmem:[#allocation4_spill] sm:$0xff] %v19661_v8  ;;  %v19683_v8 = vpop.f32.mrf.mxu1 }
 0x580   : > { %v19663_v31 = vpop.f32.mrf.mxu0 }
 0x581   : > { %22185 = vst [vmem:[#allocation103_spill] sm:$0xff] %v19663_v31 }
 0x582   : > { %v19667_v11 = vpop.f32.mrf.mxu0 }
 0x583   : > { %22186 = vst [vmem:[#allocation22_spill] sm:$0xff] %v19667_v11  ;;  %v19689_v11 = vpop.f32.mrf.mxu1 }
 0x584   : > { %v19669_v3 = vpop.f32.mrf.mxu0  ;;  %22196 = vst [vmem:[#allocation106_spill] sm:$0xff] %v19689_v11 }
 0x585   : > { %22187 = vst [vmem:[#allocation27_spill] sm:$0xff] %v19669_v3 }
 0x586   : > { %v19673_v57 = vpop.f32.mrf.mxu0 }
 0x587   : > { %22189 = vst [vmem:[#allocation39_spill] sm:$0xff] %v19673_v57  ;;  %v19695_v57 = vpop.f32.mrf.mxu1 }
 0x588   : > { %v19675_v35 = vpop.f32.mrf.mxu0  ;;  %22199 = vst [vmem:[#allocation60_spill] sm:$0xff] %v19695_v57 }
 0x589   : > { %22190 = vst [vmem:[#allocation18_spill] sm:$0xff] %v19675_v35 }
 0x58a   : > { %v19679_v15 = vpop.f32.mrf.mxu0 }
 0x58b   : > { %22192 = vst [vmem:[#allocation32_spill] sm:$0xff] %v19679_v15  ;;  %v19701_v15 = vpop.f32.mrf.mxu1 }
 0x58c   : > { %v19681_v46 = vpop.f32.mrf.mxu0  ;;  %22202 = vst [vmem:[#allocation16_spill] sm:$0xff] %v19701_v15 }
 0x58d   : > { %22193 = vst [vmem:[#allocation77_spill] sm:$0xff] %v19681_v46  ;;  %v19714_v57 = vpop.f32.mrf.mxu1 }
 0x58e   : > { %v19685_v31 = vpop.f32.mrf.mxu0 }
 0x58f   : > { %22194 = vst [vmem:[#allocation54_spill] sm:$0xff] %v19685_v31  ;;  %v7140_v31 = vadd.f32 %v19341_v0, %v19339_v29 }
 0x590   : > { %v19687_v19 = vpop.f32.mrf.mxu0 }
 0x591   : > { %22195 = vst [vmem:[#allocation43_spill] sm:$0xff] %v19687_v19  ;;  %v7727_v19 = vadd.f32 %v19459_v30, %v19457_v18 }
 0x592   : > { %v19691_v3 = vpop.f32.mrf.mxu0 }
 0x593   : > { %22197 = vst [vmem:[#allocation63_spill] sm:$0xff] %v19691_v3  ;;  %v7433_v3 = vadd.f32 %v19471_v6, %v7140_v31  ;;  %v7731_v6 = vadd.f32 %v19478_v63, %v19476_v17 }
 0x594   : > { %v19693_v59 = vpop.f32.mrf.mxu0 }
 0x595   : > { %22198 = vst [vmem:[#allocation107_spill] sm:$0xff] %v19693_v59  ;;  %v7725_v59 = vadd.f32 %v19464_v51, %v19462_v50  ;;  %v7726_v0 = vadd.f32 %v19473_v47, %v7433_v3  ;;  %v7144_v50 = vadd.f32 %v19357_v58, %v19355_v23  ;;  %v19725_v51 = vpop.f32.mrf.mxu1  ;;  %v8024_v23 = vadd.f32 %v19624_v61, %v7731_v6 }
 0x596   : > { %v19697_v35 = vpop.f32.mrf.mxu0 }
 0x597   : > { %22200 = vst [vmem:[#allocation55_spill] sm:$0xff] %v19697_v35  ;;  %v8020_v35 = vadd.f32 %v15587_v48, %v7727_v19  ;;  %v8018_v15 = vadd.f32 %v7891_v32, %v7725_v59  ;;  %v8019_v48 = vadd.f32 %v7894_v60, %v7726_v0  ;;  %v19741_v17 = vpop.f32.mrf.mxu1  ;;  %v7148_v60 = vadd.f32 %v19373_v28, %v19371_v38  ;;  %v19777_v38 = vld [vmem:[%s21561_s6] ss:$0 sm:$0xff] }
 0x598   : > { %v19699_v62 = vpop.f32.mrf.mxu0  ;;  %v7735_v32 = vadd.f32 %v19497_v2, %v19495_v55  ;;  %v6277_v28 = vadd.f32 %v19777_v38, %v19261_v45  ;;  %v7733_v2 = vadd.f32 %v19507_v52, %v19505_v20  ;;  %v7736_v45 = vadd.f32 %v19512_v7, %v19510_v43 }
 0x599   : > { %22201 = vst [vmem:[#allocation41_spill] sm:$0xff] %v19699_v62  ;;  %v8313_v18 = vadd.f32 %v15621_v9, %v8020_v35  ;;  %v8311_v31 = vadd.f32 %v8184_v12, %v8018_v15  ;;  %v7732_v12 = vadd.f32 %v19488_v16, %v19486_v36  ;;  %v8312_v59 = vadd.f32 %v19628_v14, %v8019_v48  ;;  %v22213_v48 = vld [vmem:[#allocation81_spill] sm:$0xff] }
 0x59a   : > { %v19703_v46 = vpop.f32.mrf.mxu0  ;;  %v8317_v36 = vadd.f32 %v19641_v34, %v8024_v23  ;;  %v7441_v55 = vadd.f32 %v19515_v4, %v7148_v60  ;;  %v8026_v4 = vadd.f32 %v19645_v27, %v7733_v2  ;;  %v8029_v43 = vadd.f32 %v19649_v39, %v7736_v45  ;;  %v22216_v39 = vld [vmem:[#allocation61_spill] sm:$0xff] }
 0x59b   : > { %22203 = vst [vmem:[#allocation108_spill] sm:$0xff] %v19703_v46  ;;  %v7728_v46 = vadd.f32 %v19469_v22, %v19467_v13  ;;  %v7729_v13 = vadd.f32 %v19483_v24, %v19481_v40  ;;  %v7437_v22 = vadd.f32 %v19490_v33, %v7144_v50  ;;  %v8025_v16 = vadd.f32 %v19630_v1, %v7732_v12  ;;  %v22218_v23 = vld [vmem:[#allocation21_spill] sm:$0xff] }
 0x59c   : > { %v19709_v11 = vpop.f32.mrf.mxu0  ;;  %v8028_v1 = vadd.f32 %v19643_v42, %v7735_v32  ;;  %v6570_v50 = vadd.f32 %v19265_v56, %v6277_v28  ;;  %v22214_v56 = vld [vmem:[#allocation84_spill] sm:$0xff]  ;;  %v22224_v28 = vld [vmem:[#allocation101_spill] sm:$0xff] }
 0x59d   : > { %v8021_v30 = vadd.f32 %v15588_v21, %v7728_v46  ;;  %v8022_v40 = vadd.f32 %v19626_v44, %v7729_v13  ;;  %v7730_v3 = vadd.f32 %v19492_v5, %v7437_v22  ;;  %v19764_v5 = vpop.f32.mrf.mxu1  ;;  %v7152_v13 = vadd.f32 %v22214_v56, %v22213_v48  ;;  %v22229_v56 = vld [vmem:[#allocation86_spill] sm:$0xff] }
 0x59e   : > { %v19716_v62 = vpop.f32.mrf.mxu0  ;;  %v8321_v27 = vadd.f32 %v19665_v25, %v8028_v1 }
 0x59f   : > { %22204 = vst [vmem:[#allocation73_spill] sm:$0xff] %v19716_v62  ;;  %v8314_v46 = vadd.f32 %v19622_v54, %v8021_v30  ;;  %v8315_v34 = vadd.f32 %v19647_v53, %v8022_v40  ;;  %v8023_v54 = vadd.f32 %v19632_v26, %v7730_v3  ;;  %v8318_v53 = vadd.f32 %v19653_v49, %v8025_v16  ;;  %v19794_v30 = vpop.f32.mrf.mxu1  ;;  %v22221_v16 = vld [vmem:[#allocation6_spill] sm:$0xff] }
 0x5a0   : > { %v19720_v29 = vpop.f32.mrf.mxu0  ;;  %v9391_v60 = vsel %vm3355_vm5, %v22221_v16, 0  ;;  %v7445_v2 = vadd.f32 %v22224_v28, %v7152_v13 }
 0x5a1   : > { %v8316_v52 = vadd.f32 %v19659_v41, %v8023_v54  ;;  %v6281_v41 = vadd.f32 %v19777_v38, %v19282_v37  ;;  %v19822_v12 = vpop.f32.mrf.mxu1 }
 0x5a2   : > { %v15655_v19 = vpop.f32.mrf.mxu0 }
 0x5a3   : > { %v19729_v62 = vadd.f32 %v15655_v19, %v8313_v18  ;;  %v7734_v19 = vadd.f32 %v19518_v10, %v7441_v55  ;;  %v22215_v10 = vld [vmem:[#allocation69_spill] sm:$0xff] }
 0x5a4   : > { %v8477_v35 = vpop.f32.mrf.mxu0  ;;  %v6863_v22 = vadd.f32 %v22215_v10, %v6570_v50  ;;  %v22225_v55 = vld [vmem:[#allocation105_spill] sm:$0xff] }
 0x5a5   : > { %22205 = vst [vmem:[#allocation68_spill] sm:$0xff] %v19729_v62  ;;  %v21646_v58 = vmax.f32 %v19729_v62, 0.0  ;;  %v19737_v47 = vadd.f32 %v8477_v35, %v8311_v31  ;;  %v22217_v35 = vld [vmem:[#allocation90_spill] sm:$0xff]  ;;  %v8027_v37 = vadd.f32 %v22218_v23, %v7734_v19 }
 0x5a6   : > { %v15656_v63 = vpop.f32.mrf.mxu0 }
 0x5a7   : > { %22206 = vst [vmem:[#allocation11_spill] sm:$0xff] %v19737_v47  ;;  %8670 = vst.msk [vmem:[#allocation2 + $0x31] sm:$0xff] %vm388_vm1, %v21646_v58  ;;  %v21645_v24 = vmax.f32 %v19737_v47, 0.0  ;;  %v19749_v33 = vadd.f32 %v15656_v63, %v8314_v46  ;;  %v7739_v46 = vadd.f32 %v22217_v35, %v22216_v39  ;;  %v22219_v63 = vld [vmem:[#allocation42_spill] sm:$0xff]  ;;  %v8320_v10 = vadd.f32 %v19683_v8, %v8027_v37  ;;  %v19851_v39 = vpop.f32.mrf.mxu1  ;;  %v19873_v37 = vld [vmem:[%s21562_s7 + $0x10] sm:$0xf] }
 0x5a8   : > { %v8480_v15 = vpop.f32.mrf.mxu0 }
 0x5a9   : > { %22207 = vst [vmem:[#allocation79_spill] sm:$0xff] %v19749_v33  ;;  %8668 = vst.msk [vmem:[#allocation2 + $0x19] sm:$0xff] %vm388_vm1, %v21645_v24  ;;  %v21644_v44 = vmax.f32 %v19749_v33, 0.0  ;;  %v19758_v21 = vadd.f32 %v8480_v15, %v8312_v59  ;;  %v8319_v59 = vadd.f32 %v22219_v63, %v8026_v4 }
 0x5aa   : > { %v15659_v9 = vpop.f32.mrf.mxu0 }
 0x5ab   : > { %22208 = vst [vmem:[#allocation110_spill] sm:$0xff] %v19758_v21  ;;  %8671 = vst.msk [vmem:[#allocation2 + $0x39] sm:$0xff] %vm388_vm1, %v21644_v44  ;;  %v21642_v61 = vmax.f32 %v19758_v21, 0.0  ;;  %v19772_v14 = vadd.f32 %v15659_v9, %v8317_v36  ;;  %v22222_v9 = vld [vmem:[#allocation46_spill] sm:$0xff] }
 0x5ac   : > { %v8493_v26 = vpop.f32.mrf.mxu0 }
 0x5ad   : > { %22209 = vst [vmem:[#allocation5_spill] sm:$0xff] %v19772_v14  ;;  %8669 = vst.msk [vmem:[#allocation2 + $0x21] sm:$0xff] %vm388_vm1, %v21642_v61  ;;  %v21638_v0 = vmax.f32 %v19772_v14, 0.0  ;;  %v19790_v18 = vadd.f32 %v8493_v26, %v8315_v34  ;;  %v22223_v34 = vld [vmem:[#allocation29_spill] sm:$0xff]  ;;  %v8322_v26 = vadd.f32 %v22225_v55, %v8029_v43  ;;  %v22228_v43 = vld [vmem:[#allocation8_spill] sm:$0xff] }
 0x5ae   : > { %v15660_v20 = vpop.f32.mrf.mxu0  ;;  %v7737_v54 = vadd.f32 %v22223_v34, %v22222_v9  ;;  %v8711_v48 = vld [vmem:[#allocation2 + $0x30] sm:$0xff]  ;;  %v7740_v13 = vadd.f32 %v22229_v56, %v22228_v43  ;;  %v22233_v9 = vld [vmem:[#allocation87_spill] sm:$0xff] }
 0x5af   : > { %22210 = vst [vmem:[#allocation80_spill] sm:$0xff] %v19790_v18  ;;  %8674 = vst.msk [vmem:[#allocation2 + $0x61] sm:$0xff] %vm388_vm1, %v21638_v0  ;;  %v21637_v49 = vmax.f32 %v19790_v18, 0.0  ;;  %v19802_v42 = vadd.f32 %v15660_v20, %v8318_v53  ;;  %v22226_v53 = vld [vmem:[#allocation76_spill] sm:$0xff]  ;;  %v6574_v34 = vadd.f32 %v22233_v9, %v6281_v41  ;;  %v22241_v56 = vld [vmem:[#allocation71_spill] sm:$0xff] }
 0x5b0   : > { %v8496_v7 = vpop.f32.mrf.mxu0  ;;  %v8709_v15 = vld [vmem:[#allocation2 + $0x18] sm:$0xff]  ;;  %v8032_v1 = vadd.f32 %v22226_v53, %v7739_v46  ;;  %v22238_v41 = vld [vmem:[#allocation40_spill] sm:$0xff] }
 0x5b1   : > { %22211 = vst [vmem:[#allocation56_spill] sm:$0xff] %v19802_v42  ;;  %8672 = vst.msk [vmem:[#allocation2 + $0x49] sm:$0xff] %vm388_vm1, %v21637_v49  ;;  %v21636_v6 = vmax.f32 %v19802_v42, 0.0  ;;  %v19814_v31 = vadd.f32 %v8496_v7, %v8316_v52  ;;  %v9002_v36 = vld [vmem:[#allocation2 + $0x19] sm:$0xff]  ;;  %v9004_v23 = vld [vmem:[#allocation2 + $0x31] sm:$0xff] }
 0x5b2   : > { %v15663_v25 = vpop.f32.mrf.mxu0  ;;  %v8712_v32 = vld [vmem:[#allocation2 + $0x38] sm:$0xff] }
 0x5b3   : > { %22212 = vst [vmem:[#allocation45_spill] sm:$0xff] %v19814_v31  ;;  %8675 = vst.msk [vmem:[#allocation2 + $0x69] sm:$0xff] %vm388_vm1, %v21636_v6  ;;  %v21635_v40 = vmax.f32 %v19814_v31, 0.0  ;;  %v19829_v3 = vadd.f32 %v15663_v25, %v8321_v27  ;;  %v9005_v4 = vld [vmem:[#allocation2 + $0x39] sm:$0xff]  ;;  %v19853_v46 = vpack.c.bf16 %v8712_v32, %v8711_v48  ;;  %v19878_v32 = vld [vmem:[%s21562_s7 + $0x14] sm:$0xf] }
 0x5b4   : > { %v8509_v45 = vpop.f32.mrf.mxu0  ;;  %v8710_v20 = vld [vmem:[#allocation2 + $0x20] sm:$0xff]  ;;  %v19868_v8 = vpack.c.bf16 %v9005_v4, %v9004_v23  ;;  %v22239_v48 = vld [vmem:[#allocation85_spill] sm:$0xff] }
 0x5b5   : > { %22220 = vst [vmem:[#allocation111_spill] sm:$0xff] %v19829_v3  ;;  %v9003_v52 = vld [vmem:[#allocation2 + $0x21] sm:$0xff]  ;;  %8673 = vst.msk [vmem:[#allocation2 + $0x51] sm:$0xff] %vm388_vm1, %v21635_v40  ;;  %v21633_v50 = vmax.f32 %v19829_v3, 0.0  ;;  %v19842_v19 = vadd.f32 %v8509_v45, %v8319_v59  ;;  %v19844_v7 = vpack.c.bf16 %v8710_v20, %v8709_v15  ;;  %v22231_v59 = vld [vmem:[#allocation53_spill] sm:$0xff]  ;;  %v7156_v43 = vadd.f32 %v22239_v48, %v6863_v22 }
 0x5b6   : > { %v19846_v27 = vpack.c.bf16 %v9003_v52, %v9002_v36  ;;  %v15664_v35 = vpop.f32.mrf.mxu0  ;;  %v22230_v25 = vld [vmem:[#allocation102_spill] sm:$0xff]  ;;  %v8030_v15 = vadd.f32 %v22231_v59, %v7737_v54  ;;  %v22234_v54 = vld [vmem:[#allocation4_spill] sm:$0xff] }
 0x5b7   : > { %22227 = vst [vmem:[#allocation24_spill] sm:$0xff] %v19842_v19  ;;  %v9684_v63 = vsel %vm3355_vm5, %v22230_v25, 0  ;;  %8678 = vst.msk [vmem:[#allocation2 + $0x91] sm:$0xff] %vm388_vm1, %v21633_v50  ;;  %v21632_v36 = vmax.f32 %v19842_v19, 0.0  ;;  %v19862_v16 = vadd.f32 %v15664_v35, %v8322_v26  ;;  %15688 = vmatmul.mubr.msk.bf16.vlgmr.msra.gmra.mxu1 %vm388_vm1, %v19844_v7  ;;  %v8033_v28 = vadd.f32 %v22234_v54, %v7740_v13  ;;  %v22235_v26 = vld [vmem:[#allocation91_spill] sm:$0xff]  ;;  %v22236_v45 = vld [vmem:[#allocation106_spill] sm:$0xff]  ;;  %v19899_v13 = vpop.f32.mrf.mxu1 }
 0x5b8   : > { %15722 = vmatmul.mubr.msk.bf16.vlgmr.msra.gmra.mxu0 %vm388_vm1, %v19846_v27  ;;  %15754 = vmatpush3.bf16.msra.mxu1 %v9391_v60  ;;  %v8512_v55 = vpop.f32.mrf.mxu0  ;;  %v7738_v53 = vadd.f32 %v22235_v26, %v7445_v2  ;;  %v8325_v20 = vadd.f32 %v22236_v45, %v8032_v1  ;;  %v6285_v60 = vadd.f32 %v19777_v38, %v22238_v41  ;;  %v22240_v2 = vld [vmem:[#allocation17_spill] sm:$0xff]  ;;  %v22243_v25 = vld [vmem:[#allocation103_spill] sm:$0xff]  ;;  %v22245_v26 = vld [vmem:[#allocation48_spill] sm:$0xff] }
 0x5b9   : > { %22232 = vst [vmem:[#allocation113_spill] sm:$0xff] %v19862_v16  ;;  %15691 = vmatprep.mubr.msk.bf16.mxu1 %vm388_vm1, %v19853_v46  ;;  %8676 = vst.msk [vmem:[#allocation2 + $0x79] sm:$0xff] %vm388_vm1, %v21632_v36  ;;  %v21634_v52 = vmax.f32 %v19862_v16, 0.0  ;;  %v19890_v4 = vadd.f32 %v8512_v55, %v8320_v10  ;;  %15725 = vmatprep.mubr.msk.bf16.mxu0 %vm388_vm1, %v19868_v8  ;;  %v7743_v1 = vadd.f32 %v22241_v56, %v22240_v2  ;;  %v22242_v10 = vld [vmem:[#allocation60_spill] sm:$0xff]  ;;  %v8713_v9 = vld [vmem:[#allocation2 + $0x48] sm:$0xff]  ;;  %v19931_v6 = vpop.f32.mrf.mxu1 }
 0x5ba   : > { %15788 = vmatpush3.bf16.msra.mxu0 %v9684_v63  ;;  %v15667_v35 = vpop.f32.mrf.mxu0  ;;  %16115 = vmatprep.subr.msk.bf16.mxu1 %vm3355_vm5, %v19873_v37  ;;  %v8323_v23 = vadd.f32 %v22242_v10, %v8030_v15  ;;  %v8031_v63 = vadd.f32 %v22243_v25, %v7738_v53  ;;  %v8716_v54 = vld [vmem:[#allocation2 + $0x68] sm:$0xff]  ;;  %v22247_v48 = vld [vmem:[#allocation104_spill] sm:$0xff]  ;;  %v22249_v10 = vld [vmem:[#allocation22_spill] sm:$0xff] }
 0x5bb   : > { %22237 = vst [vmem:[#allocation23_spill] sm:$0xff] %v19890_v4  ;;  %16116 = vmatprep.subr.msk.bf16.mxu0 %vm3355_vm5, %v19878_v32  ;;  %8679 = vst.msk [vmem:[#allocation2 + $0x99] sm:$0xff] %vm388_vm1, %v21634_v52  ;;  %v21639_v22 = vmax.f32 %v19890_v4, 0.0  ;;  %v19911_v59 = vadd.f32 %v15667_v35, %v8325_v20  ;;  %v9009_v55 = vld [vmem:[#allocation2 + $0x69] sm:$0xff]  ;;  %v7449_v2 = vadd.f32 %v22247_v48, %v7156_v43  ;;  %v8715_v43 = vld [vmem:[#allocation2 + $0x60] sm:$0xff] }
 0x5bc   : > { %v22246_v45 = vld [vmem:[#allocation31_spill] sm:$0xff]  ;;  %v22248_v56 = vld [vmem:[#allocation16_spill] sm:$0xff]  ;;  %v8036_v53 = vadd.f32 %v22249_v10, %v7743_v1  ;;  %v8525_v25 = vpop.f32.mrf.mxu0  ;;  %v22252_v48 = vld [vmem:[#allocation94_spill] sm:$0xff]  ;;  %v19933_v0 = vpack.c.bf16 %v8716_v54, %v8715_v43 }
 0x5bd   : > { %22244 = vst [vmem:[#allocation82_spill] sm:$0xff] %v19911_v59  ;;  %v7741_v41 = vadd.f32 %v22246_v45, %v22245_v26  ;;  %v8326_v15 = vadd.f32 %v22248_v56, %v8033_v28  ;;  %v8714_v36 = vld [vmem:[#allocation2 + $0x50] sm:$0xff]  ;;  %8677 = vst.msk [vmem:[#allocation2 + $0x81] sm:$0xff] %vm388_vm1, %v21639_v22  ;;  %v21641_v20 = vmax.f32 %v19911_v59, 0.0  ;;  %v19922_v35 = vadd.f32 %v8525_v25, %v8323_v23  ;;  %v9008_v28 = vld [vmem:[#allocation2 + $0x61] sm:$0xff] }
 0x5be   : > { %v9006_v50 = vld [vmem:[#allocation2 + $0x49] sm:$0xff]  ;;  %v9007_v52 = vld [vmem:[#allocation2 + $0x51] sm:$0xff]  ;;  %v19924_v40 = vpack.c.bf16 %v8714_v36, %v8713_v9  ;;  %v15668_v49 = vpop.f32.mrf.mxu0  ;;  %v19935_v22 = vpack.c.bf16 %v9009_v55, %v9008_v28  ;;  %v8324_v23 = vadd.f32 %v19714_v57, %v8031_v63 }
 0x5bf   : > { %22250 = vst [vmem:[#allocation57_spill] sm:$0xff] %v19922_v35  ;;  %v19926_v26 = vpack.c.bf16 %v9007_v52, %v9006_v50  ;;  %v22251_v45 = vld [vmem:[#allocation89_spill] sm:$0xff]  ;;  %v22253_v56 = vld [vmem:[#allocation72_spill] sm:$0xff]  ;;  %v22254_v36 = vld [vmem:[#allocation27_spill] sm:$0xff]  ;;  %v21640_v50 = vmax.f32 %v19922_v35, 0.0 }
 0x5c0   : > { %v6867_v1 = vadd.f32 %v22251_v45, %v6574_v34  ;;  %v7744_v10 = vadd.f32 %v22253_v56, %v22252_v48  ;;  %v8034_v9 = vadd.f32 %v22254_v36, %v7741_v41  ;;  %8682 = vst.msk [vmem:[#allocation2 + $0xc1] sm:$0xff] %vm388_vm1, %v21641_v20  ;;  %v19943_v34 = vadd.f32 %v15668_v49, %v8326_v15  ;;  %v22256_v52 = vld [vmem:[#allocation39_spill] sm:$0xff]  ;;  %v8528_v55 = vpop.f32.mrf.mxu0  ;;  %v22257_v57 = vld [vmem:[#allocation92_spill] sm:$0xff]  ;;  %v22260_v28 = vld [vmem:[#allocation9_spill] sm:$0xff] }
 0x5c1   : > { %15692 = vmatmul.mubr.msk.bf16.gmra.mxu1 %vm388_vm1, %v19924_v40  ;;  %15726 = vmatmul.mubr.msk.bf16.gmra.mxu0 %vm388_vm1, %v19926_v26  ;;  %v7742_v63 = vadd.f32 %v22257_v57, %v7449_v2  ;;  %v8329_v49 = vadd.f32 %v19725_v51, %v8036_v53  ;;  %8680 = vst.msk [vmem:[#allocation2 + $0xa9] sm:$0xff] %vm388_vm1, %v21640_v50  ;;  %v22259_v25 = vld [vmem:[#allocation44_spill] sm:$0xff]  ;;  %v22261_v48 = vld [vmem:[#allocation26_spill] sm:$0xff]  ;;  %v22263_v36 = vld [vmem:[#allocation95_spill] sm:$0xff] }
 0x5c2   : > { %22255 = vst [vmem:[#allocation51_spill] sm:$0xff] %v19943_v34  ;;  %v8037_v54 = vadd.f32 %v22256_v52, %v7744_v10  ;;  %15695 = vmatprep.mubr.msk.bf16.mxu1 %vm388_vm1, %v19933_v0  ;;  %15729 = vmatprep.mubr.msk.bf16.mxu0 %vm388_vm1, %v19935_v22  ;;  %v21643_v41 = vmax.f32 %v19943_v34, 0.0  ;;  %v19960_v15 = vadd.f32 %v8528_v55, %v8324_v23  ;;  %v22262_v10 = vld [vmem:[#allocation35_spill] sm:$0xff]  ;;  %v19968_v52 = vpop.f32.mrf.mxu1  ;;  %v15671_v51 = vpop.f32.mrf.mxu0  ;;  %v22264_v57 = vld [vmem:[#allocation18_spill] sm:$0xff] }
 0x5c3   : > { %v6578_v43 = vadd.f32 %v22259_v25, %v6285_v60  ;;  %v6289_v45 = vadd.f32 %v19777_v38, %v22260_v28  ;;  %v7160_v56 = vadd.f32 %v22261_v48, %v6867_v1  ;;  %v7747_v2 = vadd.f32 %v22263_v36, %v22262_v10  ;;  %v8717_v38 = vld [vmem:[#allocation2 + $0x78] sm:$0xff]  ;;  %v22266_v25 = vld [vmem:[#allocation59_spill] sm:$0xff]  ;;  %v22268_v10 = vld [vmem:[#allocation20_spill] sm:$0xff] }
 0x5c4   : > { %22258 = vst [vmem:[#allocation114_spill] sm:$0xff] %v19960_v15  ;;  %v8327_v53 = vadd.f32 %v19741_v17, %v8034_v9  ;;  %v8035_v50 = vadd.f32 %v22264_v57, %v7742_v63  ;;  %8683 = vst.msk [vmem:[#allocation2 + $0xc9] sm:$0xff] %vm388_vm1, %v21643_v41  ;;  %v21648_v60 = vmax.f32 %v19960_v15, 0.0  ;;  %v19976_v23 = vadd.f32 %v15671_v51, %v8329_v49  ;;  %v8720_v1 = vld [vmem:[#allocation2 + $0x98] sm:$0xff]  ;;  %v22269_v9 = vld [vmem:[#allocation32_spill] sm:$0xff]  ;;  %v8541_v57 = vpop.f32.mrf.mxu0  ;;  %v19996_v24 = vpop.f32.mrf.mxu1 }
 0x5c5   : > { %v9013_v55 = vld [vmem:[#allocation2 + $0x99] sm:$0xff]  ;;  %v7453_v36 = vadd.f32 %v22268_v10, %v7160_v56  ;;  %v8330_v17 = vadd.f32 %v19764_v5, %v8037_v54  ;;  %v8040_v63 = vadd.f32 %v22269_v9, %v7747_v2  ;;  %v9011_v41 = vld [vmem:[#allocation2 + $0x81] sm:$0xff]  ;;  %v8719_v56 = vld [vmem:[#allocation2 + $0x90] sm:$0xff] }
 0x5c6   : > { %22265 = vst [vmem:[#allocation34_spill] sm:$0xff] %v19976_v23  ;;  %v22267_v28 = vld [vmem:[#allocation93_spill] sm:$0xff]  ;;  %v8718_v20 = vld [vmem:[#allocation2 + $0x80] sm:$0xff]  ;;  %8681 = vst.msk [vmem:[#allocation2 + $0xb1] sm:$0xff] %vm388_vm1, %v21648_v60  ;;  %v21650_v49 = vmax.f32 %v19976_v23, 0.0  ;;  %v19987_v51 = vadd.f32 %v8541_v57, %v8327_v53  ;;  %v15672_v58 = vpop.f32.mrf.mxu0  ;;  %v19998_v15 = vpack.c.bf16 %v8720_v1, %v8719_v56  ;;  %v8328_v53 = vadd.f32 %v19794_v30, %v8035_v50 }
 0x5c7   : > { %v7745_v48 = vadd.f32 %v22267_v28, %v22266_v25  ;;  %v9010_v61 = vld [vmem:[#allocation2 + $0x79] sm:$0xff]  ;;  %v19989_v44 = vpack.c.bf16 %v8718_v20, %v8717_v38  ;;  %v9012_v5 = vld [vmem:[#allocation2 + $0x91] sm:$0xff]  ;;  %v22271_v54 = vld [vmem:[#allocation15_spill] sm:$0xff] }
 0x5c8   : > { %22270 = vst [vmem:[#allocation47_spill] sm:$0xff] %v19987_v51  ;;  %v19991_v25 = vpack.c.bf16 %v9011_v41, %v9010_v61  ;;  %v6871_v2 = vadd.f32 %v22271_v54, %v6578_v43  ;;  %v22272_v28 = vld [vmem:[#allocation109_spill] sm:$0xff]  ;;  %v22273_v10 = vld [vmem:[#allocation96_spill] sm:$0xff]  ;;  %v20000_v60 = vpack.c.bf16 %v9013_v55, %v9012_v5  ;;  %8686 = vst.msk [vmem:[#allocation2 + $0xf1] sm:$0xff] %vm388_vm1, %v21650_v49  ;;  %v21649_v61 = vmax.f32 %v19987_v51, 0.0  ;;  %v8544_v55 = vpop.f32.mrf.mxu0 }
 0x5c9   : > { %v7748_v9 = vadd.f32 %v22273_v10, %v22272_v28  ;;  %v22274_v20 = vld [vmem:[#allocation77_spill] sm:$0xff]  ;;  %v20008_v41 = vadd.f32 %v15672_v58, %v8330_v17  ;;  %15696 = vmatmul.mubr.msk.bf16.gmra.mxu1 %vm388_vm1, %v19989_v44  ;;  %v22276_v43 = vld [vmem:[#allocation54_spill] sm:$0xff]  ;;  %v8333_v58 = vadd.f32 %v19822_v12, %v8040_v63  ;;  %v20025_v17 = vadd.f32 %v8544_v55, %v8328_v53  ;;  %v22279_v57 = vld [vmem:[#allocation88_spill] sm:$0xff] }
 0x5ca   : > { %v8038_v38 = vadd.f32 %v22274_v20, %v7745_v48  ;;  %15730 = vmatmul.mubr.msk.bf16.gmra.mxu0 %vm388_vm1, %v19991_v25  ;;  %15699 = vmatprep.mubr.msk.bf16.mxu1 %vm388_vm1, %v19998_v15  ;;  %v22277_v30 = vld [vmem:[#allocation50_spill] sm:$0xff]  ;;  %8684 = vst.msk [vmem:[#allocation2 + $0xd9] sm:$0xff] %vm388_vm1, %v21649_v61  ;;  %v6582_v56 = vadd.f32 %v22279_v57, %v6289_v45  ;;  %v22280_v5 = vld [vmem:[#allocation67_spill] sm:$0xff]  ;;  %v22281_v28 = vld [vmem:[#allocation33_spill] sm:$0xff]  ;;  %v15646_v20 = vpop.f32.mrf.mxu1 }
 0x5cb   : > { %22275 = vst [vmem:[#allocation19_spill] sm:$0xff] %v20008_v41  ;;  %v8041_v1 = vadd.f32 %v22276_v43, %v7748_v9  ;;  %15733 = vmatprep.mubr.msk.bf16.mxu0 %vm388_vm1, %v20000_v60  ;;  %v7746_v50 = vadd.f32 %v22277_v30, %v7453_v36  ;;  %v21652_v48 = vmax.f32 %v20008_v41, 0.0  ;;  %22278 = vst [vmem:[#allocation116_spill] sm:$0xff] %v20025_v17  ;;  %v22282_v10 = vld [vmem:[#allocation14_spill] sm:$0xff]  ;;  %v15675_v43 = vpop.f32.mrf.mxu0  ;;  %v22283_v12 = vld [vmem:[#allocation43_spill] sm:$0xff]  ;;  %v21657_v53 = vmax.f32 %v20025_v17, 0.0 }
 0x5cc   : > { %v7164_v54 = vadd.f32 %v22280_v5, %v6871_v2  ;;  %v7751_v9 = vadd.f32 %v22282_v10, %v22281_v28  ;;  %v8331_v36 = vadd.f32 %v19851_v39, %v8038_v38  ;;  %v20037_v55 = vadd.f32 %v15675_v43, %v8333_v58  ;;  %v8721_v45 = vld [vmem:[#allocation2 + $0xa8] sm:$0xff]  ;;  %v22285_v57 = vld [vmem:[#allocation97_spill] sm:$0xff]  ;;  %v22286_v5 = vld [vmem:[#allocation112_spill] sm:$0xff]  ;;  %v8283_v23 = vpop.f32.mrf.mxu1 }
 0x5cd   : > { %v8039_v63 = vadd.f32 %v22283_v12, %v7746_v50  ;;  %8687 = vst.msk [vmem:[#allocation2 + $0xf9] sm:$0xff] %vm388_vm1, %v21652_v48  ;;  %v8724_v30 = vld [vmem:[#allocation2 + $0xc8] sm:$0xff]  ;;  %v7749_v28 = vadd.f32 %v22286_v5, %v22285_v57  ;;  %v22287_v10 = vld [vmem:[#allocation10_spill] sm:$0xff]  ;;  %v8334_v39 = vadd.f32 %v19899_v13, %v8041_v1  ;;  %v8557_v12 = vpop.f32.mrf.mxu0  ;;  %v8722_v49 = vld [vmem:[#allocation2 + $0xb0] sm:$0xff] }
 0x5ce   : > { %22284 = vst [vmem:[#allocation64_spill] sm:$0xff] %v20037_v55  ;;  %v9017_v2 = vld [vmem:[#allocation2 + $0xc9] sm:$0xff]  ;;  %v7457_v61 = vadd.f32 %v22287_v10, %v7164_v54  ;;  %v9015_v48 = vld [vmem:[#allocation2 + $0xb1] sm:$0xff]  ;;  %8685 = vst.msk [vmem:[#allocation2 + $0xe1] sm:$0xff] %vm388_vm1, %v21657_v53  ;;  %v21659_v58 = vmax.f32 %v20037_v55, 0.0  ;;  %v20048_v43 = vadd.f32 %v8557_v12, %v8331_v36  ;;  %v20050_v51 = vpack.c.bf16 %v8722_v49, %v8721_v45 }
 0x5cf   : > { %v22288_v38 = vld [vmem:[#allocation63_spill] sm:$0xff]  ;;  %v8723_v54 = vld [vmem:[#allocation2 + $0xc0] sm:$0xff]  ;;  %v22290_v1 = vld [vmem:[#allocation13_spill] sm:$0xff]  ;;  %v15676_v34 = vpop.f32.mrf.mxu0  ;;  %v8332_v36 = vadd.f32 %v19931_v6, %v8039_v63 }
 0x5d0   : > { %v8044_v50 = vadd.f32 %v22288_v38, %v7751_v9  ;;  %v9014_v41 = vld [vmem:[#allocation2 + $0xa9] sm:$0xff]  ;;  %22289 = vst [vmem:[#allocation83_spill] sm:$0xff] %v20048_v43  ;;  %v9016_v13 = vld [vmem:[#allocation2 + $0xc1] sm:$0xff]  ;;  %v6875_v9 = vadd.f32 %v22290_v1, %v6582_v56  ;;  %v20057_v17 = vpack.c.bf16 %v8724_v30, %v8723_v54  ;;  %8690 = vst.msk [vmem:[#allocation2 + $0x121] sm:$0xff] %vm388_vm1, %v21659_v58  ;;  %v15649_v30 = vpop.f32.mrf.mxu1 }
 0x5d1   : > { %v20052_v57 = vpack.c.bf16 %v9015_v48, %v9014_v41  ;;  %v22291_v5 = vld [vmem:[#allocation30_spill] sm:$0xff]  ;;  %v22292_v10 = vld [vmem:[#allocation28_spill] sm:$0xff]  ;;  %v20059_v53 = vpack.c.bf16 %v9017_v2, %v9016_v13  ;;  %v22293_v12 = vld [vmem:[#allocation107_spill] sm:$0xff]  ;;  %v21658_v41 = vmax.f32 %v20048_v43, 0.0  ;;  %v20067_v48 = vadd.f32 %v15676_v34, %v8334_v39  ;;  %15700 = vmatmul.mubr.msk.bf16.gmra.mxu1 %vm388_vm1, %v20050_v51  ;;  %v8560_v6 = vpop.f32.mrf.mxu0 }
 0x5d2   : > { %v7752_v38 = vadd.f32 %v22292_v10, %v22291_v5  ;;  %v8042_v49 = vadd.f32 %v22293_v12, %v7749_v28  ;;  %v22295_v56 = vld [vmem:[#allocation55_spill] sm:$0xff]  ;;  %15703 = vmatprep.mubr.msk.bf16.mxu1 %vm388_vm1, %v20057_v17  ;;  %v22296_v63 = vld [vmem:[#allocation74_spill] sm:$0xff]  ;;  %v8337_v34 = vadd.f32 %v19968_v52, %v8044_v50  ;;  %v20084_v39 = vadd.f32 %v8560_v6, %v8332_v36  ;;  %v8725_v36 = vld [vmem:[#allocation2 + $0xd8] sm:$0xff] }
 0x5d3   : > { %22294 = vst [vmem:[#allocation58_spill] sm:$0xff] %v20067_v48  ;;  %15734 = vmatmul.mubr.msk.bf16.gmra.mxu0 %vm388_vm1, %v20052_v57  ;;  %v7750_v2 = vadd.f32 %v22296_v63, %v7457_v61  ;;  %8688 = vst.msk [vmem:[#allocation2 + $0x109] sm:$0xff] %vm388_vm1, %v21658_v41  ;;  %v21662_v28 = vmax.f32 %v20067_v48, 0.0  ;;  %v22298_v54 = vld [vmem:[#allocation98_spill] sm:$0xff]  ;;  %v22299_v1 = vld [vmem:[#allocation99_spill] sm:$0xff] }
 0x5d4   : > { %v8045_v45 = vadd.f32 %v22295_v56, %v7752_v38  ;;  %15737 = vmatprep.mubr.msk.bf16.mxu0 %vm388_vm1, %v20059_v53  ;;  %22297 = vst [vmem:[#allocation49_spill] sm:$0xff] %v20084_v39  ;;  %v7168_v13 = vadd.f32 %v22298_v54, %v6875_v9  ;;  %v22300_v5 = vld [vmem:[#allocation115_spill] sm:$0xff]  ;;  %v15679_v38 = vpop.f32.mrf.mxu0  ;;  %v8335_v12 = vadd.f32 %v19996_v24, %v8042_v49  ;;  %v22301_v56 = vld [vmem:[#allocation41_spill] sm:$0xff]  ;;  %v21666_v52 = vmax.f32 %v20084_v39, 0.0  ;;  %v22303_v9 = vld [vmem:[#allocation62_spill] sm:$0xff] }
 0x5d5   : > { %v7755_v10 = vadd.f32 %v22300_v5, %v22299_v1  ;;  %v8043_v61 = vadd.f32 %v22301_v56, %v7750_v2  ;;  %8691 = vst.msk [vmem:[#allocation2 + $0x129] sm:$0xff] %vm388_vm1, %v21662_v28  ;;  %v20095_v50 = vadd.f32 %v15679_v38, %v8337_v34  ;;  %v8728_v6 = vld [vmem:[#allocation2 + $0xf8] sm:$0xff]  ;;  %v22304_v54 = vld [vmem:[#allocation75_spill] sm:$0xff]  ;;  %v22305_v1 = vld [vmem:[#allocation100_spill] sm:$0xff]  ;;  %v8296_v2 = vpop.f32.mrf.mxu1 }
 0x5d6   : > { %v9021_v63 = vld [vmem:[#allocation2 + $0xf9] sm:$0xff]  ;;  %v7753_v41 = vadd.f32 %v22304_v54, %v22303_v9  ;;  %v7461_v5 = vadd.f32 %v22305_v1, %v7168_v13  ;;  %v8338_v58 = vadd.f32 %v15646_v20, %v8045_v45  ;;  %v22306_v24 = vld [vmem:[#allocation108_spill] sm:$0xff]  ;;  %v8573_v56 = vpop.f32.mrf.mxu0  ;;  %v9019_v28 = vld [vmem:[#allocation2 + $0xe1] sm:$0xff]  ;;  %8689 = vst.msk [vmem:[#allocation2 + $0x111] sm:$0xff] %vm388_vm1, %v21666_v52 }
 0x5d7   : > { %22302 = vst [vmem:[#allocation7_spill] sm:$0xff] %v20095_v50  ;;  %v8048_v49 = vadd.f32 %v22306_v24, %v7755_v10  ;;  %v8726_v48 = vld [vmem:[#allocation2 + $0xe0] sm:$0xff]  ;;  %v21674_v34 = vmax.f32 %v20095_v50, 0.0  ;;  %v20105_v38 = vadd.f32 %v8573_v56, %v8335_v12  ;;  %v8727_v20 = vld [vmem:[#allocation2 + $0xf0] sm:$0xff]  ;;  %v22309_v10 = vld [vmem:[#allocation37_spill] sm:$0xff]  ;;  %v8336_v39 = vadd.f32 %v8283_v23, %v8043_v61 }
 0x5d8   : > { %v9018_v43 = vld [vmem:[#allocation2 + $0xd9] sm:$0xff]  ;;  %v20107_v55 = vpack.c.bf16 %v8726_v48, %v8725_v36  ;;  %v9020_v45 = vld [vmem:[#allocation2 + $0xf1] sm:$0xff]  ;;  %v15680_v1 = vpop.f32.mrf.mxu0  ;;  %v20113_v24 = vpack.c.bf16 %v8728_v6, %v8727_v20  ;;  %v8046_v52 = vadd.f32 %v19709_v11, %v7753_v41  ;;  %v15650_v36 = vpop.f32.mrf.mxu1 }
 0x5d9   : > { %22307 = vst [vmem:[#allocation36_spill] sm:$0xff] %v20105_v38  ;;  %v20109_v9 = vpack.c.bf16 %v9019_v28, %v9018_v43  ;;  %v22308_v13 = vld [vmem:[#allocation52_spill] sm:$0xff]  ;;  %v20115_v35 = vpack.c.bf16 %v9021_v63, %v9020_v45  ;;  %8694 = vst.msk [vmem:[#allocation2 + $0x151] sm:$0xff] %vm388_vm1, %v21674_v34  ;;  %v21673_v43 = vmax.f32 %v20105_v38, 0.0  ;;  %v20122_v48 = vadd.f32 %v15680_v1, %v8338_v58  ;;  %v22311_v28 = vld [vmem:[#allocation73_spill] sm:$0xff] }
 0x5da   : > { %v7756_v54 = vadd.f32 %v22309_v10, %v22308_v13  ;;  %15704 = vmatmul.mubr.msk.bf16.gmra.mxu1 %vm388_vm1, %v20107_v55  ;;  %v8576_v23 = vpop.f32.mrf.mxu0  ;;  %v22312_v11 = vld [vmem:[#allocation70_spill] sm:$0xff]  ;;  %v8341_v58 = vadd.f32 %v15649_v30, %v8048_v49  ;;  %v8339_v56 = vadd.f32 %v8296_v2, %v8046_v52  ;;  %v8729_v30 = vld [vmem:[#allocation2 + $0x108] sm:$0xff] }
 0x5db   : > { %22310 = vst [vmem:[#allocation65_spill] sm:$0xff] %v20122_v48  ;;  %15738 = vmatmul.mubr.msk.bf16.gmra.mxu0 %vm388_vm1, %v20109_v9  ;;  %15707 = vmatprep.mubr.msk.bf16.mxu1 %vm388_vm1, %v20113_v24  ;;  %v7754_v41 = vadd.f32 %v22312_v11, %v7461_v5  ;;  %8692 = vst.msk [vmem:[#allocation2 + $0x139] sm:$0xff] %vm388_vm1, %v21673_v43  ;;  %v21667_v61 = vmax.f32 %v20122_v48, 0.0  ;;  %v20138_v6 = vadd.f32 %v8576_v23, %v8336_v39  ;;  %v9297_v43 = vld [vmem:[#allocation2 + $0x32] sm:$0xff]  ;;  %v9298_v34 = vld [vmem:[#allocation2 + $0x3a] sm:$0xff] }
 0x5dc   : > { %v8049_v12 = vadd.f32 %v22311_v28, %v7756_v54  ;;  %15741 = vmatprep.mubr.msk.bf16.mxu0 %vm388_vm1, %v20115_v35  ;;  %v15683_v63 = vpop.f32.mrf.mxu0  ;;  %v8732_v49 = vld [vmem:[#allocation2 + $0x128] sm:$0xff]  ;;  %v8299_v54 = vpop.f32.mrf.mxu1 }
 0x5dd   : > { %22313 = vst [vmem:[#allocation78_spill] sm:$0xff] %v20138_v6  ;;  %v8047_v20 = vadd.f32 %v19720_v29, %v7754_v41  ;;  %8695 = vst.msk [vmem:[#allocation2 + $0x159] sm:$0xff] %vm388_vm1, %v21667_v61  ;;  %v21668_v45 = vmax.f32 %v20138_v6, 0.0  ;;  %v20145_v5 = vadd.f32 %v15683_v63, %v8341_v58  ;;  %v9025_v13 = vld [vmem:[#allocation2 + $0x129] sm:$0xff]  ;;  %v9023_v23 = vld [vmem:[#allocation2 + $0x111] sm:$0xff] }
 0x5de   : > { %v8342_v10 = vadd.f32 %v15650_v36, %v8049_v12  ;;  %v8589_v1 = vpop.f32.mrf.mxu0  ;;  %v8730_v39 = vld [vmem:[#allocation2 + $0x110] sm:$0xff]  ;;  %v8731_v41 = vld [vmem:[#allocation2 + $0x120] sm:$0xff] }
 0x5df   : > { %22314 = vst [vmem:[#allocation12_spill] sm:$0xff] %v20145_v5  ;;  %v9022_v28 = vld [vmem:[#allocation2 + $0x109] sm:$0xff]  ;;  %8693 = vst.msk [vmem:[#allocation2 + $0x141] sm:$0xff] %vm388_vm1, %v21668_v45  ;;  %v21671_v29 = vmax.f32 %v20145_v5, 0.0  ;;  %v20151_v52 = vadd.f32 %v8589_v1, %v8339_v56  ;;  %v20153_v2 = vpack.c.bf16 %v8730_v39, %v8729_v30  ;;  %v9024_v58 = vld [vmem:[#allocation2 + $0x121] sm:$0xff]  ;;  %v20157_v36 = vpack.c.bf16 %v8732_v49, %v8731_v41 }
 0x5e0   : > { %v20155_v11 = vpack.c.bf16 %v9023_v23, %v9022_v28  ;;  %v15684_v12 = vpop.f32.mrf.mxu0  ;;  %v20159_v63 = vpack.c.bf16 %v9025_v13, %v9024_v58  ;;  %v8340_v61 = vadd.f32 %v8299_v54, %v8047_v20  ;;  %v8735_v58 = vld [vmem:[#allocation2 + $0x150] sm:$0xff]  ;;  %v9317_v6 = vld [vmem:[#allocation2 + $0x122] sm:$0xff] }
 0x5e1   : > { %22315 = vst [vmem:[#allocation25_spill] sm:$0xff] %v20151_v52  ;;  %8698 = vst.msk [vmem:[#allocation2 + $0x181] sm:$0xff] %vm388_vm1, %v21671_v29  ;;  %v21672_v45 = vmax.f32 %v20151_v52, 0.0  ;;  %v20165_v56 = vadd.f32 %v15684_v12, %v8342_v10  ;;  %v9028_v12 = vld [vmem:[#allocation2 + $0x151] sm:$0xff]  ;;  %v9295_v29 = vld [vmem:[#allocation2 + $0x1a] sm:$0xff] }
 0x5e2   : > { %15708 = vmatmul.mubr.msk.bf16.gmra.mxu1 %vm388_vm1, %v20153_v2  ;;  %v8592_v30 = vpop.f32.mrf.mxu0  ;;  %v8733_v10 = vld [vmem:[#allocation2 + $0x138] sm:$0xff]  ;;  %v9318_v48 = vld [vmem:[#allocation2 + $0x12a] sm:$0xff] }
 0x5e3   : > { %22316 = vst [vmem:[#allocation38_spill] sm:$0xff] %v20165_v56  ;;  %15742 = vmatmul.mubr.msk.bf16.gmra.mxu0 %vm388_vm1, %v20155_v11  ;;  %15711 = vmatprep.mubr.msk.bf16.mxu1 %vm388_vm1, %v20157_v36  ;;  %8696 = vst.msk [vmem:[#allocation2 + $0x169] sm:$0xff] %vm388_vm1, %v21672_v45  ;;  %v21669_v20 = vmax.f32 %v20165_v56, 0.0  ;;  %v20179_v49 = vadd.f32 %v8592_v30, %v8340_v61  ;;  %v9026_v28 = vld [vmem:[#allocation2 + $0x139] sm:$0xff]  ;;  %v9296_v45 = vld [vmem:[#allocation2 + $0x22] sm:$0xff]  ;;  %v9338_v50 = vpack.c.bf16 %v9318_v48, %v9317_v6 }
 0x5e4   : > { %15745 = vmatprep.mubr.msk.bf16.mxu0 %vm388_vm1, %v20159_v63  ;;  %v8736_v54 = vld [vmem:[#allocation2 + $0x158] sm:$0xff]  ;;  %v9310_v56 = vld [vmem:[#allocation2 + $0xca] sm:$0xff] }
 0x5e5   : > { %22317 = vst [vmem:[#allocation66_spill] sm:$0xff] %v20179_v49  ;;  %8699 = vst.msk [vmem:[#allocation2 + $0x189] sm:$0xff] %vm388_vm1, %v21669_v20  ;;  %v21670_v13 = vmax.f32 %v20179_v49, 0.0  ;;  %v9029_v1 = vld [vmem:[#allocation2 + $0x159] sm:$0xff]  ;;  %v20192_v30 = vpack.c.bf16 %v8736_v54, %v8735_v58  ;;  %v9309_v49 = vld [vmem:[#allocation2 + $0xc2] sm:$0xff] }
 0x5e6   : > { %v8734_v39 = vld [vmem:[#allocation2 + $0x140] sm:$0xff]  ;;  %v20194_v20 = vpack.c.bf16 %v9029_v1, %v9028_v12  ;;  %v9313_v5 = vld [vmem:[#allocation2 + $0xf2] sm:$0xff] }
 0x5e7   : > { %v9027_v23 = vld [vmem:[#allocation2 + $0x141] sm:$0xff]  ;;  %8697 = vst.msk [vmem:[#allocation2 + $0x171] sm:$0xff] %vm388_vm1, %v21670_v13  ;;  %v20188_v41 = vpack.c.bf16 %v8734_v39, %v8733_v10  ;;  %v9294_v39 = vld [vmem:[#allocation2 + $0xa] sm:$0xff] }
 0x5e8   : > { %v20190_v61 = vpack.c.bf16 %v9027_v23, %v9026_v28  ;;  %v9293_v10 = vld [vmem:[#allocation2 + $0x2] sm:$0xff]  ;;  %v9314_v52 = vld [vmem:[#allocation2 + $0xfa] sm:$0xff] }
 0x5e9   : > { %v9326_v1 = vpack.c.bf16 %v9294_v39, %v9293_v10  ;;  %v20215_v10 = vpack.c.bf16 %v9296_v45, %v9295_v29  ;;  %v9977_v39 = vsel %vm3355_vm5, %v19873_v37, 0  ;;  %v20235_v37 = vld [vmem:[%s21562_s7 + $0x1c] sm:$0xf]  ;;  %v9302_v45 = vld [vmem:[#allocation2 + $0x6a] sm:$0xff] }
 0x5ea   : > { %15712 = vmatmul.mubr.msk.bf16.gmra.mxu1 %vm388_vm1, %v20188_v41  ;;  %v8737_v28 = vld [vmem:[#allocation2 + $0x168] sm:$0xff] }
 0x5eb   : > { %15746 = vmatmul.mubr.msk.bf16.gmra.mxu0 %vm388_vm1, %v20190_v61  ;;  %15715 = vmatprep.mubr.msk.bf16.mxu1 %vm388_vm1, %v20192_v30  ;;  %v9030_v54 = vld [vmem:[#allocation2 + $0x169] sm:$0xff] }
 0x5ec   : > { %15749 = vmatprep.mubr.msk.bf16.mxu0 %vm388_vm1, %v20194_v20 }
 0x5ee   : > { %v8738_v23 = vld [vmem:[#allocation2 + $0x170] sm:$0xff] }
 0x5ef   : > { %v9031_v58 = vld [vmem:[#allocation2 + $0x171] sm:$0xff]  ;;  %v20204_v12 = vpack.c.bf16 %v8738_v23, %v8737_v28  ;;  %v20219_v28 = vpack.c.bf16 %v9298_v34, %v9297_v43  ;;  %v10270_v23 = vsel %vm3355_vm5, %v19878_v32, 0  ;;  %v9301_v43 = vld [vmem:[#allocation2 + $0x62] sm:$0xff] }
 0x5f0   : > { %v20206_v13 = vpack.c.bf16 %v9031_v58, %v9030_v54  ;;  %v9299_v32 = vld [vmem:[#allocation2 + $0x4a] sm:$0xff]  ;;  %v9300_v34 = vld [vmem:[#allocation2 + $0x52] sm:$0xff]  ;;  %v20247_v54 = vpack.c.bf16 %v9302_v45, %v9301_v43  ;;  %v9303_v58 = vld [vmem:[#allocation2 + $0x7a] sm:$0xff] }
 0x5f1   : > { %v20245_v29 = vpack.c.bf16 %v9300_v34, %v9299_v32  ;;  %v9307_v43 = vld [vmem:[#allocation2 + $0xaa] sm:$0xff]  ;;  %v9308_v45 = vld [vmem:[#allocation2 + $0xb2] sm:$0xff] }
 0x5f2   : > { %15716 = vmatmul.mubr.msk.bf16.gmra.mxu1 %vm388_vm1, %v20204_v12  ;;  %v9323_v48 = vld [vmem:[#allocation2 + $0x16a] sm:$0xff]  ;;  %v9324_v6 = vld [vmem:[#allocation2 + $0x172] sm:$0xff] }
 0x5f3   : > { %15750 = vmatmul.mubr.msk.bf16.gmra.mxu0 %vm388_vm1, %v20206_v13  ;;  %15755 = vmatprep.mubr.msk.bf16.mxu1 %vm388_vm1, %v9326_v1  ;;  %v9304_v1 = vld [vmem:[#allocation2 + $0x82] sm:$0xff]  ;;  %v9341_v16 = vpack.c.bf16 %v9324_v6, %v9323_v48  ;;  %v11078_v21 = vld [vmem:[#allocation2 + $0x172] sm:$0xff] }
 0x5f4   : > { %15789 = vmatprep.mubr.msk.bf16.mxu0 %vm388_vm1, %v19844_v7  ;;  %v20230_v7 = vld [vmem:[%s21562_s7 + $0x18] sm:$0xf]  ;;  %v20257_v32 = vpack.c.bf16 %v9304_v1, %v9303_v58  ;;  %v20269_v58 = vpack.c.bf16 %v9308_v45, %v9307_v43  ;;  %v20271_v1 = vpack.c.bf16 %v9310_v56, %v9309_v49  ;;  %v9336_v45 = vpack.c.bf16 %v9314_v52, %v9313_v5  ;;  %v9315_v56 = vld [vmem:[#allocation2 + $0x10a] sm:$0xff]  ;;  %v9320_v52 = vld [vmem:[#allocation2 + $0x142] sm:$0xff] }
 0x5f5   : > { %v9316_v49 = vld [vmem:[#allocation2 + $0x112] sm:$0xff]  ;;  %v9319_v5 = vld [vmem:[#allocation2 + $0x13a] sm:$0xff] }
 0x5f6   : > { %v9337_v38 = vpack.c.bf16 %v9316_v49, %v9315_v56  ;;  %v9339_v59 = vpack.c.bf16 %v9320_v52, %v9319_v5  ;;  %v9617_v56 = vld [vmem:[#allocation2 + $0x188] sm:$0xff]  ;;  %v9616_v49 = vld [vmem:[#allocation2 + $0x180] sm:$0xff]  ;;  %v10563_v5 = vsel %vm3355_vm5, %v20230_v7, 0  ;;  %v10856_v52 = vsel %vm3355_vm5, %v20235_v37, 0 }
 0x5f7   : > { %v20299_v19 = vpack.c.bf16 %v9617_v56, %v9616_v49 }
 0x5fa   : > { %15756 = vmatmul.mubr.msk.bf16.vlgmr.msra.gmra.mxu1 %vm388_vm1, %v20215_v10 }
 0x5fb   : > { %15790 = vmatmul.mubr.msk.bf16.vlgmr.msra.gmra.mxu0 %vm388_vm1, %v19853_v46  ;;  %15822 = vmatpush3.bf16.msra.mxu1 %v9977_v39  ;;  %v9305_v39 = vld [vmem:[#allocation2 + $0x92] sm:$0xff] }
 0x5fc   : > { %15759 = vmatprep.mubr.msk.bf16.mxu1 %vm388_vm1, %v20219_v28  ;;  %15793 = vmatprep.mubr.msk.bf16.mxu0 %vm388_vm1, %v19924_v40 }
 0x5fd   : > { %15856 = vmatpush3.bf16.msra.mxu0 %v10270_v23  ;;  %16117 = vmatprep.subr.msk.bf16.mxu1 %vm3355_vm5, %v20230_v7  ;;  %v9306_v23 = vld [vmem:[#allocation2 + $0x9a] sm:$0xff] }
 0x5fe   : > { %16118 = vmatprep.subr.msk.bf16.mxu0 %vm3355_vm5, %v20235_v37  ;;  %v20259_v34 = vpack.c.bf16 %v9306_v23, %v9305_v39  ;;  %v9311_v39 = vld [vmem:[#allocation2 + $0xda] sm:$0xff]  ;;  %v9312_v23 = vld [vmem:[#allocation2 + $0xe2] sm:$0xff] }
 0x5ff   : > { %v9335_v43 = vpack.c.bf16 %v9312_v23, %v9311_v39  ;;  %v9321_v39 = vld [vmem:[#allocation2 + $0x152] sm:$0xff]  ;;  %v9322_v23 = vld [vmem:[#allocation2 + $0x15a] sm:$0xff] }
 0x600   : > { %v9340_v4 = vpack.c.bf16 %v9322_v23, %v9321_v39  ;;  %v11083_v39 = vld [vmem:[%s21562_s7 + $0x20] sm:$0xf] }
 0x601   : > { %v9909_v7 = vld [vmem:[#allocation2 + $0x181] sm:$0xff] }
 0x602   : > { %15760 = vmatmul.mubr.msk.bf16.gmra.mxu1 %vm388_vm1, %v20245_v29 }
 0x603   : > { %15794 = vmatmul.mubr.msk.bf16.gmra.mxu0 %vm388_vm1, %v19933_v0  ;;  %15763 = vmatprep.mubr.msk.bf16.mxu1 %vm388_vm1, %v20247_v54 }
 0x604   : > { %15797 = vmatprep.mubr.msk.bf16.mxu0 %vm388_vm1, %v19989_v44 }
 0x60a   : > { %15764 = vmatmul.mubr.msk.bf16.gmra.mxu1 %vm388_vm1, %v20257_v32 }
 0x60b   : > { %15798 = vmatmul.mubr.msk.bf16.gmra.mxu0 %vm388_vm1, %v19998_v15  ;;  %15767 = vmatprep.mubr.msk.bf16.mxu1 %vm388_vm1, %v20259_v34 }
 0x60c   : > { %15801 = vmatprep.mubr.msk.bf16.mxu0 %vm388_vm1, %v20050_v51 }
 0x612   : > { %15768 = vmatmul.mubr.msk.bf16.gmra.mxu1 %vm388_vm1, %v20269_v58 }
 0x613   : > { %15802 = vmatmul.mubr.msk.bf16.gmra.mxu0 %vm388_vm1, %v20057_v17  ;;  %15771 = vmatprep.mubr.msk.bf16.mxu1 %vm388_vm1, %v20271_v1 }
 0x614   : > { %15805 = vmatprep.mubr.msk.bf16.mxu0 %vm388_vm1, %v20107_v55 }
 0x61a   : > { %15772 = vmatmul.mubr.msk.bf16.gmra.mxu1 %vm388_vm1, %v9335_v43 }
 0x61b   : > { %15806 = vmatmul.mubr.msk.bf16.gmra.mxu0 %vm388_vm1, %v20113_v24  ;;  %15775 = vmatprep.mubr.msk.bf16.mxu1 %vm388_vm1, %v9336_v45 }
 0x61c   : > { %15809 = vmatprep.mubr.msk.bf16.mxu0 %vm388_vm1, %v20153_v2 }
 0x622   : > { %15776 = vmatmul.mubr.msk.bf16.gmra.mxu1 %vm388_vm1, %v9337_v38 }
 0x623   : > { %15810 = vmatmul.mubr.msk.bf16.gmra.mxu0 %vm388_vm1, %v20157_v36  ;;  %15779 = vmatprep.mubr.msk.bf16.mxu1 %vm388_vm1, %v9338_v50 }
 0x624   : > { %15813 = vmatprep.mubr.msk.bf16.mxu0 %vm388_vm1, %v20188_v41 }
 0x62a   : > { %15780 = vmatmul.mubr.msk.bf16.gmra.mxu1 %vm388_vm1, %v9339_v59 }
 0x62b   : > { %15814 = vmatmul.mubr.msk.bf16.gmra.mxu0 %vm388_vm1, %v20192_v30  ;;  %15783 = vmatprep.mubr.msk.bf16.mxu1 %vm388_vm1, %v9340_v4 }
 0x62c   : > { %15817 = vmatprep.mubr.msk.bf16.mxu0 %vm388_vm1, %v20204_v12 }
 0x632   : > { %15784 = vmatmul.mubr.msk.bf16.gmra.mxu1 %vm388_vm1, %v9341_v16 }
 0x633   : > { %15818 = vmatmul.mubr.msk.bf16.gmra.mxu0 %vm388_vm1, %v20299_v19  ;;  %15823 = vmatprep.mubr.msk.bf16.mxu1 %vm388_vm1, %v19846_v27  ;;  %v9910_v27 = vld [vmem:[#allocation2 + $0x189] sm:$0xff] }
 0x634   : > { %15857 = vmatprep.mubr.msk.bf16.mxu0 %vm388_vm1, %v20215_v10  ;;  %v10203_v10 = vld [vmem:[#allocation2 + $0x18a] sm:$0xff] }
 0x63a   : > { %15824 = vmatmul.mubr.msk.bf16.vlgmr.msra.gmra.mxu1 %vm388_vm1, %v19868_v8 }
 0x63b   : > { %15858 = vmatmul.mubr.msk.bf16.vlgmr.msra.gmra.mxu0 %vm388_vm1, %v20219_v28  ;;  %15890 = vmatpush3.bf16.msra.mxu1 %v10563_v5 }
 0x63c   : > { %15827 = vmatprep.mubr.msk.bf16.mxu1 %vm388_vm1, %v19926_v26  ;;  %15861 = vmatprep.mubr.msk.bf16.mxu0 %vm388_vm1, %v20245_v29 }
 0x63d   : > { %15924 = vmatpush3.bf16.msra.mxu0 %v10856_v52  ;;  %16119 = vmatprep.subr.msk.bf16.mxu1 %vm3355_vm5, %v11083_v39 }
 0x642   : > { %15828 = vmatmul.mubr.msk.bf16.gmra.mxu1 %vm388_vm1, %v19935_v22 }
 0x643   : > { %15862 = vmatmul.mubr.msk.bf16.gmra.mxu0 %vm388_vm1, %v20247_v54  ;;  %15831 = vmatprep.mubr.msk.bf16.mxu1 %vm388_vm1, %v19991_v25 }
 0x644   : > { %15865 = vmatprep.mubr.msk.bf16.mxu0 %vm388_vm1, %v20257_v32 }
 0x64a   : > { %15832 = vmatmul.mubr.msk.bf16.gmra.mxu1 %vm388_vm1, %v20000_v60 }
 0x64b   : > { %15866 = vmatmul.mubr.msk.bf16.gmra.mxu0 %vm388_vm1, %v20259_v34  ;;  %15835 = vmatprep.mubr.msk.bf16.mxu1 %vm388_vm1, %v20052_v57 }
 0x64c   : > { %15869 = vmatprep.mubr.msk.bf16.mxu0 %vm388_vm1, %v20269_v58 }
 0x652   : > { %15836 = vmatmul.mubr.msk.bf16.gmra.mxu1 %vm388_vm1, %v20059_v53 }
 0x653   : > { %15870 = vmatmul.mubr.msk.bf16.gmra.mxu0 %vm388_vm1, %v20271_v1  ;;  %15839 = vmatprep.mubr.msk.bf16.mxu1 %vm388_vm1, %v20109_v9 }
 0x654   : > { %15873 = vmatprep.mubr.msk.bf16.mxu0 %vm388_vm1, %v9335_v43 }
 0x65a   : > { %15840 = vmatmul.mubr.msk.bf16.gmra.mxu1 %vm388_vm1, %v20115_v35 }
 0x65b   : > { %15874 = vmatmul.mubr.msk.bf16.gmra.mxu0 %vm388_vm1, %v9336_v45  ;;  %15843 = vmatprep.mubr.msk.bf16.mxu1 %vm388_vm1, %v20155_v11 }
 0x65c   : > { %15877 = vmatprep.mubr.msk.bf16.mxu0 %vm388_vm1, %v9337_v38  ;;  %v10202_v38 = vld [vmem:[#allocation2 + $0x182] sm:$0xff] }
 0x65d   : > { %v20367_v37 = vpack.c.bf16 %v10203_v10, %v10202_v38 }
 0x662   : > { %15844 = vmatmul.mubr.msk.bf16.gmra.mxu1 %vm388_vm1, %v20159_v63 }
 0x663   : > { %15878 = vmatmul.mubr.msk.bf16.gmra.mxu0 %vm388_vm1, %v9338_v50  ;;  %15847 = vmatprep.mubr.msk.bf16.mxu1 %vm388_vm1, %v20190_v61  ;;  %v20365_v50 = vpack.c.bf16 %v9910_v27, %v9909_v7 }
 0x664   : > { %15881 = vmatprep.mubr.msk.bf16.mxu0 %vm388_vm1, %v9339_v59 }
 0x66a   : > { %15848 = vmatmul.mubr.msk.bf16.gmra.mxu1 %vm388_vm1, %v20194_v20 }
 0x66b   : > { %15882 = vmatmul.mubr.msk.bf16.gmra.mxu0 %vm388_vm1, %v9340_v4  ;;  %15851 = vmatprep.mubr.msk.bf16.mxu1 %vm388_vm1, %v20206_v13  ;;  %v11149_v4 = vsel %vm3355_vm5, %v11083_v39, 0 }
 0x66c   : > { %15885 = vmatprep.mubr.msk.bf16.mxu0 %vm388_vm1, %v9341_v16  ;;  %v20380_v16 = vld [vmem:[%s21563_s8] ss:$0 sm:$0xff] }
 0x672   : > { %15852 = vmatmul.mubr.msk.bf16.gmra.mxu1 %vm388_vm1, %v20365_v50 }
 0x673   : > { %15886 = vmatmul.mubr.msk.bf16.gmra.mxu0 %vm388_vm1, %v20367_v37  ;;  %15891 = vmatprep.mubr.msk.bf16.mxu1 %vm388_vm1, %v19853_v46 }
 0x674   : > { %15925 = vmatprep.mubr.msk.bf16.mxu0 %vm388_vm1, %v19868_v8 }
 0x677   : > { %v15689_v59 = vpop.f32.mrf.mxu1 }
 0x678   : > { %v15723_v29 = vpop.f32.mrf.mxu0  ;;  %v8970_v46 = vadd.f32 %v15689_v59, %v20380_v16 }
 0x679   : > { %v8841_v8 = vpop.f32.mrf.mxu1 }
 0x67a   : > { %15892 = vmatmul.mubr.msk.bf16.vlgmr.msra.gmra.mxu1 %vm388_vm1, %v19924_v40  ;;  %v9134_v32 = vpop.f32.mrf.mxu0  ;;  %v20392_v34 = vadd.f32 %v15723_v29, %v8970_v46  ;;  %v8968_v58 = vadd.f32 %v20380_v16, %v8841_v8 }
 0x67b   : > { %15926 = vmatmul.mubr.msk.bf16.vlgmr.msra.gmra.mxu0 %vm388_vm1, %v19926_v26  ;;  %15958 = vmatpush3.bf16.msra.mxu1 %v11149_v4  ;;  %v15690_v1 = vpop.f32.mrf.mxu1 }
 0x67c   : > { %15895 = vmatprep.mubr.msk.bf16.mxu1 %vm388_vm1, %v19933_v0  ;;  %15929 = vmatprep.mubr.msk.bf16.mxu0 %vm388_vm1, %v19935_v22  ;;  %v15724_v40 = vpop.f32.mrf.mxu0  ;;  %v20395_v43 = vadd.f32 %v9134_v32, %v8968_v58  ;;  %v8971_v26 = vadd.f32 %v15690_v1, %v20380_v16 }
 0x67d   : > { %v8844_v45 = vpop.f32.mrf.mxu1 }
 0x67e   : > { %v9137_v23 = vpop.f32.mrf.mxu0  ;;  %v20398_v48 = vadd.f32 %v15724_v40, %v8971_v26  ;;  %v8969_v0 = vadd.f32 %v20380_v16, %v8844_v45 }
 0x680   : > { %v20405_v56 = vadd.f32 %v9137_v23, %v8969_v0 }
 0x681   : > { %v15693_v6 = vpop.f32.mrf.mxu1  ;;  %v15727_v22 = vpop.f32.mrf.mxu0 }
 0x682   : > { %15896 = vmatmul.mubr.msk.bf16.gmra.mxu1 %vm388_vm1, %v19989_v44  ;;  %v8974_v49 = vadd.f32 %v15693_v6, %v20380_v16 }
 0x683   : > { %15930 = vmatmul.mubr.msk.bf16.gmra.mxu0 %vm388_vm1, %v19991_v25  ;;  %15899 = vmatprep.mubr.msk.bf16.mxu1 %vm388_vm1, %v19998_v15  ;;  %v8857_v5 = vpop.f32.mrf.mxu1  ;;  %v9150_v52 = vpop.f32.mrf.mxu0 }
 0x684   : > { %15933 = vmatprep.mubr.msk.bf16.mxu0 %vm388_vm1, %v20000_v60  ;;  %v20412_v39 = vadd.f32 %v15727_v22, %v8974_v49  ;;  %v8972_v27 = vadd.f32 %v20380_v16, %v8857_v5 }
 0x685   : > { %v15694_v44 = vpop.f32.mrf.mxu1  ;;  %v15728_v38 = vpop.f32.mrf.mxu0 }
 0x686   : > { %v20415_v10 = vadd.f32 %v9150_v52, %v8972_v27  ;;  %v8975_v25 = vadd.f32 %v15694_v44, %v20380_v16 }
 0x687   : > { %v8860_v7 = vpop.f32.mrf.mxu1  ;;  %v9153_v4 = vpop.f32.mrf.mxu0 }
 0x688   : > { %v20418_v59 = vadd.f32 %v15728_v38, %v8975_v25  ;;  %v8973_v15 = vadd.f32 %v20380_v16, %v8860_v7 }
 0x689   : > { %v15697_v29 = vpop.f32.mrf.mxu1 }
 0x68a   : > { %v15731_v60 = vpop.f32.mrf.mxu0  ;;  %15900 = vmatmul.mubr.msk.bf16.gmra.mxu1 %vm388_vm1, %v20050_v51  ;;  %v20425_v46 = vadd.f32 %v9153_v4, %v8973_v15  ;;  %v8978_v8 = vadd.f32 %v15697_v29, %v20380_v16 }
 0x68b   : > { %15934 = vmatmul.mubr.msk.bf16.gmra.mxu0 %vm388_vm1, %v20052_v57  ;;  %15903 = vmatprep.mubr.msk.bf16.mxu1 %vm388_vm1, %v20057_v17  ;;  %v8873_v32 = vpop.f32.mrf.mxu1 }
 0x68c   : > { %15937 = vmatprep.mubr.msk.bf16.mxu0 %vm388_vm1, %v20059_v53  ;;  %v9166_v58 = vpop.f32.mrf.mxu0  ;;  %v20432_v1 = vadd.f32 %v15731_v60, %v8978_v8  ;;  %v8976_v40 = vadd.f32 %v20380_v16, %v8873_v32 }
 0x68d   : > { %v15698_v51 = vpop.f32.mrf.mxu1 }
 0x68e   : > { %v15732_v26 = vpop.f32.mrf.mxu0  ;;  %v20435_v45 = vadd.f32 %v9166_v58, %v8976_v40  ;;  %v8979_v57 = vadd.f32 %v15698_v51, %v20380_v16 }
 0x68f   : > { %v8876_v23 = vpop.f32.mrf.mxu1 }
 0x690   : > { %v9169_v0 = vpop.f32.mrf.mxu0  ;;  %v20438_v6 = vadd.f32 %v15732_v26, %v8979_v57  ;;  %v8977_v17 = vadd.f32 %v20380_v16, %v8876_v23 }
 0x691   : > { %v15701_v22 = vpop.f32.mrf.mxu1 }
 0x692   : > { %15904 = vmatmul.mubr.msk.bf16.gmra.mxu1 %vm388_vm1, %v20107_v55  ;;  %v20445_v49 = vadd.f32 %v9169_v0, %v8977_v17  ;;  %v8982_v5 = vadd.f32 %v15701_v22, %v20380_v16 }
 0x693   : > { %v15735_v53 = vpop.f32.mrf.mxu0  ;;  %15938 = vmatmul.mubr.msk.bf16.gmra.mxu0 %vm388_vm1, %v20109_v9  ;;  %15907 = vmatprep.mubr.msk.bf16.mxu1 %vm388_vm1, %v20113_v24  ;;  %v8889_v52 = vpop.f32.mrf.mxu1 }
 0x694   : > { %15941 = vmatprep.mubr.msk.bf16.mxu0 %vm388_vm1, %v20115_v35  ;;  %v20452_v44 = vadd.f32 %v15735_v53, %v8982_v5  ;;  %v8980_v38 = vadd.f32 %v20380_v16, %v8889_v52 }
 0x695   : > { %v9182_v27 = vpop.f32.mrf.mxu0  ;;  %v15702_v55 = vpop.f32.mrf.mxu1 }
 0x696   : > { %v20455_v7 = vadd.f32 %v9182_v27, %v8980_v38  ;;  %v8983_v9 = vadd.f32 %v15702_v55, %v20380_v16 }
 0x697   : > { %v15736_v25 = vpop.f32.mrf.mxu0  ;;  %v8892_v4 = vpop.f32.mrf.mxu1 }
 0x698   : > { %v20458_v29 = vadd.f32 %v15736_v25, %v8983_v9  ;;  %v8981_v24 = vadd.f32 %v20380_v16, %v8892_v4 }
 0x699   : > { %v9185_v15 = vpop.f32.mrf.mxu0 }
 0x69a   : > { %v15705_v60 = vpop.f32.mrf.mxu1  ;;  %15908 = vmatmul.mubr.msk.bf16.gmra.mxu1 %vm388_vm1, %v20153_v2  ;;  %v20465_v8 = vadd.f32 %v9185_v15, %v8981_v24 }
 0x69b   : > { %v15739_v35 = vpop.f32.mrf.mxu0  ;;  %15942 = vmatmul.mubr.msk.bf16.gmra.mxu0 %vm388_vm1, %v20155_v11  ;;  %v8986_v32 = vadd.f32 %v15705_v60, %v20380_v16  ;;  %15911 = vmatprep.mubr.msk.bf16.mxu1 %vm388_vm1, %v20157_v36  ;;  %v10495_v60 = vld [vmem:[#allocation2 + $0x198] sm:$0xff] }
 0x69c   : > { %15945 = vmatprep.mubr.msk.bf16.mxu0 %vm388_vm1, %v20159_v63  ;;  %v8905_v58 = vpop.f32.mrf.mxu1 }
 0x69d   : > { %v9198_v40 = vpop.f32.mrf.mxu0  ;;  %v20472_v51 = vadd.f32 %v15739_v35, %v8986_v32  ;;  %v8984_v26 = vadd.f32 %v20380_v16, %v8905_v58  ;;  %v10496_v32 = vld [vmem:[#allocation2 + $0x1a0] sm:$0xff] }
 0x69e   : > { %v15706_v2 = vpop.f32.mrf.mxu1  ;;  %v10788_v58 = vld [vmem:[#allocation2 + $0x199] sm:$0xff] }
 0x69f   : > { %v15740_v57 = vpop.f32.mrf.mxu0  ;;  %v20475_v23 = vadd.f32 %v9198_v40, %v8984_v26  ;;  %v8987_v11 = vadd.f32 %v15706_v2, %v20380_v16  ;;  %v10789_v40 = vld [vmem:[#allocation2 + $0x1a1] sm:$0xff] }
 0x6a0   : > { %v20478_v0 = vpop.f32.mrf.mxu1 }
 0x6a1   : > { %v20480_v17 = vpop.f32.mrf.mxu0  ;;  %v20482_v36 = vadd.f32 %v15740_v57, %v8987_v11 }
 0x6a2   : > { %v15709_v22 = vpop.f32.mrf.mxu1  ;;  %15912 = vmatmul.mubr.msk.bf16.gmra.mxu1 %vm388_vm1, %v20188_v41 }
 0x6a3   : > { %v15743_v63 = vpop.f32.mrf.mxu0  ;;  %15946 = vmatmul.mubr.msk.bf16.gmra.mxu0 %vm388_vm1, %v20190_v61  ;;  %v8990_v53 = vadd.f32 %v15709_v22, %v20380_v16  ;;  %15915 = vmatprep.mubr.msk.bf16.mxu1 %vm388_vm1, %v20192_v30  ;;  %v10513_v22 = vpack.c.bf16 %v10496_v32, %v10495_v60  ;;  %v11054_v32 = vld [vmem:[#allocation2 + $0x52] sm:$0xff] }
 0x6a4   : > { %15949 = vmatprep.mubr.msk.bf16.mxu0 %vm388_vm1, %v20194_v20  ;;  %v8921_v5 = vpop.f32.mrf.mxu1 }
 0x6a5   : > { %v9214_v52 = vpop.f32.mrf.mxu0  ;;  %v20493_v27 = vadd.f32 %v15743_v63, %v8990_v53  ;;  %v8988_v38 = vadd.f32 %v20380_v16, %v8921_v5  ;;  %v10806_v63 = vpack.c.bf16 %v10789_v40, %v10788_v58 }
 0x6a6   : > { %v15710_v55 = vpop.f32.mrf.mxu1 }
 0x6a7   : > { %v15744_v25 = vpop.f32.mrf.mxu0  ;;  %v20496_v41 = vadd.f32 %v9214_v52, %v8988_v38  ;;  %v8991_v61 = vadd.f32 %v15710_v55, %v20380_v16 }
 0x6a8   : > { %v8924_v9 = vpop.f32.mrf.mxu1 }
 0x6a9   : > { %v20499_v4 = vpop.f32.mrf.mxu0  ;;  %v20501_v15 = vadd.f32 %v15744_v25, %v8991_v61  ;;  %v20504_v30 = vadd.f32 %v20380_v16, %v8924_v9 }
 0x6aa   : > { %v15713_v20 = vpop.f32.mrf.mxu1  ;;  %15916 = vmatmul.mubr.msk.bf16.gmra.mxu1 %vm388_vm1, %v20204_v12 }
 0x6ab   : > { %v15747_v24 = vpop.f32.mrf.mxu0  ;;  %15950 = vmatmul.mubr.msk.bf16.gmra.mxu0 %vm388_vm1, %v20206_v13  ;;  %v8994_v35 = vadd.f32 %v15713_v20, %v20380_v16  ;;  %15919 = vmatprep.mubr.msk.bf16.mxu1 %vm388_vm1, %v20299_v19 }
 0x6ac   : > { %15953 = vmatprep.mubr.msk.bf16.mxu0 %vm388_vm1, %v20365_v50  ;;  %v8937_v26 = vpop.f32.mrf.mxu1 }
 0x6ad   : > { %v9230_v2 = vpop.f32.mrf.mxu0  ;;  %v20515_v57 = vadd.f32 %v15747_v24, %v8994_v35  ;;  %v8992_v12 = vadd.f32 %v20380_v16, %v8937_v26  ;;  %v11053_v35 = vld [vmem:[#allocation2 + $0x4a] sm:$0xff] }
 0x6ae   : > { %v15714_v11 = vpop.f32.mrf.mxu1 }
 0x6af   : > { %v15748_v13 = vpop.f32.mrf.mxu0  ;;  %v20518_v53 = vadd.f32 %v9230_v2, %v8992_v12  ;;  %v8995_v19 = vadd.f32 %v15714_v11, %v20380_v16 }
 0x6b0   : > { %v8940_v5 = vpop.f32.mrf.mxu1 }
 0x6b1   : > { %v20521_v52 = vpop.f32.mrf.mxu0  ;;  %v20523_v50 = vadd.f32 %v15748_v13, %v8995_v19  ;;  %v20526_v38 = vadd.f32 %v20380_v16, %v8940_v5  ;;  %v11085_v13 = vpack.c.bf16 %v11054_v32, %v11053_v35 }
 0x6b2   : > { %v15717_v55 = vpop.f32.mrf.mxu1  ;;  %15920 = vmatmul.mubr.msk.bf16.gmra.mxu1 %vm388_vm1, %v10513_v22 }
 0x6b3   : > { %v15751_v25 = vpop.f32.mrf.mxu0  ;;  %15954 = vmatmul.mubr.msk.bf16.gmra.mxu0 %vm388_vm1, %v10806_v63  ;;  %v8998_v61 = vadd.f32 %v15717_v55, %v20380_v16  ;;  %15959 = vmatprep.mubr.msk.bf16.mxu1 %vm388_vm1, %v20219_v28 }
 0x6b4   : > { %v8953_v9 = vpop.f32.mrf.mxu1 }
 0x6b5   : > { %v9246_v20 = vpop.f32.mrf.mxu0  ;;  %v20533_v24 = vadd.f32 %v15751_v25, %v8998_v61  ;;  %v8996_v60 = vadd.f32 %v20380_v16, %v8953_v9 }
 0x6b6   : > { %v15718_v58 = vpop.f32.mrf.mxu1 }
 0x6b7   : > { %v15752_v40 = vpop.f32.mrf.mxu0  ;;  %v20536_v26 = vadd.f32 %v9246_v20, %v8996_v60  ;;  %v8999_v2 = vadd.f32 %v15718_v58, %v20380_v16  ;;  %v11057_v20 = vld [vmem:[#allocation2 + $0x7a] sm:$0xff]  ;;  %v11058_v60 = vld [vmem:[#allocation2 + $0x82] sm:$0xff]  ;;  %v11059_v58 = vld [vmem:[#allocation2 + $0x92] sm:$0xff] }
 0x6b8   : > { %v8956_v12 = vpop.f32.mrf.mxu1 }
 0x6b9   : > { %v20539_v11 = vpop.f32.mrf.mxu0  ;;  %v20541_v22 = vadd.f32 %v15752_v40, %v8999_v2  ;;  %v20544_v28 = vadd.f32 %v20380_v16, %v8956_v12  ;;  %v11060_v40 = vld [vmem:[#allocation2 + $0x9a] sm:$0xff] }
 0x6ba   : > { %v15757_v63 = vpop.f32.mrf.mxu1  ;;  %15960 = vmatmul.mubr.msk.bf16.vlgmr.msra.gmra.mxu1 %vm388_vm1, %v11085_v13 }
 0x6bb   : > { %v15791_v19 = vpop.f32.mrf.mxu0  ;;  %v9556_v5 = vadd.f32 %v15757_v63, %v20392_v34  ;;  %15963 = vmatprep.mubr.msk.bf16.mxu1 %vm388_vm1, %v20247_v54  ;;  %v11087_v54 = vpack.c.bf16 %v11058_v60, %v11057_v20  ;;  %v11061_v60 = vld [vmem:[#allocation2 + $0xaa] sm:$0xff] }
 0x6bc   : > { %v9427_v55 = vpop.f32.mrf.mxu1 }
 0x6bd   : > { %v9720_v25 = vpop.f32.mrf.mxu0  ;;  %v20550_v61 = vadd.f32 %v15791_v19, %v9556_v5  ;;  %v9554_v9 = vadd.f32 %v9427_v55, %v20395_v43  ;;  %v11088_v43 = vpack.c.bf16 %v11060_v40, %v11059_v58  ;;  %v11064_v58 = vld [vmem:[#allocation2 + $0xca] sm:$0xff] }
 0x6be   : > { %v15758_v35 = vpop.f32.mrf.mxu1 }
 0x6bf   : > { %v15792_v32 = vpop.f32.mrf.mxu0  ;;  %v20553_v2 = vadd.f32 %v9720_v25, %v9554_v9  ;;  %v9557_v12 = vadd.f32 %v15758_v35, %v20398_v48  ;;  %v11062_v35 = vld [vmem:[#allocation2 + $0xb2] sm:$0xff] }
 0x6c0   : > { %v9430_v34 = vpop.f32.mrf.mxu1 }
 0x6c1   : > { %v20556_v13 = vpop.f32.mrf.mxu0  ;;  %v20558_v63 = vadd.f32 %v15792_v32, %v9557_v12  ;;  %v20561_v19 = vadd.f32 %v9430_v34, %v20405_v56  ;;  %v11063_v12 = vld [vmem:[#allocation2 + $0xc2] sm:$0xff] }
 0x6c2   : > { %v15761_v5 = vpop.f32.mrf.mxu1  ;;  %15964 = vmatmul.mubr.msk.bf16.gmra.mxu1 %vm388_vm1, %v11087_v54 }
 0x6c3   : > { %v15795_v55 = vpop.f32.mrf.mxu0  ;;  %v9560_v3 = vadd.f32 %v15761_v5, %v20412_v39  ;;  %15967 = vmatprep.mubr.msk.bf16.mxu1 %vm388_vm1, %v11088_v43  ;;  %v11089_v43 = vpack.c.bf16 %v11062_v35, %v11061_v60  ;;  %v11065_v35 = vld [vmem:[#allocation2 + $0xda] sm:$0xff] }
 0x6c4   : > { %v9443_v25 = vpop.f32.mrf.mxu1 }
 0x6c5   : > { %v9736_v48 = vpop.f32.mrf.mxu0  ;;  %v20566_v9 = vadd.f32 %v15795_v55, %v9560_v3  ;;  %v9558_v20 = vadd.f32 %v9443_v25, %v20415_v10  ;;  %v11090_v10 = vpack.c.bf16 %v11064_v58, %v11063_v12  ;;  %v11068_v12 = vld [vmem:[#allocation2 + $0xfa] sm:$0xff] }
 0x6c6   : > { %v15762_v32 = vpop.f32.mrf.mxu1 }
 0x6c7   : > { %v15796_v56 = vpop.f32.mrf.mxu0  ;;  %v20569_v40 = vadd.f32 %v9736_v48, %v9558_v20  ;;  %v9561_v34 = vadd.f32 %v15762_v32, %v20418_v59  ;;  %v11066_v32 = vld [vmem:[#allocation2 + $0xe2] sm:$0xff] }
 0x6c8   : > { %v9446_v54 = vpop.f32.mrf.mxu1 }
 0x6c9   : > { %v20572_v39 = vpop.f32.mrf.mxu0  ;;  %v20574_v5 = vadd.f32 %v15796_v56, %v9561_v34  ;;  %v20577_v3 = vadd.f32 %v9446_v54, %v20425_v46  ;;  %v11067_v34 = vld [vmem:[#allocation2 + $0xf2] sm:$0xff] }
 0x6ca   : > { %v15765_v55 = vpop.f32.mrf.mxu1  ;;  %15968 = vmatmul.mubr.msk.bf16.gmra.mxu1 %vm388_vm1, %v11089_v43 }
 0x6cb   : > { %v15799_v25 = vpop.f32.mrf.mxu0  ;;  %v9564_v31 = vadd.f32 %v15765_v55, %v20432_v1  ;;  %15971 = vmatprep.mubr.msk.bf16.mxu1 %vm388_vm1, %v11090_v10  ;;  %v11091_v10 = vpack.c.bf16 %v11066_v32, %v11065_v35  ;;  %v11069_v32 = vld [vmem:[#allocation2 + $0x10a] sm:$0xff] }
 0x6cc   : > { %v9459_v48 = vpop.f32.mrf.mxu1 }
 0x6cd   : > { %v9752_v59 = vpop.f32.mrf.mxu0  ;;  %v20582_v20 = vadd.f32 %v15799_v25, %v9564_v31  ;;  %v9562_v60 = vadd.f32 %v9459_v48, %v20435_v45  ;;  %v11092_v45 = vpack.c.bf16 %v11068_v12, %v11067_v34  ;;  %v11072_v34 = vld [vmem:[#allocation2 + $0x12a] sm:$0xff] }
 0x6ce   : > { %v15766_v56 = vpop.f32.mrf.mxu1 }
 0x6cf   : > { %v15800_v46 = vpop.f32.mrf.mxu0  ;;  %v20585_v58 = vadd.f32 %v9752_v59, %v9562_v60  ;;  %v9565_v54 = vadd.f32 %v15766_v56, %v20438_v6  ;;  %v11070_v56 = vld [vmem:[#allocation2 + $0x112] sm:$0xff] }
 0x6d0   : > { %v9462_v43 = vpop.f32.mrf.mxu1 }
 0x6d1   : > { %v20588_v1 = vpop.f32.mrf.mxu0  ;;  %v20590_v55 = vadd.f32 %v15800_v46, %v9565_v54  ;;  %v20593_v31 = vadd.f32 %v9462_v43, %v20445_v49  ;;  %v11071_v54 = vld [vmem:[#allocation2 + $0x122] sm:$0xff] }
 0x6d2   : > { %v15769_v25 = vpop.f32.mrf.mxu1  ;;  %15972 = vmatmul.mubr.msk.bf16.gmra.mxu1 %vm388_vm1, %v11091_v10 }
 0x6d3   : > { %v15803_v48 = vpop.f32.mrf.mxu0  ;;  %v9568_v42 = vadd.f32 %v15769_v25, %v20452_v44  ;;  %15975 = vmatprep.mubr.msk.bf16.mxu1 %vm388_vm1, %v11092_v45  ;;  %v11093_v45 = vpack.c.bf16 %v11070_v56, %v11069_v32  ;;  %v11073_v56 = vld [vmem:[#allocation2 + $0x13a] sm:$0xff] }
 0x6d4   : > { %v9475_v59 = vpop.f32.mrf.mxu1 }
 0x6d5   : > { %v9768_v6 = vpop.f32.mrf.mxu0  ;;  %v20598_v60 = vadd.f32 %v15803_v48, %v9568_v42  ;;  %v9566_v35 = vadd.f32 %v9475_v59, %v20455_v7  ;;  %v11094_v7 = vpack.c.bf16 %v11072_v34, %v11071_v54  ;;  %v11076_v54 = vld [vmem:[#allocation2 + $0x15a] sm:$0xff] }
 0x6d6   : > { %v15770_v46 = vpop.f32.mrf.mxu1 }
 0x6d7   : > { %v15804_v49 = vpop.f32.mrf.mxu0  ;;  %v20601_v12 = vadd.f32 %v9768_v6, %v9566_v35  ;;  %v9569_v43 = vadd.f32 %v15770_v46, %v20458_v29  ;;  %v11074_v46 = vld [vmem:[#allocation2 + $0x142] sm:$0xff] }
 0x6d8   : > { %v9478_v10 = vpop.f32.mrf.mxu1 }
 0x6d9   : > { %v20604_v44 = vpop.f32.mrf.mxu0  ;;  %v20606_v25 = vadd.f32 %v15804_v49, %v9569_v43  ;;  %v20609_v42 = vadd.f32 %v9478_v10, %v20465_v8  ;;  %v11075_v43 = vld [vmem:[#allocation2 + $0x152] sm:$0xff] }
 0x6da   : > { %v15773_v48 = vpop.f32.mrf.mxu1  ;;  %15976 = vmatmul.mubr.msk.bf16.gmra.mxu1 %vm388_vm1, %v11093_v45 }
 0x6db   : > { %v15807_v59 = vpop.f32.mrf.mxu0  ;;  %v9572_v18 = vadd.f32 %v15773_v48, %v20472_v51  ;;  %15979 = vmatprep.mubr.msk.bf16.mxu1 %vm388_vm1, %v11094_v7  ;;  %v11095_v7 = vpack.c.bf16 %v11074_v46, %v11073_v56 }
 0x6dc   : > { %v9491_v6 = vpop.f32.mrf.mxu1 }
 0x6dd   : > { %v9784_v29 = vpop.f32.mrf.mxu0  ;;  %v20614_v35 = vadd.f32 %v15807_v59, %v9572_v18  ;;  %v9570_v32 = vadd.f32 %v9491_v6, %v20475_v23  ;;  %v11096_v18 = vpack.c.bf16 %v11076_v54, %v11075_v43 }
 0x6de   : > { %v15774_v49 = vpop.f32.mrf.mxu1 }
 0x6df   : > { %v15808_v8 = vpop.f32.mrf.mxu0  ;;  %v20617_v34 = vadd.f32 %v9784_v29, %v9570_v32  ;;  %v9573_v10 = vadd.f32 %v15774_v49, %v20482_v36  ;;  %v11077_v49 = vld [vmem:[#allocation2 + $0x16a] sm:$0xff] }
 0x6e0   : > { %v20620_v45 = vpop.f32.mrf.mxu1 }
 0x6e1   : > { %v20622_v51 = vpop.f32.mrf.mxu0  ;;  %v20624_v48 = vadd.f32 %v15808_v8, %v9573_v10 }
 0x6e2   : > { %v15777_v59 = vpop.f32.mrf.mxu1  ;;  %15980 = vmatmul.mubr.msk.bf16.gmra.mxu1 %vm388_vm1, %v11095_v7 }
 0x6e3   : > { %v15811_v23 = vpop.f32.mrf.mxu0  ;;  %v9576_v6 = vadd.f32 %v15777_v59, %v20493_v27  ;;  %15983 = vmatprep.mubr.msk.bf16.mxu1 %vm388_vm1, %v11096_v18  ;;  %v11097_v27 = vpack.c.bf16 %v11078_v21, %v11077_v49 }
 0x6e4   : > { %v9507_v29 = vpop.f32.mrf.mxu1 }
 0x6e5   : > { %v9800_v32 = vpop.f32.mrf.mxu0  ;;  %v20629_v14 = vadd.f32 %v15811_v23, %v9576_v6  ;;  %v9574_v36 = vadd.f32 %v9507_v29, %v20496_v41  ;;  %v11081_v23 = vld [vmem:[#allocation2 + $0x19a] sm:$0xff]  ;;  %v11082_v6 = vld [vmem:[#allocation2 + $0x1a2] sm:$0xff] }
 0x6e6   : > { %v15778_v56 = vpop.f32.mrf.mxu1 }
 0x6e7   : > { %v15812_v46 = vpop.f32.mrf.mxu0  ;;  %v20632_v8 = vadd.f32 %v9800_v32, %v9574_v36  ;;  %v9577_v43 = vadd.f32 %v15778_v56, %v20501_v15  ;;  %v11099_v56 = vpack.c.bf16 %v11082_v6, %v11081_v23 }
 0x6e8   : > { %v20635_v54 = vpop.f32.mrf.mxu1 }
 0x6e9   : > { %v20637_v10 = vpop.f32.mrf.mxu0  ;;  %v20639_v7 = vadd.f32 %v15812_v46, %v9577_v43  ;;  %v9286_v46 = vadd.f32 %v20521_v52, %v20526_v38 }
 0x6ea   : > { %v15781_v18 = vpop.f32.mrf.mxu1  ;;  %15984 = vmatmul.mubr.msk.bf16.gmra.mxu1 %vm388_vm1, %v11097_v27 }
 0x6eb   : > { %v15815_v59 = vpop.f32.mrf.mxu0  ;;  %v9580_v41 = vadd.f32 %v15781_v18, %v20515_v57  ;;  %15987 = vmatprep.mubr.msk.bf16.mxu1 %vm388_vm1, %v20367_v37 }
 0x6ec   : > { %v9523_v29 = vpop.f32.mrf.mxu1 }
 0x6ed   : > { %v9816_v15 = vpop.f32.mrf.mxu0  ;;  %v20645_v32 = vadd.f32 %v15815_v59, %v9580_v41  ;;  %v9578_v36 = vadd.f32 %v9523_v29, %v20518_v53 }
 0x6ee   : > { %v15782_v21 = vpop.f32.mrf.mxu1 }
 0x6ef   : > { %v15816_v49 = vpop.f32.mrf.mxu0  ;;  %v20650_v43 = vadd.f32 %v9816_v15, %v9578_v36  ;;  %v9581_v57 = vadd.f32 %v15782_v21, %v20523_v50  ;;  %v9290_v15 = vadd.f32 %v20539_v11, %v20544_v28 }
 0x6f0   : > { %v9526_v27 = vpop.f32.mrf.mxu1 }
 0x6f1   : > { %v9819_v37 = vpop.f32.mrf.mxu0  ;;  %v20653_v18 = vadd.f32 %v15816_v49, %v9581_v57  ;;  %v9579_v33 = vadd.f32 %v9526_v27, %v9286_v46 }
 0x6f2   : > { %v15785_v47 = vpop.f32.mrf.mxu1  ;;  %15988 = vmatmul.mubr.msk.bf16.gmra.mxu1 %vm388_vm1, %v11099_v56 }
 0x6f3   : > { %v15819_v59 = vpop.f32.mrf.mxu0  ;;  %v20656_v53 = vadd.f32 %v9819_v37, %v9579_v33  ;;  %v9584_v41 = vadd.f32 %v15785_v47, %v20533_v24 }
 0x6f4   : > { %v9539_v23 = vpop.f32.mrf.mxu1 }
 0x6f5   : > { %v9832_v6 = vpop.f32.mrf.mxu0  ;;  %v20659_v52 = vadd.f32 %v15819_v59, %v9584_v41  ;;  %v9582_v38 = vadd.f32 %v9539_v23, %v20536_v26 }
 0x6f6   : > { %v15786_v50 = vpop.f32.mrf.mxu1 }
 0x6f7   : > { %v15820_v29 = vpop.f32.mrf.mxu0  ;;  %v20664_v36 = vadd.f32 %v9832_v6, %v9582_v38  ;;  %v9585_v21 = vadd.f32 %v15786_v50, %v20541_v22 }
 0x6f8   : > { %v9542_v49 = vpop.f32.mrf.mxu1 }
 0x6f9   : > { %v9835_v33 = vpop.f32.mrf.mxu0  ;;  %v20667_v56 = vadd.f32 %v15820_v29, %v9585_v21  ;;  %v9583_v47 = vadd.f32 %v9542_v49, %v9290_v15 }
 0x6fa   : > { %v15825_v24 = vpop.f32.mrf.mxu1 }
 0x6fb   : > { %v20669_v46 = vpop.f32.mrf.mxu0  ;;  %v20671_v57 = vadd.f32 %v9835_v33, %v9583_v47  ;;  %v20674_v26 = vadd.f32 %v15825_v24, %v20550_v61 }
 0x6fc   : > { %v10013_v27 = vpop.f32.mrf.mxu1 }
 0x6fd   : > { %v20676_v37 = vpop.f32.mrf.mxu0  ;;  %v20679_v11 = vadd.f32 %v10013_v27, %v20553_v2 }
 0x6fe   : > { %v15826_v22 = vpop.f32.mrf.mxu1 }
 0x6ff   : > { %v20681_v28 = vpop.f32.mrf.mxu0  ;;  %v20684_v59 = vadd.f32 %v15826_v22, %v20558_v63  ;;  %v9852_v63 = vadd.f32 %v20572_v39, %v20577_v3 }
 0x700   : > { %v20686_v41 = vpop.f32.mrf.mxu1 }
 0x701   : > { %v20688_v23 = vpop.f32.mrf.mxu0 }
 0x702   : > { %22318 = vst [vmem:[#allocation81_spill] sm:$0xff] %v20688_v23  ;;  %v15829_v6 = vpop.f32.mrf.mxu1 }
 0x703   : > { %v15863_v38 = vpop.f32.mrf.mxu0  ;;  %v10146_v61 = vadd.f32 %v15829_v6, %v20566_v9 }
 0x704   : > { %v10029_v50 = vpop.f32.mrf.mxu1 }
 0x705   : > { %v10322_v29 = vpop.f32.mrf.mxu0  ;;  %v20691_v15 = vadd.f32 %v15863_v38, %v10146_v61  ;;  %v10144_v2 = vadd.f32 %v10029_v50, %v20569_v40 }
 0x706   : > { %v15830_v21 = vpop.f32.mrf.mxu1 }
 0x707   : > { %v15864_v49 = vpop.f32.mrf.mxu0  ;;  %v20696_v33 = vadd.f32 %v10322_v29, %v10144_v2  ;;  %v10147_v47 = vadd.f32 %v15830_v21, %v20574_v5  ;;  %v9856_v5 = vadd.f32 %v20588_v1, %v20593_v31  ;;  %v8985_v1 = vadd.f32 %v20380_v16, %v20478_v0 }
 0x708   : > { %v10032_v24 = vpop.f32.mrf.mxu1 }
 0x709   : > { %v10325_v27 = vpop.f32.mrf.mxu0  ;;  %v20699_v22 = vadd.f32 %v15864_v49, %v10147_v47  ;;  %v10145_v9 = vadd.f32 %v10032_v24, %v9852_v63 }
 0x70a   : > { %v15833_v6 = vpop.f32.mrf.mxu1 }
 0x70b   : > { %v15867_v62 = vpop.f32.mrf.mxu0  ;;  %v20701_v38 = vadd.f32 %v10325_v27, %v10145_v9  ;;  %v10150_v40 = vadd.f32 %v15833_v6, %v20582_v20 }
 0x70c   : > { %v10045_v61 = vpop.f32.mrf.mxu1 }
 0x70d   : > { %v10338_v50 = vpop.f32.mrf.mxu0  ;;  %v20704_v23 = vadd.f32 %v15867_v62, %v10150_v40  ;;  %v10148_v39 = vadd.f32 %v10045_v61, %v20585_v58 }
 0x70e   : > { %v15834_v3 = vpop.f32.mrf.mxu1 }
 0x70f   : > { %v15868_v29 = vpop.f32.mrf.mxu0  ;;  %v20709_v2 = vadd.f32 %v10338_v50, %v10148_v39  ;;  %v10151_v21 = vadd.f32 %v15834_v3, %v20590_v55  ;;  %v9860_v50 = vadd.f32 %v20604_v44, %v20609_v42 }
 0x710   : > { %v10048_v49 = vpop.f32.mrf.mxu1 }
 0x711   : > { %v10341_v63 = vpop.f32.mrf.mxu0  ;;  %v20712_v47 = vadd.f32 %v15868_v29, %v10151_v21  ;;  %v10149_v20 = vadd.f32 %v10048_v49, %v9856_v5  ;;  %v9278_v5 = vadd.f32 %v20480_v17, %v8985_v1 }
 0x712   : > { %v15837_v24 = vpop.f32.mrf.mxu1 }
 0x713   : > { %v15871_v27 = vpop.f32.mrf.mxu0  ;;  %v20714_v62 = vadd.f32 %v10341_v63, %v10149_v20  ;;  %v10154_v58 = vadd.f32 %v15837_v24, %v20598_v60  ;;  %v9571_v63 = vadd.f32 %v20620_v45, %v9278_v5 }
 0x714   : > { %v10061_v9 = vpop.f32.mrf.mxu1 }
 0x715   : > { %v10354_v6 = vpop.f32.mrf.mxu0  ;;  %v20719_v31 = vadd.f32 %v15871_v27, %v10154_v58  ;;  %v10152_v55 = vadd.f32 %v10061_v9, %v20601_v12  ;;  %v12447_v12 = vld [vmem:[%s21564_s9] sm:$0xf]  ;;  %v9864_v9 = vadd.f32 %v20622_v51, %v9571_v63 }
 0x716   : > { %v15838_v40 = vpop.f32.mrf.mxu1  ;;  %16120 = vmatprep.subr.msk.bf16.mxu0 %vm3355_vm5, %v12447_v12 }
 0x717   : > { %v15872_v61 = vpop.f32.mrf.mxu0  ;;  %v20724_v39 = vadd.f32 %v10354_v6, %v10152_v55  ;;  %v10155_v3 = vadd.f32 %v15838_v40, %v20606_v25 }
 0x718   : > { %v10064_v29 = vpop.f32.mrf.mxu1 }
 0x719   : > { %v10357_v60 = vpop.f32.mrf.mxu0  ;;  %v20728_v21 = vadd.f32 %v15872_v61, %v10155_v3  ;;  %v10153_v16 = vadd.f32 %v10064_v29, %v9860_v50 }
 0x71a   : > { %v15841_v0 = vpop.f32.mrf.mxu1 }
 0x71b   : > { %v15875_v49 = vpop.f32.mrf.mxu0  ;;  %v20734_v44 = vadd.f32 %v10357_v60, %v10153_v16  ;;  %v10158_v42 = vadd.f32 %v15841_v0, %v20614_v35  ;;  %v9282_v35 = vadd.f32 %v20499_v4, %v20504_v30 }
 0x71c   : > { %v10077_v25 = vpop.f32.mrf.mxu1 }
 0x71d   : > { %v10370_v20 = vpop.f32.mrf.mxu0  ;;  %v20738_v17 = vadd.f32 %v15875_v49, %v10158_v42  ;;  %v10156_v24 = vadd.f32 %v10077_v25, %v20617_v34  ;;  %v9575_v34 = vadd.f32 %v20635_v54, %v9282_v35 }
 0x71e   : > { %v15842_v27 = vpop.f32.mrf.mxu1 }
 0x71f   : > { %v15876_v58 = vpop.f32.mrf.mxu0  ;;  %v20742_v6 = vadd.f32 %v10370_v20, %v10156_v24  ;;  %v10159_v45 = vadd.f32 %v15842_v27, %v20624_v48  ;;  %v9868_v4 = vadd.f32 %v20637_v10, %v9575_v34 }
 0x720   : > { %v10080_v1 = vpop.f32.mrf.mxu1 }
 0x721   : > { %v10373_v55 = vpop.f32.mrf.mxu0  ;;  %v20747_v40 = vadd.f32 %v15876_v58, %v10159_v45  ;;  %v10157_v61 = vadd.f32 %v10080_v1, %v9864_v9 }
 0x722   : > { %v15845_v50 = vpop.f32.mrf.mxu1 }
 0x723   : > { %v15879_v3 = vpop.f32.mrf.mxu0  ;;  %v20750_v29 = vadd.f32 %v10373_v55, %v10157_v61  ;;  %v10162_v51 = vadd.f32 %v15845_v50, %v20629_v14  ;;  %v12465_v14 = vsel %vm3355_vm5, %v12447_v12, 0 }
 0x724   : > { %v10093_v60 = vpop.f32.mrf.mxu1  ;;  %15992 = vmatpush3.bf16.msra.mxu0 %v12465_v14 }
 0x725   : > { %v10386_v5 = vpop.f32.mrf.mxu0  ;;  %v20753_v16 = vadd.f32 %v15879_v3, %v10162_v51  ;;  %v10160_v48 = vadd.f32 %v10093_v60, %v20632_v8 }
 0x726   : > { %v15846_v0 = vpop.f32.mrf.mxu1 }
 0x727   : > { %v15880_v49 = vpop.f32.mrf.mxu0  ;;  %v20757_v30 = vadd.f32 %v10386_v5, %v10160_v48  ;;  %v10163_v63 = vadd.f32 %v15846_v0, %v20639_v7 }
 0x728   : > { %v10096_v42 = vpop.f32.mrf.mxu1 }
 0x729   : > { %v10389_v54 = vpop.f32.mrf.mxu0  ;;  %v20760_v25 = vadd.f32 %v15880_v49, %v10163_v63  ;;  %v10161_v20 = vadd.f32 %v10096_v42, %v9868_v4 }
 0x72a   : > { %v15849_v24 = vpop.f32.mrf.mxu1 }
 0x72b   : > { %v15883_v27 = vpop.f32.mrf.mxu0  ;;  %v20763_v58 = vadd.f32 %v10389_v54, %v10161_v20  ;;  %v10166_v8 = vadd.f32 %v15849_v24, %v20645_v32  ;;  %v12548_v20 = vld [vmem:[%s21564_s9 + $0x4] sm:$0xf] }
 0x72c   : > { %v10109_v9 = vpop.f32.mrf.mxu1  ;;  %16121 = vmatprep.subr.msk.bf16.mxu1 %vm3355_vm5, %v12548_v20 }
 0x72d   : > { %v10402_v10 = vpop.f32.mrf.mxu0  ;;  %v20766_v45 = vadd.f32 %v15883_v27, %v10166_v8  ;;  %v10164_v7 = vadd.f32 %v10109_v9, %v20650_v43 }
 0x72e   : > { %v15850_v1 = vpop.f32.mrf.mxu1 }
 0x72f   : > { %v15884_v55 = vpop.f32.mrf.mxu0  ;;  %v20769_v35 = vadd.f32 %v10402_v10, %v10164_v7  ;;  %v10167_v61 = vadd.f32 %v15850_v1, %v20653_v18 }
 0x730   : > { %v10112_v12 = vpop.f32.mrf.mxu1 }
 0x731   : > { %v10405_v50 = vpop.f32.mrf.mxu0  ;;  %v20772_v3 = vadd.f32 %v15884_v55, %v10167_v61  ;;  %v10165_v34 = vadd.f32 %v10112_v12, %v20656_v53 }
 0x732   : > { %v15853_v51 = vpop.f32.mrf.mxu1 }
 0x733   : > { %v15887_v32 = vpop.f32.mrf.mxu0  ;;  %v20775_v60 = vadd.f32 %v10405_v50, %v10165_v34  ;;  %v10170_v5 = vadd.f32 %v15853_v51, %v20659_v52 }
 0x734   : > { %v10125_v48 = vpop.f32.mrf.mxu1 }
 0x735   : > { %v10418_v43 = vpop.f32.mrf.mxu0  ;;  %v20778_v0 = vadd.f32 %v15887_v32, %v10170_v5  ;;  %v10168_v49 = vadd.f32 %v10125_v48, %v20664_v36  ;;  %v12566_v36 = vsel %vm3355_vm5, %v12548_v20, 0 }
 0x736   : > { %v15854_v4 = vpop.f32.mrf.mxu1  ;;  %16002 = vmatpush3.bf16.msra.mxu1 %v12566_v36 }
 0x737   : > { %v15888_v18 = vpop.f32.mrf.mxu0  ;;  %v20781_v63 = vadd.f32 %v10418_v43, %v10168_v49  ;;  %v10171_v42 = vadd.f32 %v15854_v4, %v20667_v56 }
 0x738   : > { %v10128_v54 = vpop.f32.mrf.mxu1 }
 0x739   : > { %v10421_v53 = vpop.f32.mrf.mxu0  ;;  %v20787_v14 = vadd.f32 %v15888_v18, %v10171_v42  ;;  %v10169_v52 = vadd.f32 %v10128_v54, %v20671_v57 }
 0x73a   : > { %v20792_v24 = vpop.f32.mrf.mxu1 }
 0x73b   : > { %v20794_v27 = vpop.f32.mrf.mxu0  ;;  %v20796_v56 = vadd.f32 %v10421_v53, %v10169_v52 }
 0x73c   : > { %v20798_v8 = vpop.f32.mrf.mxu1 }
 0x73d   : > { %v20800_v9 = vpop.f32.mrf.mxu0 }
 0x73e   : > { %v20802_v10 = vpop.f32.mrf.mxu1 }
 0x73f   : > { %v20804_v7 = vpop.f32.mrf.mxu0 }
 0x740   : > { %v20806_v57 = vpop.f32.mrf.mxu1 }
 0x741   : > { %v20808_v1 = vpop.f32.mrf.mxu0 }
 0x742   : > { %v15897_v55 = vpop.f32.mrf.mxu1 }
 0x743   : > { %v20810_v61 = vpop.f32.mrf.mxu0  ;;  %v20813_v12 = vadd.f32 %v15897_v55, %v20691_v15 }
 0x744   : > { %v10615_v50 = vpop.f32.mrf.mxu1 }
 0x745   : > { %v20815_v34 = vpop.f32.mrf.mxu0  ;;  %v20818_v51 = vadd.f32 %v10615_v50, %v20696_v33 }
 0x746   : > { %v15898_v32 = vpop.f32.mrf.mxu1 }
 0x747   : > { %v20820_v5 = vpop.f32.mrf.mxu0  ;;  %v20823_v48 = vadd.f32 %v15898_v32, %v20699_v22 }
 0x748   : > { %v10618_v43 = vpop.f32.mrf.mxu1 }
 0x749   : > { %v20825_v49 = vpop.f32.mrf.mxu0  ;;  %v20828_v4 = vadd.f32 %v10618_v43, %v20701_v38 }
 0x74a   : > { %v15901_v15 = vpop.f32.mrf.mxu1 }
 0x74b   : > { %v20830_v18 = vpop.f32.mrf.mxu0  ;;  %v20833_v42 = vadd.f32 %v15901_v15, %v20704_v23 }
 0x74c   : > { %v10631_v33 = vpop.f32.mrf.mxu1 }
 0x74d   : > { %v20835_v54 = vpop.f32.mrf.mxu0  ;;  %v20838_v53 = vadd.f32 %v10631_v33, %v20709_v2 }
 0x74e   : > { %v15902_v22 = vpop.f32.mrf.mxu1 }
 0x74f   : > { %v20840_v20 = vpop.f32.mrf.mxu0  ;;  %v20843_v52 = vadd.f32 %v15902_v22, %v20712_v47 }
 0x750   : > { %v10634_v38 = vpop.f32.mrf.mxu1 }
 0x751   : > { %v20845_v36 = vpop.f32.mrf.mxu0  ;;  %v20848_v55 = vadd.f32 %v10634_v38, %v20714_v62 }
 0x752   : > { %v15905_v23 = vpop.f32.mrf.mxu1 }
 0x753   : > { %v20850_v50 = vpop.f32.mrf.mxu0  ;;  %v20853_v32 = vadd.f32 %v15905_v23, %v20719_v31 }
 0x754   : > { %22319 = vst [vmem:[#allocation84_spill] sm:$0xff] %v20850_v50  ;;  %v10647_v2 = vpop.f32.mrf.mxu1 }
 0x755   : > { %v20855_v43 = vpop.f32.mrf.mxu0  ;;  %v20858_v15 = vadd.f32 %v10647_v2, %v20724_v39 }
 0x756   : > { %22320 = vst [vmem:[#allocation69_spill] sm:$0xff] %v20855_v43  ;;  %v15906_v47 = vpop.f32.mrf.mxu1 }
 0x757   : > { %v20860_v33 = vpop.f32.mrf.mxu0  ;;  %v20863_v22 = vadd.f32 %v15906_v47, %v20728_v21 }
 0x758   : > { %22321 = vst [vmem:[#allocation61_spill] sm:$0xff] %v20860_v33  ;;  %v10650_v62 = vpop.f32.mrf.mxu1 }
 0x759   : > { %v20865_v38 = vpop.f32.mrf.mxu0  ;;  %v20868_v50 = vadd.f32 %v10650_v62, %v20734_v44 }
 0x75a   : > { %22322 = vst [vmem:[#allocation90_spill] sm:$0xff] %v20865_v38  ;;  %v15909_v31 = vpop.f32.mrf.mxu1 }
 0x75b   : > { %v20870_v23 = vpop.f32.mrf.mxu0  ;;  %v20873_v43 = vadd.f32 %v15909_v31, %v20738_v17 }
 0x75c   : > { %22323 = vst [vmem:[#allocation21_spill] sm:$0xff] %v20870_v23  ;;  %v10663_v39 = vpop.f32.mrf.mxu1 }
 0x75d   : > { %v20875_v2 = vpop.f32.mrf.mxu0  ;;  %v20878_v33 = vadd.f32 %v10663_v39, %v20742_v6 }
 0x75e   : > { %22324 = vst [vmem:[#allocation42_spill] sm:$0xff] %v20875_v2  ;;  %v15910_v21 = vpop.f32.mrf.mxu1 }
 0x75f   : > { %v20880_v47 = vpop.f32.mrf.mxu0  ;;  %v20883_v38 = vadd.f32 %v15910_v21, %v20747_v40 }
 0x760   : > { %22325 = vst [vmem:[#allocation6_spill] sm:$0xff] %v20880_v47  ;;  %v10666_v44 = vpop.f32.mrf.mxu1 }
 0x761   : > { %v20885_v62 = vpop.f32.mrf.mxu0  ;;  %v20888_v23 = vadd.f32 %v10666_v44, %v20750_v29 }
 0x762   : > { %22326 = vst [vmem:[#allocation46_spill] sm:$0xff] %v20885_v62  ;;  %v15913_v17 = vpop.f32.mrf.mxu1 }
 0x763   : > { %v20890_v31 = vpop.f32.mrf.mxu0  ;;  %v20893_v2 = vadd.f32 %v15913_v17, %v20753_v16 }
 0x764   : > { %22327 = vst [vmem:[#allocation29_spill] sm:$0xff] %v20890_v31  ;;  %v10679_v6 = vpop.f32.mrf.mxu1 }
 0x765   : > { %22328 = vst [vmem:[#allocation101_spill] sm:$0xff] %v20893_v2  ;;  %v20895_v39 = vpop.f32.mrf.mxu0  ;;  %v20898_v47 = vadd.f32 %v10679_v6, %v20757_v30 }
 0x766   : > { %22329 = vst [vmem:[#allocation105_spill] sm:$0xff] %v20895_v39  ;;  %v15914_v40 = vpop.f32.mrf.mxu1 }
 0x767   : > { %v20900_v21 = vpop.f32.mrf.mxu0  ;;  %v20903_v62 = vadd.f32 %v15914_v40, %v20760_v25  ;;  %v9848_v25 = vadd.f32 %v20556_v13, %v20561_v19  ;;  %v10433_v19 = vadd.f32 %v20676_v37, %v20679_v11 }
 0x768   : > { %v10682_v29 = vpop.f32.mrf.mxu1 }
 0x769   : > { %v20906_v44 = vadd.f32 %v10682_v29, %v20763_v58  ;;  %v20908_v31 = vpop.f32.mrf.mxu0  ;;  %v10141_v29 = vadd.f32 %v20686_v41, %v9848_v25  ;;  %v10436_v41 = vadd.f32 %v20681_v28, %v20684_v59 }
 0x76a   : > { %22330 = vst [vmem:[#allocation76_spill] sm:$0xff] %v20908_v31  ;;  %v15917_v16 = vpop.f32.mrf.mxu1 }
 0x76b   : > { %v20911_v17 = vadd.f32 %v15917_v16, %v20766_v45  ;;  %v20913_v2 = vpop.f32.mrf.mxu0  ;;  %v10729_v37 = vadd.f32 %v20802_v10, %v10436_v41  ;;  %v11023_v41 = vadd.f32 %v20815_v34, %v20818_v51 }
 0x76c   : > { %v10695_v39 = vpop.f32.mrf.mxu1  ;;  %22332 = vst [vmem:[#allocation86_spill] sm:$0xff] %v20913_v2  ;;  %v16155_v2 = vmov 1983009808  }
 0x76d   : > { %22331 = vst [vmem:[#allocation8_spill] sm:$0xff] %v20911_v17  ;;  %v20916_v30 = vadd.f32 %v10695_v39, %v20769_v35  ;;  %v20924_v31 = vpop.f32.mrf.mxu0  ;;  %v11442_v17 = vunpack.c.l.s4 %v16155_v2  ;;  %v11444_v35 = vlaneseq  ;;  %v10435_v39 = vadd.f32 %v20669_v46, %v20674_v26 }
 0x76e   : > { %v15918_v6 = vpop.f32.mrf.mxu1  ;;  %v10726_v46 = vadd.f32 %v20798_v8, %v10433_v19 }
 0x76f   : > { %v20921_v40 = vadd.f32 %v15918_v6, %v20772_v3  ;;  %v22333_v6 = vld [vmem:[#allocation81_spill] sm:$0xff]  ;;  %v10728_v25 = vadd.f32 %v20792_v24, %v10435_v39  ;;  %v20954_v24 = vld [vmem:[%s21564_s9 + $0x8] sm:$0xf]  ;;  %v11022_v39 = vadd.f32 %v20804_v7, %v10729_v37  ;;  %v20988_v7 = vadd.f32 %v20830_v18, %v20833_v42 }
 0x770   : > { %v10698_v58 = vpop.f32.mrf.mxu1  ;;  %16122 = vmatprep.subr.msk.bf16.mxu0 %vm3355_vm5, %v20954_v24  ;;  %v22336_v42 = vld [vmem:[#allocation61_spill] sm:$0xff] }
 0x771   : > { %v20927_v45 = vadd.f32 %v10698_v58, %v20775_v60  ;;  %v10434_v60 = vadd.f32 %v22333_v6, %v10141_v29  ;;  %v20940_v58 = vpop.f32.mrf.mxu0  ;;  %v11021_v8 = vadd.f32 %v20794_v27, %v10728_v25  ;;  %v20984_v6 = vadd.f32 %v20825_v49, %v20828_v4  ;;  %v22335_v4 = vld [vmem:[#allocation69_spill] sm:$0xff] }
 0x772   : > { %v15921_v16 = vpop.f32.mrf.mxu1  ;;  %v21008_v18 = vadd.f32 %v22335_v4, %v20858_v15  ;;  %v22343_v37 = vld [vmem:[#allocation29_spill] sm:$0xff] }
 0x773   : > { %v20932_v13 = vadd.f32 %v15921_v16, %v20778_v0  ;;  %v11443_v0 = vunpack.c.0.s8 %v11442_v17  ;;  %v11445_v16 = vshrl.u32 %v11444_v35, 7  ;;  %v10727_v11 = vadd.f32 %v20806_v57, %v10434_v60  ;;  %v10991_v17 = vpop.f32.mrf.mxu0 }
 0x774   : > { %v10711_v3 = vpop.f32.mrf.mxu1 }
 0x775   : > { %v20943_v2 = vadd.f32 %v10711_v3, %v20781_v63  ;;  %v20959_v63 = vld [vmem:[%s21564_s9 + $0xc] sm:$0xf]  ;;  %v20970_v29 = vsub.s32 %v11443_v0, %v11445_v16  ;;  %v20972_v35 = vsub.s32 0, %v11445_v16  ;;  %v11020_v27 = vadd.f32 %v20808_v1, %v10727_v11  ;;  %v15955_v19 = vpop.f32.mrf.mxu0  ;;  %v22341_v0 = vld [vmem:[#allocation46_spill] sm:$0xff] }
 0x776   : > { %v15922_v26 = vpop.f32.mrf.mxu1  ;;  %16123 = vmatprep.subr.msk.bf16.mxu1 %vm3355_vm5, %v20959_v63  ;;  %v21032_v16 = vadd.f32 %v22341_v0, %v20888_v23  ;;  %v21048_v23 = vadd.f32 %v20900_v21, %v20903_v62  ;;  %v21064_v62 = vadd.f32 %v20940_v58, %v20921_v40  ;;  %v21067_v21 = vadd.f32 %v10991_v17, %v20927_v45 }
 0x777   : > { %v20949_v28 = vadd.f32 %v15922_v26, %v20787_v14  ;;  %v11019_v14 = vadd.f32 %v20800_v9, %v10726_v46  ;;  %v11026_v9 = vadd.f32 %v20820_v5, %v20823_v48  ;;  %v21000_v5 = vadd.f32 %v20845_v36, %v20848_v55  ;;  %v22334_v48 = vld [vmem:[#allocation84_spill] sm:$0xff]  ;;  %v22338_v36 = vld [vmem:[#allocation21_spill] sm:$0xff]  ;;  %v11004_v60 = vpop.f32.mrf.mxu0  ;;  %v22339_v46 = vld [vmem:[#allocation42_spill] sm:$0xff] }
 0x778   : > { %v10714_v59 = vpop.f32.mrf.mxu1  ;;  %v21004_v49 = vadd.f32 %v22334_v48, %v20853_v32  ;;  %v21020_v55 = vadd.f32 %v22338_v36, %v20873_v43  ;;  %v21024_v15 = vadd.f32 %v22339_v46, %v20878_v33  ;;  %v22340_v26 = vld [vmem:[#allocation6_spill] sm:$0xff]  ;;  %v22349_v48 = vld [vmem:[#allocation76_spill] sm:$0xff]  ;;  %v22352_v46 = vld [vmem:[#allocation79_spill] sm:$0xff]  ;;  %v21078_v58 = vadd.f32 %v11004_v60, %v20943_v2 }
 0x779   : > { %v20963_v10 = vadd.f32 %v10714_v59, %v20796_v56  ;;  %v11025_v56 = vadd.f32 %v20810_v61, %v20813_v12  ;;  %v20992_v61 = vadd.f32 %v20835_v54, %v20838_v53  ;;  %v20996_v12 = vadd.f32 %v20840_v20, %v20843_v52  ;;  %v22337_v20 = vld [vmem:[#allocation90_spill] sm:$0xff]  ;;  %v22344_v59 = vld [vmem:[#allocation68_spill] sm:$0xff]  ;;  %v15956_v36 = vpop.f32.mrf.mxu0 }
 0x77a   : > { %v15961_v57 = vpop.f32.mrf.mxu1  ;;  %v21012_v54 = vadd.f32 %v22336_v42, %v20863_v22  ;;  %v21016_v52 = vadd.f32 %v22337_v20, %v20868_v50  ;;  %v21028_v22 = vadd.f32 %v22340_v26, %v20883_v38  ;;  %v22342_v50 = vld [vmem:[#allocation101_spill] sm:$0xff]  ;;  %v21052_v4 = vadd.f32 %v22349_v48, %v20906_v44  ;;  %v22350_v42 = vld [vmem:[#allocation8_spill] sm:$0xff] }
 0x77b   : > { %v11314_v3 = vadd.f32 %v15961_v57, %v11021_v8  ;;  %v21036_v11 = vadd.f32 %v22343_v37, %v22342_v50  ;;  %v22345_v8 = vmax.f32 %v22344_v59, 0.0  ;;  %v22346_v57 = vld [vmem:[#allocation11_spill] sm:$0xff]  ;;  %v22348_v38 = vld [vmem:[#allocation105_spill] sm:$0xff]  ;;  %v21070_v44 = vadd.f32 %v15955_v19, %v20932_v13 }
 0x77c   : > { %v11185_v1 = vpop.f32.mrf.mxu1  ;;  %v22353_v26 = vmax.f32 %v22352_v46, 0.0  ;;  %v21081_v45 = vadd.f32 %v15956_v36, %v20949_v28  ;;  %v21085_v19 = vsel %vm3355_vm5, %v20954_v24, 0 }
 0x77d   : > { %v11346_v34 = vmax.f32 %v11314_v3, 0.0  ;;  %v11312_v51 = vadd.f32 %v11185_v1, %v11019_v14 }
 0x77e   : > { %v15962_v53 = vpop.f32.mrf.mxu1 }
 0x77f   : > { %v11344_v32 = vmax.f32 %v11312_v51, 0.0  ;;  %v11315_v25 = vadd.f32 %v15962_v53, %v11022_v39  ;;  %v11378_v14 = vadd.f32 %v11346_v34, %v22345_v8  ;;  %v22347_v39 = vmax.f32 %v22346_v57, 0.0  ;;  %v22351_v53 = vld [vmem:[#allocation86_spill] sm:$0xff] }
 0x780   : > { %v11188_v43 = vpop.f32.mrf.mxu1  ;;  %v21044_v51 = vadd.f32 %v22348_v38, %v20898_v47  ;;  %v21056_v34 = vadd.f32 %v22351_v53, %v22350_v42 }
 0x781   : > { %v11376_v33 = vadd.f32 %v11344_v32, %v22347_v39  ;;  %v11347_v3 = vmax.f32 %v11315_v25, 0.0  ;;  %v11313_v1 = vadd.f32 %v11188_v43, %v11020_v27  ;;  %v21060_v27 = vadd.f32 %v20924_v31, %v20916_v30  ;;  %v22356_v39 = vld [vmem:[#allocation5_spill] sm:$0xff] }
 0x782   : > { %v15965_v20 = vpop.f32.mrf.mxu1 }
 0x783   : > { %v11408_v47 = vmax.f32 %v11376_v33, %v11378_v14  ;;  %v11345_v32 = vmax.f32 %v11313_v1, 0.0  ;;  %v11318_v25 = vadd.f32 %v15965_v20, %v11025_v56  ;;  %v11379_v0 = vadd.f32 %v11347_v3, %v22353_v26  ;;  %v22354_v56 = vld [vmem:[#allocation110_spill] sm:$0xff]  ;;  %v22358_v20 = vld [vmem:[#allocation80_spill] sm:$0xff] }
 0x784   : > { %v11201_v31 = vpop.f32.mrf.mxu1  ;;  %v22355_v37 = vmax.f32 %v22354_v56, 0.0  ;;  %v22357_v33 = vmax.f32 %v22356_v39, 0.0  ;;  %v22359_v36 = vmax.f32 %v22358_v20, 0.0 }
 0x785   : > { %v11440_v30 = vcombine.high %v11408_v47, %v11408_v47  ;;  %v11447_v50 = vrot.slane %v11408_v47, %v20970_v29  ;;  %v11350_v40 = vmax.f32 %v11318_v25, 0.0  ;;  %v11316_v13 = vadd.f32 %v11201_v31, %v11023_v41 }
 0x786   : > { %v11377_v43 = vadd.f32 %v11345_v32, %v22355_v37  ;;  %v15966_v17 = vpop.f32.mrf.mxu1  ;;  %v21092_v41 = vsel %vm3355_vm5, %v20959_v63, 0 }
 0x787   : > { %v11454_v59 = vrot.slane %v11440_v30, %v20970_v29  ;;  %v11455_v8 = vcombine.high %v11447_v50, %v11447_v50  ;;  %v14005_v14 = vrot.slane %v11447_v50, 9  ;;  %v11382_v2 = vadd.f32 %v11350_v40, %v22357_v33 }
 0x788   : > { %v11409_v57 = vmax.f32 %v11377_v43, %v11379_v0  ;;  %v11348_v60 = vmax.f32 %v11316_v13, 0.0  ;;  %v11319_v3 = vadd.f32 %v15966_v17, %v11026_v9  ;;  %v11204_v28 = vpop.f32.mrf.mxu1  ;;  %v22360_v13 = vld [vmem:[#allocation56_spill] sm:$0xff] }
 0x789   : > { %v11456_v1 = vcombine.high %v11454_v59, %v11454_v59  ;;  %v14006_v38 = vrot.slane %v11455_v8, 9  ;;  %v14007_v24 = vrot.slane %v11454_v59, 9  ;;  %v11968_v48 = vmax.f32 %v11447_v50, %v14005_v14 }
 0x78a   : > { %v11457_v42 = vcombine.high %v11409_v57, %v11409_v57  ;;  %v11464_v53 = vrot.slane %v11409_v57, %v20970_v29  ;;  %v11380_v47 = vadd.f32 %v11348_v60, %v22359_v36  ;;  %v11351_v32 = vmax.f32 %v11319_v3, 0.0  ;;  %v15969_v25 = vpop.f32.mrf.mxu1 }
 0x78b   : > { %v14008_v9 = vrot.slane %v11456_v1, 9  ;;  %v11969_v46 = vmax.f32 %v11455_v8, %v14006_v38  ;;  %v11970_v26 = vmax.f32 %v11454_v59, %v14007_v24  ;;  %v12099_v63 = vrot.slane %v11968_v48, %v20972_v35 }
 0x78c   : > { %v11471_v0 = vrot.slane %v11457_v42, %v20970_v29  ;;  %v11472_v31 = vcombine.high %v11464_v53, %v11464_v53  ;;  %v14009_v30 = vrot.slane %v11464_v53, 9  ;;  %v11410_v50 = vmax.f32 %v11380_v47, %v11382_v2  ;;  %v11217_v56 = vpop.f32.mrf.mxu1 }
 0x78d   : > { %v11971_v37 = vmax.f32 %v11456_v1, %v14008_v9  ;;  %v12103_v43 = vrot.slane %v11969_v46, %v20972_v35  ;;  %v12107_v40 = vrot.slane %v11970_v26, %v20972_v35  ;;  %v22361_v17 = vmax.f32 %v22360_v13, 0.0 }
 0x78e   : > { %v11473_v57 = vcombine.high %v11471_v0, %v11471_v0  ;;  %v14010_v8 = vrot.slane %v11472_v31, 9  ;;  %v14011_v59 = vrot.slane %v11471_v0, 9  ;;  %v11972_v39 = vmax.f32 %v11464_v53, %v14009_v30  ;;  %v15970_v33 = vpop.f32.mrf.mxu1 }
 0x78f   : > { %v11383_v14 = vadd.f32 %v11351_v32, %v22361_v17  ;;  %v12111_v60 = vrot.slane %v11971_v37, %v20972_v35  ;;  %v12353_v3 = vsel %vm12352_vm6, %v12103_v43, %v12099_v63  ;;  %v11474_v38 = vcombine.high %v11410_v50, %v11410_v50 }
 0x790   : > { %v11481_v2 = vrot.slane %v11410_v50, %v20970_v29  ;;  %v12355_v1 = vsel %vm12354_vm7, %v12107_v40, %v12353_v3  ;;  %v14012_v24 = vrot.slane %v11473_v57, 9  ;;  %v11973_v48 = vmax.f32 %v11472_v31, %v14010_v8  ;;  %v11220_v20 = vpop.f32.mrf.mxu1 }
 0x791   : > { %v11974_v42 = vmax.f32 %v11471_v0, %v14011_v59  ;;  %v12115_v36 = vrot.slane %v11972_v39, %v20972_v35  ;;  %v12357_v47 = vsel %vm12356_vm8, %v12111_v60, %v12355_v1  ;;  %v11488_v53 = vrot.slane %v11474_v38, %v20970_v29 }
 0x792   : > { %v11489_v32 = vcombine.high %v11481_v2, %v11481_v2  ;;  %v11975_v9 = vmax.f32 %v11473_v57, %v14012_v24  ;;  %v12119_v46 = vrot.slane %v11973_v48, %v20972_v35  ;;  %v14013_v63 = vrot.slane %v11481_v2, 9  ;;  %v15973_v30 = vpop.f32.mrf.mxu1 }
 0x793   : > { %v12123_v26 = vrot.slane %v11974_v42, %v20972_v35  ;;  %v12359_v50 = vsel %vm12358_vm9, %v12115_v36, %v12357_v47  ;;  %v11490_v37 = vcombine.high %v11488_v53, %v11488_v53  ;;  %v14015_v0 = vrot.slane %v11488_v53, 9  ;;  %v22362_v36 = vld [vmem:[#allocation45_spill] sm:$0xff] }
 0x794   : > { %v14014_v31 = vrot.slane %v11489_v32, 9  ;;  %v12127_v43 = vrot.slane %v11975_v9, %v20972_v35  ;;  %v12361_v40 = vsel %vm12360_vm10, %v12119_v46, %v12359_v50  ;;  %v11976_v13 = vmax.f32 %v11481_v2, %v14013_v63  ;;  %v11233_v8 = vpop.f32.mrf.mxu1 }
 0x795   : > { %v11317_v17 = vadd.f32 %v11204_v28, %v20984_v6  ;;  %v12363_v57 = vsel %vm12362_vm11, %v12123_v26, %v12361_v40  ;;  %v14016_v59 = vrot.slane %v11490_v37, 9  ;;  %v11978_v60 = vmax.f32 %v11488_v53, %v14015_v0  ;;  %v22366_v40 = vld [vmem:[#allocation24_spill] sm:$0xff] }
 0x796   : > { %v11977_v39 = vmax.f32 %v11489_v32, %v14014_v31  ;;  %v12365_v3 = vsel %vm12364_vm12, %v12127_v43, %v12363_v57  ;;  %v12131_v38 = vrot.slane %v11976_v13, %v20972_v35  ;;  %v11322_v24 = vadd.f32 %v15969_v25, %v20988_v7  ;;  %v15974_v42 = vpop.f32.mrf.mxu1 }
 0x797   : > { %v11349_v1 = vmax.f32 %v11317_v17, 0.0  ;;  %12424 = vst.msk [vmem:[#allocation3 + $0x11] sm:$0xff] %vm388_vm1, %v12365_v3  ;;  %v11979_v48 = vmax.f32 %v11490_v37, %v14016_v59  ;;  %v12139_v6 = vrot.slane %v11978_v60, %v20972_v35  ;;  %v11320_v28 = vadd.f32 %v11217_v56, %v20992_v61  ;;  %v22364_v61 = vld [vmem:[#allocation111_spill] sm:$0xff] }
 0x798   : > { %v12135_v2 = vrot.slane %v11977_v39, %v20972_v35  ;;  %v22363_v47 = vmax.f32 %v22362_v36, 0.0  ;;  %v11354_v32 = vmax.f32 %v11322_v24, 0.0  ;;  %v11323_v9 = vadd.f32 %v15970_v33, %v20996_v12  ;;  %v21137_v13 = vpop.f32.mrf.mxu1  ;;  %v22370_v60 = vld [vmem:[#allocation23_spill] sm:$0xff] }
 0x799   : > { %v11321_v46 = vadd.f32 %v11220_v20, %v21000_v5  ;;  %v12143_v7 = vrot.slane %v11979_v48, %v20972_v35  ;;  %v11352_v26 = vmax.f32 %v11320_v28, 0.0  ;;  %v11326_v63 = vadd.f32 %v15973_v30, %v21004_v49  ;;  %v22368_v49 = vld [vmem:[#allocation113_spill] sm:$0xff] }
 0x79a   : > { %v11381_v53 = vadd.f32 %v11349_v1, %v22363_v47  ;;  %v12366_v25 = vsel %vm12352_vm6, %v12135_v2, %v12131_v38  ;;  %v22365_v56 = vmax.f32 %v22364_v61, 0.0  ;;  %v11355_v0 = vmax.f32 %v11323_v9, 0.0  ;;  %v22372_v1 = vld [vmem:[#allocation82_spill] sm:$0xff] }
 0x79b   : > { %v12367_v50 = vsel %vm12354_vm7, %v12139_v6, %v12366_v25  ;;  %v22367_v12 = vmax.f32 %v22366_v40, 0.0  ;;  %v11353_v5 = vmax.f32 %v11321_v46, 0.0  ;;  %v11358_v20 = vmax.f32 %v11326_v63, 0.0 }
 0x79c   : > { %v11411_v37 = vmax.f32 %v11381_v53, %v11383_v14  ;;  %v11386_v31 = vadd.f32 %v11354_v32, %v22365_v56  ;;  %v12368_v43 = vsel %vm12356_vm8, %v12143_v7, %v12367_v50  ;;  %v22369_v30 = vmax.f32 %v22368_v49, 0.0 }
 0x79d   : > { %v11384_v33 = vadd.f32 %v11352_v26, %v22367_v12  ;;  %v11324_v14 = vadd.f32 %v11233_v8, %v21008_v18  ;;  %v22371_v3 = vmax.f32 %v22370_v60, 0.0  ;;  %v22373_v24 = vmax.f32 %v22372_v1, 0.0  ;;  %v15977_v18 = vpop.f32.mrf.mxu1 }
 0x79e   : > { %v11491_v17 = vcombine.high %v11411_v37, %v11411_v37  ;;  %v11498_v57 = vrot.slane %v11411_v37, %v20970_v29  ;;  %v11387_v59 = vadd.f32 %v11355_v0, %v22369_v30  ;;  %v11327_v2 = vadd.f32 %v15974_v42, %v21012_v54 }
 0x79f   : > { %v11412_v39 = vmax.f32 %v11384_v33, %v11386_v31  ;;  %v11385_v38 = vadd.f32 %v11353_v5, %v22371_v3  ;;  %v11390_v48 = vadd.f32 %v11358_v20, %v22373_v24  ;;  %v11356_v47 = vmax.f32 %v11324_v14, 0.0  ;;  %v11249_v5 = vpop.f32.mrf.mxu1 }
 0x7a0   : > { %v11505_v6 = vrot.slane %v11491_v17, %v20970_v29  ;;  %v11506_v28 = vcombine.high %v11498_v57, %v11498_v57  ;;  %v14017_v36 = vrot.slane %v11498_v57, 9  ;;  %v11359_v46 = vmax.f32 %v11327_v2, 0.0 }
 0x7a1   : > { %v11508_v53 = vcombine.high %v11412_v39, %v11412_v39  ;;  %v11515_v32 = vrot.slane %v11412_v39, %v20970_v29  ;;  %v11413_v9 = vmax.f32 %v11385_v38, %v11387_v59 }
 0x7a2   : > { %v11507_v8 = vcombine.high %v11505_v6, %v11505_v6  ;;  %v14018_v7 = vrot.slane %v11506_v28, 9  ;;  %v14019_v25 = vrot.slane %v11505_v6, 9  ;;  %v11980_v26 = vmax.f32 %v11498_v57, %v14017_v36 }
 0x7a3   : > { %v11522_v63 = vrot.slane %v11508_v53, %v20970_v29  ;;  %v11523_v50 = vcombine.high %v11515_v32, %v11515_v32  ;;  %v14021_v37 = vrot.slane %v11515_v32, 9  ;;  %v11525_v54 = vcombine.high %v11413_v9, %v11413_v9 }
 0x7a4   : > { %v14020_v42 = vrot.slane %v11507_v8, 9  ;;  %v11981_v61 = vmax.f32 %v11506_v28, %v14018_v7  ;;  %v11982_v56 = vmax.f32 %v11505_v6, %v14019_v25  ;;  %v12147_v31 = vrot.slane %v11980_v26, %v20972_v35  ;;  %v15978_v28 = vpop.f32.mrf.mxu1  ;;  %v22374_v26 = vld [vmem:[#allocation57_spill] sm:$0xff] }
 0x7a5   : > { %v11524_v0 = vcombine.high %v11522_v63, %v11522_v63  ;;  %v14022_v40 = vrot.slane %v11523_v50, 9  ;;  %v14023_v12 = vrot.slane %v11522_v63, 9  ;;  %v11984_v33 = vmax.f32 %v11515_v32, %v14021_v37 }
 0x7a6   : > { %v11983_v20 = vmax.f32 %v11507_v8, %v14020_v42  ;;  %v12151_v17 = vrot.slane %v11981_v61, %v20972_v35  ;;  %v12155_v57 = vrot.slane %v11982_v56, %v20972_v35  ;;  %v12369_v49 = vsel %vm12358_vm9, %v12147_v31, %v12368_v43 }
 0x7a7   : > { %v14024_v30 = vrot.slane %v11524_v0, 9  ;;  %v11985_v59 = vmax.f32 %v11523_v50, %v14022_v40  ;;  %v11986_v14 = vmax.f32 %v11522_v63, %v14023_v12  ;;  %v12163_v39 = vrot.slane %v11984_v33, %v20972_v35  ;;  %v22376_v40 = vld [vmem:[#allocation51_spill] sm:$0xff] }
 0x7a8   : > { %v12159_v60 = vrot.slane %v11983_v20, %v20972_v35  ;;  %v12370_v3 = vsel %vm12360_vm10, %v12151_v17, %v12369_v49  ;;  %v11532_v38 = vrot.slane %v11413_v9, %v20970_v29  ;;  %v11539_v1 = vrot.slane %v11525_v54, %v20970_v29  ;;  %v11252_v20 = vpop.f32.mrf.mxu1 }
 0x7a9   : > { %v12371_v24 = vsel %vm12362_vm11, %v12155_v57, %v12370_v3  ;;  %v11987_v2 = vmax.f32 %v11524_v0, %v14024_v30  ;;  %v12167_v6 = vrot.slane %v11985_v59, %v20972_v35  ;;  %v12171_v43 = vrot.slane %v11986_v14, %v20972_v35 }
 0x7aa   : > { %v12372_v36 = vsel %vm12364_vm12, %v12159_v60, %v12371_v24  ;;  %v11540_v53 = vcombine.high %v11532_v38, %v11532_v38  ;;  %v11541_v32 = vcombine.high %v11539_v1, %v11539_v1  ;;  %v14025_v8 = vrot.slane %v11532_v38, 9 }
 0x7ab   : > { %12425 = vst.msk [vmem:[#allocation3 + $0x21] sm:$0xff] %vm388_vm1, %v12372_v36  ;;  %v12175_v7 = vrot.slane %v11987_v2, %v20972_v35  ;;  %v12373_v9 = vsel %vm12352_vm6, %v12167_v6, %v12163_v39  ;;  %v14027_v25 = vrot.slane %v11539_v1, 9  ;;  %v22375_v63 = vmax.f32 %v22374_v26, 0.0  ;;  %v22378_v6 = vld [vmem:[#allocation114_spill] sm:$0xff] }
 0x7ac   : > { %v12374_v37 = vsel %vm12354_vm7, %v12171_v43, %v12373_v9  ;;  %v14026_v54 = vrot.slane %v11540_v53, 9  ;;  %v14028_v42 = vrot.slane %v11541_v32, 9  ;;  %v11988_v61 = vmax.f32 %v11532_v38, %v14025_v8 }
 0x7ad   : > { %v11388_v50 = vadd.f32 %v11356_v47, %v22375_v63  ;;  %v11990_v56 = vmax.f32 %v11539_v1, %v14027_v25  ;;  %v12375_v31 = vsel %vm12356_vm8, %v12175_v7, %v12374_v37  ;;  %v22377_v12 = vmax.f32 %v22376_v40, 0.0  ;;  %v22380_v63 = vld [vmem:[#allocation34_spill] sm:$0xff] }
 0x7ae   : > { %v11989_v17 = vmax.f32 %v11540_v53, %v14026_v54  ;;  %v11991_v57 = vmax.f32 %v11541_v32, %v14028_v42  ;;  %v12179_v49 = vrot.slane %v11988_v61, %v20972_v35  ;;  %v11325_v47 = vadd.f32 %v21137_v13, %v21016_v52  ;;  %v21183_v52 = vpop.f32.mrf.mxu1 }
 0x7af   : > { %v11414_v0 = vmax.f32 %v11388_v50, %v11390_v48  ;;  %v11391_v33 = vadd.f32 %v11359_v46, %v22377_v12  ;;  %v12187_v30 = vrot.slane %v11990_v56, %v20972_v35  ;;  %v11330_v39 = vadd.f32 %v15977_v18, %v21020_v55 }
 0x7b0   : > { %v12183_v48 = vrot.slane %v11989_v17, %v20972_v35  ;;  %v12191_v60 = vrot.slane %v11991_v57, %v20972_v35  ;;  %v12376_v46 = vsel %vm12358_vm9, %v12179_v49, %v12375_v31  ;;  %v11357_v3 = vmax.f32 %v11325_v47, 0.0 }
 0x7b1   : > { %v11542_v59 = vcombine.high %v11414_v0, %v11414_v0  ;;  %v11549_v14 = vrot.slane %v11414_v0, %v20970_v29  ;;  %v11362_v2 = vmax.f32 %v11330_v39, 0.0  ;;  %v22379_v43 = vmax.f32 %v22378_v6, 0.0 }
 0x7b2   : > { %v12377_v13 = vsel %vm12360_vm10, %v12183_v48, %v12376_v46  ;;  %v11328_v55 = vadd.f32 %v11249_v5, %v21024_v15  ;;  %v11331_v18 = vadd.f32 %v15978_v28, %v21028_v22  ;;  %v22381_v50 = vmax.f32 %v22380_v63, 0.0  ;;  %v21195_v5 = vpop.f32.mrf.mxu1 }
 0x7b3   : > { %v11556_v38 = vrot.slane %v11542_v59, %v20970_v29  ;;  %v11557_v1 = vcombine.high %v11549_v14, %v11549_v14  ;;  %v14029_v24 = vrot.slane %v11549_v14, 9  ;;  %v11389_v36 = vadd.f32 %v11357_v3, %v22379_v43  ;;  %v22384_v59 = vld [vmem:[#allocation19_spill] sm:$0xff] }
 0x7b4   : > { %v12378_v53 = vsel %vm12362_vm11, %v12187_v30, %v12377_v13  ;;  %v11394_v37 = vadd.f32 %v11362_v2, %v22381_v50  ;;  %v11360_v15 = vmax.f32 %v11328_v55, 0.0  ;;  %v11363_v31 = vmax.f32 %v11331_v18, 0.0 }
 0x7b5   : > { %v11558_v32 = vcombine.high %v11556_v38, %v11556_v38  ;;  %v14030_v8 = vrot.slane %v11557_v1, 9  ;;  %v14031_v7 = vrot.slane %v11556_v38, 9  ;;  %v12379_v9 = vsel %vm12364_vm12, %v12191_v60, %v12378_v53 }
 0x7b6   : > { %v11992_v25 = vmax.f32 %v11549_v14, %v14029_v24  ;;  %v11415_v26 = vmax.f32 %v11389_v36, %v11391_v33  ;;  %12426 = vst.msk [vmem:[#allocation3 + $0x31] sm:$0xff] %vm388_vm1, %v12379_v9  ;;  %v22382_v33 = vld [vmem:[#allocation47_spill] sm:$0xff]  ;;  %v22385_v14 = vmax.f32 %v22384_v59, 0.0  ;;  %v11329_v3 = vadd.f32 %v11252_v20, %v21032_v16 }
 0x7b7   : > { %v14032_v54 = vrot.slane %v11558_v32, 9  ;;  %v11993_v42 = vmax.f32 %v11557_v1, %v14030_v8  ;;  %v11994_v61 = vmax.f32 %v11556_v38, %v14031_v7  ;;  %v22383_v17 = vmax.f32 %v22382_v33, 0.0  ;;  %v21209_v38 = vpop.f32.mrf.mxu1  ;;  %v21223_v33 = vld [vmem:[#allocation3 + $0x10] sm:$0xff] }
 0x7b8   : > { %v12195_v22 = vrot.slane %v11992_v25, %v20972_v35  ;;  %v11559_v28 = vcombine.high %v11415_v26, %v11415_v26  ;;  %v11566_v56 = vrot.slane %v11415_v26, %v20970_v29  ;;  %v11395_v39 = vadd.f32 %v11363_v31, %v22385_v14  ;;  %v21226_v59 = vld [vmem:[#allocation3 + $0x11] sm:$0xff] }
 0x7b9   : > { %v11995_v0 = vmax.f32 %v11558_v32, %v14032_v54  ;;  %v12199_v40 = vrot.slane %v11993_v42, %v20972_v35  ;;  %v12203_v12 = vrot.slane %v11994_v61, %v20972_v35  ;;  %v11392_v57 = vadd.f32 %v11360_v15, %v22383_v17  ;;  %v11268_v25 = vpop.f32.mrf.mxu1 }
 0x7ba   : > { %v11573_v49 = vrot.slane %v11559_v28, %v20970_v29  ;;  %v11574_v47 = vcombine.high %v11566_v56, %v11566_v56  ;;  %v14033_v30 = vrot.slane %v11566_v56, 9  ;;  %v11361_v8 = vmax.f32 %v11329_v3, 0.0 }
 0x7bb   : > { %v12207_v48 = vrot.slane %v11995_v0, %v20972_v35  ;;  %v12380_v60 = vsel %vm12352_vm6, %v12199_v40, %v12195_v22  ;;  %v11416_v46 = vmax.f32 %v11392_v57, %v11394_v37  ;;  %v22386_v37 = vld [vmem:[#allocation116_spill] sm:$0xff]  ;;  %v15985_v14 = vpop.f32.mrf.mxu1 }
 0x7bc   : > { %v12381_v1 = vsel %vm12354_vm7, %v12203_v12, %v12380_v60  ;;  %v11575_v24 = vcombine.high %v11573_v49, %v11573_v49  ;;  %v14034_v2 = vrot.slane %v11574_v47, 9  ;;  %v14035_v13 = vrot.slane %v11573_v49, 9  ;;  %v12439_v12 = vld [vmem:[#allocation3] sm:$0xff] }
 0x7bd   : > { %v11996_v6 = vmax.f32 %v11566_v56, %v14033_v30  ;;  %v12382_v43 = vsel %vm12356_vm8, %v12207_v48, %v12381_v1  ;;  %v11576_v36 = vcombine.high %v11416_v46, %v11416_v46  ;;  %v11583_v55 = vrot.slane %v11416_v46, %v20970_v29  ;;  %v12540_v30 = vld [vmem:[#allocation3 + $0x1] sm:$0xff] }
 0x7be   : > { %v14036_v18 = vrot.slane %v11575_v24, 9  ;;  %v11997_v53 = vmax.f32 %v11574_v47, %v14034_v2  ;;  %v11998_v32 = vmax.f32 %v11573_v49, %v14035_v13  ;;  %v22387_v54 = vmax.f32 %v22386_v37, 0.0 }
 0x7bf   : > { %v12211_v7 = vrot.slane %v11996_v6, %v20972_v35  ;;  %v11590_v16 = vrot.slane %v11576_v36, %v20970_v29  ;;  %v11591_v20 = vcombine.high %v11583_v55, %v11583_v55  ;;  %v14037_v9 = vrot.slane %v11583_v55, 9 }
 0x7c0   : > { %v11999_v26 = vmax.f32 %v11575_v24, %v14036_v18  ;;  %v12215_v63 = vrot.slane %v11997_v53, %v20972_v35  ;;  %v12219_v50 = vrot.slane %v11998_v32, %v20972_v35  ;;  %v11393_v42 = vadd.f32 %v11361_v8, %v22387_v54  ;;  %v11281_v8 = vpop.f32.mrf.mxu1 }
 0x7c1   : > { %v12383_v61 = vsel %vm12358_vm9, %v12211_v7, %v12382_v43  ;;  %v11592_v15 = vcombine.high %v11590_v16, %v11590_v16  ;;  %v14038_v22 = vrot.slane %v11591_v20, 9  ;;  %v14039_v28 = vrot.slane %v11590_v16, 9 }
 0x7c2   : > { %v12223_v56 = vrot.slane %v11999_v26, %v20972_v35  ;;  %v12384_v31 = vsel %vm12360_vm10, %v12215_v63, %v12383_v61  ;;  %v12000_v0 = vmax.f32 %v11583_v55, %v14037_v9  ;;  %v11417_v40 = vmax.f32 %v11393_v42, %v11395_v39 }
 0x7c3   : > { %v12385_v17 = vsel %vm12362_vm11, %v12219_v50, %v12384_v31  ;;  %v14040_v57 = vrot.slane %v11592_v15, 9  ;;  %v12001_v49 = vmax.f32 %v11591_v20, %v14038_v22  ;;  %v12002_v47 = vmax.f32 %v11590_v16, %v14039_v28  ;;  %v22390_v22 = vld [vmem:[#allocation83_spill] sm:$0xff] }
 0x7c4   : > { %v12386_v48 = vsel %vm12364_vm12, %v12223_v56, %v12385_v17  ;;  %v12227_v60 = vrot.slane %v12000_v0, %v20972_v35  ;;  %v11593_v46 = vcombine.high %v11417_v40, %v11417_v40  ;;  %v11600_v3 = vrot.slane %v11417_v40, %v20970_v29  ;;  %v15986_v0 = vpop.f32.mrf.mxu1 }
 0x7c5   : > { %12427 = vst.msk [vmem:[#allocation3 + $0x41] sm:$0xff] %vm388_vm1, %v12386_v48  ;;  %v12003_v39 = vmax.f32 %v11592_v15, %v14040_v57  ;;  %v12231_v1 = vrot.slane %v12001_v49, %v20972_v35  ;;  %v12235_v24 = vrot.slane %v12002_v47, %v20972_v35  ;;  %v12448_v2 = vpack.c.bf16 %v21223_v33, %v12439_v12 }
 0x7c6   : > { %v11607_v13 = vrot.slane %v11593_v46, %v20970_v29  ;;  %v11608_v6 = vcombine.high %v11600_v3, %v11600_v3  ;;  %v14041_v43 = vrot.slane %v11600_v3, 9  ;;  %v12549_v36 = vpack.c.bf16 %v21226_v59, %v12540_v30 }
 0x7c7   : > { %v12239_v55 = vrot.slane %v12003_v39, %v20972_v35  ;;  %v12387_v18 = vsel %vm12352_vm6, %v12231_v1, %v12227_v60  ;;  %15993 = vmatprep.mubr.msk.bf16.mxu0 %vm388_vm1, %v12448_v2  ;;  %v11334_v53 = vadd.f32 %v21183_v52, %v21036_v11  ;;  %v11332_v32 = vadd.f32 %v21195_v5, %v21044_v51  ;;  %v22388_v52 = vld [vmem:[#allocation64_spill] sm:$0xff]  ;;  %v22392_v60 = vld [vmem:[#allocation58_spill] sm:$0xff] }
 0x7c8   : > { %v12388_v7 = vsel %vm12354_vm7, %v12235_v24, %v12387_v18  ;;  %v11609_v16 = vcombine.high %v11607_v13, %v11607_v13  ;;  %v14042_v20 = vrot.slane %v11608_v6, 9  ;;  %v14043_v9 = vrot.slane %v11607_v13, 9  ;;  %16003 = vmatprep.mubr.msk.bf16.mxu1 %vm388_vm1, %v12549_v36  ;;  %v22394_v24 = vld [vmem:[#allocation49_spill] sm:$0xff] }
 0x7c9   : > { %v12004_v26 = vmax.f32 %v11600_v3, %v14041_v43  ;;  %v12389_v63 = vsel %vm12356_vm8, %v12239_v55, %v12388_v7  ;;  %v11366_v50 = vmax.f32 %v11334_v53, 0.0  ;;  %v11364_v37 = vmax.f32 %v11332_v32, 0.0  ;;  %v22396_v32 = vld [vmem:[#allocation7_spill] sm:$0xff] }
 0x7ca   : > { %v14044_v54 = vrot.slane %v11609_v16, 9  ;;  %v12005_v42 = vmax.f32 %v11608_v6, %v14042_v20  ;;  %v12006_v61 = vmax.f32 %v11607_v13, %v14043_v9  ;;  %v11335_v11 = vadd.f32 %v21209_v38, %v21048_v23  ;;  %v11284_v6 = vpop.f32.mrf.mxu1 }
 0x7cb   : > { %v12243_v51 = vrot.slane %v12004_v26, %v20972_v35  ;;  %v22389_v5 = vmax.f32 %v22388_v52, 0.0  ;;  %v22391_v28 = vmax.f32 %v22390_v22, 0.0  ;;  %v11333_v31 = vadd.f32 %v11268_v25, %v21052_v4 }
 0x7cc   : > { %v12007_v40 = vmax.f32 %v11609_v16, %v14044_v54  ;;  %v12247_v12 = vrot.slane %v12005_v42, %v20972_v35  ;;  %v12251_v17 = vrot.slane %v12006_v61, %v20972_v35  ;;  %v11367_v57 = vmax.f32 %v11335_v11, 0.0  ;;  %v22398_v16 = vld [vmem:[#allocation36_spill] sm:$0xff] }
 0x7cd   : > { %v11398_v15 = vadd.f32 %v11366_v50, %v22389_v5  ;;  %v11396_v56 = vadd.f32 %v11364_v37, %v22391_v28  ;;  %v12390_v49 = vsel %vm12358_vm9, %v12243_v51, %v12389_v63  ;;  %v11365_v38 = vmax.f32 %v11333_v31, 0.0  ;;  %v22400_v51 = vld [vmem:[#allocation65_spill] sm:$0xff] }
 0x7ce   : > { %v11338_v47 = vadd.f32 %v15985_v14, %v21056_v34  ;;  %v12255_v30 = vrot.slane %v12007_v40, %v20972_v35  ;;  %v12391_v48 = vsel %vm12360_vm10, %v12247_v12, %v12390_v49  ;;  %v22393_v46 = vmax.f32 %v22392_v60, 0.0 }
 0x7cf   : > { %v11418_v23 = vmax.f32 %v11396_v56, %v11398_v15  ;;  %v11336_v25 = vadd.f32 %v11281_v8, %v21060_v27  ;;  %v12392_v3 = vsel %vm12362_vm11, %v12251_v17, %v12391_v48  ;;  %v22395_v2 = vmax.f32 %v22394_v24, 0.0  ;;  %v15989_v15 = vpop.f32.mrf.mxu1 }
 0x7d0   : > { %v11399_v4 = vadd.f32 %v11367_v57, %v22393_v46  ;;  %v12393_v34 = vsel %vm12364_vm12, %v12255_v30, %v12392_v3  ;;  %v11370_v14 = vmax.f32 %v11338_v47, 0.0  ;;  %v11339_v36 = vadd.f32 %v15986_v0, %v21064_v62 }
 0x7d1   : > { %v11610_v39 = vcombine.high %v11418_v23, %v11418_v23  ;;  %v11617_v1 = vrot.slane %v11418_v23, %v20970_v29  ;;  %v11397_v13 = vadd.f32 %v11365_v38, %v22395_v2  ;;  %v11368_v43 = vmax.f32 %v11336_v25, 0.0  ;;  %12428 = vst.msk [vmem:[#allocation3 + $0x51] sm:$0xff] %vm388_vm1, %v12393_v34  ;;  %v11297_v60 = vpop.f32.mrf.mxu1 }
 0x7d2   : > { %v22397_v8 = vmax.f32 %v22396_v32, 0.0  ;;  %v22399_v20 = vmax.f32 %v22398_v16, 0.0  ;;  %v11371_v26 = vmax.f32 %v11339_v36, 0.0  ;;  %v21277_v63 = vadd.f32 %v11284_v6, %v21067_v21  ;;  %v21298_v16 = vld [vmem:[#allocation3 + $0x30] sm:$0xff] }
 0x7d3   : > { %v11624_v55 = vrot.slane %v11610_v39, %v20970_v29  ;;  %v11625_v27 = vcombine.high %v11617_v1, %v11617_v1  ;;  %v14045_v18 = vrot.slane %v11617_v1, 9  ;;  %v11419_v53 = vmax.f32 %v11397_v13, %v11399_v4 }
 0x7d4   : > { %v11402_v7 = vadd.f32 %v11370_v14, %v22397_v8  ;;  %v11400_v9 = vadd.f32 %v11368_v43, %v22399_v20  ;;  %v22401_v52 = vmax.f32 %v22400_v51, 0.0  ;;  %v11007_v20 = vpop.f32.mrf.mxu0  ;;  %v21307_v51 = vld [vmem:[#allocation3 + $0x20] sm:$0xff] }
 0x7d5   : > { %v11626_v50 = vcombine.high %v11624_v55, %v11624_v55  ;;  %v14046_v37 = vrot.slane %v11625_v27, 9  ;;  %v14047_v62 = vrot.slane %v11624_v55, 9  ;;  %v12008_v54 = vmax.f32 %v11617_v1, %v14045_v18  ;;  %v15990_v18 = vpop.f32.mrf.mxu1 }
 0x7d6   : > { %v11627_v42 = vcombine.high %v11419_v53, %v11419_v53  ;;  %v11634_v61 = vrot.slane %v11419_v53, %v20970_v29  ;;  %v11420_v11 = vmax.f32 %v11400_v9, %v11402_v7  ;;  %v21282_v5 = vadd.f32 %v11371_v26, %v22401_v52 }
 0x7d7   : > { %v14048_v22 = vrot.slane %v11626_v50, 9  ;;  %v12009_v28 = vmax.f32 %v11625_v27, %v14046_v37  ;;  %v12010_v56 = vmax.f32 %v11624_v55, %v14047_v62  ;;  %v12259_v31 = vrot.slane %v12008_v54, %v20972_v35  ;;  %v21303_v62 = vld [vmem:[#allocation3 + $0x31] sm:$0xff] }
 0x7d8   : > { %v11641_v21 = vrot.slane %v11627_v42, %v20970_v29  ;;  %v11642_v0 = vcombine.high %v11634_v61, %v11634_v61  ;;  %v14049_v40 = vrot.slane %v11634_v61, 9  ;;  %v11644_v12 = vcombine.high %v11420_v11, %v11420_v11 }
 0x7d9   : > { %v12011_v17 = vmax.f32 %v11626_v50, %v14048_v22  ;;  %v12263_v57 = vrot.slane %v12009_v28, %v20972_v35  ;;  %v12267_v49 = vrot.slane %v12010_v56, %v20972_v35  ;;  %v11651_v23 = vrot.slane %v11420_v11, %v20970_v29  ;;  %v22402_v28 = vld [vmem:[#allocation78_spill] sm:$0xff] }
 0x7da   : > { %v11643_v38 = vcombine.high %v11641_v21, %v11641_v21  ;;  %v14050_v47 = vrot.slane %v11642_v0, 9  ;;  %v14051_v30 = vrot.slane %v11641_v21, 9  ;;  %v12012_v48 = vmax.f32 %v11634_v61, %v14049_v40  ;;  %v21319_v40 = vld [vmem:[#allocation3 + $0x50] sm:$0xff] }
 0x7db   : > { %v12271_v46 = vrot.slane %v12011_v17, %v20972_v35  ;;  %v12394_v4 = vsel %vm12352_vm6, %v12263_v57, %v12259_v31  ;;  %v11658_v25 = vrot.slane %v11644_v12, %v20970_v29  ;;  %v11659_v3 = vcombine.high %v11651_v23, %v11651_v23 }
 0x7dc   : > { %v12395_v39 = vsel %vm12354_vm7, %v12267_v49, %v12394_v4  ;;  %v14052_v1 = vrot.slane %v11643_v38, 9  ;;  %v12013_v24 = vmax.f32 %v11642_v0, %v14050_v47  ;;  %v12014_v2 = vmax.f32 %v11641_v21, %v14051_v30  ;;  %v21317_v21 = vld [vmem:[#allocation3 + $0x21] sm:$0xff]  ;;  %v11300_v0 = vpop.f32.mrf.mxu1 }
 0x7dd   : > { %v12275_v13 = vrot.slane %v12012_v48, %v20972_v35  ;;  %v12396_v6 = vsel %vm12356_vm8, %v12271_v46, %v12395_v39  ;;  %v11660_v34 = vcombine.high %v11658_v25, %v11658_v25  ;;  %v14053_v14 = vrot.slane %v11651_v23, 9  ;;  %v21340_v48 = vld [vmem:[#allocation3 + $0x40] sm:$0xff]  ;;  %v21342_v46 = vld [vmem:[#allocation3 + $0x51] sm:$0xff] }
 0x7de   : > { %v12015_v43 = vmax.f32 %v11643_v38, %v14052_v1  ;;  %v12279_v36 = vrot.slane %v12013_v24, %v20972_v35  ;;  %v12283_v55 = vrot.slane %v12014_v2, %v20972_v35  ;;  %v14054_v27 = vrot.slane %v11659_v3, 9 }
 0x7df   : > { %v12397_v53 = vsel %vm12358_vm9, %v12275_v13, %v12396_v6  ;;  %v14055_v32 = vrot.slane %v11658_v25, 9  ;;  %v14056_v8 = vrot.slane %v11660_v34, 9  ;;  %v12016_v7 = vmax.f32 %v11651_v23, %v14053_v14  ;;  %v21332_v23 = vld [vmem:[%s21564_s9 + $0x10] sm:$0xf]  ;;  %v22404_v6 = vld [vmem:[#allocation25_spill] sm:$0xff] }
 0x7e0   : > { %v12287_v9 = vrot.slane %v12015_v43, %v20972_v35  ;;  %v12398_v26 = vsel %vm12360_vm10, %v12279_v36, %v12397_v53  ;;  %v12017_v50 = vmax.f32 %v11659_v3, %v14054_v27  ;;  %v11369_v37 = vmax.f32 %v21277_v63, 0.0  ;;  %v21358_v3 = vld [vmem:[#allocation3 + $0x41] sm:$0xff]  ;;  %v22408_v27 = vld [vmem:[#allocation38_spill] sm:$0xff] }
 0x7e1   : > { %v12399_v54 = vsel %vm12362_vm11, %v12283_v55, %v12398_v26  ;;  %v12018_v42 = vmax.f32 %v11658_v25, %v14055_v32  ;;  %v12019_v61 = vmax.f32 %v11660_v34, %v14056_v8  ;;  %v12291_v11 = vrot.slane %v12016_v7, %v20972_v35  ;;  %v22406_v43 = vld [vmem:[#allocation12_spill] sm:$0xff]  ;;  %v22410_v32 = vld [vmem:[#allocation66_spill] sm:$0xff] }
 0x7e2   : > { %v12400_v52 = vsel %vm12364_vm12, %v12287_v9, %v12399_v54  ;;  %v12295_v22 = vrot.slane %v12017_v50, %v20972_v35  ;;  %v22403_v56 = vmax.f32 %v22402_v28, 0.0  ;;  %v21315_v63 = vpack.c.bf16 %v21298_v16, %v21307_v51 }
 0x7e3   : > { %v11048_v12 = vadd.f32 %v11007_v20, %v20963_v10  ;;  %12429 = vst.msk [vmem:[#allocation3 + $0x61] sm:$0xff] %vm388_vm1, %v12400_v52  ;;  %v12299_v17 = vrot.slane %v12018_v42, %v20972_v35  ;;  %v21326_v57 = vpack.c.bf16 %v21303_v62, %v21317_v21  ;;  %v11342_v49 = vadd.f32 %v15989_v15, %v21070_v44  ;;  %v21347_v44 = vld [vmem:[%s21564_s9 + $0x14] sm:$0xf] }
 0x7e4   : > { %v11401_v31 = vadd.f32 %v11369_v37, %v22403_v56  ;;  %v12401_v38 = vsel %vm12352_vm6, %v12295_v22, %v12291_v11  ;;  %15994 = vmatmul.mubr.msk.bf16.vlgmr.msra.gmra.mxu0 %vm388_vm1, %v21315_v63  ;;  %v11340_v10 = vadd.f32 %v11297_v60, %v21078_v58  ;;  %v11343_v30 = vadd.f32 %v15990_v18, %v21081_v45 }
 0x7e5   : > { %16004 = vmatmul.mubr.msk.bf16.vlgmr.msra.gmra.mxu1 %vm388_vm1, %v21326_v57  ;;  %v11341_v15 = vadd.f32 %v11300_v0, %v11048_v12  ;;  %v21353_v4 = vpack.c.bf16 %v21319_v40, %v21340_v48  ;;  %16012 = vmatpush3.bf16.msra.mxu0 %v21085_v19  ;;  %v12303_v58 = vrot.slane %v12019_v61, %v20972_v35  ;;  %v22405_v34 = vmax.f32 %v22404_v6, 0.0 }
 0x7e6   : > { %v11421_v47 = vmax.f32 %v11401_v31, %v21282_v5  ;;  %v11374_v5 = vmax.f32 %v11342_v49, 0.0  ;;  %v11372_v25 = vmax.f32 %v11340_v10, 0.0  ;;  %16022 = vmatpush3.bf16.msra.mxu1 %v21092_v41  ;;  %16124 = vmatprep.subr.msk.bf16.mxu0 %vm3355_vm5, %v21332_v23  ;;  %v12402_v39 = vsel %vm12354_vm7, %v12299_v17, %v12401_v38 }
 0x7e7   : > { %v11375_v1 = vmax.f32 %v11343_v30, 0.0  ;;  %v11373_v24 = vmax.f32 %v11341_v15, 0.0  ;;  %15997 = vmatprep.mubr.msk.bf16.mxu0 %vm388_vm1, %v21353_v4  ;;  %v21368_v19 = vpack.c.bf16 %v21342_v46, %v21358_v3  ;;  %16125 = vmatprep.subr.msk.bf16.mxu1 %vm3355_vm5, %v21347_v44  ;;  %v22407_v36 = vmax.f32 %v22406_v43, 0.0 }
 0x7e8   : > { %v11661_v45 = vcombine.high %v11421_v47, %v11421_v47  ;;  %v11668_v60 = vrot.slane %v11421_v47, %v20970_v29  ;;  %v11404_v14 = vadd.f32 %v11372_v25, %v22405_v34  ;;  %v22409_v18 = vmax.f32 %v22408_v27, 0.0 }
 0x7e9   : > { %v11406_v55 = vadd.f32 %v11374_v5, %v22407_v36  ;;  %v22411_v8 = vmax.f32 %v22410_v32, 0.0  ;;  %16007 = vmatprep.mubr.msk.bf16.mxu1 %vm388_vm1, %v21368_v19  ;;  %v12403_v37 = vsel %vm12356_vm8, %v12303_v58, %v12402_v39 }
 0x7ea   : > { %v11675_v2 = vrot.slane %v11661_v45, %v20970_v29  ;;  %v11676_v41 = vcombine.high %v11668_v60, %v11668_v60  ;;  %v14057_v13 = vrot.slane %v11668_v60, 9  ;;  %v11407_v53 = vadd.f32 %v11375_v1, %v22409_v18 }
 0x7eb   : > { %v11405_v7 = vadd.f32 %v11373_v24, %v22411_v8  ;;  %v11422_v54 = vmax.f32 %v11404_v14, %v11406_v55 }
 0x7ec   : > { %v11677_v20 = vcombine.high %v11675_v2, %v11675_v2  ;;  %v14058_v9 = vrot.slane %v11676_v41, 9  ;;  %v14059_v26 = vrot.slane %v11675_v2, 9  ;;  %v12020_v50 = vmax.f32 %v11668_v60, %v14057_v13 }
 0x7ed   : > { %v11423_v42 = vmax.f32 %v11405_v7, %v11407_v53  ;;  %v11678_v28 = vcombine.high %v11422_v54, %v11422_v54  ;;  %v11685_v56 = vrot.slane %v11422_v54, %v20970_v29 }
 0x7ee   : > { %v14060_v61 = vrot.slane %v11677_v20, 9  ;;  %v12021_v11 = vmax.f32 %v11676_v41, %v14058_v9  ;;  %v12022_v52 = vmax.f32 %v11675_v2, %v14059_v26  ;;  %v12307_v22 = vrot.slane %v12020_v50, %v20972_v35 }
 0x7ef   : > { %v11695_v31 = vcombine.high %v11423_v42, %v11423_v42  ;;  %v11702_v0 = vrot.slane %v11423_v42, %v20970_v29  ;;  %v11692_v47 = vrot.slane %v11678_v28, %v20970_v29  ;;  %v11693_v10 = vcombine.high %v11685_v56, %v11685_v56  ;;  %v12642_v28 = vld [vmem:[#allocation3 + $0x12] sm:$0xff] }
 0x7f0   : > { %v12023_v12 = vmax.f32 %v11677_v20, %v14060_v61  ;;  %v12311_v17 = vrot.slane %v12021_v11, %v20972_v35  ;;  %v12315_v49 = vrot.slane %v12022_v52, %v20972_v35  ;;  %v12404_v38 = vsel %vm12358_vm9, %v12307_v22, %v12403_v37  ;;  %v12445_v52 = vld [vmem:[#allocation3 + $0x60] sm:$0xff] }
 0x7f1   : > { %v14061_v30 = vrot.slane %v11685_v56, 9  ;;  %v11709_v5 = vrot.slane %v11695_v31, %v20970_v29  ;;  %v11710_v45 = vcombine.high %v11702_v0, %v11702_v0  ;;  %v14065_v60 = vrot.slane %v11702_v0, 9  ;;  %v12641_v22 = vld [vmem:[#allocation3 + $0x2] sm:$0xff] }
 0x7f2   : > { %v12319_v15 = vrot.slane %v12023_v12, %v20972_v35  ;;  %v12405_v58 = vsel %vm12360_vm10, %v12311_v17, %v12404_v38  ;;  %v11694_v39 = vcombine.high %v11692_v47, %v11692_v47  ;;  %v14062_v1 = vrot.slane %v11693_v10, 9 }
 0x7f3   : > { %v12406_v25 = vsel %vm12362_vm11, %v12315_v49, %v12405_v58  ;;  %v14063_v24 = vrot.slane %v11692_v47, 9  ;;  %v12024_v41 = vmax.f32 %v11685_v56, %v14061_v30  ;;  %v11711_v13 = vcombine.high %v11709_v5, %v11709_v5  ;;  %v12643_v58 = vld [vmem:[#allocation3 + $0x22] sm:$0xff] }
 0x7f4   : > { %v12407_v2 = vsel %vm12364_vm12, %v12319_v15, %v12406_v25  ;;  %v14066_v6 = vrot.slane %v11710_v45, 9  ;;  %v14064_v34 = vrot.slane %v11694_v39, 9  ;;  %v12025_v29 = vmax.f32 %v11693_v10, %v14062_v1  ;;  %v12646_v15 = vld [vmem:[#allocation3 + $0x52] sm:$0xff] }
 0x7f5   : > { %12430 = vst.msk [vmem:[#allocation3 + $0x71] sm:$0xff] %vm388_vm1, %v12407_v2  ;;  %v12026_v14 = vmax.f32 %v11692_v47, %v14063_v24  ;;  %v14067_v43 = vrot.slane %v11709_v5, 9  ;;  %v12323_v36 = vrot.slane %v12024_v41, %v20972_v35  ;;  %v14068_v55 = vrot.slane %v11711_v13, 9  ;;  %v13054_v24 = vld [vmem:[%s21564_s9 + $0x18] sm:$0xf] }
 0x7f6   : > { %v12028_v27 = vmax.f32 %v11702_v0, %v14065_v60  ;;  %v12029_v18 = vmax.f32 %v11710_v45, %v14066_v6  ;;  %v12027_v53 = vmax.f32 %v11694_v39, %v14064_v34  ;;  %v12327_v32 = vrot.slane %v12025_v29, %v20972_v35  ;;  %v12546_v0 = vld [vmem:[#allocation3 + $0x61] sm:$0xff] }
 0x7f7   : > { %v12331_v8 = vrot.slane %v12026_v14, %v20972_v35  ;;  %v12030_v7 = vmax.f32 %v11709_v5, %v14067_v43  ;;  %v12031_v20 = vmax.f32 %v11711_v13, %v14068_v55  ;;  %v12650_v47 = vpack.c.bf16 %v12642_v28, %v12641_v22  ;;  %v12644_v5 = vld [vmem:[#allocation3 + $0x32] sm:$0xff]  ;;  %v12645_v60 = vld [vmem:[#allocation3 + $0x42] sm:$0xff] }
 0x7f8   : > { %v12339_v9 = vrot.slane %v12028_v27, %v20972_v35  ;;  %v12335_v26 = vrot.slane %v12027_v53, %v20972_v35  ;;  %v12408_v50 = vsel %vm12352_vm6, %v12327_v32, %v12323_v36  ;;  %v12343_v37 = vrot.slane %v12029_v18, %v20972_v35  ;;  %v13053_v27 = vld [vmem:[#allocation3 + $0x90] sm:$0xff] }
 0x7f9   : > { %v12409_v54 = vsel %vm12354_vm7, %v12331_v8, %v12408_v50  ;;  %v12347_v42 = vrot.slane %v12030_v7, %v20972_v35  ;;  %v12351_v61 = vrot.slane %v12031_v20, %v20972_v35  ;;  %v12751_v10 = vpack.c.bf16 %v21307_v51, %v21223_v33 }
 0x7fa   : > { %v12410_v11 = vsel %vm12356_vm8, %v12335_v26, %v12409_v54  ;;  %v12651_v45 = vpack.c.bf16 %v12644_v5, %v12643_v58  ;;  %v12752_v33 = vpack.c.bf16 %v21340_v48, %v21298_v16  ;;  %v12869_v51 = vsel %vm3355_vm5, %v21332_v23, 0  ;;  %v13155_v16 = vld [vmem:[%s21564_s9 + $0x1c] sm:$0xf] }
 0x7fb   : > { %v12411_v56 = vsel %vm12358_vm9, %v12339_v9, %v12410_v11  ;;  %v12652_v25 = vpack.c.bf16 %v12646_v15, %v12645_v60  ;;  %v12970_v39 = vsel %vm3355_vm5, %v21347_v44, 0  ;;  %v12753_v1 = vpack.c.bf16 %v12445_v52, %v21319_v40  ;;  %v12647_v40 = vld [vmem:[#allocation3 + $0x62] sm:$0xff] }
 0x7fc   : > { %v12446_v31 = vld [vmem:[#allocation3 + $0x70] sm:$0xff]  ;;  %v12412_v17 = vsel %vm12360_vm10, %v12343_v37, %v12411_v56  ;;  %v12852_v41 = vpack.c.bf16 %v21317_v21, %v21226_v59  ;;  %v12953_v13 = vpack.c.bf16 %v12643_v58, %v12642_v28  ;;  %v12853_v6 = vpack.c.bf16 %v21358_v3, %v21303_v62 }
 0x7fd   : > { %v21409_v12 = vld [vmem:[#allocation3 + $0x71] sm:$0xff]  ;;  %v21412_v49 = vpack.c.bf16 %v12446_v31, %v12445_v52  ;;  %v12413_v35 = vsel %vm12362_vm11, %v12347_v42, %v12412_v17  ;;  %v12954_v34 = vpack.c.bf16 %v12645_v60, %v12644_v5  ;;  %v13072_v29 = vsel %vm3355_vm5, %v13054_v24, 0 }
 0x7fe   : > { %v21415_v38 = vpack.c.bf16 %v21409_v12, %v12546_v0  ;;  %v12414_v30 = vsel %vm12364_vm12, %v12351_v61, %v12413_v35  ;;  %v12648_v23 = vld [vmem:[#allocation3 + $0x72] sm:$0xff]  ;;  %v12854_v14 = vpack.c.bf16 %v12546_v0, %v21342_v46  ;;  %v13173_v43 = vsel %vm3355_vm5, %v13155_v16, 0 }
 0x7ff   : > { %15998 = vmatmul.mubr.msk.bf16.gmra.mxu0 %vm388_vm1, %v21412_v49  ;;  %12431 = vst.msk [vmem:[#allocation3 + $0x81] sm:$0xff] %vm388_vm1, %v12414_v30  ;;  %v12653_v44 = vpack.c.bf16 %v12648_v23, %v12647_v40  ;;  %v12955_v59 = vpack.c.bf16 %v12647_v40, %v12646_v15  ;;  %v13256_v21 = vld [vmem:[%s21564_s9 + $0x20] sm:$0xf] }
 0x800   : > { %16008 = vmatmul.mubr.msk.bf16.gmra.mxu1 %vm388_vm1, %v21415_v38  ;;  %16013 = vmatprep.mubr.msk.bf16.mxu0 %vm388_vm1, %v12650_v47  ;;  %v13274_v55 = vsel %vm3355_vm5, %v13256_v21, 0 }
 0x801   : > { %16023 = vmatprep.mubr.msk.bf16.mxu1 %vm388_vm1, %v12751_v10 }
 0x806   : > { %v12749_v48 = vld [vmem:[#allocation3 + $0x80] sm:$0xff] }
 0x807   : > { %16014 = vmatmul.mubr.msk.bf16.vlgmr.msra.gmra.mxu0 %vm388_vm1, %v12651_v45  ;;  %v12754_v2 = vpack.c.bf16 %v12749_v48, %v12446_v31  ;;  %v12850_v62 = vld [vmem:[#allocation3 + $0x81] sm:$0xff]  ;;  %v13058_v18 = vpack.c.bf16 %v13053_v27, %v12749_v48 }
 0x808   : > { %16024 = vmatmul.mubr.msk.bf16.vlgmr.msra.gmra.mxu1 %vm388_vm1, %v12752_v33  ;;  %16032 = vmatpush3.bf16.msra.mxu0 %v12869_v51  ;;  %v12951_v3 = vld [vmem:[#allocation3 + $0x82] sm:$0xff]  ;;  %v12855_v46 = vpack.c.bf16 %v12850_v62, %v21409_v12 }
 0x809   : > { %16017 = vmatprep.mubr.msk.bf16.mxu0 %vm388_vm1, %v12652_v25  ;;  %16027 = vmatprep.mubr.msk.bf16.mxu1 %vm388_vm1, %v12753_v1  ;;  %v12956_v36 = vpack.c.bf16 %v12951_v3, %v12648_v23 }
 0x80a   : > { %16042 = vmatpush3.bf16.msra.mxu1 %v12970_v39  ;;  %16126 = vmatprep.subr.msk.bf16.mxu0 %vm3355_vm5, %v13054_v24 }
 0x80b   : > { %16127 = vmatprep.subr.msk.bf16.mxu1 %vm3355_vm5, %v13155_v16  ;;  %v14069_v16 = vld [vmem:[%s21565_s10] ss:$0 sm:$0xff] }
 0x80f   : > { %16018 = vmatmul.mubr.msk.bf16.gmra.mxu0 %vm388_vm1, %v12653_v44 }
 0x810   : > { %16028 = vmatmul.mubr.msk.bf16.gmra.mxu1 %vm388_vm1, %v12754_v2  ;;  %16033 = vmatprep.mubr.msk.bf16.mxu0 %vm388_vm1, %v12852_v41 }
 0x811   : > { %16043 = vmatprep.mubr.msk.bf16.mxu1 %vm388_vm1, %v12953_v13 }
 0x817   : > { %16034 = vmatmul.mubr.msk.bf16.vlgmr.msra.gmra.mxu0 %vm388_vm1, %v12853_v6 }
 0x818   : > { %16044 = vmatmul.mubr.msk.bf16.vlgmr.msra.gmra.mxu1 %vm388_vm1, %v12954_v34  ;;  %16052 = vmatpush3.bf16.msra.mxu0 %v13072_v29 }
 0x819   : > { %16037 = vmatprep.mubr.msk.bf16.mxu0 %vm388_vm1, %v12854_v14  ;;  %16047 = vmatprep.mubr.msk.bf16.mxu1 %vm388_vm1, %v12955_v59 }
 0x81a   : > { %16062 = vmatpush3.bf16.msra.mxu1 %v13173_v43  ;;  %16128 = vmatprep.subr.msk.bf16.mxu0 %vm3355_vm5, %v13256_v21 }
 0x81f   : > { %16038 = vmatmul.mubr.msk.bf16.gmra.mxu0 %vm388_vm1, %v12855_v46 }
 0x820   : > { %16048 = vmatmul.mubr.msk.bf16.gmra.mxu1 %vm388_vm1, %v12956_v36  ;;  %16053 = vmatprep.mubr.msk.bf16.mxu0 %vm388_vm1, %v21315_v63  ;;  %v13154_v63 = vld [vmem:[#allocation3 + $0x91] sm:$0xff] }
 0x821   : > { %16063 = vmatprep.mubr.msk.bf16.mxu1 %vm388_vm1, %v21326_v57  ;;  %v13159_v53 = vpack.c.bf16 %v13154_v63, %v12850_v62  ;;  %v13255_v57 = vld [vmem:[#allocation3 + $0x92] sm:$0xff] }
 0x827   : > { %16054 = vmatmul.mubr.msk.bf16.vlgmr.msra.gmra.mxu0 %vm388_vm1, %v21353_v4  ;;  %v13260_v4 = vpack.c.bf16 %v13255_v57, %v12951_v3 }
 0x828   : > { %16064 = vmatmul.mubr.msk.bf16.vlgmr.msra.gmra.mxu1 %vm388_vm1, %v21368_v19  ;;  %16072 = vmatpush3.bf16.msra.mxu0 %v13274_v55 }
 0x829   : > { %16057 = vmatprep.mubr.msk.bf16.mxu0 %vm388_vm1, %v21412_v49  ;;  %16067 = vmatprep.mubr.msk.bf16.mxu1 %vm388_vm1, %v21415_v38 }
 0x82f   : > { %16058 = vmatmul.mubr.msk.bf16.gmra.mxu0 %vm388_vm1, %v13058_v18 }
 0x830   : > { %16068 = vmatmul.mubr.msk.bf16.gmra.mxu1 %vm388_vm1, %v13159_v53  ;;  %16073 = vmatprep.mubr.msk.bf16.mxu0 %vm388_vm1, %v12651_v45 }
 0x837   : > { %16074 = vmatmul.mubr.msk.bf16.vlgmr.msra.gmra.mxu0 %vm388_vm1, %v12652_v25 }
 0x838   : > { %16077 = vmatprep.mubr.msk.bf16.mxu0 %vm388_vm1, %v12653_v44 }
 0x83f   : > { %16078 = vmatmul.mubr.msk.bf16.gmra.mxu0 %vm388_vm1, %v13260_v4 }
 0x8a4   : > { %v15995_v19 = vpop.f32.mrf.mxu0 }
 0x8a5   : > { %v16005_v32 = vpop.f32.mrf.mxu1  ;;  %v12534_v2 = vadd.f32 %v15995_v19, %v14069_v16 }
 0x8a6   : > { %v12501_v8 = vpop.f32.mrf.mxu0 }
 0x8a7   : > { %v12602_v7 = vpop.f32.mrf.mxu1  ;;  %v12532_v6 = vadd.f32 %v14069_v16, %v12501_v8  ;;  %v12635_v14 = vadd.f32 %v16005_v32, %v12534_v2 }
 0x8a8   : > { %v15996_v20 = vpop.f32.mrf.mxu0 }
 0x8a9   : > { %v16006_v9 = vpop.f32.mrf.mxu1  ;;  %v12535_v43 = vadd.f32 %v15996_v20, %v14069_v16  ;;  %v12633_v62 = vadd.f32 %v12602_v7, %v12532_v6 }
 0x8aa   : > { %v12504_v26 = vpop.f32.mrf.mxu0 }
 0x8ab   : > { %v12605_v50 = vpop.f32.mrf.mxu1  ;;  %v12533_v3 = vadd.f32 %v14069_v16, %v12504_v26  ;;  %v12636_v63 = vadd.f32 %v16006_v9, %v12535_v43 }
 0x8ad   : > { %v12634_v4 = vadd.f32 %v12605_v50, %v12533_v3 }
 0x8bf   : > { %v15999_v37 = vpop.f32.mrf.mxu0 }
 0x8c0   : > { %v16009_v54 = vpop.f32.mrf.mxu1  ;;  %v12538_v36 = vadd.f32 %v15999_v37, %v14069_v16 }
 0x8c1   : > { %v12517_v42 = vpop.f32.mrf.mxu0 }
 0x8c2   : > { %v12618_v61 = vpop.f32.mrf.mxu1  ;;  %v12536_v53 = vadd.f32 %v14069_v16, %v12517_v42 }
 0x8c3   : > { %v16000_v11 = vpop.f32.mrf.mxu0 }
 0x8c4   : > { %v21488_v52 = vpop.f32.mrf.mxu1  ;;  %v12539_v2 = vadd.f32 %v16000_v11, %v14069_v16  ;;  %v12637_v7 = vadd.f32 %v12618_v61, %v12536_v53 }
 0x8c5   : > { %v12520_v22 = vpop.f32.mrf.mxu0 }
 0x8c6   : > { %v21490_v28 = vpop.f32.mrf.mxu1  ;;  %v12537_v26 = vadd.f32 %v14069_v16, %v12520_v22  ;;  %v12640_v50 = vadd.f32 %v21488_v52, %v12539_v2 }
 0x8c7   : > { %v16015_v56 = vpop.f32.mrf.mxu0 }
 0x8c8   : > { %v16025_v31 = vpop.f32.mrf.mxu1  ;;  %v12736_v46 = vadd.f32 %v16015_v56, %v12635_v14  ;;  %v12638_v11 = vadd.f32 %v21490_v28, %v12537_v26 }
 0x8c9   : > { %v12703_v0 = vpop.f32.mrf.mxu0 }
 0x8ca   : > { %v12804_v12 = vpop.f32.mrf.mxu1  ;;  %v12734_v18 = vadd.f32 %v12703_v0, %v12633_v62  ;;  %v12837_v19 = vadd.f32 %v16025_v31, %v12736_v46 }
 0x8cb   : > { %v16016_v17 = vpop.f32.mrf.mxu0 }
 0x8cc   : > { %v16026_v49 = vpop.f32.mrf.mxu1  ;;  %v12737_v8 = vadd.f32 %v16016_v17, %v12636_v63 }
 0x8cd   : > { %v12706_v38 = vpop.f32.mrf.mxu0 }
 0x8ce   : > { %v12807_v35 = vpop.f32.mrf.mxu1  ;;  %v12838_v6 = vadd.f32 %v16026_v49, %v12737_v8 }
 0x8cf   : > { %v16019_v47 = vpop.f32.mrf.mxu0 }
 0x8d0   : > { %v16029_v10 = vpop.f32.mrf.mxu1 }
 0x8d1   : > { %v12719_v30 = vpop.f32.mrf.mxu0 }
 0x8d2   : > { %v21492_v5 = vpop.f32.mrf.mxu1  ;;  %v12738_v9 = vadd.f32 %v12719_v30, %v12637_v7 }
 0x8d3   : > { %v16020_v15 = vpop.f32.mrf.mxu0 }
 0x8d4   : > { %v21494_v58 = vpop.f32.mrf.mxu1  ;;  %v12839_v49 = vadd.f32 %v21492_v5, %v12738_v9 }
 0x8d5   : > { %v21496_v45 = vpop.f32.mrf.mxu0 }
 0x8d6   : > { %v21498_v33 = vpop.f32.mrf.mxu1  ;;  %v12739_v30 = vadd.f32 %v21496_v45, %v12638_v11 }
 0x8d7   : > { %v16035_v51 = vpop.f32.mrf.mxu0 }
 0x8d8   : > { %v16045_v60 = vpop.f32.mrf.mxu1 }
 0x8d9   : > { %v12905_v25 = vpop.f32.mrf.mxu0 }
 0x8da   : > { %v13006_v39 = vpop.f32.mrf.mxu1 }
 0x8db   : > { %v16036_v1 = vpop.f32.mrf.mxu0 }
 0x8dc   : > { %v16046_v24 = vpop.f32.mrf.mxu1 }
 0x8dd   : > { %v12908_v23 = vpop.f32.mrf.mxu0 }
 0x8de   : > { %v21503_v48 = vpop.f32.mrf.mxu1 }
 0x8df   : > { %v16039_v40 = vpop.f32.mrf.mxu0 }
 0x8e0   : > { %v21505_v44 = vpop.f32.mrf.mxu1 }
 0x8e1   : > { %v12921_v41 = vpop.f32.mrf.mxu0 }
 0x8e2   : > { %v21507_v13 = vpop.f32.mrf.mxu1 }
 0x8e3   : > { %22412 = vst [vmem:[#allocation102_spill] sm:$0xff] %v21507_v13  ;;  %v21509_v34 = vpop.f32.mrf.mxu0  ;;  %v12735_v13 = vadd.f32 %v12706_v38, %v12634_v4 }
 0x8e4   : > { %v21511_v29 = vpop.f32.mrf.mxu1 }
 0x8e5   : > { %22413 = vst [vmem:[#allocation53_spill] sm:$0xff] %v21511_v29  ;;  %v21513_v59 = vpop.f32.mrf.mxu0  ;;  %v12639_v29 = vadd.f32 %v16009_v54, %v12538_v36  ;;  %v12836_v31 = vadd.f32 %v12807_v35, %v12735_v13  ;;  %v12939_v54 = vadd.f32 %v16036_v1, %v12838_v6 }
 0x8e6   : > { %22414 = vst [vmem:[#allocation87_spill] sm:$0xff] %v21513_v59  ;;  %v21515_v21 = vpop.f32.mrf.mxu1  ;;  %v12835_v59 = vadd.f32 %v12804_v12, %v12734_v18 }
 0x8e7   : > { %22415 = vst [vmem:[#allocation4_spill] sm:$0xff] %v21515_v21  ;;  %v16055_v55 = vpop.f32.mrf.mxu0  ;;  %v12938_v21 = vadd.f32 %v16035_v51, %v12837_v19  ;;  %v12740_v56 = vadd.f32 %v16019_v47, %v12639_v29  ;;  %v12741_v51 = vadd.f32 %v16020_v15, %v12640_v50  ;;  %v12937_v22 = vadd.f32 %v12908_v23, %v12836_v31 }
 0x8e8   : > { %v16065_v27 = vpop.f32.mrf.mxu1  ;;  %v12936_v14 = vadd.f32 %v12905_v25, %v12835_v59  ;;  %v13040_v52 = vadd.f32 %v16046_v24, %v12939_v54  ;;  %v12840_v23 = vadd.f32 %v21498_v33, %v12739_v30 }
 0x8e9   : > { %v13108_v57 = vpop.f32.mrf.mxu0  ;;  %v13039_v17 = vadd.f32 %v16045_v60, %v12938_v21  ;;  %v12841_v12 = vadd.f32 %v16029_v10, %v12740_v56  ;;  %v12940_v60 = vadd.f32 %v12921_v41, %v12839_v49  ;;  %v12842_v28 = vadd.f32 %v21494_v58, %v12741_v51 }
 0x8ea   : > { %v13209_v32 = vpop.f32.mrf.mxu1  ;;  %v13037_v61 = vadd.f32 %v13006_v39, %v12936_v14  ;;  %v13038_v10 = vadd.f32 %v21503_v48, %v12937_v22  ;;  %v22416_v41 = vld [vmem:[#allocation102_spill] sm:$0xff] }
 0x8eb   : > { %v16056_v20 = vpop.f32.mrf.mxu0  ;;  %v13141_v47 = vadd.f32 %v16055_v55, %v13039_v17  ;;  %v12942_v25 = vadd.f32 %v16039_v40, %v12841_v12  ;;  %v12943_v24 = vadd.f32 %v21509_v34, %v12842_v28  ;;  %v13041_v43 = vadd.f32 %v22416_v41, %v12940_v60 }
 0x8ec   : > { %v16066_v0 = vpop.f32.mrf.mxu1  ;;  %v13139_v35 = vadd.f32 %v13108_v57, %v13037_v61  ;;  %v13142_v39 = vadd.f32 %v16056_v20, %v13040_v52  ;;  %v22418_v55 = vld [vmem:[#allocation53_spill] sm:$0xff] }
 0x8ed   : > { %v13111_v37 = vpop.f32.mrf.mxu0  ;;  %v13242_v15 = vadd.f32 %v16065_v27, %v13141_v47  ;;  %v13043_v5 = vadd.f32 %v21505_v44, %v12942_v25  ;;  %v22417_v33 = vld [vmem:[#allocation87_spill] sm:$0xff]  ;;  %v13044_v34 = vadd.f32 %v22418_v55, %v12943_v24 }
 0x8ee   : > { %v13212_v16 = vpop.f32.mrf.mxu1  ;;  %v13240_v58 = vadd.f32 %v13209_v32, %v13139_v35  ;;  %v13140_v40 = vadd.f32 %v13111_v37, %v13038_v10  ;;  %v12941_v21 = vadd.f32 %v22417_v33, %v12840_v23  ;;  %v13243_v44 = vadd.f32 %v16066_v0, %v13142_v39  ;;  %v22419_v57 = vld [vmem:[#allocation4_spill] sm:$0xff] }
 0x8ef   : > { %v16059_v42 = vpop.f32.mrf.mxu0 }
 0x8f0   : > { %v16069_v13 = vpop.f32.mrf.mxu1  ;;  %v13145_v62 = vadd.f32 %v16059_v42, %v13043_v5  ;;  %v13241_v27 = vadd.f32 %v13212_v16, %v13140_v40  ;;  %v13042_v4 = vadd.f32 %v22419_v57, %v12941_v21 }
 0x8f1   : > { %v13124_v38 = vpop.f32.mrf.mxu0 }
 0x8f2   : > { %v13225_v46 = vpop.f32.mrf.mxu1  ;;  %v13143_v63 = vadd.f32 %v13124_v38, %v13041_v43  ;;  %v13246_v19 = vadd.f32 %v16069_v13, %v13145_v62 }
 0x8f3   : > { %v16060_v29 = vpop.f32.mrf.mxu0 }
 0x8f4   : > { %v13146_v8 = vadd.f32 %v16060_v29, %v13044_v34  ;;  %v16070_v20 = vpop.f32.mrf.mxu1  ;;  %v13244_v7 = vadd.f32 %v13225_v46, %v13143_v63 }
 0x8f5   : > { %v13127_v1 = vpop.f32.mrf.mxu0 }
 0x8f6   : > { %v13144_v26 = vadd.f32 %v13127_v1, %v13042_v4  ;;  %v13247_v6 = vadd.f32 %v16070_v20, %v13146_v8  ;;  %v13228_v9 = vpop.f32.mrf.mxu1 }
 0x8f7   : > { %v16075_v45 = vpop.f32.mrf.mxu0 }
 0x8f8   : > { %v13343_v48 = vadd.f32 %v16075_v45, %v13242_v15  ;;  %v13245_v42 = vadd.f32 %v13228_v9, %v13144_v26 }
 0x8f9   : > { %v13310_v59 = vpop.f32.mrf.mxu0 }
 0x8fa   : > { %13351 = vst.msk [vmem:[%s21529_s12 + $0x10] sm:$0xff] %vm388_vm1, %v13343_v48  ;;  %v13341_v3 = vadd.f32 %v13310_v59, %v13240_v58 }
 0x8fb   : > { %v16076_v36 = vpop.f32.mrf.mxu0 }
 0x8fc   : > { %13349 = vst.msk [vmem:[%s21529_s12] sm:$0xff] %vm388_vm1, %v13341_v3  ;;  %v13344_v18 = vadd.f32 %v16076_v36, %v13243_v44 }
 0x8fd   : > { %v13313_v53 = vpop.f32.mrf.mxu0 }
 0x8fe   : > { %13352 = vst.msk [vmem:[%s21529_s12 + $0x18] sm:$0xff] %vm388_vm1, %v13344_v18  ;;  %v13342_v32 = vadd.f32 %v13313_v53, %v13241_v27 }
 0x8ff   : > { %v16079_v2 = vpop.f32.mrf.mxu0 }
 0x900   : > { %13350 = vst.msk [vmem:[%s21529_s12 + $0x8] sm:$0xff] %vm388_vm1, %v13342_v32  ;;  %v13347_v56 = vadd.f32 %v16079_v2, %v13246_v19 }
 0x901   : > { %v13326_v37 = vpop.f32.mrf.mxu0 }
 0x902   : > { %13355 = vst.msk [vmem:[%s21529_s12 + $0x30] sm:$0xff] %vm388_vm1, %v13347_v56  ;;  %v13345_v14 = vadd.f32 %v13326_v37, %v13244_v7 }
 0x903   : > { %v16080_v0 = vpop.f32.mrf.mxu0 }
 0x904   : > { %13353 = vst.msk [vmem:[%s21529_s12 + $0x20] sm:$0xff] %vm388_vm1, %v13345_v14  ;;  %v13348_v50 = vadd.f32 %v16080_v0, %v13247_v6 }
 0x905   : > { %v13329_v31 = vpop.f32.mrf.mxu0 }
 0x906   : > { %13356 = vst.msk [vmem:[%s21529_s12 + $0x38] sm:$0xff] %vm388_vm1, %v13348_v50  ;;  %v13346_v17 = vadd.f32 %v13329_v31, %v13245_v42 }
 0x908   : > { %13354 = vst.msk [vmem:[%s21529_s12 + $0x28] sm:$0xff] %vm388_vm1, %v13346_v17 }
 0x909 PF: > { %s21_s17 = sadd.s32 1, %s16152_s17  }
 0x90a   : > { %p18_p4 = scmp.ge.s32.totalorder %s21_s17, 4  }
 0x90c   :  { %20 = sbr.rel (!%p18_p4) target bundleno = 1 (0x1), region = 100 }

</bundles_post_ra>
